<compile_context>
chip_gen: v7x
topology: tpu7x:2x2x1
jax: 0.10.0
libtpu: 0.0.40
codegen_flags: <defaults>
</compile_context>

<pallas_src>
import functools
import math

import numpy as np
import jax
import jax.numpy as jnp
from jax.experimental import pallas as pl
from jax.experimental.pallas import tpu as pltpu


TAG_PAD = 128  # lane-dense emission width (n_tags=13 padded to 128)

# ---- packed-slab index constants -------------------------------------------
# wdd slab: (L, 10, D, D)
W_XQ, W_XK, W_XV, W_XO = 0, 1, 2, 3
W_OQ, W_OK = 4, 5
W_X2O_X, W_X2O_O = 6, 7
W_O2X_X, W_O2X_O = 8, 9
# bias_d slab: (L, 22, D)
B_XQ, B_XK, B_XV, B_XO = 0, 1, 2, 3
B_OQ, B_OK = 4, 5
B_X2O, B_O2X = 6, 7
B_FX2, B_FO2 = 8, 9
LN_MX_G, LN_MX_B = 10, 11
LN_GX_G, LN_GX_B = 12, 13
LN_FX_G, LN_FX_B = 14, 15
LN_MO_G, LN_MO_B = 16, 17
LN_GO_G, LN_GO_B = 18, 19
LN_FO_G, LN_FO_B = 20, 21


# -----------------------------------------------------------------------------
# Fused kernel: grid = (n_layers,); text/object states live in VMEM scratch.
# -----------------------------------------------------------------------------
def mmner_fused_kernel(
    # data / runtime-aux (constant block index -> fetched once)
    bertx_ref, obj_ref, biasx_ref, biaso_ref, redi_ref, redj_ref,
    # static 0/1 selector constants (bf16, fetched once)
    repx_ref, hmx_ref, psegx_ref, repo_ref, hmo_ref, psego_ref,
    sirep_ref, sjrep_ref,
    # pre/post-amble weights (constant block index)
    txtw_ref, txtb_ref, ow1_ref, ob1_ref, ow2_ref, ob2_ref,
    tagw1_ref, tagw2_ref, tagb_ref,
    # per-layer packed slabs (indexed by the layer grid axis)
    wdd_ref, wff1_ref, wff2_ref, bd_ref, bh_ref,
    # output
    emis_ref,
    # scratch (persists across the layer grid axis)
    x_st, o_st,
    *, n_layers,
):
    f32, bf16 = jnp.float32, jnp.bfloat16
    layer = pl.program_id(0)

    def mm(a_bf, w_bf):
        # bf16 MXU matmul with f32 accumulation (both operands already bf16).
        return jnp.dot(a_bf, w_bf, preferred_element_type=f32)

    # ---------------- layer-0 preamble: trans_txt / trans_obj (batched) -------
    @pl.when(layer == 0)
    def _():
        x_st[...] = mm(bertx_ref[...], txtw_ref[...]) + txtb_ref[...]
        h1 = jnp.maximum(mm(obj_ref[...], ow1_ref[...]) + ob1_ref[...], 0.0)
        o_st[...] = jnp.maximum(mm(h1.astype(bf16), ow2_ref[...]) + ob2_ref[...],
                                0.0)

    # ---- helpers -------------------------------------------------------------
    def ln(v, gi, bi):
        # Annotated-Transformer LayerNorm: unbiased std, eps added to the std.
        g = bd_ref[0, gi]
        b = bd_ref[0, bi]
        m = jnp.mean(v, axis=-1, keepdims=True)
        c = v - m
        var = jnp.sum(c * c, axis=-1, keepdims=True) * (1.0 / (v.shape[-1] - 1))
        inv = pl.reciprocal(jnp.sqrt(var) + 1e-6, approx=True)
        return g * (c * inv) + b

    def mha(q_bf, k_bf, v_bf, rep, hm, pseg, bias):
        """Batched multi-head attention via block-diagonal K/V packing.

        q_bf: (Lq, D) bf16 (Q already scaled by 1/sqrt(dk) via the packed W).
        k_bf/v_bf: (Lk_tot, D) bf16 for ALL batch rows.
        rep:  (R, Lk_tot) bf16 0/1, R = B*H*Lk  -- replicates each key row H
              times inside its batch block.
        hm:   (R, D) bf16 0/1 head-feature mask.
        pseg: (R, R) bf16 0/1 segment (batch, head) projector for the softmax
              denominator.
        bias: (Lq, R) f32 additive mask (0 or -1e9): batch-block + key mask.
        """
        k_bd = jnp.dot(rep, k_bf, preferred_element_type=f32).astype(bf16) * hm
        v_bd = jnp.dot(rep, v_bf, preferred_element_type=f32).astype(bf16) * hm
        s = jax.lax.dot_general(q_bf, k_bd, (((1,), (1,)), ((), ())),
                                preferred_element_type=f32) + bias
        m = jnp.max(s, axis=-1, keepdims=True)
        e = jnp.exp(s - m)                                   # masked cols -> 0
        den = jnp.dot(e.astype(bf16), pseg, preferred_element_type=f32)
        p = e * pl.reciprocal(jnp.maximum(den, 1e-30), approx=True)
        return jnp.dot(p.astype(bf16), v_bd, preferred_element_type=f32)

    # ---------------- one fusion layer (fully batched) -------------------------
    x = x_st[...]                                            # (B*Lx, D) f32
    o = o_st[...]                                            # (B*No, D) f32
    x_bf = x.astype(bf16)
    o_bf = o.astype(bf16)

    # ---- text self-attention ----
    q = (mm(x_bf, wdd_ref[0, W_XQ]) + bd_ref[0, B_XQ]).astype(bf16)
    k = (mm(x_bf, wdd_ref[0, W_XK]) + bd_ref[0, B_XK]).astype(bf16)
    v = (mm(x_bf, wdd_ref[0, W_XV]) + bd_ref[0, B_XV]).astype(bf16)
    attx = mha(q, k, v, repx_ref[...], hmx_ref[...], psegx_ref[...],
               biasx_ref[...])
    attx = mm(attx.astype(bf16), wdd_ref[0, W_XO]) + bd_ref[0, B_XO]
    newx = ln(x + attx, LN_MX_G, LN_MX_B)                    # res4mes_x
    newx_bf = newx.astype(bf16)

    # ---- object self-attention (no value / output projection, no key mask) ----
    qo = (mm(o_bf, wdd_ref[0, W_OQ]) + bd_ref[0, B_OQ]).astype(bf16)
    ko = (mm(o_bf, wdd_ref[0, W_OK]) + bd_ref[0, B_OK]).astype(bf16)
    atto = mha(qo, ko, o_bf, repo_ref[...], hmo_ref[...], psego_ref[...],
               biaso_ref[...])
    newo = ln(o + atto, LN_MO_G, LN_MO_B)                    # res4mes_o
    newo_bf = newo.astype(bf16)

    # ---- cross-modal gates on the flattened (B*Lx*No, D) layout ----
    a_x2o = (mm(newx_bf, wdd_ref[0, W_X2O_X]) + bd_ref[0, B_X2O]).astype(bf16)
    a_o2x = mm(newx_bf, wdd_ref[0, W_O2X_X]).astype(bf16)
    bo = mm(newo_bf, wdd_ref[0, W_X2O_O]).astype(bf16)
    b2 = (mm(newo_bf, wdd_ref[0, W_O2X_O]) + bd_ref[0, B_O2X]).astype(bf16)

    s_i = sirep_ref[...]                                     # (NR, B*Lx) bf16
    s_j = sjrep_ref[...]                                     # (NR, B*No) bf16
    gate = jax.nn.sigmoid(mm(s_i, a_x2o) + mm(s_j, bo))      # (NR, D) f32
    gate2 = jax.nn.sigmoid(mm(s_i, a_o2x) + mm(s_j, b2))     # (NR, D) f32
    o_rep = mm(s_j, newo_bf)                                 # (NR, D) f32
    x_rep = mm(s_i, newx_bf)                                 # (NR, D) f32
    # inter matrix is pre-folded into redi/redj (0/1 * inter).
    x2o = mm(redi_ref[...], (gate * o_rep).astype(bf16))     # (B*Lx, D)
    o2x = mm(redj_ref[...], (gate2 * x_rep).astype(bf16))    # (B*No, D)

    xg = ln(newx + x2o, LN_GX_G, LN_GX_B)                    # xgate
    og = ln(newo + o2x, LN_GO_G, LN_GO_B)                    # ogate
    xg_bf = xg.astype(bf16)
    og_bf = og.astype(bf16)

    # ---- feed-forwards + residual norms ----
    hx = jnp.maximum(mm(xg_bf, wff1_ref[0, 0]) + bh_ref[0, 0], 0.0)
    ffx = mm(hx.astype(bf16), wff2_ref[0, 0]) + bd_ref[0, B_FX2]
    x_new = ln(xg + ffx, LN_FX_G, LN_FX_B)                   # res4ffn_x
    x_st[...] = x_new

    ho = jnp.maximum(mm(og_bf, wff1_ref[0, 1]) + bh_ref[0, 1], 0.0)
    ffo = mm(ho.astype(bf16), wff2_ref[0, 1]) + bd_ref[0, B_FO2]
    o_st[...] = ln(og + ffo, LN_FO_G, LN_FO_B)               # res4ffn_o

    # ---------------- last-layer epilogue: hidden2tag on [bert_x ; x] ----------
    @pl.when(layer == n_layers - 1)
    def _():
        emis_ref[...] = (mm(bertx_ref[...], tagw1_ref[...])
                         + mm(x_new.astype(bf16), tagw2_ref[...])
                         + tagb_ref[...])


# -----------------------------------------------------------------------------
# Static 0/1 selector constants (built once at trace time with numpy)
# -----------------------------------------------------------------------------
def _static_selectors(B, Lx, No, H, D):
    dk = D // H
    d = np.arange(D)

    # text attention packing: packed row r = (b*H + h)*Lx + j
    R = B * H * Lx
    r = np.arange(R)
    rb, rh, rj = r // (H * Lx), (r // Lx) % H, r % Lx
    c = np.arange(B * Lx)
    cb, cj = c // Lx, c % Lx
    rep_x = ((rb[:, None] == cb[None, :]) &
             (rj[:, None] == cj[None, :])).astype(np.float32)
    hm_x = (rh[:, None] == d[None, :] // dk).astype(np.float32)
    seg_x = rb * H + rh
    pseg_x = (seg_x[:, None] == seg_x[None, :]).astype(np.float32)

    # object attention packing: packed row r = (b*H + h)*No + j
    Ro = B * H * No
    ro = np.arange(Ro)
    rob, roh, roj = ro // (H * No), (ro // No) % H, ro % No
    co = np.arange(B * No)
    cob, coj = co // No, co % No
    rep_o = ((rob[:, None] == cob[None, :]) &
             (roj[:, None] == coj[None, :])).astype(np.float32)
    hm_o = (roh[:, None] == d[None, :] // dk).astype(np.float32)
    seg_o = rob * H + roh
    pseg_o = (seg_o[:, None] == seg_o[None, :]).astype(np.float32)
    bias_o = np.where(cob[:, None] == rob[None, :], 0.0, -1e9).astype(np.float32)

    # cross-modal gate layout: flattened row g = (b*Lx + i)*No + j
    NR = B * Lx * No
    g = np.arange(NR)
    gb, gi, gj = g // (Lx * No), (g // No) % Lx, g % No
    s_irep = ((gb[:, None] == cb[None, :]) &
              (gi[:, None] == cj[None, :])).astype(np.float32)
    s_jrep = ((gb[:, None] == cob[None, :]) &
              (gj[:, None] == coj[None, :])).astype(np.float32)

    return dict(rep_x=rep_x, hm_x=hm_x, pseg_x=pseg_x,
                rep_o=rep_o, hm_o=hm_o, pseg_o=pseg_o, bias_o=bias_o,
                s_irep=s_irep, s_jrep=s_jrep)


# -----------------------------------------------------------------------------
# CRF Viterbi decode (plain JAX glue; sequential scan)
# -----------------------------------------------------------------------------
def crf_viterbi_decode(emissions, mask, start_trans, end_trans, trans):
    B, L, T = emissions.shape
    maskb = mask > 0
    score = start_trans[None, :] + emissions[:, 0]

    def fwd(score, inp):
        emit_t, m_t = inp
        cand = score[:, :, None] + trans[None, :, :] + emit_t[:, None, :]
        nscore = jnp.max(cand, axis=1)
        idx = jnp.argmax(cand, axis=1).astype(jnp.int32)
        nscore = jnp.where(m_t[:, None], nscore, score)
        return nscore, idx

    xs = (jnp.transpose(emissions[:, 1:], (1, 0, 2)),
          jnp.transpose(maskb[:, 1:], (1, 0)))
    score, hist = jax.lax.scan(fwd, score, xs)
    score = score + end_trans[None, :]
    last = jnp.argmax(score, axis=-1).astype(jnp.int32)

    # TODO(synk): backtrack assumes full-length masks (demo uses all-ones mask);
    # torchcrf backtracks from each sample's seq_end for ragged masks.
    def bwd(tag, idx_t):
        prev = jnp.take_along_axis(idx_t, tag[:, None], axis=1)[:, 0]
        return prev, prev

    _, prevs = jax.lax.scan(bwd, last, hist, reverse=True)
    tags = jnp.concatenate([prevs, last[None, :]], axis=0)   # (L, B)
    return jnp.transpose(tags, (1, 0))


# -----------------------------------------------------------------------------
# Parameters (packed slabs) & full forward
# -----------------------------------------------------------------------------
def init_params(key, *, d_model, d_hidden, n_layers, n_heads, bert_dim, obj_dim,
                n_tags, tag_pad=TAG_PAD):
    keys = iter(jax.random.split(key, 16))

    def W(shape, s=0.02):
        return s * jax.random.normal(next(keys), shape, jnp.float32)

    z = lambda shape: jnp.zeros(shape, jnp.float32)
    L, D, Dh = n_layers, d_model, d_hidden
    qscale = 1.0 / math.sqrt(D // n_heads)

    wdd = W((L, 10, D, D))
    # Fold the 1/sqrt(dk) attention scale into the Q projections (exact).
    wdd = wdd.at[:, W_XQ].multiply(qscale).at[:, W_OQ].multiply(qscale)
    wdd = wdd.astype(jnp.bfloat16)                   # packed DxD weights (bf16)
    wff1 = W((L, 2, D, Dh)).astype(jnp.bfloat16)     # [fxw1, fow1]
    wff2 = W((L, 2, Dh, D)).astype(jnp.bfloat16)     # [fxw2, fow2]

    bias_d = jnp.zeros((L, 22, D), jnp.float32)      # biases + LN params (f32)
    for gi in (LN_MX_G, LN_GX_G, LN_FX_G, LN_MO_G, LN_GO_G, LN_FO_G):
        bias_d = bias_d.at[:, gi].set(1.0)
    # Q biases are pre-scaled too (no-op for zero init, kept for consistency).
    bias_d = bias_d.at[:, B_XQ].multiply(qscale).at[:, B_OQ].multiply(qscale)
    bias_h = jnp.zeros((L, 2, Dh), jnp.float32)      # [fxb1, fob1]

    tag_w = W((bert_dim + D, n_tags))
    tag_w1 = jnp.zeros((bert_dim, tag_pad), jnp.float32).at[:, :n_tags].set(
        tag_w[:bert_dim])
    tag_w2 = jnp.zeros((D, tag_pad), jnp.float32).at[:, :n_tags].set(
        tag_w[bert_dim:])

    return {
        "txt_w": W((bert_dim, D)).astype(jnp.bfloat16), "txt_b": z((1, D)),
        "obj_w1": W((obj_dim, D)).astype(jnp.bfloat16), "obj_b1": z((1, D)),
        "obj_w2": W((D, D)).astype(jnp.bfloat16), "obj_b2": z((1, D)),
        "wdd": wdd, "wff1": wff1, "wff2": wff2,
        "bias_d": bias_d, "bias_h": bias_h,
        "tag_w1": tag_w1.astype(jnp.bfloat16),
        "tag_w2": tag_w2.astype(jnp.bfloat16),
        "tag_b": jnp.zeros((1, tag_pad), jnp.float32),
        "crf_start": 0.1 * jax.random.normal(next(keys), (n_tags,), jnp.float32),
        "crf_end": 0.1 * jax.random.normal(next(keys), (n_tags,), jnp.float32),
        "crf_trans": 0.1 * jax.random.normal(next(keys), (n_tags, n_tags),
                                             jnp.float32),
    }


def mmner_forward(p, bert_x, obj_feats, inter, text_mask, *, n_heads, n_layers):
    B, Lx, bert_dim = bert_x.shape
    No, obj_dim = obj_feats.shape[1], obj_feats.shape[2]
    D = p["txt_w"].shape[1]
    Dh = p["wff1"].shape[-1]
    tpad = p["tag_b"].shape[-1]
    n_tags = p["crf_trans"].shape[0]
    H = n_heads
    NR = B * Lx * No
    bf16 = jnp.bfloat16

    # features as bf16 (only ever used as matmul LHS inside the kernel)
    bert2d = bert_x.reshape(B * Lx, bert_dim).astype(bf16)
    obj2d = obj_feats.reshape(B * No, obj_dim).astype(bf16)

    # ---- static 0/1 selector constants (trace-time numpy; fetched once) ------
    S = _static_selectors(B, Lx, No, H, D)
    tobf = lambda a: jnp.asarray(a, bf16)

    # ---- runtime aux: attention mask bias + inter-folded reducers ------------
    rcol = np.arange(B * H * Lx)
    col_b, col_j = rcol // (H * Lx), rcol % Lx
    row_b = np.arange(B * Lx) // Lx
    key_ok = text_mask[jnp.asarray(col_b), jnp.asarray(col_j)] > 0       # (R,)
    same_b = jnp.asarray(row_b[:, None] == col_b[None, :])
    bias_x = jnp.where(same_b & key_ok[None, :], 0.0, -1e9).astype(jnp.float32)

    inter_flat = inter.reshape(NR).astype(jnp.float32)
    red_i_int = (jnp.asarray(S["s_irep"].T) * inter_flat[None, :]).astype(bf16)
    red_j_int = (jnp.asarray(S["s_jrep"].T) * inter_flat[None, :]).astype(bf16)

    cmap2 = lambda l: (0, 0)
    wmap3 = lambda l: (l, 0, 0)
    wmap4 = lambda l: (l, 0, 0, 0)

    kernel = functools.partial(mmner_fused_kernel, n_layers=n_layers)

    # TODO(synk): on v7x, re-measure a 2-TensorCore batch split and
    # pipeline_mode=pl.Buffered(1) on constant-index weight inputs.
    emis_pad = pl.pallas_call(
        kernel,
        out_shape=jax.ShapeDtypeStruct((B * Lx, tpad), jnp.float32),
        grid_spec=pltpu.PrefetchScalarGridSpec(
            num_scalar_prefetch=0,
            grid=(n_layers,),
            in_specs=[
                pl.BlockSpec((B * Lx, bert_dim), cmap2),       # bert feats bf16
                pl.BlockSpec((B * No, obj_dim), cmap2),        # obj feats bf16
                pl.BlockSpec((B * Lx, B * H * Lx), cmap2),     # text attn bias
                pl.BlockSpec((B * No, B * H * No), cmap2),     # obj attn bias
                pl.BlockSpec((B * Lx, NR), cmap2),             # red_i * inter
                pl.BlockSpec((B * No, NR), cmap2),             # red_j * inter
                pl.BlockSpec((B * H * Lx, B * Lx), cmap2),     # rep_x
                pl.BlockSpec((B * H * Lx, D), cmap2),          # hm_x
                pl.BlockSpec((B * H * Lx, B * H * Lx), cmap2), # pseg_x
                pl.BlockSpec((B * H * No, B * No), cmap2),     # rep_o
                pl.BlockSpec((B * H * No, D), cmap2),          # hm_o
                pl.BlockSpec((B * H * No, B * H * No), cmap2), # pseg_o
                pl.BlockSpec((NR, B * Lx), cmap2),             # s_irep
                pl.BlockSpec((NR, B * No), cmap2),             # s_jrep
                pl.BlockSpec((bert_dim, D), cmap2),            # txt_w (bf16)
                pl.BlockSpec((1, D), cmap2),                   # txt_b
                pl.BlockSpec((obj_dim, D), cmap2),             # obj_w1 (bf16)
                pl.BlockSpec((1, D), cmap2),                   # obj_b1
                pl.BlockSpec((D, D), cmap2),                   # obj_w2 (bf16)
                pl.BlockSpec((1, D), cmap2),                   # obj_b2
                pl.BlockSpec((bert_dim, tpad), cmap2),         # tag_w1 (bf16)
                pl.BlockSpec((D, tpad), cmap2),                # tag_w2 (bf16)
                pl.BlockSpec((1, tpad), cmap2),                # tag_b
                pl.BlockSpec((1, 10, D, D), wmap4),            # per-layer DxD
                pl.BlockSpec((1, 2, D, Dh), wmap4),            # per-layer FFN-in
                pl.BlockSpec((1, 2, Dh, D), wmap4),            # per-layer FFN-out
                pl.BlockSpec((1, 22, D), wmap3),               # per-layer bias/LN
                pl.BlockSpec((1, 2, Dh), wmap3),               # per-layer FFN bias
            ],
            out_specs=pl.BlockSpec((B * Lx, tpad), cmap2),
            scratch_shapes=[
                pltpu.VMEM((B * Lx, D), jnp.float32),          # carried text state
                pltpu.VMEM((B * No, D), jnp.float32),          # carried obj state
            ],
        ),
        compiler_params=pltpu.CompilerParams(
            dimension_semantics=("arbitrary",),
            vmem_limit_bytes=32 * 1024 * 1024,
        ),
    )(
        bert2d, obj2d, bias_x, jnp.asarray(S["bias_o"]), red_i_int, red_j_int,
        tobf(S["rep_x"]), tobf(S["hm_x"]), tobf(S["pseg_x"]),
        tobf(S["rep_o"]), tobf(S["hm_o"]), tobf(S["pseg_o"]),
        tobf(S["s_irep"]), tobf(S["s_jrep"]),
        p["txt_w"], p["txt_b"], p["obj_w1"], p["obj_b1"], p["obj_w2"], p["obj_b2"],
        p["tag_w1"], p["tag_w2"], p["tag_b"],
        p["wdd"], p["wff1"], p["wff2"], p["bias_d"], p["bias_h"],
    )

    emis = emis_pad.reshape(B, Lx, tpad)[:, :, :n_tags]
    return crf_viterbi_decode(emis, text_mask, p["crf_start"], p["crf_end"],
                              p["crf_trans"])


if __name__ == "__main__":
    # Small shapes consistent with the module's forward.
    B, Lx, No = 2, 16, 4            # batch, max_len, max_node (inter last dim = 4)
    D, Dh, H, NL = 256, 128, 8, 6   # d_model, d_hidden, n_heads, layer
    BERT_DIM, OBJ_DIM, NT = 768, 2048, 13

    key = jax.random.PRNGKey(0)
    k1, k2, k3, kp = jax.random.split(key, 4)

    # TODO(synk): BertModel / ResNet-152 backbones are not translated; their
    # outputs are modeled as deterministic synthetic feature inputs.
    bert_x = jax.random.normal(k1, (B, Lx, BERT_DIM), jnp.float32)
    obj_feats = jax.random.normal(k2, (B, No, OBJ_DIM), jnp.float32)
    inter_matrix = (jax.random.uniform(k3, (B, Lx, No)) > 0.5).astype(jnp.float32)
    text_mask = jnp.ones((B, Lx), jnp.float32)

    params = init_params(kp, d_model=D, d_hidden=Dh, n_layers=NL, n_heads=H,
                         bert_dim=BERT_DIM, obj_dim=OBJ_DIM, n_tags=NT)

    fwd = jax.jit(functools.partial(mmner_forward, n_heads=H, n_layers=NL))
    tags = fwd(params, bert_x, obj_feats, inter_matrix, text_mask)
    tags = jax.block_until_ready(tags)
    assert tags.shape == (B, Lx)
    assert bool(jnp.all((tags >= 0) & (tags < NT)))
    print("KERNEL_OK")
</pallas_src>

<mosaic_0001>
module attributes {stable_mosaic.version = 11 : i64} {
  func.func @mmner_fused_kernel(%arg0: i32, %arg1: memref<32x768xbf16, #tpu.memory_space<vmem>>, %arg2: memref<8x2048xbf16, #tpu.memory_space<vmem>>, %arg3: memref<32x256xf32, #tpu.memory_space<vmem>>, %arg4: memref<8x64xf32, #tpu.memory_space<vmem>>, %arg5: memref<32x128xbf16, #tpu.memory_space<vmem>>, %arg6: memref<8x128xbf16, #tpu.memory_space<vmem>>, %arg7: memref<256x32xbf16, #tpu.memory_space<vmem>>, %arg8: memref<256x256xbf16, #tpu.memory_space<vmem>>, %arg9: memref<256x256xbf16, #tpu.memory_space<vmem>>, %arg10: memref<64x8xbf16, #tpu.memory_space<vmem>>, %arg11: memref<64x256xbf16, #tpu.memory_space<vmem>>, %arg12: memref<64x64xbf16, #tpu.memory_space<vmem>>, %arg13: memref<128x32xbf16, #tpu.memory_space<vmem>>, %arg14: memref<128x8xbf16, #tpu.memory_space<vmem>>, %arg15: memref<768x256xbf16, #tpu.memory_space<vmem>>, %arg16: memref<1x256xf32, #tpu.memory_space<vmem>>, %arg17: memref<2048x256xbf16, #tpu.memory_space<vmem>>, %arg18: memref<1x256xf32, #tpu.memory_space<vmem>>, %arg19: memref<256x256xbf16, #tpu.memory_space<vmem>>, %arg20: memref<1x256xf32, #tpu.memory_space<vmem>>, %arg21: memref<768x128xbf16, #tpu.memory_space<vmem>>, %arg22: memref<256x128xbf16, #tpu.memory_space<vmem>>, %arg23: memref<1x128xf32, #tpu.memory_space<vmem>>, %arg24: memref<1x10x256x256xbf16, #tpu.memory_space<vmem>>, %arg25: memref<1x2x256x128xbf16, #tpu.memory_space<vmem>>, %arg26: memref<1x2x128x256xbf16, #tpu.memory_space<vmem>>, %arg27: memref<1x22x256xf32, #tpu.memory_space<vmem>>, %arg28: memref<1x2x128xf32, #tpu.memory_space<vmem>>, %arg29: memref<32x128xf32, #tpu.memory_space<vmem>>, %arg30: memref<32x256xf32, #tpu.memory_space<vmem>>, %arg31: memref<8x256xf32, #tpu.memory_space<vmem>>) attributes {dimension_semantics = [#tpu.dimension_semantics<arbitrary>], iteration_bounds = array<i64: 6>, scalar_prefetch = 0 : i64, scratch_operands = 2 : i64, tpu.core_type = #tpu.core_type<tc>, window_params = [{pipeline_mode = #tpu.pipeline_mode<synchronous>, transform_indices = @transform_0, window_bounds = array<i64: 32, 768>}, {pipeline_mode = #tpu.pipeline_mode<synchronous>, transform_indices = @transform_1, window_bounds = array<i64: 8, 2048>}, {pipeline_mode = #tpu.pipeline_mode<synchronous>, transform_indices = @transform_2, window_bounds = array<i64: 32, 256>}, {pipeline_mode = #tpu.pipeline_mode<synchronous>, transform_indices = @transform_3, window_bounds = array<i64: 8, 64>}, {pipeline_mode = #tpu.pipeline_mode<synchronous>, transform_indices = @transform_4, window_bounds = array<i64: 32, 128>}, {pipeline_mode = #tpu.pipeline_mode<synchronous>, transform_indices = @transform_5, window_bounds = array<i64: 8, 128>}, {pipeline_mode = #tpu.pipeline_mode<synchronous>, transform_indices = @transform_6, window_bounds = array<i64: 256, 32>}, {pipeline_mode = #tpu.pipeline_mode<synchronous>, transform_indices = @transform_7, window_bounds = array<i64: 256, 256>}, {pipeline_mode = #tpu.pipeline_mode<synchronous>, transform_indices = @transform_8, window_bounds = array<i64: 256, 256>}, {pipeline_mode = #tpu.pipeline_mode<synchronous>, transform_indices = @transform_9, window_bounds = array<i64: 64, 8>}, {pipeline_mode = #tpu.pipeline_mode<synchronous>, transform_indices = @transform_10, window_bounds = array<i64: 64, 256>}, {pipeline_mode = #tpu.pipeline_mode<synchronous>, transform_indices = @transform_11, window_bounds = array<i64: 64, 64>}, {pipeline_mode = #tpu.pipeline_mode<synchronous>, transform_indices = @transform_12, window_bounds = array<i64: 128, 32>}, {pipeline_mode = #tpu.pipeline_mode<synchronous>, transform_indices = @transform_13, window_bounds = array<i64: 128, 8>}, {pipeline_mode = #tpu.pipeline_mode<synchronous>, transform_indices = @transform_14, window_bounds = array<i64: 768, 256>}, {pipeline_mode = #tpu.pipeline_mode<synchronous>, transform_indices = @transform_15, window_bounds = array<i64: 1, 256>}, {pipeline_mode = #tpu.pipeline_mode<synchronous>, transform_indices = @transform_16, window_bounds = array<i64: 2048, 256>}, {pipeline_mode = #tpu.pipeline_mode<synchronous>, transform_indices = @transform_17, window_bounds = array<i64: 1, 256>}, {pipeline_mode = #tpu.pipeline_mode<synchronous>, transform_indices = @transform_18, window_bounds = array<i64: 256, 256>}, {pipeline_mode = #tpu.pipeline_mode<synchronous>, transform_indices = @transform_19, window_bounds = array<i64: 1, 256>}, {pipeline_mode = #tpu.pipeline_mode<synchronous>, transform_indices = @transform_20, window_bounds = array<i64: 768, 128>}, {pipeline_mode = #tpu.pipeline_mode<synchronous>, transform_indices = @transform_21, window_bounds = array<i64: 256, 128>}, {pipeline_mode = #tpu.pipeline_mode<synchronous>, transform_indices = @transform_22, window_bounds = array<i64: 1, 128>}, {transform_indices = @transform_23, window_bounds = array<i64: 1, 10, 256, 256>}, {transform_indices = @transform_24, window_bounds = array<i64: 1, 2, 256, 128>}, {transform_indices = @transform_25, window_bounds = array<i64: 1, 2, 128, 256>}, {transform_indices = @transform_26, window_bounds = array<i64: 1, 22, 256>}, {transform_indices = @transform_27, window_bounds = array<i64: 1, 2, 128>}, {pipeline_mode = #tpu.pipeline_mode<synchronous>, transform_indices = @transform_28, window_bounds = array<i64: 32, 128>}]} {
    %c0_i32 = arith.constant 0 : i32
    %0 = arith.cmpi eq, %arg0, %c0_i32 : i32
    %1 = arith.extui %0 : i1 to i32
    %c0_i32_0 = arith.constant 0 : i32
    %2 = arith.cmpi ne, %1, %c0_i32_0 : i32
    scf.if %2 {
      %c0_209 = arith.constant 0 : index
      %c0_210 = arith.constant 0 : index
      %380 = vector.load %arg1[%c0_209, %c0_210] : memref<32x768xbf16, #tpu.memory_space<vmem>>, vector<32x768xbf16>
      %c0_211 = arith.constant 0 : index
      %c0_212 = arith.constant 0 : index
      %381 = vector.load %arg15[%c0_211, %c0_212] : memref<768x256xbf16, #tpu.memory_space<vmem>>, vector<768x256xbf16>
      %cst_213 = arith.constant dense<0.000000e+00> : vector<32x256xf32>
      %382 = tpu.matmul %380, %381, %cst_213 {dimension_numbers = #tpu.dot_dimension_numbers<[1], [0], [0], [1], [0, 0, 1, 1], [], []>} : vector<32x768xbf16>, vector<768x256xbf16>, vector<32x256xf32> -> vector<32x256xf32>
      %c0_214 = arith.constant 0 : index
      %c0_215 = arith.constant 0 : index
      %383 = vector.load %arg16[%c0_214, %c0_215] : memref<1x256xf32, #tpu.memory_space<vmem>>, vector<1x256xf32>
      %384 = vector.broadcast %383 : vector<1x256xf32> to vector<32x256xf32>
      %385 = arith.addf %382, %384 : vector<32x256xf32>
      %c0_216 = arith.constant 0 : index
      %c0_217 = arith.constant 0 : index
      %386 = vector.load %arg30[%c0_216, %c0_217] : memref<32x256xf32, #tpu.memory_space<vmem>>, vector<32x256xf32>
      tpu.vector_store %arg30[%c0_216, %c0_217], %385 {strides = array<i32>} : memref<32x256xf32, #tpu.memory_space<vmem>>, vector<32x256xf32>,
      %c0_218 = arith.constant 0 : index
      %c0_219 = arith.constant 0 : index
      %387 = vector.load %arg2[%c0_218, %c0_219] : memref<8x2048xbf16, #tpu.memory_space<vmem>>, vector<8x2048xbf16>
      %c0_220 = arith.constant 0 : index
      %c0_221 = arith.constant 0 : index
      %388 = vector.load %arg17[%c0_220, %c0_221] : memref<2048x256xbf16, #tpu.memory_space<vmem>>, vector<2048x256xbf16>
      %cst_222 = arith.constant dense<0.000000e+00> : vector<8x256xf32>
      %389 = tpu.matmul %387, %388, %cst_222 {dimension_numbers = #tpu.dot_dimension_numbers<[1], [0], [0], [1], [0, 0, 1, 1], [], []>} : vector<8x2048xbf16>, vector<2048x256xbf16>, vector<8x256xf32> -> vector<8x256xf32>
      %c0_223 = arith.constant 0 : index
      %c0_224 = arith.constant 0 : index
      %390 = vector.load %arg18[%c0_223, %c0_224] : memref<1x256xf32, #tpu.memory_space<vmem>>, vector<1x256xf32>
      %391 = vector.broadcast %390 : vector<1x256xf32> to vector<8x256xf32>
      %392 = arith.addf %389, %391 : vector<8x256xf32>
      %cst_225 = arith.constant 0.000000e+00 : f32
      %393 = vector.broadcast %cst_225 : f32 to vector<8x256xf32>
      %394 = arith.maximumf %392, %393 : vector<8x256xf32>
      %395 = arith.truncf %394 : vector<8x256xf32> to vector<8x256xbf16>
      %c0_226 = arith.constant 0 : index
      %c0_227 = arith.constant 0 : index
      %396 = vector.load %arg19[%c0_226, %c0_227] : memref<256x256xbf16, #tpu.memory_space<vmem>>, vector<256x256xbf16>
      %cst_228 = arith.constant dense<0.000000e+00> : vector<8x256xf32>
      %397 = tpu.matmul %395, %396, %cst_228 {dimension_numbers = #tpu.dot_dimension_numbers<[1], [0], [0], [1], [0, 0, 1, 1], [], []>} : vector<8x256xbf16>, vector<256x256xbf16>, vector<8x256xf32> -> vector<8x256xf32>
      %c0_229 = arith.constant 0 : index
      %c0_230 = arith.constant 0 : index
      %398 = vector.load %arg20[%c0_229, %c0_230] : memref<1x256xf32, #tpu.memory_space<vmem>>, vector<1x256xf32>
      %399 = vector.broadcast %398 : vector<1x256xf32> to vector<8x256xf32>
      %400 = arith.addf %397, %399 : vector<8x256xf32>
      %cst_231 = arith.constant 0.000000e+00 : f32
      %401 = vector.broadcast %cst_231 : f32 to vector<8x256xf32>
      %402 = arith.maximumf %400, %401 : vector<8x256xf32>
      %c0_232 = arith.constant 0 : index
      %c0_233 = arith.constant 0 : index
      %403 = vector.load %arg31[%c0_232, %c0_233] : memref<8x256xf32, #tpu.memory_space<vmem>>, vector<8x256xf32>
      tpu.vector_store %arg31[%c0_232, %c0_233], %402 {strides = array<i32>} : memref<8x256xf32, #tpu.memory_space<vmem>>, vector<8x256xf32>,
    } else {
    }
    %c0 = arith.constant 0 : index
    %c0_1 = arith.constant 0 : index
    %3 = vector.load %arg30[%c0, %c0_1] : memref<32x256xf32, #tpu.memory_space<vmem>>, vector<32x256xf32>
    %c0_2 = arith.constant 0 : index
    %c0_3 = arith.constant 0 : index
    %4 = vector.load %arg31[%c0_2, %c0_3] : memref<8x256xf32, #tpu.memory_space<vmem>>, vector<8x256xf32>
    %5 = arith.truncf %3 : vector<32x256xf32> to vector<32x256xbf16>
    %6 = arith.truncf %4 : vector<8x256xf32> to vector<8x256xbf16>
    %c0_4 = arith.constant 0 : index
    %c0_5 = arith.constant 0 : index
    %c0_6 = arith.constant 0 : index
    %c0_7 = arith.constant 0 : index
    %7 = vector.load %arg24[%c0_4, %c0_5, %c0_6, %c0_7] : memref<1x10x256x256xbf16, #tpu.memory_space<vmem>>, vector<1x1x256x256xbf16>
    %8 = vector.shape_cast %7 : vector<1x1x256x256xbf16> to vector<256x256xbf16>
    %cst = arith.constant dense<0.000000e+00> : vector<32x256xf32>
    %9 = tpu.matmul %5, %8, %cst {dimension_numbers = #tpu.dot_dimension_numbers<[1], [0], [0], [1], [0, 0, 1, 1], [], []>} : vector<32x256xbf16>, vector<256x256xbf16>, vector<32x256xf32> -> vector<32x256xf32>
    %c0_8 = arith.constant 0 : index
    %c0_9 = arith.constant 0 : index
    %c0_10 = arith.constant 0 : index
    %10 = vector.load %arg27[%c0_8, %c0_9, %c0_10] : memref<1x22x256xf32, #tpu.memory_space<vmem>>, vector<1x1x256xf32>
    %11 = vector.shape_cast %10 : vector<1x1x256xf32> to vector<256xf32>
    %12 = vector.shape_cast %11 : vector<256xf32> to vector<1x256xf32>
    %13 = vector.broadcast %12 : vector<1x256xf32> to vector<32x256xf32>
    %14 = arith.addf %9, %13 : vector<32x256xf32>
    %15 = arith.truncf %14 : vector<32x256xf32> to vector<32x256xbf16>
    %c0_11 = arith.constant 0 : index
    %c1 = arith.constant 1 : index
    %c0_12 = arith.constant 0 : index
    %c0_13 = arith.constant 0 : index
    %16 = vector.load %arg24[%c0_11, %c1, %c0_12, %c0_13] : memref<1x10x256x256xbf16, #tpu.memory_space<vmem>>, vector<1x1x256x256xbf16>
    %17 = vector.shape_cast %16 : vector<1x1x256x256xbf16> to vector<256x256xbf16>
    %cst_14 = arith.constant dense<0.000000e+00> : vector<32x256xf32>
    %18 = tpu.matmul %5, %17, %cst_14 {dimension_numbers = #tpu.dot_dimension_numbers<[1], [0], [0], [1], [0, 0, 1, 1], [], []>} : vector<32x256xbf16>, vector<256x256xbf16>, vector<32x256xf32> -> vector<32x256xf32>
    %c0_15 = arith.constant 0 : index
    %c1_16 = arith.constant 1 : index
    %c0_17 = arith.constant 0 : index
    %19 = vector.load %arg27[%c0_15, %c1_16, %c0_17] : memref<1x22x256xf32, #tpu.memory_space<vmem>>, vector<1x1x256xf32>
    %20 = vector.shape_cast %19 : vector<1x1x256xf32> to vector<256xf32>
    %21 = vector.shape_cast %20 : vector<256xf32> to vector<1x256xf32>
    %22 = vector.broadcast %21 : vector<1x256xf32> to vector<32x256xf32>
    %23 = arith.addf %18, %22 : vector<32x256xf32>
    %24 = arith.truncf %23 : vector<32x256xf32> to vector<32x256xbf16>
    %c0_18 = arith.constant 0 : index
    %c2 = arith.constant 2 : index
    %c0_19 = arith.constant 0 : index
    %c0_20 = arith.constant 0 : index
    %25 = vector.load %arg24[%c0_18, %c2, %c0_19, %c0_20] : memref<1x10x256x256xbf16, #tpu.memory_space<vmem>>, vector<1x1x256x256xbf16>
    %26 = vector.shape_cast %25 : vector<1x1x256x256xbf16> to vector<256x256xbf16>
    %cst_21 = arith.constant dense<0.000000e+00> : vector<32x256xf32>
    %27 = tpu.matmul %5, %26, %cst_21 {dimension_numbers = #tpu.dot_dimension_numbers<[1], [0], [0], [1], [0, 0, 1, 1], [], []>} : vector<32x256xbf16>, vector<256x256xbf16>, vector<32x256xf32> -> vector<32x256xf32>
    %c0_22 = arith.constant 0 : index
    %c2_23 = arith.constant 2 : index
    %c0_24 = arith.constant 0 : index
    %28 = vector.load %arg27[%c0_22, %c2_23, %c0_24] : memref<1x22x256xf32, #tpu.memory_space<vmem>>, vector<1x1x256xf32>
    %29 = vector.shape_cast %28 : vector<1x1x256xf32> to vector<256xf32>
    %30 = vector.shape_cast %29 : vector<256xf32> to vector<1x256xf32>
    %31 = vector.broadcast %30 : vector<1x256xf32> to vector<32x256xf32>
    %32 = arith.addf %27, %31 : vector<32x256xf32>
    %33 = arith.truncf %32 : vector<32x256xf32> to vector<32x256xbf16>
    %c0_25 = arith.constant 0 : index
    %c0_26 = arith.constant 0 : index
    %34 = vector.load %arg7[%c0_25, %c0_26] : memref<256x32xbf16, #tpu.memory_space<vmem>>, vector<256x32xbf16>
    %c0_27 = arith.constant 0 : index
    %c0_28 = arith.constant 0 : index
    %35 = vector.load %arg8[%c0_27, %c0_28] : memref<256x256xbf16, #tpu.memory_space<vmem>>, vector<256x256xbf16>
    %c0_29 = arith.constant 0 : index
    %c0_30 = arith.constant 0 : index
    %36 = vector.load %arg9[%c0_29, %c0_30] : memref<256x256xbf16, #tpu.memory_space<vmem>>, vector<256x256xbf16>
    %c0_31 = arith.constant 0 : index
    %c0_32 = arith.constant 0 : index
    %37 = vector.load %arg3[%c0_31, %c0_32] : memref<32x256xf32, #tpu.memory_space<vmem>>, vector<32x256xf32>
    %cst_33 = arith.constant dense<0.000000e+00> : vector<256x256xf32>
    %38 = tpu.matmul %34, %24, %cst_33 {dimension_numbers = #tpu.dot_dimension_numbers<[1], [0], [0], [1], [0, 0, 1, 1], [], []>} : vector<256x32xbf16>, vector<32x256xbf16>, vector<256x256xf32> -> vector<256x256xf32>
    %39 = arith.truncf %38 : vector<256x256xf32> to vector<256x256xbf16>
    %40 = arith.mulf %39, %35 : vector<256x256xbf16>
    %cst_34 = arith.constant dense<0.000000e+00> : vector<256x256xf32>
    %41 = tpu.matmul %34, %33, %cst_34 {dimension_numbers = #tpu.dot_dimension_numbers<[1], [0], [0], [1], [0, 0, 1, 1], [], []>} : vector<256x32xbf16>, vector<32x256xbf16>, vector<256x256xf32> -> vector<256x256xf32>
    %42 = arith.truncf %41 : vector<256x256xf32> to vector<256x256xbf16>
    %43 = arith.mulf %42, %35 : vector<256x256xbf16>
    %cst_35 = arith.constant dense<0.000000e+00> : vector<32x256xf32>
    %44 = tpu.matmul %15, %40, %cst_35 {dimension_numbers = #tpu.dot_dimension_numbers<[1], [1], [0], [0], [0, 0, 1, 0], [], []>} : vector<32x256xbf16>, vector<256x256xbf16>, vector<32x256xf32> -> vector<32x256xf32>
    %45 = arith.addf %44, %37 : vector<32x256xf32>
    %cst_36 = arith.constant dense<0xFF800000> : vector<32xf32>
    %46 = vector.multi_reduction <maximumf>, %45, %cst_36 [1] : vector<32x256xf32> to vector<32xf32>
    %47 = vector.shape_cast %46 : vector<32xf32> to vector<32x1xf32>
    %48 = vector.broadcast %47 : vector<32x1xf32> to vector<32x256xf32>
    %49 = arith.subf %45, %48 : vector<32x256xf32>
    %50 = math.exp %49 : vector<32x256xf32>
    %51 = arith.truncf %50 : vector<32x256xf32> to vector<32x256xbf16>
    %cst_37 = arith.constant dense<0.000000e+00> : vector<32x256xf32>
    %52 = tpu.matmul %51, %36, %cst_37 {dimension_numbers = #tpu.dot_dimension_numbers<[1], [0], [0], [1], [0, 0, 1, 1], [], []>} : vector<32x256xbf16>, vector<256x256xbf16>, vector<32x256xf32> -> vector<32x256xf32>
    %cst_38 = arith.constant 1.000000e-30 : f32
    %53 = vector.broadcast %cst_38 : f32 to vector<32x256xf32>
    %54 = arith.maximumf %52, %53 : vector<32x256xf32>
    %55 = tpu.reciprocal %54 {approx = true} : vector<32x256xf32> -> vector<32x256xf32>
    %56 = arith.mulf %50, %55 : vector<32x256xf32>
    %57 = arith.truncf %56 : vector<32x256xf32> to vector<32x256xbf16>
    %cst_39 = arith.constant dense<0.000000e+00> : vector<32x256xf32>
    %58 = tpu.matmul %57, %43, %cst_39 {dimension_numbers = #tpu.dot_dimension_numbers<[1], [0], [0], [1], [0, 0, 1, 1], [], []>} : vector<32x256xbf16>, vector<256x256xbf16>, vector<32x256xf32> -> vector<32x256xf32>
    %59 = arith.truncf %58 : vector<32x256xf32> to vector<32x256xbf16>
    %c0_40 = arith.constant 0 : index
    %c3 = arith.constant 3 : index
    %c0_41 = arith.constant 0 : index
    %c0_42 = arith.constant 0 : index
    %60 = vector.load %arg24[%c0_40, %c3, %c0_41, %c0_42] : memref<1x10x256x256xbf16, #tpu.memory_space<vmem>>, vector<1x1x256x256xbf16>
    %61 = vector.shape_cast %60 : vector<1x1x256x256xbf16> to vector<256x256xbf16>
    %cst_43 = arith.constant dense<0.000000e+00> : vector<32x256xf32>
    %62 = tpu.matmul %59, %61, %cst_43 {dimension_numbers = #tpu.dot_dimension_numbers<[1], [0], [0], [1], [0, 0, 1, 1], [], []>} : vector<32x256xbf16>, vector<256x256xbf16>, vector<32x256xf32> -> vector<32x256xf32>
    %c0_44 = arith.constant 0 : index
    %c3_45 = arith.constant 3 : index
    %c0_46 = arith.constant 0 : index
    %63 = vector.load %arg27[%c0_44, %c3_45, %c0_46] : memref<1x22x256xf32, #tpu.memory_space<vmem>>, vector<1x1x256xf32>
    %64 = vector.shape_cast %63 : vector<1x1x256xf32> to vector<256xf32>
    %65 = vector.shape_cast %64 : vector<256xf32> to vector<1x256xf32>
    %66 = vector.broadcast %65 : vector<1x256xf32> to vector<32x256xf32>
    %67 = arith.addf %62, %66 : vector<32x256xf32>
    %68 = arith.addf %3, %67 : vector<32x256xf32>
    %c0_47 = arith.constant 0 : index
    %c10 = arith.constant 10 : index
    %c0_48 = arith.constant 0 : index
    %69 = vector.load %arg27[%c0_47, %c10, %c0_48] : memref<1x22x256xf32, #tpu.memory_space<vmem>>, vector<1x1x256xf32>
    %70 = vector.shape_cast %69 : vector<1x1x256xf32> to vector<256xf32>
    %c0_49 = arith.constant 0 : index
    %c11 = arith.constant 11 : index
    %c0_50 = arith.constant 0 : index
    %71 = vector.load %arg27[%c0_49, %c11, %c0_50] : memref<1x22x256xf32, #tpu.memory_space<vmem>>, vector<1x1x256xf32>
    %72 = vector.shape_cast %71 : vector<1x1x256xf32> to vector<256xf32>
    %cst_51 = arith.constant dense<0.000000e+00> : vector<32xf32>
    %73 = vector.multi_reduction <add>, %68, %cst_51 [1] : vector<32x256xf32> to vector<32xf32>
    %74 = vector.shape_cast %73 : vector<32xf32> to vector<32x1xf32>
    %cst_52 = arith.constant 2.560000e+02 : f32
    %75 = vector.broadcast %cst_52 : f32 to vector<32x1xf32>
    %76 = arith.divf %74, %75 : vector<32x1xf32>
    %77 = vector.broadcast %76 : vector<32x1xf32> to vector<32x256xf32>
    %78 = arith.subf %68, %77 : vector<32x256xf32>
    %79 = arith.mulf %78, %78 : vector<32x256xf32>
    %cst_53 = arith.constant dense<0.000000e+00> : vector<32xf32>
    %80 = vector.multi_reduction <add>, %79, %cst_53 [1] : vector<32x256xf32> to vector<32xf32>
    %81 = vector.shape_cast %80 : vector<32xf32> to vector<32x1xf32>
    %cst_54 = arith.constant 0.00392156886 : f32
    %82 = vector.broadcast %cst_54 : f32 to vector<32x1xf32>
    %83 = arith.mulf %81, %82 : vector<32x1xf32>
    %84 = math.sqrt %83 : vector<32x1xf32>
    %cst_55 = arith.constant 9.99999997E-7 : f32
    %85 = vector.broadcast %cst_55 : f32 to vector<32x1xf32>
    %86 = arith.addf %84, %85 : vector<32x1xf32>
    %87 = tpu.reciprocal %86 {approx = true} : vector<32x1xf32> -> vector<32x1xf32>
    %88 = vector.broadcast %87 : vector<32x1xf32> to vector<32x256xf32>
    %89 = arith.mulf %78, %88 : vector<32x256xf32>
    %90 = vector.shape_cast %70 : vector<256xf32> to vector<1x256xf32>
    %91 = vector.broadcast %90 : vector<1x256xf32> to vector<32x256xf32>
    %92 = arith.mulf %91, %89 : vector<32x256xf32>
    %93 = vector.shape_cast %72 : vector<256xf32> to vector<1x256xf32>
    %94 = vector.broadcast %93 : vector<1x256xf32> to vector<32x256xf32>
    %95 = arith.addf %92, %94 : vector<32x256xf32>
    %96 = arith.truncf %95 : vector<32x256xf32> to vector<32x256xbf16>
    %c0_56 = arith.constant 0 : index
    %c4 = arith.constant 4 : index
    %c0_57 = arith.constant 0 : index
    %c0_58 = arith.constant 0 : index
    %97 = vector.load %arg24[%c0_56, %c4, %c0_57, %c0_58] : memref<1x10x256x256xbf16, #tpu.memory_space<vmem>>, vector<1x1x256x256xbf16>
    %98 = vector.shape_cast %97 : vector<1x1x256x256xbf16> to vector<256x256xbf16>
    %cst_59 = arith.constant dense<0.000000e+00> : vector<8x256xf32>
    %99 = tpu.matmul %6, %98, %cst_59 {dimension_numbers = #tpu.dot_dimension_numbers<[1], [0], [0], [1], [0, 0, 1, 1], [], []>} : vector<8x256xbf16>, vector<256x256xbf16>, vector<8x256xf32> -> vector<8x256xf32>
    %c0_60 = arith.constant 0 : index
    %c4_61 = arith.constant 4 : index
    %c0_62 = arith.constant 0 : index
    %100 = vector.load %arg27[%c0_60, %c4_61, %c0_62] : memref<1x22x256xf32, #tpu.memory_space<vmem>>, vector<1x1x256xf32>
    %101 = vector.shape_cast %100 : vector<1x1x256xf32> to vector<256xf32>
    %102 = vector.shape_cast %101 : vector<256xf32> to vector<1x256xf32>
    %103 = vector.broadcast %102 : vector<1x256xf32> to vector<8x256xf32>
    %104 = arith.addf %99, %103 : vector<8x256xf32>
    %105 = arith.truncf %104 : vector<8x256xf32> to vector<8x256xbf16>
    %c0_63 = arith.constant 0 : index
    %c5 = arith.constant 5 : index
    %c0_64 = arith.constant 0 : index
    %c0_65 = arith.constant 0 : index
    %106 = vector.load %arg24[%c0_63, %c5, %c0_64, %c0_65] : memref<1x10x256x256xbf16, #tpu.memory_space<vmem>>, vector<1x1x256x256xbf16>
    %107 = vector.shape_cast %106 : vector<1x1x256x256xbf16> to vector<256x256xbf16>
    %cst_66 = arith.constant dense<0.000000e+00> : vector<8x256xf32>
    %108 = tpu.matmul %6, %107, %cst_66 {dimension_numbers = #tpu.dot_dimension_numbers<[1], [0], [0], [1], [0, 0, 1, 1], [], []>} : vector<8x256xbf16>, vector<256x256xbf16>, vector<8x256xf32> -> vector<8x256xf32>
    %c0_67 = arith.constant 0 : index
    %c5_68 = arith.constant 5 : index
    %c0_69 = arith.constant 0 : index
    %109 = vector.load %arg27[%c0_67, %c5_68, %c0_69] : memref<1x22x256xf32, #tpu.memory_space<vmem>>, vector<1x1x256xf32>
    %110 = vector.shape_cast %109 : vector<1x1x256xf32> to vector<256xf32>
    %111 = vector.shape_cast %110 : vector<256xf32> to vector<1x256xf32>
    %112 = vector.broadcast %111 : vector<1x256xf32> to vector<8x256xf32>
    %113 = arith.addf %108, %112 : vector<8x256xf32>
    %114 = arith.truncf %113 : vector<8x256xf32> to vector<8x256xbf16>
    %c0_70 = arith.constant 0 : index
    %c0_71 = arith.constant 0 : index
    %115 = vector.load %arg10[%c0_70, %c0_71] : memref<64x8xbf16, #tpu.memory_space<vmem>>, vector<64x8xbf16>
    %c0_72 = arith.constant 0 : index
    %c0_73 = arith.constant 0 : index
    %116 = vector.load %arg11[%c0_72, %c0_73] : memref<64x256xbf16, #tpu.memory_space<vmem>>, vector<64x256xbf16>
    %c0_74 = arith.constant 0 : index
    %c0_75 = arith.constant 0 : index
    %117 = vector.load %arg12[%c0_74, %c0_75] : memref<64x64xbf16, #tpu.memory_space<vmem>>, vector<64x64xbf16>
    %c0_76 = arith.constant 0 : index
    %c0_77 = arith.constant 0 : index
    %118 = vector.load %arg4[%c0_76, %c0_77] : memref<8x64xf32, #tpu.memory_space<vmem>>, vector<8x64xf32>
    %cst_78 = arith.constant dense<0.000000e+00> : vector<64x256xf32>
    %119 = tpu.matmul %115, %114, %cst_78 {dimension_numbers = #tpu.dot_dimension_numbers<[1], [0], [0], [1], [0, 0, 1, 1], [], []>} : vector<64x8xbf16>, vector<8x256xbf16>, vector<64x256xf32> -> vector<64x256xf32>
    %120 = arith.truncf %119 : vector<64x256xf32> to vector<64x256xbf16>
    %121 = arith.mulf %120, %116 : vector<64x256xbf16>
    %cst_79 = arith.constant dense<0.000000e+00> : vector<64x256xf32>
    %122 = tpu.matmul %115, %6, %cst_79 {dimension_numbers = #tpu.dot_dimension_numbers<[1], [0], [0], [1], [0, 0, 1, 1], [], []>} : vector<64x8xbf16>, vector<8x256xbf16>, vector<64x256xf32> -> vector<64x256xf32>
    %123 = arith.truncf %122 : vector<64x256xf32> to vector<64x256xbf16>
    %124 = arith.mulf %123, %116 : vector<64x256xbf16>
    %cst_80 = arith.constant dense<0.000000e+00> : vector<8x64xf32>
    %125 = tpu.matmul %105, %121, %cst_80 {dimension_numbers = #tpu.dot_dimension_numbers<[1], [1], [0], [0], [0, 0, 1, 0], [], []>} : vector<8x256xbf16>, vector<64x256xbf16>, vector<8x64xf32> -> vector<8x64xf32>
    %126 = arith.addf %125, %118 : vector<8x64xf32>
    %cst_81 = arith.constant dense<0xFF800000> : vector<8xf32>
    %127 = vector.multi_reduction <maximumf>, %126, %cst_81 [1] : vector<8x64xf32> to vector<8xf32>
    %128 = vector.shape_cast %127 : vector<8xf32> to vector<8x1xf32>
    %129 = vector.broadcast %128 : vector<8x1xf32> to vector<8x64xf32>
    %130 = arith.subf %126, %129 : vector<8x64xf32>
    %131 = math.exp %130 : vector<8x64xf32>
    %132 = arith.truncf %131 : vector<8x64xf32> to vector<8x64xbf16>
    %cst_82 = arith.constant dense<0.000000e+00> : vector<8x64xf32>
    %133 = tpu.matmul %132, %117, %cst_82 {dimension_numbers = #tpu.dot_dimension_numbers<[1], [0], [0], [1], [0, 0, 1, 1], [], []>} : vector<8x64xbf16>, vector<64x64xbf16>, vector<8x64xf32> -> vector<8x64xf32>
    %cst_83 = arith.constant 1.000000e-30 : f32
    %134 = vector.broadcast %cst_83 : f32 to vector<8x64xf32>
    %135 = arith.maximumf %133, %134 : vector<8x64xf32>
    %136 = tpu.reciprocal %135 {approx = true} : vector<8x64xf32> -> vector<8x64xf32>
    %137 = arith.mulf %131, %136 : vector<8x64xf32>
    %138 = arith.truncf %137 : vector<8x64xf32> to vector<8x64xbf16>
    %cst_84 = arith.constant dense<0.000000e+00> : vector<8x256xf32>
    %139 = tpu.matmul %138, %124, %cst_84 {dimension_numbers = #tpu.dot_dimension_numbers<[1], [0], [0], [1], [0, 0, 1, 1], [], []>} : vector<8x64xbf16>, vector<64x256xbf16>, vector<8x256xf32> -> vector<8x256xf32>
    %140 = arith.addf %4, %139 : vector<8x256xf32>
    %c0_85 = arith.constant 0 : index
    %c16 = arith.constant 16 : index
    %c0_86 = arith.constant 0 : index
    %141 = vector.load %arg27[%c0_85, %c16, %c0_86] : memref<1x22x256xf32, #tpu.memory_space<vmem>>, vector<1x1x256xf32>
    %142 = vector.shape_cast %141 : vector<1x1x256xf32> to vector<256xf32>
    %c0_87 = arith.constant 0 : index
    %c17 = arith.constant 17 : index
    %c0_88 = arith.constant 0 : index
    %143 = vector.load %arg27[%c0_87, %c17, %c0_88] : memref<1x22x256xf32, #tpu.memory_space<vmem>>, vector<1x1x256xf32>
    %144 = vector.shape_cast %143 : vector<1x1x256xf32> to vector<256xf32>
    %cst_89 = arith.constant dense<0.000000e+00> : vector<8xf32>
    %145 = vector.multi_reduction <add>, %140, %cst_89 [1] : vector<8x256xf32> to vector<8xf32>
    %146 = vector.shape_cast %145 : vector<8xf32> to vector<8x1xf32>
    %cst_90 = arith.constant 2.560000e+02 : f32
    %147 = vector.broadcast %cst_90 : f32 to vector<8x1xf32>
    %148 = arith.divf %146, %147 : vector<8x1xf32>
    %149 = vector.broadcast %148 : vector<8x1xf32> to vector<8x256xf32>
    %150 = arith.subf %140, %149 : vector<8x256xf32>
    %151 = arith.mulf %150, %150 : vector<8x256xf32>
    %cst_91 = arith.constant dense<0.000000e+00> : vector<8xf32>
    %152 = vector.multi_reduction <add>, %151, %cst_91 [1] : vector<8x256xf32> to vector<8xf32>
    %153 = vector.shape_cast %152 : vector<8xf32> to vector<8x1xf32>
    %cst_92 = arith.constant 0.00392156886 : f32
    %154 = vector.broadcast %cst_92 : f32 to vector<8x1xf32>
    %155 = arith.mulf %153, %154 : vector<8x1xf32>
    %156 = math.sqrt %155 : vector<8x1xf32>
    %cst_93 = arith.constant 9.99999997E-7 : f32
    %157 = vector.broadcast %cst_93 : f32 to vector<8x1xf32>
    %158 = arith.addf %156, %157 : vector<8x1xf32>
    %159 = tpu.reciprocal %158 {approx = true} : vector<8x1xf32> -> vector<8x1xf32>
    %160 = vector.broadcast %159 : vector<8x1xf32> to vector<8x256xf32>
    %161 = arith.mulf %150, %160 : vector<8x256xf32>
    %162 = vector.shape_cast %142 : vector<256xf32> to vector<1x256xf32>
    %163 = vector.broadcast %162 : vector<1x256xf32> to vector<8x256xf32>
    %164 = arith.mulf %163, %161 : vector<8x256xf32>
    %165 = vector.shape_cast %144 : vector<256xf32> to vector<1x256xf32>
    %166 = vector.broadcast %165 : vector<1x256xf32> to vector<8x256xf32>
    %167 = arith.addf %164, %166 : vector<8x256xf32>
    %168 = arith.truncf %167 : vector<8x256xf32> to vector<8x256xbf16>
    %c0_94 = arith.constant 0 : index
    %c6 = arith.constant 6 : index
    %c0_95 = arith.constant 0 : index
    %c0_96 = arith.constant 0 : index
    %169 = vector.load %arg24[%c0_94, %c6, %c0_95, %c0_96] : memref<1x10x256x256xbf16, #tpu.memory_space<vmem>>, vector<1x1x256x256xbf16>
    %170 = vector.shape_cast %169 : vector<1x1x256x256xbf16> to vector<256x256xbf16>
    %cst_97 = arith.constant dense<0.000000e+00> : vector<32x256xf32>
    %171 = tpu.matmul %96, %170, %cst_97 {dimension_numbers = #tpu.dot_dimension_numbers<[1], [0], [0], [1], [0, 0, 1, 1], [], []>} : vector<32x256xbf16>, vector<256x256xbf16>, vector<32x256xf32> -> vector<32x256xf32>
    %c0_98 = arith.constant 0 : index
    %c6_99 = arith.constant 6 : index
    %c0_100 = arith.constant 0 : index
    %172 = vector.load %arg27[%c0_98, %c6_99, %c0_100] : memref<1x22x256xf32, #tpu.memory_space<vmem>>, vector<1x1x256xf32>
    %173 = vector.shape_cast %172 : vector<1x1x256xf32> to vector<256xf32>
    %174 = vector.shape_cast %173 : vector<256xf32> to vector<1x256xf32>
    %175 = vector.broadcast %174 : vector<1x256xf32> to vector<32x256xf32>
    %176 = arith.addf %171, %175 : vector<32x256xf32>
    %177 = arith.truncf %176 : vector<32x256xf32> to vector<32x256xbf16>
    %c0_101 = arith.constant 0 : index
    %c8 = arith.constant 8 : index
    %c0_102 = arith.constant 0 : index
    %c0_103 = arith.constant 0 : index
    %178 = vector.load %arg24[%c0_101, %c8, %c0_102, %c0_103] : memref<1x10x256x256xbf16, #tpu.memory_space<vmem>>, vector<1x1x256x256xbf16>
    %179 = vector.shape_cast %178 : vector<1x1x256x256xbf16> to vector<256x256xbf16>
    %cst_104 = arith.constant dense<0.000000e+00> : vector<32x256xf32>
    %180 = tpu.matmul %96, %179, %cst_104 {dimension_numbers = #tpu.dot_dimension_numbers<[1], [0], [0], [1], [0, 0, 1, 1], [], []>} : vector<32x256xbf16>, vector<256x256xbf16>, vector<32x256xf32> -> vector<32x256xf32>
    %181 = arith.truncf %180 : vector<32x256xf32> to vector<32x256xbf16>
    %c0_105 = arith.constant 0 : index
    %c7 = arith.constant 7 : index
    %c0_106 = arith.constant 0 : index
    %c0_107 = arith.constant 0 : index
    %182 = vector.load %arg24[%c0_105, %c7, %c0_106, %c0_107] : memref<1x10x256x256xbf16, #tpu.memory_space<vmem>>, vector<1x1x256x256xbf16>
    %183 = vector.shape_cast %182 : vector<1x1x256x256xbf16> to vector<256x256xbf16>
    %cst_108 = arith.constant dense<0.000000e+00> : vector<8x256xf32>
    %184 = tpu.matmul %168, %183, %cst_108 {dimension_numbers = #tpu.dot_dimension_numbers<[1], [0], [0], [1], [0, 0, 1, 1], [], []>} : vector<8x256xbf16>, vector<256x256xbf16>, vector<8x256xf32> -> vector<8x256xf32>
    %185 = arith.truncf %184 : vector<8x256xf32> to vector<8x256xbf16>
    %c0_109 = arith.constant 0 : index
    %c9 = arith.constant 9 : index
    %c0_110 = arith.constant 0 : index
    %c0_111 = arith.constant 0 : index
    %186 = vector.load %arg24[%c0_109, %c9, %c0_110, %c0_111] : memref<1x10x256x256xbf16, #tpu.memory_space<vmem>>, vector<1x1x256x256xbf16>
    %187 = vector.shape_cast %186 : vector<1x1x256x256xbf16> to vector<256x256xbf16>
    %cst_112 = arith.constant dense<0.000000e+00> : vector<8x256xf32>
    %188 = tpu.matmul %168, %187, %cst_112 {dimension_numbers = #tpu.dot_dimension_numbers<[1], [0], [0], [1], [0, 0, 1, 1], [], []>} : vector<8x256xbf16>, vector<256x256xbf16>, vector<8x256xf32> -> vector<8x256xf32>
    %c0_113 = arith.constant 0 : index
    %c7_114 = arith.constant 7 : index
    %c0_115 = arith.constant 0 : index
    %189 = vector.load %arg27[%c0_113, %c7_114, %c0_115] : memref<1x22x256xf32, #tpu.memory_space<vmem>>, vector<1x1x256xf32>
    %190 = vector.shape_cast %189 : vector<1x1x256xf32> to vector<256xf32>
    %191 = vector.shape_cast %190 : vector<256xf32> to vector<1x256xf32>
    %192 = vector.broadcast %191 : vector<1x256xf32> to vector<8x256xf32>
    %193 = arith.addf %188, %192 : vector<8x256xf32>
    %194 = arith.truncf %193 : vector<8x256xf32> to vector<8x256xbf16>
    %c0_116 = arith.constant 0 : index
    %c0_117 = arith.constant 0 : index
    %195 = vector.load %arg13[%c0_116, %c0_117] : memref<128x32xbf16, #tpu.memory_space<vmem>>, vector<128x32xbf16>
    %c0_118 = arith.constant 0 : index
    %c0_119 = arith.constant 0 : index
    %196 = vector.load %arg14[%c0_118, %c0_119] : memref<128x8xbf16, #tpu.memory_space<vmem>>, vector<128x8xbf16>
    %cst_120 = arith.constant dense<0.000000e+00> : vector<128x256xf32>
    %197 = tpu.matmul %195, %177, %cst_120 {dimension_numbers = #tpu.dot_dimension_numbers<[1], [0], [0], [1], [0, 0, 1, 1], [], []>} : vector<128x32xbf16>, vector<32x256xbf16>, vector<128x256xf32> -> vector<128x256xf32>
    %cst_121 = arith.constant dense<0.000000e+00> : vector<128x256xf32>
    %198 = tpu.matmul %196, %185, %cst_121 {dimension_numbers = #tpu.dot_dimension_numbers<[1], [0], [0], [1], [0, 0, 1, 1], [], []>} : vector<128x8xbf16>, vector<8x256xbf16>, vector<128x256xf32> -> vector<128x256xf32>
    %199 = arith.addf %197, %198 : vector<128x256xf32>
    %200 = arith.negf %199 : vector<128x256xf32>
    %201 = math.exp %200 : vector<128x256xf32>
    %cst_122 = arith.constant 1.000000e+00 : f32
    %202 = vector.broadcast %cst_122 : f32 to vector<128x256xf32>
    %203 = arith.addf %202, %201 : vector<128x256xf32>
    %204 = arith.divf %202, %203 : vector<128x256xf32>
    %cst_123 = arith.constant dense<0.000000e+00> : vector<128x256xf32>
    %205 = tpu.matmul %195, %181, %cst_123 {dimension_numbers = #tpu.dot_dimension_numbers<[1], [0], [0], [1], [0, 0, 1, 1], [], []>} : vector<128x32xbf16>, vector<32x256xbf16>, vector<128x256xf32> -> vector<128x256xf32>
    %cst_124 = arith.constant dense<0.000000e+00> : vector<128x256xf32>
    %206 = tpu.matmul %196, %194, %cst_124 {dimension_numbers = #tpu.dot_dimension_numbers<[1], [0], [0], [1], [0, 0, 1, 1], [], []>} : vector<128x8xbf16>, vector<8x256xbf16>, vector<128x256xf32> -> vector<128x256xf32>
    %207 = arith.addf %205, %206 : vector<128x256xf32>
    %208 = arith.negf %207 : vector<128x256xf32>
    %209 = math.exp %208 : vector<128x256xf32>
    %cst_125 = arith.constant 1.000000e+00 : f32
    %210 = vector.broadcast %cst_125 : f32 to vector<128x256xf32>
    %211 = arith.addf %210, %209 : vector<128x256xf32>
    %212 = arith.divf %210, %211 : vector<128x256xf32>
    %cst_126 = arith.constant dense<0.000000e+00> : vector<128x256xf32>
    %213 = tpu.matmul %196, %168, %cst_126 {dimension_numbers = #tpu.dot_dimension_numbers<[1], [0], [0], [1], [0, 0, 1, 1], [], []>} : vector<128x8xbf16>, vector<8x256xbf16>, vector<128x256xf32> -> vector<128x256xf32>
    %cst_127 = arith.constant dense<0.000000e+00> : vector<128x256xf32>
    %214 = tpu.matmul %195, %96, %cst_127 {dimension_numbers = #tpu.dot_dimension_numbers<[1], [0], [0], [1], [0, 0, 1, 1], [], []>} : vector<128x32xbf16>, vector<32x256xbf16>, vector<128x256xf32> -> vector<128x256xf32>
    %c0_128 = arith.constant 0 : index
    %c0_129 = arith.constant 0 : index
    %215 = vector.load %arg5[%c0_128, %c0_129] : memref<32x128xbf16, #tpu.memory_space<vmem>>, vector<32x128xbf16>
    %216 = arith.mulf %204, %213 : vector<128x256xf32>
    %217 = arith.truncf %216 : vector<128x256xf32> to vector<128x256xbf16>
    %cst_130 = arith.constant dense<0.000000e+00> : vector<32x256xf32>
    %218 = tpu.matmul %215, %217, %cst_130 {dimension_numbers = #tpu.dot_dimension_numbers<[1], [0], [0], [1], [0, 0, 1, 1], [], []>} : vector<32x128xbf16>, vector<128x256xbf16>, vector<32x256xf32> -> vector<32x256xf32>
    %c0_131 = arith.constant 0 : index
    %c0_132 = arith.constant 0 : index
    %219 = vector.load %arg6[%c0_131, %c0_132] : memref<8x128xbf16, #tpu.memory_space<vmem>>, vector<8x128xbf16>
    %220 = arith.mulf %212, %214 : vector<128x256xf32>
    %221 = arith.truncf %220 : vector<128x256xf32> to vector<128x256xbf16>
    %cst_133 = arith.constant dense<0.000000e+00> : vector<8x256xf32>
    %222 = tpu.matmul %219, %221, %cst_133 {dimension_numbers = #tpu.dot_dimension_numbers<[1], [0], [0], [1], [0, 0, 1, 1], [], []>} : vector<8x128xbf16>, vector<128x256xbf16>, vector<8x256xf32> -> vector<8x256xf32>
    %223 = arith.addf %95, %218 : vector<32x256xf32>
    %c0_134 = arith.constant 0 : index
    %c12 = arith.constant 12 : index
    %c0_135 = arith.constant 0 : index
    %224 = vector.load %arg27[%c0_134, %c12, %c0_135] : memref<1x22x256xf32, #tpu.memory_space<vmem>>, vector<1x1x256xf32>
    %225 = vector.shape_cast %224 : vector<1x1x256xf32> to vector<256xf32>
    %c0_136 = arith.constant 0 : index
    %c13 = arith.constant 13 : index
    %c0_137 = arith.constant 0 : index
    %226 = vector.load %arg27[%c0_136, %c13, %c0_137] : memref<1x22x256xf32, #tpu.memory_space<vmem>>, vector<1x1x256xf32>
    %227 = vector.shape_cast %226 : vector<1x1x256xf32> to vector<256xf32>
    %cst_138 = arith.constant dense<0.000000e+00> : vector<32xf32>
    %228 = vector.multi_reduction <add>, %223, %cst_138 [1] : vector<32x256xf32> to vector<32xf32>
    %229 = vector.shape_cast %228 : vector<32xf32> to vector<32x1xf32>
    %cst_139 = arith.constant 2.560000e+02 : f32
    %230 = vector.broadcast %cst_139 : f32 to vector<32x1xf32>
    %231 = arith.divf %229, %230 : vector<32x1xf32>
    %232 = vector.broadcast %231 : vector<32x1xf32> to vector<32x256xf32>
    %233 = arith.subf %223, %232 : vector<32x256xf32>
    %234 = arith.mulf %233, %233 : vector<32x256xf32>
    %cst_140 = arith.constant dense<0.000000e+00> : vector<32xf32>
    %235 = vector.multi_reduction <add>, %234, %cst_140 [1] : vector<32x256xf32> to vector<32xf32>
    %236 = vector.shape_cast %235 : vector<32xf32> to vector<32x1xf32>
    %cst_141 = arith.constant 0.00392156886 : f32
    %237 = vector.broadcast %cst_141 : f32 to vector<32x1xf32>
    %238 = arith.mulf %236, %237 : vector<32x1xf32>
    %239 = math.sqrt %238 : vector<32x1xf32>
    %cst_142 = arith.constant 9.99999997E-7 : f32
    %240 = vector.broadcast %cst_142 : f32 to vector<32x1xf32>
    %241 = arith.addf %239, %240 : vector<32x1xf32>
    %242 = tpu.reciprocal %241 {approx = true} : vector<32x1xf32> -> vector<32x1xf32>
    %243 = vector.broadcast %242 : vector<32x1xf32> to vector<32x256xf32>
    %244 = arith.mulf %233, %243 : vector<32x256xf32>
    %245 = vector.shape_cast %225 : vector<256xf32> to vector<1x256xf32>
    %246 = vector.broadcast %245 : vector<1x256xf32> to vector<32x256xf32>
    %247 = arith.mulf %246, %244 : vector<32x256xf32>
    %248 = vector.shape_cast %227 : vector<256xf32> to vector<1x256xf32>
    %249 = vector.broadcast %248 : vector<1x256xf32> to vector<32x256xf32>
    %250 = arith.addf %247, %249 : vector<32x256xf32>
    %251 = arith.addf %167, %222 : vector<8x256xf32>
    %c0_143 = arith.constant 0 : index
    %c18 = arith.constant 18 : index
    %c0_144 = arith.constant 0 : index
    %252 = vector.load %arg27[%c0_143, %c18, %c0_144] : memref<1x22x256xf32, #tpu.memory_space<vmem>>, vector<1x1x256xf32>
    %253 = vector.shape_cast %252 : vector<1x1x256xf32> to vector<256xf32>
    %c0_145 = arith.constant 0 : index
    %c19 = arith.constant 19 : index
    %c0_146 = arith.constant 0 : index
    %254 = vector.load %arg27[%c0_145, %c19, %c0_146] : memref<1x22x256xf32, #tpu.memory_space<vmem>>, vector<1x1x256xf32>
    %255 = vector.shape_cast %254 : vector<1x1x256xf32> to vector<256xf32>
    %cst_147 = arith.constant dense<0.000000e+00> : vector<8xf32>
    %256 = vector.multi_reduction <add>, %251, %cst_147 [1] : vector<8x256xf32> to vector<8xf32>
    %257 = vector.shape_cast %256 : vector<8xf32> to vector<8x1xf32>
    %cst_148 = arith.constant 2.560000e+02 : f32
    %258 = vector.broadcast %cst_148 : f32 to vector<8x1xf32>
    %259 = arith.divf %257, %258 : vector<8x1xf32>
    %260 = vector.broadcast %259 : vector<8x1xf32> to vector<8x256xf32>
    %261 = arith.subf %251, %260 : vector<8x256xf32>
    %262 = arith.mulf %261, %261 : vector<8x256xf32>
    %cst_149 = arith.constant dense<0.000000e+00> : vector<8xf32>
    %263 = vector.multi_reduction <add>, %262, %cst_149 [1] : vector<8x256xf32> to vector<8xf32>
    %264 = vector.shape_cast %263 : vector<8xf32> to vector<8x1xf32>
    %cst_150 = arith.constant 0.00392156886 : f32
    %265 = vector.broadcast %cst_150 : f32 to vector<8x1xf32>
    %266 = arith.mulf %264, %265 : vector<8x1xf32>
    %267 = math.sqrt %266 : vector<8x1xf32>
    %cst_151 = arith.constant 9.99999997E-7 : f32
    %268 = vector.broadcast %cst_151 : f32 to vector<8x1xf32>
    %269 = arith.addf %267, %268 : vector<8x1xf32>
    %270 = tpu.reciprocal %269 {approx = true} : vector<8x1xf32> -> vector<8x1xf32>
    %271 = vector.broadcast %270 : vector<8x1xf32> to vector<8x256xf32>
    %272 = arith.mulf %261, %271 : vector<8x256xf32>
    %273 = vector.shape_cast %253 : vector<256xf32> to vector<1x256xf32>
    %274 = vector.broadcast %273 : vector<1x256xf32> to vector<8x256xf32>
    %275 = arith.mulf %274, %272 : vector<8x256xf32>
    %276 = vector.shape_cast %255 : vector<256xf32> to vector<1x256xf32>
    %277 = vector.broadcast %276 : vector<1x256xf32> to vector<8x256xf32>
    %278 = arith.addf %275, %277 : vector<8x256xf32>
    %279 = arith.truncf %250 : vector<32x256xf32> to vector<32x256xbf16>
    %280 = arith.truncf %278 : vector<8x256xf32> to vector<8x256xbf16>
    %c0_152 = arith.constant 0 : index
    %c0_153 = arith.constant 0 : index
    %c0_154 = arith.constant 0 : index
    %c0_155 = arith.constant 0 : index
    %281 = vector.load %arg25[%c0_152, %c0_153, %c0_154, %c0_155] : memref<1x2x256x128xbf16, #tpu.memory_space<vmem>>, vector<1x1x256x128xbf16>
    %282 = vector.shape_cast %281 : vector<1x1x256x128xbf16> to vector<256x128xbf16>
    %cst_156 = arith.constant dense<0.000000e+00> : vector<32x128xf32>
    %283 = tpu.matmul %279, %282, %cst_156 {dimension_numbers = #tpu.dot_dimension_numbers<[1], [0], [0], [1], [0, 0, 1, 1], [], []>} : vector<32x256xbf16>, vector<256x128xbf16>, vector<32x128xf32> -> vector<32x128xf32>
    %c0_157 = arith.constant 0 : index
    %c0_158 = arith.constant 0 : index
    %c0_159 = arith.constant 0 : index
    %284 = vector.load %arg28[%c0_157, %c0_158, %c0_159] : memref<1x2x128xf32, #tpu.memory_space<vmem>>, vector<1x1x128xf32>
    %285 = vector.shape_cast %284 : vector<1x1x128xf32> to vector<128xf32>
    %286 = vector.shape_cast %285 : vector<128xf32> to vector<1x128xf32>
    %287 = vector.broadcast %286 : vector<1x128xf32> to vector<32x128xf32>
    %288 = arith.addf %283, %287 : vector<32x128xf32>
    %cst_160 = arith.constant 0.000000e+00 : f32
    %289 = vector.broadcast %cst_160 : f32 to vector<32x128xf32>
    %290 = arith.maximumf %288, %289 : vector<32x128xf32>
    %291 = arith.truncf %290 : vector<32x128xf32> to vector<32x128xbf16>
    %c0_161 = arith.constant 0 : index
    %c0_162 = arith.constant 0 : index
    %c0_163 = arith.constant 0 : index
    %c0_164 = arith.constant 0 : index
    %292 = vector.load %arg26[%c0_161, %c0_162, %c0_163, %c0_164] : memref<1x2x128x256xbf16, #tpu.memory_space<vmem>>, vector<1x1x128x256xbf16>
    %293 = vector.shape_cast %292 : vector<1x1x128x256xbf16> to vector<128x256xbf16>
    %cst_165 = arith.constant dense<0.000000e+00> : vector<32x256xf32>
    %294 = tpu.matmul %291, %293, %cst_165 {dimension_numbers = #tpu.dot_dimension_numbers<[1], [0], [0], [1], [0, 0, 1, 1], [], []>} : vector<32x128xbf16>, vector<128x256xbf16>, vector<32x256xf32> -> vector<32x256xf32>
    %c0_166 = arith.constant 0 : index
    %c8_167 = arith.constant 8 : index
    %c0_168 = arith.constant 0 : index
    %295 = vector.load %arg27[%c0_166, %c8_167, %c0_168] : memref<1x22x256xf32, #tpu.memory_space<vmem>>, vector<1x1x256xf32>
    %296 = vector.shape_cast %295 : vector<1x1x256xf32> to vector<256xf32>
    %297 = vector.shape_cast %296 : vector<256xf32> to vector<1x256xf32>
    %298 = vector.broadcast %297 : vector<1x256xf32> to vector<32x256xf32>
    %299 = arith.addf %294, %298 : vector<32x256xf32>
    %300 = arith.addf %250, %299 : vector<32x256xf32>
    %c0_169 = arith.constant 0 : index
    %c14 = arith.constant 14 : index
    %c0_170 = arith.constant 0 : index
    %301 = vector.load %arg27[%c0_169, %c14, %c0_170] : memref<1x22x256xf32, #tpu.memory_space<vmem>>, vector<1x1x256xf32>
    %302 = vector.shape_cast %301 : vector<1x1x256xf32> to vector<256xf32>
    %c0_171 = arith.constant 0 : index
    %c15 = arith.constant 15 : index
    %c0_172 = arith.constant 0 : index
    %303 = vector.load %arg27[%c0_171, %c15, %c0_172] : memref<1x22x256xf32, #tpu.memory_space<vmem>>, vector<1x1x256xf32>
    %304 = vector.shape_cast %303 : vector<1x1x256xf32> to vector<256xf32>
    %cst_173 = arith.constant dense<0.000000e+00> : vector<32xf32>
    %305 = vector.multi_reduction <add>, %300, %cst_173 [1] : vector<32x256xf32> to vector<32xf32>
    %306 = vector.shape_cast %305 : vector<32xf32> to vector<32x1xf32>
    %cst_174 = arith.constant 2.560000e+02 : f32
    %307 = vector.broadcast %cst_174 : f32 to vector<32x1xf32>
    %308 = arith.divf %306, %307 : vector<32x1xf32>
    %309 = vector.broadcast %308 : vector<32x1xf32> to vector<32x256xf32>
    %310 = arith.subf %300, %309 : vector<32x256xf32>
    %311 = arith.mulf %310, %310 : vector<32x256xf32>
    %cst_175 = arith.constant dense<0.000000e+00> : vector<32xf32>
    %312 = vector.multi_reduction <add>, %311, %cst_175 [1] : vector<32x256xf32> to vector<32xf32>
    %313 = vector.shape_cast %312 : vector<32xf32> to vector<32x1xf32>
    %cst_176 = arith.constant 0.00392156886 : f32
    %314 = vector.broadcast %cst_176 : f32 to vector<32x1xf32>
    %315 = arith.mulf %313, %314 : vector<32x1xf32>
    %316 = math.sqrt %315 : vector<32x1xf32>
    %cst_177 = arith.constant 9.99999997E-7 : f32
    %317 = vector.broadcast %cst_177 : f32 to vector<32x1xf32>
    %318 = arith.addf %316, %317 : vector<32x1xf32>
    %319 = tpu.reciprocal %318 {approx = true} : vector<32x1xf32> -> vector<32x1xf32>
    %320 = vector.broadcast %319 : vector<32x1xf32> to vector<32x256xf32>
    %321 = arith.mulf %310, %320 : vector<32x256xf32>
    %322 = vector.shape_cast %302 : vector<256xf32> to vector<1x256xf32>
    %323 = vector.broadcast %322 : vector<1x256xf32> to vector<32x256xf32>
    %324 = arith.mulf %323, %321 : vector<32x256xf32>
    %325 = vector.shape_cast %304 : vector<256xf32> to vector<1x256xf32>
    %326 = vector.broadcast %325 : vector<1x256xf32> to vector<32x256xf32>
    %327 = arith.addf %324, %326 : vector<32x256xf32>
    %c0_178 = arith.constant 0 : index
    %c0_179 = arith.constant 0 : index
    %328 = vector.load %arg30[%c0_178, %c0_179] : memref<32x256xf32, #tpu.memory_space<vmem>>, vector<32x256xf32>
    tpu.vector_store %arg30[%c0_178, %c0_179], %327 {strides = array<i32>} : memref<32x256xf32, #tpu.memory_space<vmem>>, vector<32x256xf32>,
    %c0_180 = arith.constant 0 : index
    %c1_181 = arith.constant 1 : index
    %c0_182 = arith.constant 0 : index
    %c0_183 = arith.constant 0 : index
    %329 = vector.load %arg25[%c0_180, %c1_181, %c0_182, %c0_183] : memref<1x2x256x128xbf16, #tpu.memory_space<vmem>>, vector<1x1x256x128xbf16>
    %330 = vector.shape_cast %329 : vector<1x1x256x128xbf16> to vector<256x128xbf16>
    %cst_184 = arith.constant dense<0.000000e+00> : vector<8x128xf32>
    %331 = tpu.matmul %280, %330, %cst_184 {dimension_numbers = #tpu.dot_dimension_numbers<[1], [0], [0], [1], [0, 0, 1, 1], [], []>} : vector<8x256xbf16>, vector<256x128xbf16>, vector<8x128xf32> -> vector<8x128xf32>
    %c0_185 = arith.constant 0 : index
    %c1_186 = arith.constant 1 : index
    %c0_187 = arith.constant 0 : index
    %332 = vector.load %arg28[%c0_185, %c1_186, %c0_187] : memref<1x2x128xf32, #tpu.memory_space<vmem>>, vector<1x1x128xf32>
    %333 = vector.shape_cast %332 : vector<1x1x128xf32> to vector<128xf32>
    %334 = vector.shape_cast %333 : vector<128xf32> to vector<1x128xf32>
    %335 = vector.broadcast %334 : vector<1x128xf32> to vector<8x128xf32>
    %336 = arith.addf %331, %335 : vector<8x128xf32>
    %cst_188 = arith.constant 0.000000e+00 : f32
    %337 = vector.broadcast %cst_188 : f32 to vector<8x128xf32>
    %338 = arith.maximumf %336, %337 : vector<8x128xf32>
    %339 = arith.truncf %338 : vector<8x128xf32> to vector<8x128xbf16>
    %c0_189 = arith.constant 0 : index
    %c1_190 = arith.constant 1 : index
    %c0_191 = arith.constant 0 : index
    %c0_192 = arith.constant 0 : index
    %340 = vector.load %arg26[%c0_189, %c1_190, %c0_191, %c0_192] : memref<1x2x128x256xbf16, #tpu.memory_space<vmem>>, vector<1x1x128x256xbf16>
    %341 = vector.shape_cast %340 : vector<1x1x128x256xbf16> to vector<128x256xbf16>
    %cst_193 = arith.constant dense<0.000000e+00> : vector<8x256xf32>
    %342 = tpu.matmul %339, %341, %cst_193 {dimension_numbers = #tpu.dot_dimension_numbers<[1], [0], [0], [1], [0, 0, 1, 1], [], []>} : vector<8x128xbf16>, vector<128x256xbf16>, vector<8x256xf32> -> vector<8x256xf32>
    %c0_194 = arith.constant 0 : index
    %c9_195 = arith.constant 9 : index
    %c0_196 = arith.constant 0 : index
    %343 = vector.load %arg27[%c0_194, %c9_195, %c0_196] : memref<1x22x256xf32, #tpu.memory_space<vmem>>, vector<1x1x256xf32>
    %344 = vector.shape_cast %343 : vector<1x1x256xf32> to vector<256xf32>
    %345 = vector.shape_cast %344 : vector<256xf32> to vector<1x256xf32>
    %346 = vector.broadcast %345 : vector<1x256xf32> to vector<8x256xf32>
    %347 = arith.addf %342, %346 : vector<8x256xf32>
    %348 = arith.addf %278, %347 : vector<8x256xf32>
    %c0_197 = arith.constant 0 : index
    %c20 = arith.constant 20 : index
    %c0_198 = arith.constant 0 : index
    %349 = vector.load %arg27[%c0_197, %c20, %c0_198] : memref<1x22x256xf32, #tpu.memory_space<vmem>>, vector<1x1x256xf32>
    %350 = vector.shape_cast %349 : vector<1x1x256xf32> to vector<256xf32>
    %c0_199 = arith.constant 0 : index
    %c21 = arith.constant 21 : index
    %c0_200 = arith.constant 0 : index
    %351 = vector.load %arg27[%c0_199, %c21, %c0_200] : memref<1x22x256xf32, #tpu.memory_space<vmem>>, vector<1x1x256xf32>
    %352 = vector.shape_cast %351 : vector<1x1x256xf32> to vector<256xf32>
    %cst_201 = arith.constant dense<0.000000e+00> : vector<8xf32>
    %353 = vector.multi_reduction <add>, %348, %cst_201 [1] : vector<8x256xf32> to vector<8xf32>
    %354 = vector.shape_cast %353 : vector<8xf32> to vector<8x1xf32>
    %cst_202 = arith.constant 2.560000e+02 : f32
    %355 = vector.broadcast %cst_202 : f32 to vector<8x1xf32>
    %356 = arith.divf %354, %355 : vector<8x1xf32>
    %357 = vector.broadcast %356 : vector<8x1xf32> to vector<8x256xf32>
    %358 = arith.subf %348, %357 : vector<8x256xf32>
    %359 = arith.mulf %358, %358 : vector<8x256xf32>
    %cst_203 = arith.constant dense<0.000000e+00> : vector<8xf32>
    %360 = vector.multi_reduction <add>, %359, %cst_203 [1] : vector<8x256xf32> to vector<8xf32>
    %361 = vector.shape_cast %360 : vector<8xf32> to vector<8x1xf32>
    %cst_204 = arith.constant 0.00392156886 : f32
    %362 = vector.broadcast %cst_204 : f32 to vector<8x1xf32>
    %363 = arith.mulf %361, %362 : vector<8x1xf32>
    %364 = math.sqrt %363 : vector<8x1xf32>
    %cst_205 = arith.constant 9.99999997E-7 : f32
    %365 = vector.broadcast %cst_205 : f32 to vector<8x1xf32>
    %366 = arith.addf %364, %365 : vector<8x1xf32>
    %367 = tpu.reciprocal %366 {approx = true} : vector<8x1xf32> -> vector<8x1xf32>
    %368 = vector.broadcast %367 : vector<8x1xf32> to vector<8x256xf32>
    %369 = arith.mulf %358, %368 : vector<8x256xf32>
    %370 = vector.shape_cast %350 : vector<256xf32> to vector<1x256xf32>
    %371 = vector.broadcast %370 : vector<1x256xf32> to vector<8x256xf32>
    %372 = arith.mulf %371, %369 : vector<8x256xf32>
    %373 = vector.shape_cast %352 : vector<256xf32> to vector<1x256xf32>
    %374 = vector.broadcast %373 : vector<1x256xf32> to vector<8x256xf32>
    %375 = arith.addf %372, %374 : vector<8x256xf32>
    %c0_206 = arith.constant 0 : index
    %c0_207 = arith.constant 0 : index
    %376 = vector.load %arg31[%c0_206, %c0_207] : memref<8x256xf32, #tpu.memory_space<vmem>>, vector<8x256xf32>
    tpu.vector_store %arg31[%c0_206, %c0_207], %375 {strides = array<i32>} : memref<8x256xf32, #tpu.memory_space<vmem>>, vector<8x256xf32>,
    %c5_i32 = arith.constant 5 : i32
    %377 = arith.cmpi eq, %arg0, %c5_i32 : i32
    %378 = arith.extui %377 : i1 to i32
    %c0_i32_208 = arith.constant 0 : i32
    %379 = arith.cmpi ne, %378, %c0_i32_208 : i32
    scf.if %379 {
      %c0_209 = arith.constant 0 : index
      %c0_210 = arith.constant 0 : index
      %380 = vector.load %arg1[%c0_209, %c0_210] : memref<32x768xbf16, #tpu.memory_space<vmem>>, vector<32x768xbf16>
      %c0_211 = arith.constant 0 : index
      %c0_212 = arith.constant 0 : index
      %381 = vector.load %arg21[%c0_211, %c0_212] : memref<768x128xbf16, #tpu.memory_space<vmem>>, vector<768x128xbf16>
      %cst_213 = arith.constant dense<0.000000e+00> : vector<32x128xf32>
      %382 = tpu.matmul %380, %381, %cst_213 {dimension_numbers = #tpu.dot_dimension_numbers<[1], [0], [0], [1], [0, 0, 1, 1], [], []>} : vector<32x768xbf16>, vector<768x128xbf16>, vector<32x128xf32> -> vector<32x128xf32>
      %383 = arith.truncf %327 : vector<32x256xf32> to vector<32x256xbf16>
      %c0_214 = arith.constant 0 : index
      %c0_215 = arith.constant 0 : index
      %384 = vector.load %arg22[%c0_214, %c0_215] : memref<256x128xbf16, #tpu.memory_space<vmem>>, vector<256x128xbf16>
      %cst_216 = arith.constant dense<0.000000e+00> : vector<32x128xf32>
      %385 = tpu.matmul %383, %384, %cst_216 {dimension_numbers = #tpu.dot_dimension_numbers<[1], [0], [0], [1], [0, 0, 1, 1], [], []>} : vector<32x256xbf16>, vector<256x128xbf16>, vector<32x128xf32> -> vector<32x128xf32>
      %386 = arith.addf %382, %385 : vector<32x128xf32>
      %c0_217 = arith.constant 0 : index
      %c0_218 = arith.constant 0 : index
      %387 = vector.load %arg23[%c0_217, %c0_218] : memref<1x128xf32, #tpu.memory_space<vmem>>, vector<1x128xf32>
      %388 = vector.broadcast %387 : vector<1x128xf32> to vector<32x128xf32>
      %389 = arith.addf %386, %388 : vector<32x128xf32>
      %c0_219 = arith.constant 0 : index
      %c0_220 = arith.constant 0 : index
      %390 = vector.load %arg29[%c0_219, %c0_220] : memref<32x128xf32, #tpu.memory_space<vmem>>, vector<32x128xf32>
      tpu.vector_store %arg29[%c0_219, %c0_220], %389 {strides = array<i32>} : memref<32x128xf32, #tpu.memory_space<vmem>>, vector<32x128xf32>,
    } else {
    }
    return
  }
  func.func @transform_0(%arg0: i32) -> (i32, i32) {
    %c0_i32 = arith.constant 0 : i32
    %c0_i32_0 = arith.constant 0 : i32
    %c0_i32_1 = arith.constant 0 : i32
    return %c0_i32, %c0_i32_0 : i32, i32
  }
  func.func @transform_1(%arg0: i32) -> (i32, i32) {
    %c0_i32 = arith.constant 0 : i32
    %c0_i32_0 = arith.constant 0 : i32
    %c0_i32_1 = arith.constant 0 : i32
    return %c0_i32, %c0_i32_0 : i32, i32
  }
  func.func @transform_2(%arg0: i32) -> (i32, i32) {
    %c0_i32 = arith.constant 0 : i32
    %c0_i32_0 = arith.constant 0 : i32
    %c0_i32_1 = arith.constant 0 : i32
    return %c0_i32, %c0_i32_0 : i32, i32
  }
  func.func @transform_3(%arg0: i32) -> (i32, i32) {
    %c0_i32 = arith.constant 0 : i32
    %c0_i32_0 = arith.constant 0 : i32
    %c0_i32_1 = arith.constant 0 : i32
    return %c0_i32, %c0_i32_0 : i32, i32
  }
  func.func @transform_4(%arg0: i32) -> (i32, i32) {
    %c0_i32 = arith.constant 0 : i32
    %c0_i32_0 = arith.constant 0 : i32
    %c0_i32_1 = arith.constant 0 : i32
    return %c0_i32, %c0_i32_0 : i32, i32
  }
  func.func @transform_5(%arg0: i32) -> (i32, i32) {
    %c0_i32 = arith.constant 0 : i32
    %c0_i32_0 = arith.constant 0 : i32
    %c0_i32_1 = arith.constant 0 : i32
    return %c0_i32, %c0_i32_0 : i32, i32
  }
  func.func @transform_6(%arg0: i32) -> (i32, i32) {
    %c0_i32 = arith.constant 0 : i32
    %c0_i32_0 = arith.constant 0 : i32
    %c0_i32_1 = arith.constant 0 : i32
    return %c0_i32, %c0_i32_0 : i32, i32
  }
  func.func @transform_7(%arg0: i32) -> (i32, i32) {
    %c0_i32 = arith.constant 0 : i32
    %c0_i32_0 = arith.constant 0 : i32
    %c0_i32_1 = arith.constant 0 : i32
    return %c0_i32, %c0_i32_0 : i32, i32
  }
  func.func @transform_8(%arg0: i32) -> (i32, i32) {
    %c0_i32 = arith.constant 0 : i32
    %c0_i32_0 = arith.constant 0 : i32
    %c0_i32_1 = arith.constant 0 : i32
    return %c0_i32, %c0_i32_0 : i32, i32
  }
  func.func @transform_9(%arg0: i32) -> (i32, i32) {
    %c0_i32 = arith.constant 0 : i32
    %c0_i32_0 = arith.constant 0 : i32
    %c0_i32_1 = arith.constant 0 : i32
    return %c0_i32, %c0_i32_0 : i32, i32
  }
  func.func @transform_10(%arg0: i32) -> (i32, i32) {
    %c0_i32 = arith.constant 0 : i32
    %c0_i32_0 = arith.constant 0 : i32
    %c0_i32_1 = arith.constant 0 : i32
    return %c0_i32, %c0_i32_0 : i32, i32
  }
  func.func @transform_11(%arg0: i32) -> (i32, i32) {
    %c0_i32 = arith.constant 0 : i32
    %c0_i32_0 = arith.constant 0 : i32
    %c0_i32_1 = arith.constant 0 : i32
    return %c0_i32, %c0_i32_0 : i32, i32
  }
  func.func @transform_12(%arg0: i32) -> (i32, i32) {
    %c0_i32 = arith.constant 0 : i32
    %c0_i32_0 = arith.constant 0 : i32
    %c0_i32_1 = arith.constant 0 : i32
    return %c0_i32, %c0_i32_0 : i32, i32
  }
  func.func @transform_13(%arg0: i32) -> (i32, i32) {
    %c0_i32 = arith.constant 0 : i32
    %c0_i32_0 = arith.constant 0 : i32
    %c0_i32_1 = arith.constant 0 : i32
    return %c0_i32, %c0_i32_0 : i32, i32
  }
  func.func @transform_14(%arg0: i32) -> (i32, i32) {
    %c0_i32 = arith.constant 0 : i32
    %c0_i32_0 = arith.constant 0 : i32
    %c0_i32_1 = arith.constant 0 : i32
    return %c0_i32, %c0_i32_0 : i32, i32
  }
  func.func @transform_15(%arg0: i32) -> (i32, i32) {
    %c0_i32 = arith.constant 0 : i32
    %c0_i32_0 = arith.constant 0 : i32
    %c0_i32_1 = arith.constant 0 : i32
    return %c0_i32, %c0_i32_0 : i32, i32
  }
  func.func @transform_16(%arg0: i32) -> (i32, i32) {
    %c0_i32 = arith.constant 0 : i32
    %c0_i32_0 = arith.constant 0 : i32
    %c0_i32_1 = arith.constant 0 : i32
    return %c0_i32, %c0_i32_0 : i32, i32
  }
  func.func @transform_17(%arg0: i32) -> (i32, i32) {
    %c0_i32 = arith.constant 0 : i32
    %c0_i32_0 = arith.constant 0 : i32
    %c0_i32_1 = arith.constant 0 : i32
    return %c0_i32, %c0_i32_0 : i32, i32
  }
  func.func @transform_18(%arg0: i32) -> (i32, i32) {
    %c0_i32 = arith.constant 0 : i32
    %c0_i32_0 = arith.constant 0 : i32
    %c0_i32_1 = arith.constant 0 : i32
    return %c0_i32, %c0_i32_0 : i32, i32
  }
  func.func @transform_19(%arg0: i32) -> (i32, i32) {
    %c0_i32 = arith.constant 0 : i32
    %c0_i32_0 = arith.constant 0 : i32
    %c0_i32_1 = arith.constant 0 : i32
    return %c0_i32, %c0_i32_0 : i32, i32
  }
  func.func @transform_20(%arg0: i32) -> (i32, i32) {
    %c0_i32 = arith.constant 0 : i32
    %c0_i32_0 = arith.constant 0 : i32
    %c0_i32_1 = arith.constant 0 : i32
    return %c0_i32, %c0_i32_0 : i32, i32
  }
  func.func @transform_21(%arg0: i32) -> (i32, i32) {
    %c0_i32 = arith.constant 0 : i32
    %c0_i32_0 = arith.constant 0 : i32
    %c0_i32_1 = arith.constant 0 : i32
    return %c0_i32, %c0_i32_0 : i32, i32
  }
  func.func @transform_22(%arg0: i32) -> (i32, i32) {
    %c0_i32 = arith.constant 0 : i32
    %c0_i32_0 = arith.constant 0 : i32
    %c0_i32_1 = arith.constant 0 : i32
    return %c0_i32, %c0_i32_0 : i32, i32
  }
  func.func @transform_23(%arg0: i32) -> (i32, i32, i32, i32) {
    %c0_i32 = arith.constant 0 : i32
    %c0_i32_0 = arith.constant 0 : i32
    %c0_i32_1 = arith.constant 0 : i32
    %c0_i32_2 = arith.constant 0 : i32
    return %arg0, %c0_i32, %c0_i32_0, %c0_i32_1 : i32, i32, i32, i32
  }
  func.func @transform_24(%arg0: i32) -> (i32, i32, i32, i32) {
    %c0_i32 = arith.constant 0 : i32
    %c0_i32_0 = arith.constant 0 : i32
    %c0_i32_1 = arith.constant 0 : i32
    %c0_i32_2 = arith.constant 0 : i32
    return %arg0, %c0_i32, %c0_i32_0, %c0_i32_1 : i32, i32, i32, i32
  }
  func.func @transform_25(%arg0: i32) -> (i32, i32, i32, i32) {
    %c0_i32 = arith.constant 0 : i32
    %c0_i32_0 = arith.constant 0 : i32
    %c0_i32_1 = arith.constant 0 : i32
    %c0_i32_2 = arith.constant 0 : i32
    return %arg0, %c0_i32, %c0_i32_0, %c0_i32_1 : i32, i32, i32, i32
  }
  func.func @transform_26(%arg0: i32) -> (i32, i32, i32) {
    %c0_i32 = arith.constant 0 : i32
    %c0_i32_0 = arith.constant 0 : i32
    %c0_i32_1 = arith.constant 0 : i32
    return %arg0, %c0_i32, %c0_i32_0 : i32, i32, i32
  }
  func.func @transform_27(%arg0: i32) -> (i32, i32, i32) {
    %c0_i32 = arith.constant 0 : i32
    %c0_i32_0 = arith.constant 0 : i32
    %c0_i32_1 = arith.constant 0 : i32
    return %arg0, %c0_i32, %c0_i32_0 : i32, i32, i32
  }
  func.func @transform_28(%arg0: i32) -> (i32, i32) {
    %c0_i32 = arith.constant 0 : i32
    %c0_i32_0 = arith.constant 0 : i32
    %c0_i32_1 = arith.constant 0 : i32
    return %c0_i32, %c0_i32_0 : i32, i32
  }
}

</mosaic_0001>

<bundles_post_ra>
// kernel: mul.9
= control target key start
LH: loop header
LB: loop body
LE: loop exit
PB: predicated region body
PF: predicated region fallthrough
CT: control target
= control target key end

     0   :  { %s259_s10 = smov 124   ;;  %s260_s11 = smov 116   ;;  %vm3_vm0 = vcmask 31744   ;;  %vm9_vm1 = vcmask 1048544   ;;  %vm15_vm2 = vcmask 1015744   ;;  %vm21_vm3 = vcmask 982944   ;;  %s399_s0 = inlined_call_operand.vmem [shape: f32[2,16,4], index: 0, kind: input, shape index: {}]   ;;  %s400_s1 = inlined_call_operand.vmem [shape: f32[128], index: 1, kind: output, shape index: {}]  }
   0x1   :  { %v197_v0 = vld [vmem:[%s399_s0 + $0x1f] sm:$0x1]   ;;  %v199_v1 = vld [vmem:[%s399_s0 + $0x1d] sm:$0x1]   ;;  %v198_v2 = vld [vmem:[%s399_s0 + $0x1e] sm:$0x1]  }
   0x2   :  { %7 = vrot.lane.b32.xlu0 %v197_v0, %s259_s10  ;;  %19 = vrot.lane.b32.xlu1 %v199_v1, %s260_s11  ;;  %v200_v3 = vld [vmem:[%s399_s0 + $0x1c] sm:$0x1]   ;;  %s261_s16 = smov 120   ;;  %s262_s17 = smov 112   ;;  %v201_v4 = vld [vmem:[%s399_s0 + $0x1b] sm:$0x1]  }
   0x3   :  { %v202_v5 = vld [vmem:[%s399_s0 + $0x1a] sm:$0x1]   ;;  %s263_s22 = smov 108   ;;  %s264_s23 = smov 104   ;;  %v203_v6 = vld [vmem:[%s399_s0 + $0x19] sm:$0x1]  }
   0x4   :  { %v204_v7 = vld [vmem:[%s399_s0 + $0x18] sm:$0x1]   ;;  %s265_s28 = smov 100   ;;  %s266_s29 = smov 96   ;;  %v205_v8 = vld [vmem:[%s399_s0 + $0x17] sm:$0x1]  }
   0x5   :  { %v206_v9 = vld [vmem:[%s399_s0 + $0x16] sm:$0x1]   ;;  %v2_v10 = vld [vmem:[%s399_s0] sm:$0x1]   ;;  %s267_s7 = smov 92   ;;  %s268_s8 = smov 88  }
   0x6   :  { %13 = vrot.lane.b32.xlu0 %v198_v2, %s261_s16  ;;  %25 = vrot.lane.b32.xlu1 %v200_v3, %s262_s17  ;;  %4 = vst.msk [vmem:[#allocation0] sm:$0x1] %vm3_vm0, %v2_v10   ;;  %v207_v11 = vld [vmem:[%s399_s0 + $0x15] sm:$0x1]   ;;  %v208_v12 = vld [vmem:[%s399_s0 + $0x14] sm:$0x1]  }
   0x7   :  { %s269_s13 = smov 84   ;;  %s270_s14 = smov 80   ;;  %v209_v13 = vld [vmem:[%s399_s0 + $0x13] sm:$0x1]   ;;  %v210_v14 = vld [vmem:[%s399_s0 + $0x12] sm:$0x1]  }
   0x8   :  { %s271_s19 = smov 76   ;;  %s272_s20 = smov 72   ;;  %v211_v15 = vld [vmem:[%s399_s0 + $0x11] sm:$0x1]   ;;  %v212_v16 = vld [vmem:[%s399_s0 + $0x10] sm:$0x1]  }
   0x9   :  { %s273_s25 = smov 68   ;;  %s274_s26 = smov 64   ;;  %v213_v17 = vld [vmem:[%s399_s0 + $0xf] sm:$0x1]   ;;  %v214_v18 = vld [vmem:[%s399_s0 + $0xe] sm:$0x1]  }
   0xa   :  { %31 = vrot.lane.b32.xlu0 %v201_v4, %s263_s22  ;;  %37 = vrot.lane.b32.xlu1 %v202_v5, %s264_s23  ;;  %s275_s2 = smov 60   ;;  %s276_s3 = smov 56   ;;  %v215_v19 = vld [vmem:[%s399_s0 + $0xd] sm:$0x1]   ;;  %v216_v20 = vld [vmem:[%s399_s0 + $0xc] sm:$0x1]  }
   0xb   :  { %s278_s9 = smov 48   ;;  %v217_v21 = vld [vmem:[%s399_s0 + $0xb] sm:$0x1]   ;;  %v218_v22 = vld [vmem:[%s399_s0 + $0xa] sm:$0x1]   ;;  %s280_s15 = smov 40  }
   0xc   :  { %v219_v23 = vld [vmem:[%s399_s0 + $0x9] sm:$0x1]   ;;  %v220_v24 = vld [vmem:[%s399_s0 + $0x8] sm:$0x1]   ;;  %s282_s21 = smov 32   ;;  %s284_s27 = smov 24  }
   0xd   :  { %v221_v25 = vld [vmem:[%s399_s0 + $0x7] sm:$0x1]   ;;  %v222_v26 = vld [vmem:[%s399_s0 + $0x6] sm:$0x1]   ;;  %v223_v27 = vld [vmem:[%s399_s0 + $0x5] sm:$0x1]  }
   0xe   :  { %43 = vrot.lane.b32.xlu0 %v203_v6, %s265_s28  ;;  %49 = vrot.lane.b32.xlu1 %v204_v7, %s266_s29  ;;  %v224_v28 = vld [vmem:[%s399_s0 + $0x4] sm:$0x1]   ;;  %s286_s4 = smov 16   ;;  %v225_v29 = vld [vmem:[%s399_s0 + $0x3] sm:$0x1]   ;;  %s288_s10 = smov 8  }
   0xf   :  { %v226_v30 = vld [vmem:[%s399_s0 + $0x2] sm:$0x1]   ;;  %v227_v31 = vld [vmem:[%s399_s0 + $0x1] sm:$0x1]   ;;  %s289_s0 = smov 4   ;;  %vm27_vm4 = vcmask 950144  }
  0x10   :  { %vm33_vm5 = vcmask 917344   ;;  %vm39_vm6 = vcmask 884544   ;;  %vm45_vm7 = vcmask 851744   ;;  %vm51_vm8 = vcmask 818944  }
  0x11   :  { %vm57_vm9 = vcmask 786144   ;;  %vm63_vm10 = vcmask 753344   ;;  %vm69_vm11 = vcmask 720544   ;;  %vm75_vm12 = vcmask 687744  }
  0x12   :  { %55 = vrot.lane.b32.xlu0 %v205_v8, %s267_s7  ;;  %61 = vrot.lane.b32.xlu1 %v206_v9, %s268_s8  ;;  %s277_s8 = smov 52   ;;  %vm81_vm13 = vcmask 654944   ;;  %vm87_vm14 = vcmask 622144   ;;  %vm93_vm15 = vcmask 589344   ;;  %vm99_vm0 = vcmask 556544  }
  0x16   :  { %67 = vrot.lane.b32.xlu0 %v207_v11, %s269_s13  ;;  %73 = vrot.lane.b32.xlu1 %v208_v12, %s270_s14  ;;  %s279_s14 = smov 44  }
  0x1a   :  { %79 = vrot.lane.b32.xlu0 %v209_v13, %s271_s19  ;;  %85 = vrot.lane.b32.xlu1 %v210_v14, %s272_s20  ;;  %s281_s20 = smov 36  }
  0x1e   :  { %91 = vrot.lane.b32.xlu0 %v211_v15, %s273_s25  ;;  %97 = vrot.lane.b32.xlu1 %v212_v16, %s274_s26  ;;  %s283_s26 = smov 28  }
  0x22   :  { %103 = vrot.lane.b32.xlu0 %v213_v17, %s275_s2  ;;  %109 = vrot.lane.b32.xlu1 %v214_v18, %s276_s3  ;;  %s285_s3 = smov 20  }
  0x26   :  { %115 = vrot.lane.b32.xlu0 %v215_v19, %s277_s8  ;;  %121 = vrot.lane.b32.xlu1 %v216_v20, %s278_s9  ;;  %s287_s9 = smov 12  }
  0x2a   :  { %127 = vrot.lane.b32.xlu0 %v217_v21, %s279_s14  ;;  %133 = vrot.lane.b32.xlu1 %v218_v22, %s280_s15 }
  0x2e   :  { %139 = vrot.lane.b32.xlu0 %v219_v23, %s281_s20  ;;  %145 = vrot.lane.b32.xlu1 %v220_v24, %s282_s21 }
  0x32   :  { %151 = vrot.lane.b32.xlu0 %v221_v25, %s283_s26  ;;  %157 = vrot.lane.b32.xlu1 %v222_v26, %s284_s27 }
  0x36   :  { %163 = vrot.lane.b32.xlu0 %v223_v27, %s285_s3  ;;  %169 = vrot.lane.b32.xlu1 %v224_v28, %s286_s4 }
  0x3a   :  { %175 = vrot.lane.b32.xlu0 %v225_v29, %s287_s9  ;;  %181 = vrot.lane.b32.xlu1 %v226_v30, %s288_s10 }
  0x3e   :  { %187 = vrot.lane.b32.xlu0 %v227_v31, %s289_s0 }
  0x74   :  { %v8_v32 = vpop.permute.xlu0 %7   ;;  %v20_v33 = vpop.permute.xlu1 %19  }
  0x75   :  { %10 = vst.msk [vmem:[#allocation0] sm:$0x1] %vm9_vm1, %v8_v32   ;;  %vm105_vm1 = vcmask 523744  }
  0x78   :  { %v14_v34 = vpop.permute.xlu0 %13   ;;  %v26_v35 = vpop.permute.xlu1 %25  }
  0x79   :  { %16 = vst.msk [vmem:[#allocation0] sm:$0x1] %vm15_vm2, %v14_v34   ;;  %vm111_vm2 = vcmask 490944  }
  0x7a   :  { %22 = vst.msk [vmem:[#allocation0] sm:$0x1] %vm21_vm3, %v20_v33   ;;  %vm117_vm3 = vcmask 458144  }
  0x7b   :  { %28 = vst.msk [vmem:[#allocation0] sm:$0x1] %vm27_vm4, %v26_v35   ;;  %vm123_vm4 = vcmask 425344  }
  0x7c   :  { %v32_v36 = vpop.permute.xlu0 %31   ;;  %v38_v37 = vpop.permute.xlu1 %37  }
  0x7d   :  { %34 = vst.msk [vmem:[#allocation0] sm:$0x1] %vm33_vm5, %v32_v36   ;;  %vm129_vm5 = vcmask 392544  }
  0x7e   :  { %40 = vst.msk [vmem:[#allocation0] sm:$0x1] %vm39_vm6, %v38_v37   ;;  %vm135_vm6 = vcmask 359744  }
  0x80   :  { %v44_v38 = vpop.permute.xlu0 %43   ;;  %v50_v39 = vpop.permute.xlu1 %49  }
  0x81   :  { %46 = vst.msk [vmem:[#allocation0] sm:$0x1] %vm45_vm7, %v44_v38   ;;  %vm141_vm7 = vcmask 326944  }
  0x82   :  { %52 = vst.msk [vmem:[#allocation0] sm:$0x1] %vm51_vm8, %v50_v39   ;;  %vm147_vm8 = vcmask 294144  }
  0x84   :  { %v56_v40 = vpop.permute.xlu0 %55   ;;  %v62_v41 = vpop.permute.xlu1 %61  }
  0x85   :  { %58 = vst.msk [vmem:[#allocation0] sm:$0x1] %vm57_vm9, %v56_v40   ;;  %vm153_vm9 = vcmask 261344  }
  0x86   :  { %64 = vst.msk [vmem:[#allocation0] sm:$0x1] %vm63_vm10, %v62_v41   ;;  %vm159_vm10 = vcmask 228544  }
  0x88   :  { %v68_v42 = vpop.permute.xlu0 %67   ;;  %v74_v43 = vpop.permute.xlu1 %73  }
  0x89   :  { %70 = vst.msk [vmem:[#allocation0] sm:$0x1] %vm69_vm11, %v68_v42   ;;  %vm165_vm11 = vcmask 195744  }
  0x8a   :  { %76 = vst.msk [vmem:[#allocation0] sm:$0x1] %vm75_vm12, %v74_v43   ;;  %vm171_vm12 = vcmask 162944  }
  0x8c   :  { %v80_v44 = vpop.permute.xlu0 %79   ;;  %v86_v45 = vpop.permute.xlu1 %85  }
  0x8d   :  { %82 = vst.msk [vmem:[#allocation0] sm:$0x1] %vm81_vm13, %v80_v44   ;;  %vm177_vm13 = vcmask 130144  }
  0x8e   :  { %88 = vst.msk [vmem:[#allocation0] sm:$0x1] %vm87_vm14, %v86_v45   ;;  %vm183_vm14 = vcmask 97344  }
  0x90   :  { %v92_v46 = vpop.permute.xlu0 %91   ;;  %v98_v47 = vpop.permute.xlu1 %97  }
  0x91   :  { %94 = vst.msk [vmem:[#allocation0] sm:$0x1] %vm93_vm15, %v92_v46   ;;  %vm189_vm15 = vcmask 64544  }
  0x92   :  { %100 = vst.msk [vmem:[#allocation0] sm:$0x1] %vm99_vm0, %v98_v47  }
  0x94   :  { %v104_v48 = vpop.permute.xlu0 %103   ;;  %v110_v49 = vpop.permute.xlu1 %109  }
  0x95   :  { %106 = vst.msk [vmem:[#allocation0] sm:$0x1] %vm105_vm1, %v104_v48  }
  0x96   :  { %112 = vst.msk [vmem:[#allocation0] sm:$0x1] %vm111_vm2, %v110_v49  }
  0x98   :  { %v116_v50 = vpop.permute.xlu0 %115   ;;  %v122_v51 = vpop.permute.xlu1 %121  }
  0x99   :  { %118 = vst.msk [vmem:[#allocation0] sm:$0x1] %vm117_vm3, %v116_v50  }
  0x9a   :  { %124 = vst.msk [vmem:[#allocation0] sm:$0x1] %vm123_vm4, %v122_v51  }
  0x9c   :  { %v128_v52 = vpop.permute.xlu0 %127   ;;  %v134_v53 = vpop.permute.xlu1 %133  }
  0x9d   :  { %130 = vst.msk [vmem:[#allocation0] sm:$0x1] %vm129_vm5, %v128_v52  }
  0x9e   :  { %136 = vst.msk [vmem:[#allocation0] sm:$0x1] %vm135_vm6, %v134_v53  }
  0xa0   :  { %v140_v54 = vpop.permute.xlu0 %139   ;;  %v146_v55 = vpop.permute.xlu1 %145  }
  0xa1   :  { %142 = vst.msk [vmem:[#allocation0] sm:$0x1] %vm141_vm7, %v140_v54  }
  0xa2   :  { %148 = vst.msk [vmem:[#allocation0] sm:$0x1] %vm147_vm8, %v146_v55  }
  0xa4   :  { %v152_v56 = vpop.permute.xlu0 %151   ;;  %v158_v57 = vpop.permute.xlu1 %157  }
  0xa5   :  { %154 = vst.msk [vmem:[#allocation0] sm:$0x1] %vm153_vm9, %v152_v56  }
  0xa6   :  { %160 = vst.msk [vmem:[#allocation0] sm:$0x1] %vm159_vm10, %v158_v57  }
  0xa8   :  { %v164_v58 = vpop.permute.xlu0 %163   ;;  %v170_v59 = vpop.permute.xlu1 %169  }
  0xa9   :  { %166 = vst.msk [vmem:[#allocation0] sm:$0x1] %vm165_vm11, %v164_v58  }
  0xaa   :  { %172 = vst.msk [vmem:[#allocation0] sm:$0x1] %vm171_vm12, %v170_v59  }
  0xac   :  { %v176_v60 = vpop.permute.xlu0 %175   ;;  %v182_v61 = vpop.permute.xlu1 %181  }
  0xad   :  { %178 = vst.msk [vmem:[#allocation0] sm:$0x1] %vm177_vm13, %v176_v60  }
  0xae   :  { %184 = vst.msk [vmem:[#allocation0] sm:$0x1] %vm183_vm14, %v182_v61  }
  0xb0   :  { %v188_v62 = vpop.permute.xlu0 %187  }
  0xb1   :  { %190 = vst.msk [vmem:[#allocation0] sm:$0x1] %vm189_vm15, %v188_v62  }
  0xb8   :  { %v194_v63 = vld [vmem:[#allocation0] sm:$0x1] }
  0xb9   :  { %196 = vst [vmem:[%s400_s1] sm:$0x1] %v194_v63 }

// kernel: custom-call.4
= control target key start
LH: loop header
LB: loop body
LE: loop exit
PB: predicated region body
PF: predicated region fallthrough
CT: control target
= control target key end

     0   :  { %s6_s0 = inlined_call_operand.vmem [shape: s32[15,2,13], index: 0, kind: output, shape index: {}]  }

// kernel: mmner_forward.1
= control target key start
LH: loop header
LB: loop body
LE: loop exit
PB: predicated region body
PF: predicated region fallthrough
CT: control target
= control target key end

     0   :  { %s19676_s0 = inlined_call_operand.vmem [shape: bf16[32,768], index: 0, kind: input, shape index: {}]   ;;  %s19677_s1 = inlined_call_operand.vmem [shape: bf16[8,2048], index: 1, kind: input, shape index: {}]   ;;  %s19678_s2 = inlined_call_operand.vmem [shape: f32[32,256], index: 2, kind: input, shape index: {}]   ;;  %s19679_s3 = inlined_call_operand.hbm [shape: f32[8,64], index: 3, kind: input, shape index: {}]   ;;  %s19680_s4 = inlined_call_operand.vmem [shape: bf16[32,128], index: 4, kind: input, shape index: {}]   ;;  %s19681_s5 = inlined_call_operand.vmem [shape: bf16[8,128], index: 5, kind: input, shape index: {}]   ;;  %s19682_s6 = inlined_call_operand.hbm [shape: bf16[256,32], index: 6, kind: input, shape index: {}]   ;;  %s19683_s7 = inlined_call_operand.vmem [shape: bf16[256,256], index: 7, kind: input, shape index: {}]   ;;  %s19684_s8 = inlined_call_operand.vmem [shape: bf16[256,256], index: 8, kind: input, shape index: {}]   ;;  %s19685_s9 = inlined_call_operand.hbm [shape: bf16[64,8], index: 9, kind: input, shape index: {}]   ;;  %s19686_s10 = inlined_call_operand.vmem [shape: bf16[64,256], index: 10, kind: input, shape index: {}]   ;;  %s19687_s11 = inlined_call_operand.hbm [shape: bf16[64,64], index: 11, kind: input, shape index: {}]   ;;  %s19688_s12 = inlined_call_operand.hbm [shape: bf16[128,32], index: 12, kind: input, shape index: {}]   ;;  %s19689_s13 = inlined_call_operand.hbm [shape: bf16[128,8], index: 13, kind: input, shape index: {}]   ;;  %s19690_s14 = inlined_call_operand.hbm [shape: bf16[768,256], index: 14, kind: input, shape index: {}]   ;;  %s19691_s15 = inlined_call_operand.hbm [shape: f32[1,256], index: 15, kind: input, shape index: {}]   ;;  %s19692_s16 = inlined_call_operand.hbm [shape: bf16[2048,256], index: 16, kind: input, shape index: {}]   ;;  %s19693_s17 = inlined_call_operand.hbm [shape: f32[1,256], index: 17, kind: input, shape index: {}]   ;;  %s19694_s18 = inlined_call_operand.hbm [shape: bf16[256,256], index: 18, kind: input, shape index: {}]   ;;  %s19695_s19 = inlined_call_operand.hbm [shape: f32[1,256], index: 19, kind: input, shape index: {}]   ;;  %s19696_s20 = inlined_call_operand.hbm [shape: bf16[768,128], index: 20, kind: input, shape index: {}]   ;;  %s19697_s21 = inlined_call_operand.hbm [shape: bf16[256,128], index: 21, kind: input, shape index: {}]   ;;  %s19698_s22 = inlined_call_operand.hbm [shape: f32[1,128], index: 22, kind: input, shape index: {}]   ;;  %s19699_s23 = inlined_call_operand.hbm [shape: bf16[6,10,256,256], index: 23, kind: input, shape index: {}]   ;;  %s19700_s24 = inlined_call_operand.hbm [shape: bf16[6,2,256,128], index: 24, kind: input, shape index: {}]   ;;  %s19701_s25 = inlined_call_operand.hbm [shape: bf16[6,2,128,256], index: 25, kind: input, shape index: {}]   ;;  %s19702_s26 = inlined_call_operand.hbm [shape: f32[6,22,256], index: 26, kind: input, shape index: {}]   ;;  %s19703_s27 = inlined_call_operand.hbm [shape: f32[6,2,128], index: 27, kind: input, shape index: {}]   ;;  %s19704_s28 = inlined_call_operand.vmem [shape: f32[32,128], index: 28, kind: output, shape index: {}]  }
   0x1   :  { %19785 = sst [smem:[#allocation70_spill]] %s19676_s0 }
   0x2   :  { %19786 = sst [smem:[#allocation71_spill]] %s19677_s1 }
   0x3   :  { %19787 = sst [smem:[#allocation72_spill]] %s19678_s2 }
   0x4   :  { %19788 = sst [smem:[#allocation73_spill]] %s19679_s3 }
   0x5   :  { %19789 = sst [smem:[#allocation74_spill]] %s19680_s4 }
   0x6   :  { %19790 = sst [smem:[#allocation75_spill]] %s19681_s5 }
   0x7   :  { %19791 = sst [smem:[#allocation76_spill]] %s19682_s6 }
   0x8   :  { %19792 = sst [smem:[#allocation77_spill]] %s19683_s7 }
   0x9   :  { %19793 = sst [smem:[#allocation78_spill]] %s19684_s8 }
   0xa   :  { %19794 = sst [smem:[#allocation79_spill]] %s19685_s9 }
   0xb   :  { %19795 = sst [smem:[#allocation80_spill]] %s19686_s10 }
   0xc   :  { %19796 = sst [smem:[#allocation81_spill]] %s19687_s11 }
   0xd   :  { %19797 = sst [smem:[#allocation82_spill]] %s19688_s12 }
   0xe   :  { %19798 = sst [smem:[#allocation83_spill]] %s19689_s13 }
   0xf   :  { %19799 = sst [smem:[#allocation84_spill]] %s19690_s14 }
  0x10   :  { %19800 = sst [smem:[#allocation85_spill]] %s19691_s15 }
  0x11   :  { %19801 = sst [smem:[#allocation86_spill]] %s19692_s16 }
  0x12   :  { %19802 = sst [smem:[#allocation87_spill]] %s19693_s17 }
  0x13   :  { %19803 = sst [smem:[#allocation88_spill]] %s19694_s18 }
  0x14   :  { %19804 = sst [smem:[#allocation89_spill]] %s19695_s19 }
  0x15   :  { %19805 = sst [smem:[#allocation90_spill]] %s19696_s20 }
  0x16   :  { %19806 = sst [smem:[#allocation91_spill]] %s19697_s21 }
  0x17   :  { %19807 = sst [smem:[#allocation92_spill]] %s19698_s22 }
  0x18   :  { %19808 = sst [smem:[#allocation93_spill]] %s19699_s23 }
  0x19   :  { %19809 = sst [smem:[#allocation94_spill]] %s19701_s25 }
  0x1a   :  { %19810 = sst [smem:[#allocation95_spill]] %s19702_s26 }
  0x1b   :  { %19811 = sst [smem:[#allocation96_spill]] %s19703_s27 }
  0x1c   :  { %19812 = sst [smem:[#allocation97_spill]] %s19704_s28 }
  0x1d   :  { %33 = vsyncpa [#allocation5], 0 }
  0x1e   :  { %34 = vsyncpa [#allocation7], 0 }
  0x1f   :  { %35 = vsyncpa [#allocation10], 0 }
  0x20   :  { %36 = vsyncpa [#allocation13], 0 }
  0x21   :  { %37 = vsyncpa [#allocation16], 0 }
  0x22   :  { %38 = vsyncpa [#allocation19], 0 }
  0x23   :  { %39 = vsyncpa [#allocation22], 0 }
  0x24   :  { %40 = vsyncpa [#allocation25], 0 }
  0x25   :  { %41 = vsyncpa [#allocation28], 0 }
  0x26   :  { %43 = vsyncpa [#allocation28 + $0x1], 0 }
  0x27   :  { %44 = vsyncpa [#allocation31], 0 }
  0x28   :  { %46 = vsyncpa [#allocation31 + $0x1], 0 }
  0x29   :  { %47 = vsyncpa [#allocation34], 0 }
  0x2a   :  { %49 = vsyncpa [#allocation34 + $0x1], 0  ;;  %s17014_s8 = smov 0   ;;  %s17016_s5 = smov 0  }
  0x2b   :  { %s17018_s9 = smov 0   ;;  %s17020_s30 = smov 0  }
  0x2c LB: > { %19813 = sst [smem:[#allocation46_spill]] %s16830_s5  ;;  %s16840_s3 = smov [#allocation6]   ;;  %s16838_s30 = sphi %s17020_s30, %s19947_s30   ;;  %s16834_s9 = sphi %s17018_s9, %s19950_s9   ;;  %s16830_s5 = sphi %s17016_s5, %s19949_s5   ;;  %s16826_s8 = sphi %s17014_s8, %s19948_s8  }
  0x2d   : > { %19814 = sst [smem:[#allocation47_spill]] %s16834_s9  ;;  %s732_s6 = sshll.u32 %s16840_s3, 4  ;;  %s17041_s6 = int_to_ptr.vmem [resolvable:$true] %s732_s6 }
  0x2e   : > { %s17035_s10 = sadd.s32 4294967295, %s16838_s30   ;;  %p12355_p0 = scmp.ge.s32.totalorder %s16838_s30, 1 }
  0x2f   : > { %p19728_p1 = scmp.eq.s32.totalorder %s17035_s10, 0  ;;  %p694_p2 = scmp.lt.s32.totalorder %s16838_s30, 7 }
  0x30   : > { %s16841_s11 = smov [#allocation9]   ;;  %s16842_s7 = smov [#allocation12]  }
  0x31   : > { %p17043_p4 = pnand %p12355_p0, %p694_p2  ;;  %s767_s29 = sshll.u32 %s16841_s11, 4  ;;  %s17055_s29 = int_to_ptr.vmem [resolvable:$true] %s767_s29 }
  0x32   : > { %s793_s12 = sshll.u32 %s16842_s7, 4  ;;  %s19818_s3 = sld [smem:[#allocation76_spill]]  ;;  %s17057_s12 = int_to_ptr.vmem [resolvable:$true] %s793_s12 }
  0x33   : > { %s19815_s0 = scalar_select %p17043_p4, 1, 0 }
  0x34   : > { %p14283_p5 = pneg %p17043_p4 }
  0x35   : > { %19816 = sst [smem:[#allocation48_spill]] %s19815_s0 }
  0x36   : > { %p17051_p6 = pnand %p14283_p5, %p19728_p1 }
  0x38   : > { %s19817_s2 = scalar_select %p17051_p6, 1, 0 }
  0x39   : > { %s16194_s28 = scalar_lea.hbm %s19818_s3, 2048  ;;  %p17067_p8 = pneg %p17051_p6 }
  0x3a   : > { %p16195_p7 = scmp.ne.s32.totalorder %s19818_s3, %s16194_s28  ;;  %p16201_p11 = scmp.lt.u32.totalorder %s16194_s28, %s19818_s3 }
  0x3b   : > { %s19819_s11 = scalar_select %p17067_p8, 1, 0 }
  0x3c   : > { %p16197_p9 = pnand %p17067_p8, %p16195_p7 }
  0x3e   : > { %p16198_p10 = pneg %p16197_p9 }
  0x40   : > { %p16203_p12 = pnand %p16201_p11, %p16198_p10 }
  0x42   : > { %16206 = shalt.err (!%p16203_p12)
}
  0x43   : > { %s16207_s27 = scalar_lea.vmem %s17041_s6, 2048  ;;  %p16215_p5 = scmp.lt.s32.totalorder %s17041_s6, %s17041_s6 }
  0x44   : > { %p16208_p13 = scmp.ne.s32.totalorder %s17041_s6, %s16207_s27  ;;  %p16216_p3 = scmp.lt.s32.totalorder %s16207_s27, %s16207_s27 }
  0x46   : > { %p16210_p0 = pnand %p16208_p13, %p17067_p8  ;;  %p16217_p7 = por %p16216_p3, %p16215_p5 }
  0x48   : > { %p16211_p2 = pneg %p16210_p0 }
  0x4a   : > { %p16218_p9 = pnand %p16217_p7, %p16211_p2 }
  0x4c   : > { %16221 = shalt.err (!%p16218_p9)
}
  0x4d   : > { %s19730_s0 = smov 64   ;;  %s19732_s26 = smov 4  }
  0x4e   : > { %14289 = dma.hbm_to_vmem [thread:$0]  (!%p17051_p6), %s19818_s3, 2048, %s17041_s6, [#allocation7], %s19730_s0, %s19730_s0, %s19732_s26  }
  0x4f   : > { %s19820_s22 = sld [smem:[#allocation81_spill]] }
  0x55   : > { %s16222_s27 = scalar_lea.hbm %s19820_s22, 512 }
  0x56   : > { %p16223_p3 = scmp.ne.s32.totalorder %s19820_s22, %s16222_s27  ;;  %p16229_p12 = scmp.lt.u32.totalorder %s16222_s27, %s19820_s22 }
  0x58   : > { %p16225_p10 = pnand %p16223_p3, %p17067_p8 }
  0x5a   : > { %p16226_p11 = pneg %p16225_p10 }
  0x5c   : > { %p16231_p13 = pnand %p16229_p12, %p16226_p11 }
  0x5e   : > { %16234 = shalt.err (!%p16231_p13)
}
  0x5f   : > { %s16235_s6 = scalar_lea.vmem %s17055_s29, 512  ;;  %p16243_p7 = scmp.lt.s32.totalorder %s17055_s29, %s17055_s29 }
  0x60   : > { %p16236_p0 = scmp.ne.s32.totalorder %s17055_s29, %s16235_s6  ;;  %p16244_p9 = scmp.lt.s32.totalorder %s16235_s6, %s16235_s6 }
  0x62   : > { %p16238_p2 = pnand %p16236_p0, %p17067_p8  ;;  %p16245_p3 = por %p16244_p9, %p16243_p7 }
  0x64   : > { %p16239_p5 = pneg %p16238_p2 }
  0x66   : > { %p16246_p10 = pnand %p16245_p3, %p16239_p5 }
  0x68   : > { %16249 = shalt.err (!%p16246_p10)
}
  0x69   : > { %14295 = dma.hbm_to_vmem [thread:$0]  (!%p17051_p6), %s19820_s22, 512, %s17055_s29, [#allocation10], %s19730_s0, %s19730_s0, %s19732_s26  }
  0x6a   : > { %s19821_s13 = sld [smem:[#allocation83_spill]] }
  0x70   : > { %s16250_s28 = scalar_lea.hbm %s19821_s13, 1024 }
  0x71   : > { %p16251_p11 = scmp.ne.s32.totalorder %s19821_s13, %s16250_s28  ;;  %p16257_p0 = scmp.lt.u32.totalorder %s16250_s28, %s19821_s13 }
  0x73   : > { %p16253_p12 = pnand %p16251_p11, %p17067_p8 }
  0x75   : > { %p16254_p13 = pneg %p16253_p12 }
  0x77   : > { %p16259_p2 = pnand %p16257_p0, %p16254_p13 }
  0x79   : > { %16262 = shalt.err (!%p16259_p2)
}
  0x7a   : > { %s16263_s29 = scalar_lea.vmem %s17057_s12, 1024  ;;  %p16271_p3 = scmp.lt.s32.totalorder %s17057_s12, %s17057_s12 }
  0x7b   : > { %p16264_p5 = scmp.ne.s32.totalorder %s17057_s12, %s16263_s29  ;;  %p16272_p10 = scmp.lt.s32.totalorder %s16263_s29, %s16263_s29 }
  0x7d   : > { %p16266_p7 = pnand %p16264_p5, %p17067_p8  ;;  %p16273_p11 = por %p16272_p10, %p16271_p3 }
  0x7f   : > { %p16267_p9 = pneg %p16266_p7 }
  0x81   : > { %p16274_p12 = pnand %p16273_p11, %p16267_p9 }
  0x83   : > { %16277 = shalt.err (!%p16274_p12)
}
  0x84   : > { %14301 = dma.hbm_to_vmem [thread:$0]  (!%p17051_p6), %s19821_s13, 1024, %s17057_s12, [#allocation13], %s19730_s0, %s19730_s0, %s19732_s26  }
  0x85   : > { %s16845_s16 = smov [#allocation15]   ;;  %s16846_s20 = smov [#allocation18]  }
  0x86   : > { %s820_s18 = sshll.u32 %s16845_s16, 4  ;;  %s844_s28 = sshll.u32 %s16846_s20, 4  ;;  %s821_s18 = int_to_ptr.vmem [resolvable:$true] %s820_s18  ;;  %s845_s28 = int_to_ptr.vmem [resolvable:$true] %s844_s28 }
  0x87   : > { %s19822_s15 = sld [smem:[#allocation85_spill]] }
  0x8d   : > { %s16278_s7 = scalar_lea.hbm %s19822_s15, 32 }
  0x8e   : > { %p16279_p13 = scmp.ne.s32.totalorder %s19822_s15, %s16278_s7  ;;  %p16285_p5 = scmp.lt.u32.totalorder %s16278_s7, %s19822_s15 }
  0x90   : > { %p16281_p0 = pnand %p16279_p13, %p17067_p8 }
  0x92   : > { %p16282_p2 = pneg %p16281_p0 }
  0x94   : > { %p16287_p7 = pnand %p16285_p5, %p16282_p2 }
  0x96   : > { %16290 = shalt.err (!%p16287_p7)
}
  0x97   : > { %s16291_s12 = scalar_lea.vmem %s821_s18, 32  ;;  %p16299_p11 = scmp.lt.s32.totalorder %s821_s18, %s821_s18 }
  0x98   : > { %p16292_p9 = scmp.ne.s32.totalorder %s821_s18, %s16291_s12  ;;  %p16300_p12 = scmp.lt.s32.totalorder %s16291_s12, %s16291_s12 }
  0x9a   : > { %p16294_p3 = pnand %p16292_p9, %p17067_p8  ;;  %p16301_p1 = por %p16300_p12, %p16299_p11 }
  0x9c   : > { %p16295_p10 = pneg %p16294_p3 }
  0x9e   : > { %p16302_p4 = pnand %p16301_p1, %p16295_p10 }
  0xa0   : > { %16305 = shalt.err (!%p16302_p4)
}
  0xa1   : > { %14307 = dma.hbm_to_vmem [thread:$0]  (!%p17051_p6), %s19822_s15, 32, %s821_s18, [#allocation16]  }
  0xa2   : > { %s19823_s17 = sld [smem:[#allocation87_spill]] }
  0xa8   : > { %s16306_s1 = scalar_lea.hbm %s19823_s17, 32 }
  0xa9   : > { %p16307_p13 = scmp.ne.s32.totalorder %s19823_s17, %s16306_s1  ;;  %p16313_p4 = scmp.lt.u32.totalorder %s16306_s1, %s19823_s17 }
  0xab   : > { %p16309_p0 = pnand %p16307_p13, %p17067_p8 }
  0xad   : > { %p16310_p1 = pneg %p16309_p0 }
  0xaf   : > { %p16315_p2 = pnand %p16313_p4, %p16310_p1 }
  0xb1   : > { %16318 = shalt.err (!%p16315_p2)
}
  0xb2   : > { %s16319_s6 = scalar_lea.vmem %s845_s28, 32  ;;  %p16327_p3 = scmp.lt.s32.totalorder %s845_s28, %s845_s28 }
  0xb3   : > { %p16320_p5 = scmp.ne.s32.totalorder %s845_s28, %s16319_s6  ;;  %p16328_p10 = scmp.lt.s32.totalorder %s16319_s6, %s16319_s6 }
  0xb5   : > { %p16322_p7 = pnand %p16320_p5, %p17067_p8  ;;  %p16329_p11 = por %p16328_p10, %p16327_p3 }
  0xb7   : > { %p16323_p9 = pneg %p16322_p7 }
  0xb9   : > { %p16330_p12 = pnand %p16329_p11, %p16323_p9 }
  0xbb   : > { %16333 = shalt.err (!%p16330_p12)
}
  0xbc   : > { %14313 = dma.hbm_to_vmem [thread:$0]  (!%p17051_p6), %s19823_s17, 32, %s845_s28, [#allocation19]  }
  0xbd   : > { %s16847_s14 = smov [#allocation21]   ;;  %s16848_s3 = smov [#allocation24]  }
  0xbe   : > { %s868_s16 = sshll.u32 %s16847_s14, 4  ;;  %s891_s20 = sshll.u32 %s16848_s3, 4  ;;  %s869_s16 = int_to_ptr.vmem [resolvable:$true] %s868_s16  ;;  %s892_s20 = int_to_ptr.vmem [resolvable:$true] %s891_s20 }
  0xbf   : > { %s19824_s19 = sld [smem:[#allocation89_spill]] }
  0xc5   : > { %s16334_s7 = scalar_lea.hbm %s19824_s19, 32 }
  0xc6   : > { %p16335_p13 = scmp.ne.s32.totalorder %s19824_s19, %s16334_s7  ;;  %p16341_p4 = scmp.lt.u32.totalorder %s16334_s7, %s19824_s19 }
  0xc8   : > { %p16337_p0 = pnand %p16335_p13, %p17067_p8 }
  0xca   : > { %p16338_p1 = pneg %p16337_p0 }
  0xcc   : > { %p16343_p2 = pnand %p16341_p4, %p16338_p1 }
  0xce   : > { %16346 = shalt.err (!%p16343_p2)
}
  0xcf   : > { %s16347_s28 = scalar_lea.vmem %s869_s16, 32  ;;  %p16355_p3 = scmp.lt.s32.totalorder %s869_s16, %s869_s16 }
  0xd0   : > { %p16348_p5 = scmp.ne.s32.totalorder %s869_s16, %s16347_s28  ;;  %p16356_p10 = scmp.lt.s32.totalorder %s16347_s28, %s16347_s28 }
  0xd2   : > { %p16350_p7 = pnand %p16348_p5, %p17067_p8  ;;  %p16357_p11 = por %p16356_p10, %p16355_p3 }
  0xd4   : > { %p16351_p9 = pneg %p16350_p7 }
  0xd6   : > { %p16358_p12 = pnand %p16357_p11, %p16351_p9 }
  0xd8   : > { %16361 = shalt.err (!%p16358_p12)
}
  0xd9   : > { %14319 = dma.hbm_to_vmem [thread:$0]  (!%p17051_p6), %s19824_s19, 32, %s869_s16, [#allocation22]  }
  0xda   : > { %s19825_s21 = sld [smem:[#allocation91_spill]] }
  0xe0   : > { %s16362_s4 = scalar_lea.hbm %s19825_s21, 2048 }
  0xe1   : > { %p16363_p13 = scmp.ne.s32.totalorder %s19825_s21, %s16362_s4  ;;  %p16369_p4 = scmp.lt.u32.totalorder %s16362_s4, %s19825_s21 }
  0xe3   : > { %p16365_p0 = pnand %p16363_p13, %p17067_p8 }
  0xe5   : > { %p16366_p1 = pneg %p16365_p0 }
  0xe7   : > { %p16371_p2 = pnand %p16369_p4, %p16366_p1 }
  0xe9   : > { %16374 = shalt.err (!%p16371_p2)
}
  0xea   : > { %s16375_s18 = scalar_lea.vmem %s892_s20, 2048  ;;  %p16383_p3 = scmp.lt.s32.totalorder %s892_s20, %s892_s20 }
  0xeb   : > { %p16376_p5 = scmp.ne.s32.totalorder %s892_s20, %s16375_s18  ;;  %p16384_p10 = scmp.lt.s32.totalorder %s16375_s18, %s16375_s18 }
  0xed   : > { %p16378_p7 = pnand %p16376_p5, %p17067_p8  ;;  %p16385_p11 = por %p16384_p10, %p16383_p3 }
  0xef   : > { %p16379_p9 = pneg %p16378_p7 }
  0xf1   : > { %p16386_p12 = pnand %p16385_p11, %p16379_p9 }
  0xf3   : > { %16389 = shalt.err (!%p16386_p12)
}
  0xf4   : > { %14325 = dma.hbm_to_vmem [thread:$0]  (!%p17051_p6), %s19825_s21, 2048, %s892_s20, [#allocation25], %s19730_s0, %s19730_s0, %s19732_s26  }
  0xf5   : > { %s17219_s12 = sadd.s32 1, %s16838_s30   ;;  %s545_s3 = sadd.s32 1, %s16834_s9 }
  0xf6   : > { %19826 = sst [smem:[#allocation49_spill]] %s17219_s12  ;;  %s542_s14 = ssub.s32 %s16838_s30, %s17219_s12 }
  0xf7   : > { %p543_p13 = scmp.eq.s32.totalorder %s542_s14, 0  ;;  %p552_p0 = scmp.ne.s32.totalorder %s16834_s9, %s16830_s5 }
  0xf8   : > { %p553_p1 = scmp.eq.s32.totalorder %s16838_s30, 0  ;;  %p558_p4 = scmp.ne.s32.totalorder %s16830_s5, %s16826_s8 }
  0xf9   : > { %s17230_s1 = scalar_select %p543_p13, %s16834_s9, %s545_s3  }
  0xfa   : > { %p554_p2 = por %p553_p1, %p552_p0  ;;  %p19828_p5 = scmp.eq.s32.totalorder %s17035_s10, 0 }
  0xfb   : > { %19827 = sst [smem:[#allocation50_spill]] %s17230_s1  ;;  %p14360_p9 = scmp.lt.s32.totalorder %s16838_s30, 6 }
  0xfc   : > { %p17234_p7 = por %p19828_p5, %p558_p4  ;;  %s19734_s20 = sand.u32 1, %s16838_s30  }
  0xfd   : > { %s17241_s7 = sand.u32 1, %s16834_s9   ;;  %p17244_p3 = pnand %p14360_p9, %p554_p2 }
  0xfe   : > { %s19829_s4 = scalar_select %p17234_p7, 1, 0 }
  0xff   : > { %s14207_s27 = smul.u32 2560, %s17241_s7  ;;  %s19832_s23 = sld [smem:[#allocation93_spill]] }
 0x100   : > { %19830 = sst [smem:[#allocation51_spill]] %s19829_s4  ;;  %s14208_s8 = smul.u32 40960, %s16838_s30 }
 0x101   : > { %s19831_s29 = scalar_select %p17244_p3, 1, 0 }
 0x102   : > { %s920_s14 = scalar_lea.vmem [#allocation27], %s14207_s27  ;;  %s17259_s0 = scalar_lea.sflag [#allocation28], %s19734_s20 }
 0x103   : > { %s927_s3 = sshll.u32 %s920_s14, 4  ;;  %p17265_p11 = pneg %p17244_p3  ;;  %s17255_s3 = int_to_ptr.vmem [resolvable:$true] %s927_s3 }
 0x105   : > { %s17253_s28 = scalar_lea.hbm %s19832_s23, %s14208_s8  ;;  %s16395_s27 = scalar_lea.hbm %s19832_s23, 245760 }
 0x106   : > { %s16390_s26 = scalar_lea.hbm %s17253_s28, 40960  ;;  %p16396_p0 = scmp.lt.u32.totalorder %s17253_s28, %s19832_s23 }
 0x107   : > { %p16391_p10 = scmp.ne.s32.totalorder %s17253_s28, %s16390_s26  ;;  %p16397_p1 = scmp.lt.u32.totalorder %s16395_s27, %s16390_s26 }
 0x108   : > { %s19833_s6 = scalar_select %p17265_p11, 1, 0 }
 0x109   : > { %p16393_p12 = pnand %p17265_p11, %p16391_p10  ;;  %p16398_p4 = por %p16397_p1, %p16396_p0 }
 0x10a   : > { %p16399_p2 = scmp.lt.u32.totalorder %s16390_s26, %s17253_s28 }
 0x10b   : > { %p16394_p13 = pneg %p16393_p12 }
 0x10c   : > { %p16400_p5 = por %p16399_p2, %p16398_p4 }
 0x10e   : > { %p16401_p9 = pnand %p16400_p5, %p16394_p13 }
 0x110   : > { %16404 = shalt.err (!%p16401_p9)
}
 0x111   : > { %s16405_s20 = scalar_lea.vmem %s17255_s3, 40960  ;;  %s16849_s8 = smov [#allocation27]  }
 0x112   : > { %p16406_p10 = scmp.ne.s32.totalorder %s17255_s3, %s16405_s20  ;;  %s16410_s18 = sshll.u32 %s16849_s8, 4  ;;  %s16411_s18 = int_to_ptr.vmem [resolvable:$false] %s16410_s18 }
 0x113   : > { %s16412_s16 = scalar_lea.vmem %s16411_s18, 81920  ;;  %p16413_p6 = scmp.lt.s32.totalorder %s17255_s3, %s16411_s18 }
 0x114   : > { %p16408_p12 = pnand %p16406_p10, %p17265_p11  ;;  %p16414_p8 = scmp.lt.s32.totalorder %s16412_s16, %s16405_s20 }
 0x116   : > { %p16409_p7 = pneg %p16408_p12  ;;  %p16415_p0 = por %p16414_p8, %p16413_p6 }
 0x118   : > { %p16416_p1 = pnand %p16415_p0, %p16409_p7 }
 0x11a   : > { %16419 = shalt.err (!%p16416_p1)
}
 0x11b   : > { %s19741_s26 = smov 128   ;;  %s19748_s27 = smov 8  }
 0x11c   : > { %14332 = dma.hbm_to_vmem [thread:$0]  (!%p17244_p3), %s17253_s28, 40960, %s17255_s3, %s17259_s0, %s19741_s26, %s19741_s26, %s19748_s27  }
 0x11d   : > { %s13910_s20 = sshll.u32 %s16838_s30, 12  ;;  %s19834_s14 = sshll.u32 %s17241_s7, 8 }
 0x11e   : > { %s941_s8 = scalar_lea.vmem [#allocation29], %s19834_s14  ;;  %s17298_s15 = scalar_lea.hbm %s19700_s24, %s13910_s20 }
 0x11f   : > { %s948_s18 = sshll.u32 %s941_s8, 4  ;;  %s19835_s25 = sld [smem:[#allocation94_spill]]  ;;  %s17300_s18 = int_to_ptr.vmem [resolvable:$true] %s948_s18 }
 0x120   : > { %s19836_s22 = smov %s19834_s14  ;;  %s19837_s14 = sand.u32 1, %s16838_s30  }
 0x121   : > { %s962_s28 = scalar_lea.vmem [#allocation30], %s19836_s22  ;;  %s17313_s13 = scalar_lea.sflag [#allocation31], %s19837_s14 }
 0x122   : > { %s969_s3 = sshll.u32 %s962_s28, 4  ;;  %s17309_s3 = int_to_ptr.vmem [resolvable:$true] %s969_s3 }
 0x125   : > { %s17305_s21 = scalar_lea.hbm %s19835_s25, %s13910_s20  ;;  %s16425_s20 = scalar_lea.hbm %s19835_s25, 24576 }
 0x126   : > { %s16420_s8 = scalar_lea.hbm %s17305_s21, 4096  ;;  %p16426_p13 = scmp.lt.u32.totalorder %s17305_s21, %s19835_s25 }
 0x127   : > { %p16421_p6 = scmp.ne.s32.totalorder %s17305_s21, %s16420_s8  ;;  %p16427_p4 = scmp.lt.u32.totalorder %s16425_s20, %s16420_s8 }
 0x128   : > { %p16429_p5 = scmp.lt.u32.totalorder %s16420_s8, %s17305_s21 }
 0x129   : > { %p16423_p8 = pnand %p16421_p6, %p17265_p11  ;;  %p16428_p2 = por %p16427_p4, %p16426_p13 }
 0x12b   : > { %p16424_p7 = pneg %p16423_p8  ;;  %p16430_p9 = por %p16429_p5, %p16428_p2 }
 0x12d   : > { %p16431_p10 = pnand %p16430_p9, %p16424_p7 }
 0x12f   : > { %16434 = shalt.err (!%p16431_p10)
}
 0x130   : > { %s16435_s22 = scalar_lea.vmem %s17309_s3, 4096  ;;  %s16852_s28 = smov [#allocation30]  }
 0x131   : > { %p16436_p12 = scmp.ne.s32.totalorder %s17309_s3, %s16435_s22  ;;  %s16440_s14 = sshll.u32 %s16852_s28, 4  ;;  %s16441_s14 = int_to_ptr.vmem [resolvable:$false] %s16440_s14 }
 0x132   : > { %s16442_s26 = scalar_lea.vmem %s16441_s14, 8192  ;;  %p16443_p6 = scmp.lt.s32.totalorder %s17309_s3, %s16441_s14 }
 0x133   : > { %p16438_p0 = pnand %p16436_p12, %p17265_p11  ;;  %p16444_p8 = scmp.lt.s32.totalorder %s16442_s26, %s16435_s22 }
 0x135   : > { %p16439_p1 = pneg %p16438_p0  ;;  %p16445_p13 = por %p16444_p8, %p16443_p6 }
 0x137   : > { %p16446_p4 = pnand %p16445_p13, %p16439_p1 }
 0x139   : > { %16449 = shalt.err (!%p16446_p4)
}
 0x13a   : > { %s19838_s8 = smov 128   ;;  %s16853_s17 = smov [#allocation4]  }
 0x13b   : > { %14338 = dma.hbm_to_vmem [thread:$0]  (!%p17244_p3), %s17305_s21, 4096, %s17309_s3, %s17313_s13, %s19838_s8, %s19838_s8, %s19748_s27  }
 0x13c   : > { %s716_s19 = sshll.u32 %s16853_s17, 4  ;;  %s16854_s20 = smov [#allocation8]   ;;  %s717_s19 = int_to_ptr.vmem [resolvable:$true] %s716_s19 }
 0x13d   : > { %s751_s16 = sshll.u32 %s16854_s20, 4  ;;  %s19839_s14 = sld [smem:[#allocation73_spill]]  ;;  %s752_s16 = int_to_ptr.vmem [resolvable:$true] %s751_s16 }
 0x13e   : > { %p19840_p2 = scmp.ne.s32.totalorder %s19819_s11, 0 }
 0x143   : > { %s16450_s26 = scalar_lea.hbm %s19839_s14, 128 }
 0x144   : > { %p16451_p7 = scmp.ne.s32.totalorder %s19839_s14, %s16450_s26  ;;  %p16457_p10 = scmp.lt.u32.totalorder %s16450_s26, %s19839_s14 }
 0x146   : > { %p16453_p5 = pnand %p16451_p7, %p19840_p2 }
 0x148   : > { %p16454_p9 = pneg %p16453_p5 }
 0x14a   : > { %p16459_p12 = pnand %p16457_p10, %p16454_p9 }
 0x14c   : > { %16462 = shalt.err (!%p16459_p12)
}
 0x14d   : > { %s16463_s21 = scalar_lea.vmem %s717_s19, 128  ;;  %p16471_p8 = scmp.lt.s32.totalorder %s717_s19, %s717_s19 }
 0x14e   : > { %p16464_p0 = scmp.ne.s32.totalorder %s717_s19, %s16463_s21  ;;  %p16472_p13 = scmp.lt.s32.totalorder %s16463_s21, %s16463_s21 }
 0x150   : > { %p16466_p1 = pnand %p16464_p0, %p19840_p2  ;;  %p16473_p4 = por %p16472_p13, %p16471_p8 }
 0x152   : > { %p16467_p6 = pneg %p16466_p1 }
 0x154   : > { %p16474_p3 = pnand %p16473_p4, %p16467_p6 }
 0x156   : > { %16477 = shalt.err (!%p16474_p3)
}
 0x157   : > { %p19841_p7 = scmp.ne.s32.totalorder %s19817_s2, 0  ;;  %s19842_s3 = sld [smem:[#allocation79_spill]] }
 0x159   : > { %14286 = dma.hbm_to_vmem [thread:$0]  (!%p19841_p7), %s19839_s14, 128, %s717_s19, [#allocation5]  }
 0x15d   : > { %s16478_s17 = scalar_lea.hbm %s19842_s3, 512 }
 0x15e   : > { %p16479_p5 = scmp.ne.s32.totalorder %s19842_s3, %s16478_s17  ;;  %p16485_p3 = scmp.lt.u32.totalorder %s16478_s17, %s19842_s3 }
 0x160   : > { %p16481_p9 = pnand %p16479_p5, %p19840_p2 }
 0x162   : > { %p16482_p10 = pneg %p16481_p9 }
 0x164   : > { %p16487_p12 = pnand %p16485_p3, %p16482_p10 }
 0x166   : > { %16490 = shalt.err (!%p16487_p12)
}
 0x167   : > { %s16491_s21 = scalar_lea.vmem %s752_s16, 512  ;;  %p16499_p8 = scmp.lt.s32.totalorder %s752_s16, %s752_s16 }
 0x168   : > { %p16492_p0 = scmp.ne.s32.totalorder %s752_s16, %s16491_s21  ;;  %p16500_p13 = scmp.lt.s32.totalorder %s16491_s21, %s16491_s21 }
 0x16a   : > { %p16494_p1 = pnand %p16492_p0, %p19840_p2  ;;  %p16501_p4 = por %p16500_p13, %p16499_p8 }
 0x16c   : > { %p16495_p6 = pneg %p16494_p1 }
 0x16e   : > { %p16502_p11 = pnand %p16501_p4, %p16495_p6 }
 0x170   : > { %16505 = shalt.err (!%p16502_p11)
}
 0x171   : > { %s19843_s19 = smov 4   ;;  %s19844_s23 = smov 64  }
 0x172   : > { %14292 = dma.hbm_to_vmem [thread:$0]  (!%p19841_p7), %s19842_s3, 512, %s752_s16, [#allocation7], %s19844_s23, %s19844_s23, %s19843_s19  }
 0x173   : > { %s16855_s1 = smov [#allocation11]   ;;  %s16856_s20 = smov [#allocation14]  }
 0x174   : > { %s780_s17 = sshll.u32 %s16855_s1, 4  ;;  %s806_s28 = sshll.u32 %s16856_s20, 4  ;;  %s781_s17 = int_to_ptr.vmem [resolvable:$true] %s780_s17  ;;  %s807_s28 = int_to_ptr.vmem [resolvable:$true] %s806_s28 }
 0x175   : > { %s19845_s21 = sld [smem:[#allocation82_spill]] }
 0x17b   : > { %s16506_s27 = scalar_lea.hbm %s19845_s21, 1024 }
 0x17c   : > { %p16507_p11 = scmp.ne.s32.totalorder %s19845_s21, %s16506_s27  ;;  %p16513_p10 = scmp.lt.u32.totalorder %s16506_s27, %s19845_s21 }
 0x17e   : > { %p16509_p5 = pnand %p16507_p11, %p19840_p2 }
 0x180   : > { %p16510_p9 = pneg %p16509_p5 }
 0x182   : > { %p16515_p3 = pnand %p16513_p10, %p16510_p9 }
 0x184   : > { %16518 = shalt.err (!%p16515_p3)
}
 0x185   : > { %s16519_s16 = scalar_lea.vmem %s781_s17, 1024  ;;  %p16527_p6 = scmp.lt.s32.totalorder %s781_s17, %s781_s17 }
 0x186   : > { %p16520_p12 = scmp.ne.s32.totalorder %s781_s17, %s16519_s16  ;;  %p16528_p8 = scmp.lt.s32.totalorder %s16519_s16, %s16519_s16 }
 0x188   : > { %p16522_p0 = pnand %p16520_p12, %p19840_p2  ;;  %p16529_p13 = por %p16528_p8, %p16527_p6 }
 0x18a   : > { %p16523_p1 = pneg %p16522_p0 }
 0x18c   : > { %p16530_p4 = pnand %p16529_p13, %p16523_p1 }
 0x18e   : > { %16533 = shalt.err (!%p16530_p4)
}
 0x18f   : > { %14298 = dma.hbm_to_vmem [thread:$0]  (!%p19841_p7), %s19845_s21, 1024, %s781_s17, [#allocation10], %s19844_s23, %s19844_s23, %s19843_s19  }
 0x190   : > { %s19846_s9 = sld [smem:[#allocation84_spill]] }
 0x196   : > { %s19847_s1 = smov %s19846_s9  ;;  %s16534_s20 = scalar_lea.hbm %s19846_s9, 12288 }
 0x197   : > { %p16535_p11 = scmp.ne.s32.totalorder %s19847_s1, %s16534_s20  ;;  %p16541_p10 = scmp.lt.u32.totalorder %s16534_s20, %s19847_s1 }
 0x199   : > { %p16537_p5 = pnand %p16535_p11, %p19840_p2 }
 0x19b   : > { %p16538_p9 = pneg %p16537_p5 }
 0x19d   : > { %p16543_p3 = pnand %p16541_p10, %p16538_p9 }
 0x19f   : > { %16546 = shalt.err (!%p16543_p3)
}
 0x1a0   : > { %s16547_s12 = scalar_lea.vmem %s807_s28, 12288  ;;  %p16555_p6 = scmp.lt.s32.totalorder %s807_s28, %s807_s28 }
 0x1a1   : > { %p16548_p12 = scmp.ne.s32.totalorder %s807_s28, %s16547_s12  ;;  %p16556_p8 = scmp.lt.s32.totalorder %s16547_s12, %s16547_s12 }
 0x1a3   : > { %p16550_p0 = pnand %p16548_p12, %p19840_p2  ;;  %p16557_p13 = por %p16556_p8, %p16555_p6 }
 0x1a5   : > { %p16551_p1 = pneg %p16550_p0 }
 0x1a7   : > { %p16558_p4 = pnand %p16557_p13, %p16551_p1 }
 0x1a9   : > { %16561 = shalt.err (!%p16558_p4)
}
 0x1aa   : > { %s19848_s17 = smov 8   ;;  %s16857_s14 = smov [#allocation17]  }
 0x1ab   : > { %14304 = dma.hbm_to_vmem [thread:$0]  (!%p19841_p7), %s19847_s1, 12288, %s807_s28, [#allocation13], %s19838_s8, %s19838_s8, %s19848_s17  }
 0x1ac   : > { %s830_s9 = sshll.u32 %s16857_s14, 4  ;;  %s16858_s20 = smov [#allocation20]   ;;  %s831_s9 = int_to_ptr.vmem [resolvable:$true] %s830_s9 }
 0x1ad   : > { %s854_s22 = sshll.u32 %s16858_s20, 4  ;;  %s19849_s16 = sld [smem:[#allocation86_spill]]  ;;  %s855_s22 = int_to_ptr.vmem [resolvable:$true] %s854_s22 }
 0x1b3   : > { %s16562_s12 = scalar_lea.hbm %s19849_s16, 32768 }
 0x1b4   : > { %p16563_p11 = scmp.ne.s32.totalorder %s19849_s16, %s16562_s12  ;;  %p16569_p10 = scmp.lt.u32.totalorder %s16562_s12, %s19849_s16 }
 0x1b6   : > { %p16565_p5 = pnand %p16563_p11, %p19840_p2 }
 0x1b8   : > { %p16566_p9 = pneg %p16565_p5 }
 0x1ba   : > { %p16571_p3 = pnand %p16569_p10, %p16566_p9 }
 0x1bc   : > { %16574 = shalt.err (!%p16571_p3)
}
 0x1bd   : > { %s16575_s28 = scalar_lea.vmem %s831_s9, 32768  ;;  %p16583_p6 = scmp.lt.s32.totalorder %s831_s9, %s831_s9 }
 0x1be   : > { %p16576_p12 = scmp.ne.s32.totalorder %s831_s9, %s16575_s28  ;;  %p16584_p8 = scmp.lt.s32.totalorder %s16575_s28, %s16575_s28 }
 0x1c0   : > { %p16578_p0 = pnand %p16576_p12, %p19840_p2  ;;  %p16585_p13 = por %p16584_p8, %p16583_p6 }
 0x1c2   : > { %p16579_p1 = pneg %p16578_p0 }
 0x1c4   : > { %p16586_p4 = pnand %p16585_p13, %p16579_p1 }
 0x1c6   : > { %16589 = shalt.err (!%p16586_p4)
}
 0x1c7   : > { %14310 = dma.hbm_to_vmem [thread:$0]  (!%p19841_p7), %s19849_s16, 32768, %s831_s9, [#allocation16], %s19838_s8, %s19838_s8, %s19848_s17  }
 0x1c8   : > { %s19850_s14 = sld [smem:[#allocation88_spill]] }
 0x1ce   : > { %s16590_s20 = scalar_lea.hbm %s19850_s14, 4096 }
 0x1cf   : > { %p16591_p11 = scmp.ne.s32.totalorder %s19850_s14, %s16590_s20  ;;  %p16597_p10 = scmp.lt.u32.totalorder %s16590_s20, %s19850_s14 }
 0x1d1   : > { %p16593_p5 = pnand %p16591_p11, %p19840_p2 }
 0x1d3   : > { %p16594_p9 = pneg %p16593_p5 }
 0x1d5   : > { %p16599_p3 = pnand %p16597_p10, %p16594_p9 }
 0x1d7   : > { %16602 = shalt.err (!%p16599_p3)
}
 0x1d8   : > { %s16603_s28 = scalar_lea.vmem %s855_s22, 4096  ;;  %p16611_p6 = scmp.lt.s32.totalorder %s855_s22, %s855_s22 }
 0x1d9   : > { %p16604_p12 = scmp.ne.s32.totalorder %s855_s22, %s16603_s28  ;;  %p16612_p8 = scmp.lt.s32.totalorder %s16603_s28, %s16603_s28 }
 0x1db   : > { %p16606_p0 = pnand %p16604_p12, %p19840_p2  ;;  %p16613_p13 = por %p16612_p8, %p16611_p6 }
 0x1dd   : > { %p16607_p1 = pneg %p16606_p0 }
 0x1df   : > { %p16614_p4 = pnand %p16613_p13, %p16607_p1 }
 0x1e1   : > { %16617 = shalt.err (!%p16614_p4)
}
 0x1e2   : > { %14316 = dma.hbm_to_vmem [thread:$0]  (!%p19841_p7), %s19850_s14, 4096, %s855_s22, [#allocation19], %s19838_s8, %s19838_s8, %s19848_s17  }
 0x1e3   : > { %s16859_s3 = smov [#allocation23]   ;;  %s16860_s27 = smov [#allocation26]  }
 0x1e4   : > { %s878_s21 = sshll.u32 %s16859_s3, 4  ;;  %s905_s20 = sshll.u32 %s16860_s27, 4  ;;  %s879_s21 = int_to_ptr.vmem [resolvable:$true] %s878_s21  ;;  %s906_s20 = int_to_ptr.vmem [resolvable:$true] %s905_s20 }
 0x1e5   : > { %s19851_s12 = sld [smem:[#allocation90_spill]] }
 0x1eb   : > { %s16618_s4 = scalar_lea.hbm %s19851_s12, 6144 }
 0x1ec   : > { %p16619_p11 = scmp.ne.s32.totalorder %s19851_s12, %s16618_s4  ;;  %p16625_p10 = scmp.lt.u32.totalorder %s16618_s4, %s19851_s12 }
 0x1ee   : > { %p16621_p5 = pnand %p16619_p11, %p19840_p2 }
 0x1f0   : > { %p16622_p9 = pneg %p16621_p5 }
 0x1f2   : > { %p16627_p3 = pnand %p16625_p10, %p16622_p9 }
 0x1f4   : > { %16630 = shalt.err (!%p16627_p3)
}
 0x1f5   : > { %s16631_s8 = scalar_lea.vmem %s879_s21, 6144  ;;  %p16639_p6 = scmp.lt.s32.totalorder %s879_s21, %s879_s21 }
 0x1f6   : > { %p16632_p12 = scmp.ne.s32.totalorder %s879_s21, %s16631_s8  ;;  %p16640_p8 = scmp.lt.s32.totalorder %s16631_s8, %s16631_s8 }
 0x1f8   : > { %p16634_p0 = pnand %p16632_p12, %p19840_p2  ;;  %p16641_p13 = por %p16640_p8, %p16639_p6 }
 0x1fa   : > { %p16635_p1 = pneg %p16634_p0 }
 0x1fc   : > { %p16642_p4 = pnand %p16641_p13, %p16635_p1 }
 0x1fe   : > { %16645 = shalt.err (!%p16642_p4)
}
 0x1ff   : > { %14322 = dma.hbm_to_vmem [thread:$0]  (!%p19841_p7), %s19851_s12, 6144, %s879_s21, [#allocation22], %s19844_s23, %s19844_s23, %s19843_s19  }
 0x200   : > { %s14209_s22 = smul.u32 48, %s17241_s7  ;;  %s19852_s3 = sld [smem:[#allocation92_spill]] }
 0x206   : > { %s16646_s27 = scalar_lea.hbm %s19852_s3, 16 }
 0x207   : > { %p16647_p11 = scmp.ne.s32.totalorder %s19852_s3, %s16646_s27  ;;  %p16653_p10 = scmp.lt.u32.totalorder %s16646_s27, %s19852_s3 }
 0x209   : > { %p16649_p5 = pnand %p16647_p11, %p19840_p2 }
 0x20b   : > { %p16650_p9 = pneg %p16649_p5 }
 0x20d   : > { %p16655_p3 = pnand %p16653_p10, %p16650_p9 }
 0x20f   : > { %16658 = shalt.err (!%p16655_p3)
}
 0x210   : > { %s16659_s21 = scalar_lea.vmem %s906_s20, 16  ;;  %s16666_s9 = scalar_lea.vmem %s906_s20, 32 }
 0x211   : > { %p16660_p12 = scmp.ne.s32.totalorder %s906_s20, %s16659_s21  ;;  %p16667_p6 = scmp.lt.s32.totalorder %s906_s20, %s906_s20 }
 0x212   : > { %p16668_p8 = scmp.lt.s32.totalorder %s16666_s9, %s16659_s21 }
 0x213   : > { %p16662_p0 = pnand %p16660_p12, %p19840_p2 }
 0x214   : > { %p16669_p13 = por %p16668_p8, %p16667_p6 }
 0x215   : > { %p16663_p1 = pneg %p16662_p0 }
 0x217   : > { %p16670_p4 = pnand %p16669_p13, %p16663_p1 }
 0x219   : > { %16673 = shalt.err (!%p16670_p4)
}
 0x21a   : > { %14328 = dma.hbm_to_vmem [thread:$0]  (!%p19841_p7), %s19852_s3, 16, %s906_s20, [#allocation25]  }
 0x21b   : > { %s16674_s11 = scalar_lea.hbm %s17298_s15, 4096  ;;  %p19853_p11 = scmp.ne.s32.totalorder %s19833_s6, 0 }
 0x21c   : > { %p16675_p2 = scmp.ne.s32.totalorder %s17298_s15, %s16674_s11  ;;  %s16679_s5 = scalar_lea.hbm %s19700_s24, 24576 }
 0x21d   : > { %p16680_p10 = scmp.lt.u32.totalorder %s17298_s15, %s19700_s24  ;;  %p16681_p3 = scmp.lt.u32.totalorder %s16679_s5, %s16674_s11 }
 0x21e   : > { %p16677_p5 = pnand %p16675_p2, %p19853_p11  ;;  %p16683_p0 = scmp.lt.u32.totalorder %s16674_s11, %s17298_s15 }
 0x21f   : > { %p16682_p12 = por %p16681_p3, %p16680_p10 }
 0x220   : > { %p16678_p9 = pneg %p16677_p5 }
 0x221   : > { %p16684_p1 = por %p16683_p0, %p16682_p12 }
 0x223   : > { %p16685_p6 = pnand %p16684_p1, %p16678_p9 }
 0x225   : > { %16688 = shalt.err (!%p16685_p6)
}
 0x226   : > { %s16689_s20 = scalar_lea.vmem %s17300_s18, 4096  ;;  %s16861_s26 = smov [#allocation29]  }
 0x227   : > { %p16690_p7 = scmp.ne.s32.totalorder %s17300_s18, %s16689_s20  ;;  %s16694_s25 = sshll.u32 %s16861_s26, 4  ;;  %s16695_s25 = int_to_ptr.vmem [resolvable:$false] %s16694_s25 }
 0x228   : > { %s16696_s4 = scalar_lea.vmem %s16695_s25, 8192  ;;  %p16697_p4 = scmp.lt.s32.totalorder %s17300_s18, %s16695_s25 }
 0x229   : > { %p16692_p8 = pnand %p16690_p7, %p19853_p11  ;;  %p16698_p2 = scmp.lt.s32.totalorder %s16696_s4, %s16689_s20 }
 0x22b   : > { %p16693_p13 = pneg %p16692_p8  ;;  %p16699_p5 = por %p16698_p2, %p16697_p4 }
 0x22d   : > { %p16700_p10 = pnand %p16699_p5, %p16693_p13 }
 0x22f   : > { %16703 = shalt.err (!%p16700_p10)
}
 0x230   : > { %p19854_p9 = scmp.ne.s32.totalorder %s19831_s29, 0  ;;  %s14210_s28 = smul.u32 768, %s16838_s30 }
 0x231   : > { %s983_s21 = scalar_lea.vmem [#allocation32], %s14209_s22  ;;  %s19855_s11 = sld [smem:[#allocation95_spill]] }
 0x232   : > { %14335 = dma.hbm_to_vmem [thread:$0]  (!%p19854_p9), %s17298_s15, 4096, %s17300_s18, %s17259_s0, %s19844_s23, %s19844_s23, %s19843_s19  }
 0x233   : > { %s990_s9 = sshll.u32 %s983_s21, 4  ;;  %s17536_s9 = int_to_ptr.vmem [resolvable:$true] %s990_s9 }
 0x237   : > { %s17534_s17 = scalar_lea.hbm %s19855_s11, %s14210_s28  ;;  %s16709_s18 = scalar_lea.hbm %s19855_s11, 4608 }
 0x238   : > { %s16704_s16 = scalar_lea.hbm %s17534_s17, 768  ;;  %p16710_p1 = scmp.lt.u32.totalorder %s17534_s17, %s19855_s11 }
 0x239   : > { %p16705_p3 = scmp.ne.s32.totalorder %s17534_s17, %s16704_s16  ;;  %p16711_p6 = scmp.lt.u32.totalorder %s16709_s18, %s16704_s16 }
 0x23a   : > { %p16713_p8 = scmp.lt.u32.totalorder %s16704_s16, %s17534_s17 }
 0x23b   : > { %p16707_p12 = pnand %p16705_p3, %p19853_p11  ;;  %p16712_p7 = por %p16711_p6, %p16710_p1 }
 0x23d   : > { %p16708_p0 = pneg %p16707_p12  ;;  %p16714_p13 = por %p16713_p8, %p16712_p7 }
 0x23f   : > { %p16715_p4 = pnand %p16714_p13, %p16708_p0 }
 0x241   : > { %16718 = shalt.err (!%p16715_p4)
}
 0x242   : > { %s16719_s22 = scalar_lea.vmem %s17536_s9, 768  ;;  %s16862_s5 = smov [#allocation32]  }
 0x243   : > { %p16720_p2 = scmp.ne.s32.totalorder %s17536_s9, %s16719_s22  ;;  %s16724_s27 = sshll.u32 %s16862_s5, 4  ;;  %s16725_s27 = int_to_ptr.vmem [resolvable:$false] %s16724_s27 }
 0x244   : > { %s16726_s2 = scalar_lea.vmem %s16725_s27, 1536  ;;  %p16727_p3 = scmp.lt.s32.totalorder %s17536_s9, %s16725_s27 }
 0x245   : > { %p16722_p5 = pnand %p16720_p2, %p19853_p11  ;;  %p16728_p12 = scmp.lt.s32.totalorder %s16726_s2, %s16719_s22 }
 0x247   : > { %p16723_p10 = pneg %p16722_p5  ;;  %p16729_p1 = por %p16728_p12, %p16727_p3 }
 0x249   : > { %p16730_p6 = pnand %p16729_p1, %p16723_p10 }
 0x24b   : > { %16733 = shalt.err (!%p16730_p6)
}
 0x24c   : > { %s16863_s20 = smov 256   ;;  %s16864_s26 = smov 16  }
 0x24d   : > { %14341 = dma.hbm_to_vmem [thread:$0]  (!%p19854_p9), %s17534_s17, 768, %s17536_s9, %s17313_s13, %s16863_s20, %s16863_s20, %s16864_s26  }
 0x24e   : > { %s12380_s25 = sshll.u32 %s17241_s7, 1  ;;  %s12381_s4 = sshll.u32 %s16838_s30, 5 }
 0x24f   : > { %s19856_s8 = sld [smem:[#allocation96_spill]]  ;;  %s1004_s15 = scalar_lea.vmem [#allocation33], %s12380_s25 }
 0x250   : > { %s1011_s0 = sshll.u32 %s1004_s15, 4  ;;  %s1001_s18 = scalar_lea.sflag [#allocation34], %s17241_s7  ;;  %s1012_s0 = int_to_ptr.vmem [resolvable:$true] %s1011_s0 }
 0x255   : > { %s19857_s1 = smov %s19856_s8  ;;  %s17565_s16 = scalar_lea.hbm %s19856_s8, %s12381_s4 }
 0x256   : > { %s16734_s19 = scalar_lea.hbm %s17565_s16, 32  ;;  %s16739_s9 = scalar_lea.hbm %s19857_s1, 192 }
 0x257   : > { %p16735_p0 = scmp.ne.s32.totalorder %s17565_s16, %s16734_s19  ;;  %p16740_p13 = scmp.lt.u32.totalorder %s17565_s16, %s19857_s1 }
 0x258   : > { %p16741_p4 = scmp.lt.u32.totalorder %s16739_s9, %s16734_s19  ;;  %p16743_p5 = scmp.lt.u32.totalorder %s16734_s19, %s17565_s16 }
 0x259   : > { %p16737_p7 = pnand %p16735_p0, %p19853_p11 }
 0x25a   : > { %p16742_p2 = por %p16741_p4, %p16740_p13 }
 0x25b   : > { %p16738_p8 = pneg %p16737_p7 }
 0x25c   : > { %p16744_p10 = por %p16743_p5, %p16742_p2 }
 0x25e   : > { %p16745_p3 = pnand %p16744_p10, %p16738_p8 }
 0x260   : > { %16748 = shalt.err (!%p16745_p3)
}
 0x261   : > { %s16749_s7 = scalar_lea.vmem %s1012_s0, 32  ;;  %s16865_s22 = smov [#allocation33]  }
 0x262   : > { %p16750_p12 = scmp.ne.s32.totalorder %s1012_s0, %s16749_s7  ;;  %s16754_s5 = sshll.u32 %s16865_s22, 4  ;;  %s16755_s5 = int_to_ptr.vmem [resolvable:$false] %s16754_s5 }
 0x263   : > { %s16756_s27 = scalar_lea.vmem %s16755_s5, 64  ;;  %p16757_p0 = scmp.lt.s32.totalorder %s1012_s0, %s16755_s5 }
 0x264   : > { %p16752_p1 = pnand %p16750_p12, %p19853_p11  ;;  %p16758_p7 = scmp.lt.s32.totalorder %s16756_s27, %s16749_s7 }
 0x266   : > { %p16753_p6 = pneg %p16752_p1  ;;  %p16759_p9 = por %p16758_p7, %p16757_p0 }
 0x268   : > { %p16760_p4 = pnand %p16759_p9, %p16753_p6 }
 0x26a   : > { %16763 = shalt.err (!%p16760_p4)
}
 0x26b   : > { %p19858_p13 = scmp.ne.s32.totalorder %s19831_s29, 0  ;;  %s19859_s2 = sld [smem:[#allocation48_spill]] }
 0x26d   : > { %14344 = dma.hbm_to_vmem [thread:$0]  (!%p19858_p13), %s17565_s16, 32, %s1012_s0, %s1001_s18  }
 0x271   : > { %p19860_p8 = scmp.ne.s32.totalorder %s19859_s2, 0 }
 0x273   : > { %1020 = sbr.rel (%p19860_p8) target bundleno = 6947 (0x1b23), region = 132 }
 0x27a   : > { %p19861_p2 = scmp.eq.s32.totalorder %s17035_s10, 0 }
 0x27c   : > { %16781 = dma.done.wait (%p19861_p2), [#allocation5], 128   ;;  %p19862_p11 = pmov %p19861_p2 }
 0x27d   : > { %p19863_p5 = pmov %p19861_p2 }
 0x27e   : > { %16783 = vsyncadd (%p19862_p11), [#allocation5], 4294967168 }
 0x27f   : > { %16785 = dma.done.wait (%p19863_p5), [#allocation7], 2560   ;;  %p19864_p10 = pmov %p19861_p2 }
 0x280   : > { %p19865_p9 = pmov %p19861_p2 }
 0x281   : > { %16787 = vsyncadd (%p19864_p10), [#allocation7], 4294964736 }
 0x282   : > { %16789 = dma.done.wait (%p19865_p9), [#allocation10], 1536   ;;  %p19866_p3 = pmov %p19861_p2 }
 0x283   : > { %p19867_p12 = pmov %p19861_p2 }
 0x284   : > { %16791 = vsyncadd (%p19866_p3), [#allocation10], 4294965760 }
 0x285   : > { %16793 = dma.done.wait (%p19867_p12), [#allocation13], 13312   ;;  %p19868_p1 = pmov %p19861_p2 }
 0x287   : > { %16795 = vsyncadd (%p19868_p1), [#allocation13], 4294953984  ;;  %p19869_p6 = pmov %p19868_p1 }
 0x288   : > { %p19870_p0 = pmov %p19868_p1 }
 0x289   : > { %16797 = dma.done.wait (%p19869_p6), [#allocation16], 32800  }
 0x28a   : > { %16799 = vsyncadd (%p19870_p0), [#allocation16], 4294934496  ;;  %p19871_p7 = pmov %p19870_p0 }
 0x28b   : > { %p19872_p4 = pmov %p19870_p0 }
 0x28c   : > { %16801 = dma.done.wait (%p19871_p7), [#allocation19], 4128  }
 0x28d   : > { %16803 = vsyncadd (%p19872_p4), [#allocation19], 4294963168  ;;  %p19873_p13 = pmov %p19870_p0 }
 0x28e   : > { %p19874_p8 = pmov %p19870_p0 }
 0x28f   : > { %16805 = dma.done.wait (%p19873_p13), [#allocation22], 6176  }
 0x290   : > { %16807 = vsyncadd (%p19874_p8), [#allocation22], 4294961120  ;;  %p19875_p2 = pmov %p19870_p0 }
 0x291   : > { %p19876_p11 = pmov %p19870_p0 }
 0x292   : > { %16809 = dma.done.wait (%p19875_p2), [#allocation25], 2064  }
 0x293   : > { %16811 = vsyncadd (%p19876_p11), [#allocation25], 4294965232  ;;  %s19877_s29 = sld [smem:[#allocation46_spill]]  ;;  %s19878_s6 = sld [smem:[#allocation51_spill]] }
 0x294   : > { %s1082_s20 = sand.u32 1, %s17035_s10  }
 0x295   : > { %s1083_s4 = scalar_lea.sflag [#allocation28], %s1082_s20 }
 0x299   : > { %s1084_s26 = sand.u32 1, %s19877_s29   ;;  %p19879_p5 = scmp.ne.s32.totalorder %s19878_s6, 0 }
 0x29a   : > { %s14211_s25 = smul.u32 2560, %s1084_s26 }
 0x29c   : > { %s17621_s28 = scalar_lea.vmem [#allocation27], %s14211_s25 }
 0x29d   : > { %16813 = dma.done.wait (%p19879_p5), %s1083_s4, 45056  }
 0x29e   : > { %16815 = vsyncadd (%p19879_p5), %s1083_s4, 4294922240  ;;  %s12398_s21 = sshll.u32 %s1084_s26, 8  ;;  %s1101_s16 = scalar_lea.sflag [#allocation31], %s1082_s20 }
 0x29f   : > { %s17627_s8 = scalar_lea.vmem [#allocation29], %s12398_s21  ;;  %s17629_s15 = scalar_lea.vmem [#allocation30], %s12398_s21 }
 0x2a0   : > { %16817 = dma.done.wait (%p19879_p5), %s1101_s16, 4864  }
 0x2a1   : > { %16819 = vsyncadd (%p19879_p5), %s1101_s16, 4294962432  ;;  %s14212_s0 = smul.u32 48, %s1084_s26  ;;  %s12400_s18 = sshll.u32 %s1084_s26, 1 }
 0x2a2   : > { %s1119_s13 = scalar_lea.sflag [#allocation34], %s1084_s26  ;;  %s17637_s30 = scalar_lea.vmem [#allocation33], %s12400_s18 }
 0x2a3   : > { %s17635_s19 = scalar_lea.vmem [#allocation32], %s14212_s0 }
 0x2a4   : > { %16821 = dma.done.wait (%p19879_p5), %s1119_s13, 32  }
 0x2a5   : > { %16823 = vsyncadd (%p19879_p5), %s1119_s13, 4294967264  ;;  %p19880_p10 = scmp.ne.s32.totalorder %s17035_s10, 0 }
 0x2a6   : > { %v14432_v0 = vld [vmem:[#allocation14 + $0x4] ss:$8 sps:$4 sm:$0xff] (!%p19880_p10)   ;;  %v14436_v2 = vld [vmem:[#allocation14] ss:$8 sps:$4 sm:$0xff] (!%p19880_p10)   ;;  %v14438_v4 = vld [vmem:[#allocation14 + $0x14] ss:$8 sps:$4 sm:$0xff] (!%p19880_p10)  }
 0x2a7   : > { %1214 = sbr.rel (%p19880_p10) target bundleno = 1502 (0x5de), region = 216  ;;  %v14434_v1 = vld [vmem:[#allocation17 + $0x204] ss:$8 sps:$4 sm:$0xff] (!%p19880_p10)   ;;  %1875 = vmatprep.subr.bf16.mxu0 (!%p19880_p10), %v14432_v0  ;;  %v14437_v3 = vld [vmem:[#allocation17 + $0x200] ss:$8 sps:$4 sm:$0xff] (!%p19880_p10)   ;;  %s19881_s23 = sld [smem:[#allocation70_spill]] (!%p19880_p10) }
 0x2a8   : > { %3736 = vmatprep.subr.bf16.mxu1 (!%p19880_p10), %v14434_v1  ;;  %1876 = vmatpush1.bf16.msra.mxu0 (!%p19880_p10), %v14436_v2  ;;  %v14440_v5 = vld [vmem:[#allocation17 + $0x214] ss:$8 sps:$4 sm:$0xff] (!%p19880_p10)   ;;  %v14443_v7 = vld [vmem:[#allocation17 + $0x210] ss:$8 sps:$4 sm:$0xff] (!%p19880_p10)   ;;  %v14444_v8 = vld [vmem:[#allocation14 + $0x24] ss:$8 sps:$4 sm:$0xff] (!%p19880_p10)  }
 0x2a9   : > { %3737 = vmatpush1.bf16.msra.mxu1 (!%p19880_p10), %v14437_v3  ;;  %v14442_v6 = vld [vmem:[#allocation14 + $0x10] ss:$8 sps:$4 sm:$0xff] (!%p19880_p10)   ;;  %1877 = vmatprep.subr.bf16.mxu0 (!%p19880_p10), %v14438_v4  ;;  %v14448_v10 = vld [vmem:[#allocation14 + $0x20] ss:$8 sps:$4 sm:$0xff] (!%p19880_p10)   ;;  %v14450_v12 = vld [vmem:[#allocation14 + $0x34] ss:$8 sps:$4 sm:$0xff] (!%p19880_p10)  }
 0x2aa   : > { %3738 = vmatprep.subr.bf16.mxu1 (!%p19880_p10), %v14440_v5  ;;  %v14446_v9 = vld [vmem:[#allocation17 + $0x224] ss:$8 sps:$4 sm:$0xff] (!%p19880_p10)   ;;  %v14449_v11 = vld [vmem:[#allocation17 + $0x220] ss:$8 sps:$4 sm:$0xff] (!%p19880_p10)   ;;  %v14452_v13 = vld [vmem:[#allocation17 + $0x234] ss:$8 sps:$4 sm:$0xff] (!%p19880_p10)  }
 0x2ab   : > { %v14454_v14 = vld [vmem:[#allocation14 + $0x30] ss:$8 sps:$4 sm:$0xff] (!%p19880_p10)   ;;  %v14456_v16 = vld [vmem:[#allocation14 + $0x44] ss:$8 sps:$4 sm:$0xff] (!%p19880_p10)   ;;  %v14460_v18 = vld [vmem:[#allocation14 + $0x40] ss:$8 sps:$4 sm:$0xff] (!%p19880_p10)  }
 0x2ac   : > { %1878 = vmatpush1.bf16.msra.mxu0 (!%p19880_p10), %v14442_v6  ;;  %v14455_v15 = vld [vmem:[#allocation17 + $0x230] ss:$8 sps:$4 sm:$0xff] (!%p19880_p10)   ;;  %v14458_v17 = vld [vmem:[#allocation17 + $0x244] ss:$8 sps:$4 sm:$0xff] (!%p19880_p10)   ;;  %v14461_v19 = vld [vmem:[#allocation17 + $0x240] ss:$8 sps:$4 sm:$0xff] (!%p19880_p10)  }
 0x2ad   : > { %3739 = vmatpush1.bf16.msra.mxu1 (!%p19880_p10), %v14443_v7  ;;  %1879 = vmatprep.subr.bf16.mxu0 (!%p19880_p10), %v14444_v8  ;;  %v14462_v20 = vld [vmem:[#allocation14 + $0x54] ss:$8 sps:$4 sm:$0xff] (!%p19880_p10)   ;;  %v14466_v22 = vld [vmem:[#allocation14 + $0x50] ss:$8 sps:$4 sm:$0xff] (!%p19880_p10)   ;;  %v14468_v24 = vld [vmem:[#allocation14 + $0x64] ss:$8 sps:$4 sm:$0xff] (!%p19880_p10)  }
 0x2ae   : > { %3740 = vmatprep.subr.bf16.mxu1 %v14446_v9  ;;  %v14464_v21 = vld [vmem:[#allocation17 + $0x254] ss:$8 sps:$4 sm:$0xff]   ;;  %v14467_v23 = vld [vmem:[#allocation17 + $0x250] ss:$8 sps:$4 sm:$0xff]   ;;  %v14470_v25 = vld [vmem:[#allocation17 + $0x264] ss:$8 sps:$4 sm:$0xff]  }
 0x2af   : > { %v14472_v26 = vld [vmem:[#allocation14 + $0x60] ss:$8 sps:$4 sm:$0xff]   ;;  %v14474_v28 = vld [vmem:[#allocation14 + $0x74] ss:$8 sps:$4 sm:$0xff]   ;;  %v14478_v30 = vld [vmem:[#allocation14 + $0x70] ss:$8 sps:$4 sm:$0xff]  }
 0x2b0   : > { %1880 = vmatpush1.bf16.msra.mxu0 %v14448_v10  ;;  %v14473_v27 = vld [vmem:[#allocation17 + $0x260] ss:$8 sps:$4 sm:$0xff]   ;;  %v14476_v29 = vld [vmem:[#allocation17 + $0x274] ss:$8 sps:$4 sm:$0xff]   ;;  %v14479_v31 = vld [vmem:[#allocation17 + $0x270] ss:$8 sps:$4 sm:$0xff]  }
 0x2b1   : > { %3741 = vmatpush1.bf16.msra.mxu1 %v14449_v11  ;;  %1881 = vmatprep.subr.bf16.mxu0 %v14450_v12  ;;  %v14480_v32 = vld [vmem:[#allocation14 + $0x84] ss:$8 sps:$4 sm:$0xff]   ;;  %v14484_v34 = vld [vmem:[#allocation14 + $0x80] ss:$8 sps:$4 sm:$0xff]   ;;  %v14486_v36 = vld [vmem:[#allocation14 + $0x94] ss:$8 sps:$4 sm:$0xff]  }
 0x2b2   : > { %3742 = vmatprep.subr.bf16.mxu1 %v14452_v13  ;;  %v14482_v33 = vld [vmem:[#allocation17 + $0x284] ss:$8 sps:$4 sm:$0xff]   ;;  %v14485_v35 = vld [vmem:[#allocation17 + $0x280] ss:$8 sps:$4 sm:$0xff]   ;;  %v14488_v37 = vld [vmem:[#allocation17 + $0x294] ss:$8 sps:$4 sm:$0xff]  }
 0x2b3   : > { %v14490_v38 = vld [vmem:[#allocation14 + $0x90] ss:$8 sps:$4 sm:$0xff]   ;;  %v14492_v40 = vld [vmem:[#allocation14 + $0xa4] ss:$8 sps:$4 sm:$0xff]   ;;  %v14496_v42 = vld [vmem:[#allocation14 + $0xa0] ss:$8 sps:$4 sm:$0xff]  }
 0x2b4   : > { %1882 = vmatpush1.bf16.msra.mxu0 %v14454_v14  ;;  %v14491_v39 = vld [vmem:[#allocation17 + $0x290] ss:$8 sps:$4 sm:$0xff]   ;;  %v14494_v41 = vld [vmem:[#allocation17 + $0x2a4] ss:$8 sps:$4 sm:$0xff]   ;;  %v14497_v43 = vld [vmem:[#allocation17 + $0x2a0] ss:$8 sps:$4 sm:$0xff]  }
 0x2b5   : > { %3743 = vmatpush1.bf16.msra.mxu1 %v14455_v15  ;;  %1883 = vmatprep.subr.bf16.mxu0 %v14456_v16  ;;  %v14498_v44 = vld [vmem:[#allocation14 + $0xb4] ss:$8 sps:$4 sm:$0xff]   ;;  %v14502_v46 = vld [vmem:[#allocation14 + $0xb0] ss:$8 sps:$4 sm:$0xff]   ;;  %v14530_v48 = vld [vmem:[%s19881_s23 + $0x4] ss:$24 sps:$4 sm:$0xff]  }
 0x2b6   : > { %3744 = vmatprep.subr.bf16.mxu1 %v14458_v17  ;;  %v14500_v45 = vld [vmem:[#allocation17 + $0x2b4] ss:$8 sps:$4 sm:$0xff]   ;;  %v14503_v47 = vld [vmem:[#allocation17 + $0x2b0] ss:$8 sps:$4 sm:$0xff]   ;;  %v14504_v49 = vld [vmem:[#allocation14 + $0xc4] ss:$8 sps:$4 sm:$0xff]   ;;  %1907 = vmatprep.mubr.bf16.mxu0 %v14530_v48 }
 0x2b7   : > { %v14506_v50 = vld [vmem:[#allocation17 + $0x2c4] ss:$8 sps:$4 sm:$0xff]   ;;  %s19882_s5 = sld [smem:[#allocation71_spill]]  ;;  %v14509_v54 = vld [vmem:[#allocation17 + $0x2c0] ss:$8 sps:$4 sm:$0xff]  }
 0x2b8   : > { %1884 = vmatpush1.bf16.msra.mxu0 %v14460_v18  ;;  %v14508_v53 = vld [vmem:[#allocation14 + $0xc0] ss:$8 sps:$4 sm:$0xff]   ;;  %v14510_v55 = vld [vmem:[#allocation14 + $0xd4] ss:$8 sps:$4 sm:$0xff]   ;;  %v14514_v57 = vld [vmem:[#allocation14 + $0xd0] ss:$8 sps:$4 sm:$0xff]  }
 0x2b9   : > { %3745 = vmatpush1.bf16.msra.mxu1 %v14461_v19  ;;  %1885 = vmatprep.subr.bf16.mxu0 %v14462_v20  ;;  %v14512_v56 = vld [vmem:[#allocation17 + $0x2d4] ss:$8 sps:$4 sm:$0xff]   ;;  %v14515_v58 = vld [vmem:[#allocation17 + $0x2d0] ss:$8 sps:$4 sm:$0xff]   ;;  %v14516_v59 = vld [vmem:[#allocation14 + $0xe4] ss:$8 sps:$4 sm:$0xff]  }
 0x2ba   : > { %3746 = vmatprep.subr.bf16.mxu1 %v14464_v21  ;;  %v14518_v60 = vld [vmem:[#allocation17 + $0x2e4] ss:$8 sps:$4 sm:$0xff]   ;;  %v14521_v62 = vld [vmem:[#allocation17 + $0x2e0] ss:$8 sps:$4 sm:$0xff]   ;;  %v14522_v63 = vld [vmem:[#allocation14 + $0xf4] ss:$8 sps:$4 sm:$0xff]  }
 0x2bb   : > { %v14520_v61 = vld [vmem:[#allocation14 + $0xe0] ss:$8 sps:$4 sm:$0xff]   ;;  %v14526_v1 = vld [vmem:[#allocation14 + $0xf0] ss:$8 sps:$4 sm:$0xff]   ;;  %v14533_v3 = vld [vmem:[#allocation14 + $0x104] ss:$8 sps:$4 sm:$0xff]  }
 0x2bc   : > { %1886 = vmatpush1.bf16.msra.mxu0 %v14466_v22  ;;  %v14524_v0 = vld [vmem:[#allocation17 + $0x2f4] ss:$8 sps:$4 sm:$0xff]   ;;  %v14527_v2 = vld [vmem:[#allocation17 + $0x2f0] ss:$8 sps:$4 sm:$0xff]   ;;  %v14538_v4 = vld [vmem:[#allocation17 + $0x304] ss:$8 sps:$4 sm:$0xff]  }
 0x2bd   : > { %3747 = vmatpush1.bf16.msra.mxu1 %v14467_v23  ;;  %1887 = vmatprep.subr.bf16.mxu0 %v14468_v24  ;;  %s19883_s27 = smov %s19882_s5  ;;  %v2044_v51 = vld [vmem:[%s19882_s5 + $0x10] sm:$0xff]  ;;  %v14528_v5 = vld [vmem:[%s19881_s23] ss:$24 sps:$4 sm:$0xff]   ;;  %v14547_v13 = vld [vmem:[#allocation14 + $0x124] ss:$8 sps:$4 sm:$0xff]  }
 0x2be   : > { %3748 = vmatprep.subr.bf16.mxu1 %v14470_v25  ;;  %v12515_v52 = vcombine.high %v2044_v51, %v2044_v51  ;;  %v14531_v6 = vld [vmem:[#allocation14 + $0x100] ss:$8 sps:$4 sm:$0xff]   ;;  %v12514_v7 = vcombine.low %v2044_v51, %v2044_v51  ;;  %v14541_v9 = vld [vmem:[#allocation14 + $0x114] ss:$8 sps:$4 sm:$0xff]   ;;  %v14539_v11 = vld [vmem:[#allocation14 + $0x110] ss:$8 sps:$4 sm:$0xff]  }
 0x2bf   : > { %v14536_v8 = vld [vmem:[#allocation17 + $0x300] ss:$8 sps:$4 sm:$0xff]   ;;  %v14544_v10 = vld [vmem:[#allocation17 + $0x314] ss:$8 sps:$4 sm:$0xff]   ;;  %v14542_v12 = vld [vmem:[#allocation17 + $0x310] ss:$8 sps:$4 sm:$0xff]  }
 0x2c0   : > { %1888 = vmatpush1.bf16.msra.mxu0 %v14472_v26  ;;  %3768 = vmatprep.mubr.bf16.mxu1 %v12515_v52  ;;  %v14550_v14 = vld [vmem:[#allocation17 + $0x324] ss:$8 sps:$4 sm:$0xff]   ;;  %v14548_v16 = vld [vmem:[#allocation17 + $0x320] ss:$8 sps:$4 sm:$0xff]   ;;  %v14553_v17 = vld [vmem:[#allocation14 + $0x134] ss:$8 sps:$4 sm:$0xff]  }
 0x2c1   : > { %3749 = vmatpush1.bf16.msra.mxu1 %v14473_v27  ;;  %1889 = vmatprep.subr.bf16.mxu0 %v14474_v28  ;;  %v14545_v15 = vld [vmem:[#allocation14 + $0x120] ss:$8 sps:$4 sm:$0xff]   ;;  %v14551_v19 = vld [vmem:[#allocation14 + $0x130] ss:$8 sps:$4 sm:$0xff]   ;;  %v14559_v21 = vld [vmem:[#allocation14 + $0x144] ss:$8 sps:$4 sm:$0xff]  }
 0x2c2   : > { %3750 = vmatprep.subr.bf16.mxu1 %v14476_v29  ;;  %v14556_v18 = vld [vmem:[#allocation17 + $0x334] ss:$8 sps:$4 sm:$0xff]   ;;  %v14554_v20 = vld [vmem:[#allocation17 + $0x330] ss:$8 sps:$4 sm:$0xff]   ;;  %v14562_v22 = vld [vmem:[#allocation17 + $0x344] ss:$8 sps:$4 sm:$0xff]  }
 0x2c3   : > { %v14557_v23 = vld [vmem:[#allocation14 + $0x140] ss:$8 sps:$4 sm:$0xff]   ;;  %v14565_v25 = vld [vmem:[#allocation14 + $0x154] ss:$8 sps:$4 sm:$0xff]   ;;  %v14563_v28 = vld [vmem:[#allocation14 + $0x150] ss:$8 sps:$4 sm:$0xff]  }
 0x2c4   : > { %1890 = vmatpush1.bf16.msra.mxu0 %v14478_v30  ;;  %v14560_v24 = vld [vmem:[#allocation17 + $0x340] ss:$8 sps:$4 sm:$0xff]   ;;  %v14568_v26 = vld [vmem:[#allocation17 + $0x354] ss:$8 sps:$4 sm:$0xff]   ;;  %v14566_v29 = vld [vmem:[#allocation17 + $0x350] ss:$8 sps:$4 sm:$0xff]  }
 0x2c5   : > { %3751 = vmatpush1.bf16.msra.mxu1 %v14479_v31  ;;  %1891 = vmatprep.subr.bf16.mxu0 %v14480_v32  ;;  %v14617_v27 = vld [vmem:[%s19881_s23 + $0x34] ss:$24 sps:$4 sm:$0xff]   ;;  %v14571_v30 = vld [vmem:[#allocation14 + $0x164] ss:$8 sps:$4 sm:$0xff]   ;;  %v14625_v32 = vld [vmem:[%s19881_s23 + $0x30] ss:$24 sps:$4 sm:$0xff]  }
 0x2c6   : > { %3752 = vmatprep.subr.bf16.mxu1 %v14482_v33  ;;  %v14574_v31 = vld [vmem:[#allocation17 + $0x364] ss:$8 sps:$4 sm:$0xff]  }
 0x2c7   : > { %v14569_v33 = vld [vmem:[#allocation14 + $0x160] ss:$8 sps:$4 sm:$0xff]   ;;  %v14587_v48 = vld [vmem:[#allocation14 + $0x190] ss:$8 sps:$4 sm:$0xff]  }
 0x2c8   : > { %1892 = vmatpush1.bf16.msra.mxu0 %v14484_v34  ;;  %v14572_v34 = vld [vmem:[#allocation17 + $0x360] ss:$8 sps:$4 sm:$0xff]   ;;  %v14598_v51 = vld [vmem:[#allocation17 + $0x3a4] ss:$8 sps:$4 sm:$0xff]  }
 0x2c9   : > { %3753 = vmatpush1.bf16.msra.mxu1 %v14485_v35  ;;  %1893 = vmatprep.subr.bf16.mxu0 %v14486_v36  ;;  %v14577_v35 = vld [vmem:[#allocation14 + $0x174] ss:$8 sps:$4 sm:$0xff]   ;;  %v14593_v52 = vld [vmem:[#allocation14 + $0x1a0] ss:$8 sps:$4 sm:$0xff]  }
 0x2ca   : > { %3754 = vmatprep.subr.bf16.mxu1 %v14488_v37  ;;  %v14580_v36 = vld [vmem:[#allocation17 + $0x374] ss:$8 sps:$4 sm:$0xff]  }
 0x2cb   : > { %v14634_v37 = vld [vmem:[%s19881_s23 + $0xc] ss:$24 sps:$4 sm:$0xff]  }
 0x2cc   : > { %1894 = vmatpush1.bf16.msra.mxu0 %v14490_v38  ;;  %v17666_v38 = vld [vmem:[%s19883_s27 + $0x18] sm:$0xff] }
 0x2cd   : > { %3755 = vmatpush1.bf16.msra.mxu1 %v14491_v39  ;;  %1895 = vmatprep.subr.bf16.mxu0 %v14492_v40  ;;  %v14575_v39 = vld [vmem:[#allocation14 + $0x170] ss:$8 sps:$4 sm:$0xff]  }
 0x2ce   : > { %3756 = vmatprep.subr.bf16.mxu1 %v14494_v41  ;;  %v14578_v40 = vld [vmem:[#allocation17 + $0x370] ss:$8 sps:$4 sm:$0xff]   ;;  %v12517_v41 = vcombine.high %v17666_v38, %v17666_v38 }
 0x2d0   : > { %1896 = vmatpush1.bf16.msra.mxu0 %v14496_v42  ;;  %v14583_v42 = vld [vmem:[#allocation14 + $0x184] ss:$8 sps:$4 sm:$0xff]  }
 0x2d1   : > { %3757 = vmatpush1.bf16.msra.mxu1 %v14497_v43  ;;  %1897 = vmatprep.subr.bf16.mxu0 %v14498_v44  ;;  %v14586_v43 = vld [vmem:[#allocation17 + $0x384] ss:$8 sps:$4 sm:$0xff]  }
 0x2d2   : > { %3758 = vmatprep.subr.bf16.mxu1 %v14500_v45  ;;  %v14581_v44 = vld [vmem:[#allocation14 + $0x180] ss:$8 sps:$4 sm:$0xff]  }
 0x2d3   : > { %v14584_v45 = vld [vmem:[#allocation17 + $0x380] ss:$8 sps:$4 sm:$0xff]  }
 0x2d4   : > { %1898 = vmatpush1.bf16.msra.mxu0 %v14502_v46  ;;  %v14589_v46 = vld [vmem:[#allocation14 + $0x194] ss:$8 sps:$4 sm:$0xff]  }
 0x2d5   : > { %3759 = vmatpush1.bf16.msra.mxu1 %v14503_v47  ;;  %1899 = vmatprep.subr.bf16.mxu0 %v14504_v49  ;;  %v14592_v47 = vld [vmem:[#allocation17 + $0x394] ss:$8 sps:$4 sm:$0xff]   ;;  %v14590_v49 = vld [vmem:[#allocation17 + $0x390] ss:$8 sps:$4 sm:$0xff]  }
 0x2d6   : > { %3760 = vmatprep.subr.bf16.mxu1 %v14506_v50  ;;  %v14595_v50 = vld [vmem:[#allocation14 + $0x1a4] ss:$8 sps:$4 sm:$0xff]  }
 0x2d8   : > { %1900 = vmatpush1.bf16.msra.mxu0 %v14508_v53  ;;  %v14596_v53 = vld [vmem:[#allocation17 + $0x3a0] ss:$8 sps:$4 sm:$0xff]  }
 0x2d9   : > { %3761 = vmatpush1.bf16.msra.mxu1 %v14509_v54  ;;  %1901 = vmatprep.subr.bf16.mxu0 %v14510_v55  ;;  %v14601_v54 = vld [vmem:[#allocation14 + $0x1b4] ss:$8 sps:$4 sm:$0xff]  }
 0x2da   : > { %3762 = vmatprep.subr.bf16.mxu1 %v14512_v56  ;;  %v14604_v55 = vld [vmem:[#allocation17 + $0x3b4] ss:$8 sps:$4 sm:$0xff]  }
 0x2db   : > { %v14599_v56 = vld [vmem:[#allocation14 + $0x1b0] ss:$8 sps:$4 sm:$0xff]  }
 0x2dc   : > { %1902 = vmatpush1.bf16.msra.mxu0 %v14514_v57  ;;  %v14602_v57 = vld [vmem:[#allocation17 + $0x3b0] ss:$8 sps:$4 sm:$0xff]  }
 0x2dd   : > { %3763 = vmatpush1.bf16.msra.mxu1 %v14515_v58  ;;  %1903 = vmatprep.subr.bf16.mxu0 %v14516_v59  ;;  %v14607_v58 = vld [vmem:[#allocation14 + $0x1c4] ss:$8 sps:$4 sm:$0xff]  }
 0x2de   : > { %3764 = vmatprep.subr.bf16.mxu1 %v14518_v60  ;;  %v14610_v59 = vld [vmem:[#allocation17 + $0x3c4] ss:$8 sps:$4 sm:$0xff]  }
 0x2df   : > { %v14605_v60 = vld [vmem:[#allocation14 + $0x1c0] ss:$8 sps:$4 sm:$0xff]  }
 0x2e0   : > { %1904 = vmatpush1.bf16.msra.mxu0 %v14520_v61  ;;  %v14608_v61 = vld [vmem:[#allocation17 + $0x3c0] ss:$8 sps:$4 sm:$0xff]  }
 0x2e1   : > { %3765 = vmatpush1.bf16.msra.mxu1 %v14521_v62  ;;  %1905 = vmatprep.subr.bf16.mxu0 %v14522_v63  ;;  %v14613_v62 = vld [vmem:[#allocation14 + $0x1d4] ss:$8 sps:$4 sm:$0xff]  }
 0x2e2   : > { %3766 = vmatprep.subr.bf16.mxu1 %v14524_v0  ;;  %v14616_v63 = vld [vmem:[#allocation17 + $0x3d4] ss:$8 sps:$4 sm:$0xff]  }
 0x2e3   : > { %v14611_v0 = vld [vmem:[#allocation14 + $0x1d0] ss:$8 sps:$4 sm:$0xff]  }
 0x2e4   : > { %1906 = vmatpush1.bf16.msra.mxu0 %v14526_v1  ;;  %v14614_v1 = vld [vmem:[#allocation17 + $0x3d0] ss:$8 sps:$4 sm:$0xff]  }
 0x2e5   : > { %3767 = vmatpush1.bf16.msra.mxu1 %v14527_v2  ;;  %1928 = vmatprep.subr.bf16.mxu0 %v14533_v3  ;;  %v14621_v2 = vld [vmem:[#allocation14 + $0x1e4] ss:$8 sps:$4 sm:$0xff]  }
 0x2e6   : > { %3777 = vmatprep.subr.bf16.mxu1 %v14538_v4  ;;  %v14624_v3 = vld [vmem:[#allocation17 + $0x3e4] ss:$8 sps:$4 sm:$0xff]  }
 0x2e7   : > { %1908 = vmatmul.mubr.bf16.vlgmr.msra.gmra.mrb[0].mxu0 %v14528_v5  ;;  %v14619_v4 = vld [vmem:[#allocation14 + $0x1e0] ss:$8 sps:$4 sm:$0xff]  }
 0x2e8   : > { %3769 = vmatmul.mubr.bf16.vlgmr.msra.gmra.mrb[0].mxu1 %v12514_v7  ;;  %1929 = vmatpush1.bf16.msra.mxu0 %v14531_v6  ;;  %v14622_v5 = vld [vmem:[#allocation17 + $0x3e0] ss:$8 sps:$4 sm:$0xff]   ;;  %v14628_v6 = vld [vmem:[#allocation14 + $0x1f4] ss:$8 sps:$4 sm:$0xff]  }
 0x2e9   : > { %3778 = vmatpush1.bf16.msra.mxu1 %v14536_v8  ;;  %1930 = vmatprep.subr.bf16.mxu0 %v14541_v9  ;;  %v14631_v7 = vld [vmem:[#allocation17 + $0x3f4] ss:$8 sps:$4 sm:$0xff]   ;;  %v14629_v9 = vld [vmem:[#allocation17 + $0x3f0] ss:$8 sps:$4 sm:$0xff]  }
 0x2ea   : > { %3779 = vmatprep.subr.bf16.mxu1 %v14544_v10  ;;  %1917 = vmatprep.mubr.bf16.mxu0 %v14617_v27  ;;  %v14626_v8 = vld [vmem:[#allocation14 + $0x1f0] ss:$8 sps:$4 sm:$0xff]   ;;  %v14637_v10 = vld [vmem:[#allocation14 + $0x204] ss:$8 sps:$4 sm:$0xff]  }
 0x2eb   : > { %3809 = vmatprep.mubr.bf16.mxu1 %v12517_v41  ;;  %v17684_v27 = vld [vmem:[%s19883_s27 + $0x20] sm:$0xff] }
 0x2ec   : > { %1931 = vmatpush1.bf16.msra.mxu0 %v14539_v11  ;;  %v14642_v11 = vld [vmem:[#allocation17 + $0x404] ss:$8 sps:$4 sm:$0xff]  }
 0x2ed   : > { %3780 = vmatpush1.bf16.msra.mxu1 %v14542_v12  ;;  %1932 = vmatprep.subr.bf16.mxu0 %v14547_v13  ;;  %v14632_v12 = vld [vmem:[%s19881_s23 + $0x8] ss:$24 sps:$4 sm:$0xff]   ;;  %v12516_v13 = vcombine.low %v17666_v38, %v17666_v38  ;;  %v14672_v38 = vld [vmem:[#allocation17 + $0x454] ss:$8 sps:$4 sm:$0xff]   ;;  %v14675_v41 = vld [vmem:[#allocation14 + $0x264] ss:$8 sps:$4 sm:$0xff]  }
 0x2ee   : > { %3781 = vmatprep.subr.bf16.mxu1 %v14550_v14  ;;  %v14635_v14 = vld [vmem:[#allocation14 + $0x200] ss:$8 sps:$4 sm:$0xff]  }
 0x2ef   : > { %1918 = vmatmul.mubr.bf16.gmra.mrb[4].mxu0 %v14625_v32  ;;  %v14658_v32 = vld [vmem:[#allocation17 + $0x430] ss:$8 sps:$4 sm:$0xff]  }
 0x2f0   : > { %1933 = vmatpush1.bf16.msra.mxu0 %v14545_v15  ;;  %1960 = vmatprep.mubr.bf16.mxu0 %v14634_v37  ;;  %v14640_v15 = vld [vmem:[#allocation17 + $0x400] ss:$8 sps:$4 sm:$0xff]   ;;  %v14669_v37 = vld [vmem:[#allocation14 + $0x254] ss:$8 sps:$4 sm:$0xff]  }
 0x2f1   : > { %3782 = vmatpush1.bf16.msra.mxu1 %v14548_v16  ;;  %1934 = vmatprep.subr.bf16.mxu0 %v14553_v17  ;;  %v14645_v16 = vld [vmem:[#allocation14 + $0x214] ss:$8 sps:$4 sm:$0xff]  }
 0x2f2   : > { %3783 = vmatprep.subr.bf16.mxu1 %v14556_v18  ;;  %v14648_v17 = vld [vmem:[#allocation17 + $0x414] ss:$8 sps:$4 sm:$0xff]  }
 0x2f3   : > { %v14721_v18 = vld [vmem:[%s19881_s23 + $0x3c] ss:$24 sps:$4 sm:$0xff]  }
 0x2f4   : > { %1935 = vmatpush1.bf16.msra.mxu0 %v14551_v19  ;;  %v14643_v19 = vld [vmem:[#allocation14 + $0x210] ss:$8 sps:$4 sm:$0xff]  }
 0x2f5   : > { %3784 = vmatpush1.bf16.msra.mxu1 %v14554_v20  ;;  %1936 = vmatprep.subr.bf16.mxu0 %v14559_v21  ;;  %v14646_v20 = vld [vmem:[#allocation17 + $0x410] ss:$8 sps:$4 sm:$0xff]   ;;  %v14651_v21 = vld [vmem:[#allocation14 + $0x224] ss:$8 sps:$4 sm:$0xff]  }
 0x2f6   : > { %3785 = vmatprep.subr.bf16.mxu1 %v14562_v22  ;;  %v14654_v22 = vld [vmem:[#allocation17 + $0x424] ss:$8 sps:$4 sm:$0xff]  }
 0x2f8   : > { %1937 = vmatpush1.bf16.msra.mxu0 %v14557_v23  ;;  %v14649_v23 = vld [vmem:[#allocation14 + $0x220] ss:$8 sps:$4 sm:$0xff]  }
 0x2f9   : > { %3786 = vmatpush1.bf16.msra.mxu1 %v14560_v24  ;;  %1938 = vmatprep.subr.bf16.mxu0 %v14565_v25  ;;  %v14723_v24 = vld [vmem:[%s19881_s23 + $0x38] ss:$24 sps:$4 sm:$0xff]  }
 0x2fa   : > { %3787 = vmatprep.subr.bf16.mxu1 %v14568_v26  ;;  %v14652_v25 = vld [vmem:[#allocation17 + $0x420] ss:$8 sps:$4 sm:$0xff]   ;;  %v14657_v26 = vld [vmem:[#allocation14 + $0x234] ss:$8 sps:$4 sm:$0xff]  }
 0x2fc   : > { %1939 = vmatpush1.bf16.msra.mxu0 %v14563_v28  ;;  %v14660_v28 = vld [vmem:[#allocation17 + $0x434] ss:$8 sps:$4 sm:$0xff]  }
 0x2fd   : > { %3788 = vmatpush1.bf16.msra.mxu1 %v14566_v29  ;;  %1940 = vmatprep.subr.bf16.mxu0 %v14571_v30  ;;  %v12519_v29 = vcombine.high %v17684_v27, %v17684_v27  ;;  %v14738_v30 = vld [vmem:[%s19881_s23 + $0x14] ss:$24 sps:$4 sm:$0xff]  }
 0x2fe   : > { %3789 = vmatprep.subr.bf16.mxu1 %v14574_v31  ;;  %v14655_v31 = vld [vmem:[#allocation14 + $0x230] ss:$8 sps:$4 sm:$0xff]  }
 0x300   : > { %1941 = vmatpush1.bf16.msra.mxu0 %v14569_v33  ;;  %v14663_v33 = vld [vmem:[#allocation14 + $0x244] ss:$8 sps:$4 sm:$0xff]  }
 0x301   : > { %3790 = vmatpush1.bf16.msra.mxu1 %v14572_v34  ;;  %1942 = vmatprep.subr.bf16.mxu0 %v14577_v35  ;;  %v14666_v34 = vld [vmem:[#allocation17 + $0x444] ss:$8 sps:$4 sm:$0xff]  }
 0x302   : > { %3791 = vmatprep.subr.bf16.mxu1 %v14580_v36  ;;  %v14661_v35 = vld [vmem:[#allocation14 + $0x240] ss:$8 sps:$4 sm:$0xff]  }
 0x303   : > { %v14664_v36 = vld [vmem:[#allocation17 + $0x440] ss:$8 sps:$4 sm:$0xff]  }
 0x304   : > { %1943 = vmatpush1.bf16.msra.mxu0 %v14575_v39  ;;  %v14667_v39 = vld [vmem:[#allocation14 + $0x250] ss:$8 sps:$4 sm:$0xff]  }
 0x305   : > { %3792 = vmatpush1.bf16.msra.mxu1 %v14578_v40  ;;  %1944 = vmatprep.subr.bf16.mxu0 %v14583_v42  ;;  %v14670_v40 = vld [vmem:[#allocation17 + $0x450] ss:$8 sps:$4 sm:$0xff]   ;;  %v14678_v42 = vld [vmem:[#allocation17 + $0x464] ss:$8 sps:$4 sm:$0xff]  }
 0x306   : > { %3793 = vmatprep.subr.bf16.mxu1 %v14586_v43  ;;  %v14673_v43 = vld [vmem:[#allocation14 + $0x260] ss:$8 sps:$4 sm:$0xff]  }
 0x308   : > { %1945 = vmatpush1.bf16.msra.mxu0 %v14581_v44  ;;  %v14676_v44 = vld [vmem:[#allocation17 + $0x460] ss:$8 sps:$4 sm:$0xff]  }
 0x309   : > { %3794 = vmatpush1.bf16.msra.mxu1 %v14584_v45  ;;  %1946 = vmatprep.subr.bf16.mxu0 %v14589_v46  ;;  %v14681_v45 = vld [vmem:[#allocation14 + $0x274] ss:$8 sps:$4 sm:$0xff]  }
 0x30a   : > { %3795 = vmatprep.subr.bf16.mxu1 %v14592_v47  ;;  %v14684_v46 = vld [vmem:[#allocation17 + $0x474] ss:$8 sps:$4 sm:$0xff]  }
 0x30b   : > { %v14679_v47 = vld [vmem:[#allocation14 + $0x270] ss:$8 sps:$4 sm:$0xff]  }
 0x30c   : > { %1947 = vmatpush1.bf16.msra.mxu0 %v14587_v48  ;;  %v14682_v48 = vld [vmem:[#allocation17 + $0x470] ss:$8 sps:$4 sm:$0xff]  }
 0x30d   : > { %3796 = vmatpush1.bf16.msra.mxu1 %v14590_v49  ;;  %1948 = vmatprep.subr.bf16.mxu0 %v14595_v50  ;;  %v14687_v49 = vld [vmem:[#allocation14 + $0x284] ss:$8 sps:$4 sm:$0xff]  }
 0x30e   : > { %3797 = vmatprep.subr.bf16.mxu1 %v14598_v51  ;;  %v14690_v50 = vld [vmem:[#allocation17 + $0x484] ss:$8 sps:$4 sm:$0xff]  }
 0x30f   : > { %v14685_v51 = vld [vmem:[#allocation14 + $0x280] ss:$8 sps:$4 sm:$0xff]  }
 0x310   : > { %1949 = vmatpush1.bf16.msra.mxu0 %v14593_v52  ;;  %v14688_v52 = vld [vmem:[#allocation17 + $0x480] ss:$8 sps:$4 sm:$0xff]  }
 0x311   : > { %3798 = vmatpush1.bf16.msra.mxu1 %v14596_v53  ;;  %1950 = vmatprep.subr.bf16.mxu0 %v14601_v54  ;;  %v14693_v53 = vld [vmem:[#allocation14 + $0x294] ss:$8 sps:$4 sm:$0xff]  }
 0x312   : > { %3799 = vmatprep.subr.bf16.mxu1 %v14604_v55  ;;  %v14696_v54 = vld [vmem:[#allocation17 + $0x494] ss:$8 sps:$4 sm:$0xff]  }
 0x313   : > { %v14691_v55 = vld [vmem:[#allocation14 + $0x290] ss:$8 sps:$4 sm:$0xff]  }
 0x314   : > { %1951 = vmatpush1.bf16.msra.mxu0 %v14599_v56  ;;  %v14694_v56 = vld [vmem:[#allocation17 + $0x490] ss:$8 sps:$4 sm:$0xff]  }
 0x315   : > { %3800 = vmatpush1.bf16.msra.mxu1 %v14602_v57  ;;  %1952 = vmatprep.subr.bf16.mxu0 %v14607_v58  ;;  %v14699_v57 = vld [vmem:[#allocation14 + $0x2a4] ss:$8 sps:$4 sm:$0xff]  }
 0x316   : > { %3801 = vmatprep.subr.bf16.mxu1 %v14610_v59  ;;  %v14702_v58 = vld [vmem:[#allocation17 + $0x4a4] ss:$8 sps:$4 sm:$0xff]  }
 0x317   : > { %v14697_v59 = vld [vmem:[#allocation14 + $0x2a0] ss:$8 sps:$4 sm:$0xff]  }
 0x318   : > { %1953 = vmatpush1.bf16.msra.mxu0 %v14605_v60  ;;  %v14700_v60 = vld [vmem:[#allocation17 + $0x4a0] ss:$8 sps:$4 sm:$0xff]  }
 0x319   : > { %3802 = vmatpush1.bf16.msra.mxu1 %v14608_v61  ;;  %1954 = vmatprep.subr.bf16.mxu0 %v14613_v62  ;;  %v14705_v61 = vld [vmem:[#allocation14 + $0x2b4] ss:$8 sps:$4 sm:$0xff]  }
 0x31a   : > { %3803 = vmatprep.subr.bf16.mxu1 %v14616_v63  ;;  %v14708_v62 = vld [vmem:[#allocation17 + $0x4b4] ss:$8 sps:$4 sm:$0xff]  }
 0x31b   : > { %v14703_v63 = vld [vmem:[#allocation14 + $0x2b0] ss:$8 sps:$4 sm:$0xff]  }
 0x31c   : > { %1955 = vmatpush1.bf16.msra.mxu0 %v14611_v0  ;;  %v14706_v0 = vld [vmem:[#allocation17 + $0x4b0] ss:$8 sps:$4 sm:$0xff]  }
 0x31d   : > { %3804 = vmatpush1.bf16.msra.mxu1 %v14614_v1  ;;  %1956 = vmatprep.subr.bf16.mxu0 %v14621_v2  ;;  %v14711_v1 = vld [vmem:[#allocation14 + $0x2c4] ss:$8 sps:$4 sm:$0xff]  }
 0x31e   : > { %3805 = vmatprep.subr.bf16.mxu1 %v14624_v3  ;;  %v14714_v2 = vld [vmem:[#allocation17 + $0x4c4] ss:$8 sps:$4 sm:$0xff]  }
 0x31f   : > { %v14709_v3 = vld [vmem:[#allocation14 + $0x2c0] ss:$8 sps:$4 sm:$0xff]  }
 0x320   : > { %1957 = vmatpush1.bf16.msra.mxu0 %v14619_v4  ;;  %v14712_v4 = vld [vmem:[#allocation17 + $0x4c0] ss:$8 sps:$4 sm:$0xff]  }
 0x321   : > { %3806 = vmatpush1.bf16.msra.mxu1 %v14622_v5  ;;  %1958 = vmatprep.subr.bf16.mxu0 %v14628_v6  ;;  %v14717_v5 = vld [vmem:[#allocation14 + $0x2d4] ss:$8 sps:$4 sm:$0xff]  }
 0x322   : > { %3807 = vmatprep.subr.bf16.mxu1 %v14631_v7  ;;  %v14720_v6 = vld [vmem:[#allocation17 + $0x4d4] ss:$8 sps:$4 sm:$0xff]  }
 0x323   : > { %v14715_v7 = vld [vmem:[#allocation14 + $0x2d0] ss:$8 sps:$4 sm:$0xff]  }
 0x324   : > { %1959 = vmatpush1.bf16.msra.mxu0 %v14626_v8  ;;  %v14718_v8 = vld [vmem:[#allocation17 + $0x4d0] ss:$8 sps:$4 sm:$0xff]  }
 0x325   : > { %3808 = vmatpush1.bf16.msra.mxu1 %v14629_v9  ;;  %1981 = vmatprep.subr.bf16.mxu0 %v14637_v10  ;;  %v14726_v9 = vld [vmem:[#allocation14 + $0x2e4] ss:$8 sps:$4 sm:$0xff]  }
 0x326   : > { %3818 = vmatprep.subr.bf16.mxu1 %v14642_v11  ;;  %v14729_v10 = vld [vmem:[#allocation17 + $0x4e4] ss:$8 sps:$4 sm:$0xff]  }
 0x327   : > { %1961 = vmatmul.mubr.bf16.vlgmr.msra.gmra.mrb[0].mxu0 %v14632_v12  ;;  %v14724_v11 = vld [vmem:[#allocation14 + $0x2e0] ss:$8 sps:$4 sm:$0xff]  }
 0x328   : > { %3810 = vmatmul.mubr.bf16.vlgmr.msra.gmra.mrb[0].mxu1 %v12516_v13  ;;  %1982 = vmatpush1.bf16.msra.mxu0 %v14635_v14  ;;  %v14727_v12 = vld [vmem:[#allocation17 + $0x4e0] ss:$8 sps:$4 sm:$0xff]   ;;  %v14732_v13 = vld [vmem:[#allocation14 + $0x2f4] ss:$8 sps:$4 sm:$0xff]  }
 0x329   : > { %3819 = vmatpush1.bf16.msra.mxu1 %v14640_v15  ;;  %1983 = vmatprep.subr.bf16.mxu0 %v14645_v16  ;;  %v14735_v14 = vld [vmem:[#allocation17 + $0x4f4] ss:$8 sps:$4 sm:$0xff]   ;;  %v14733_v16 = vld [vmem:[#allocation17 + $0x4f0] ss:$8 sps:$4 sm:$0xff]  }
 0x32a   : > { %3820 = vmatprep.subr.bf16.mxu1 %v14648_v17  ;;  %1970 = vmatprep.mubr.bf16.mxu0 %v14721_v18  ;;  %v14730_v15 = vld [vmem:[#allocation14 + $0x2f0] ss:$8 sps:$4 sm:$0xff]  }
 0x32b   : > { %3850 = vmatprep.mubr.bf16.mxu1 %v12519_v29  ;;  %v14741_v17 = vld [vmem:[#allocation17 + $0x4] ss:$8 sps:$4 sm:$0xff]   ;;  %v14750_v29 = vld [vmem:[#allocation17 + $0x510] ss:$8 sps:$4 sm:$0xff]  }
 0x32c   : > { %1984 = vmatpush1.bf16.msra.mxu0 %v14643_v19  ;;  %v14746_v18 = vld [vmem:[#allocation17 + $0x504] ss:$8 sps:$4 sm:$0xff]  }
 0x32d   : > { %3821 = vmatpush1.bf16.msra.mxu1 %v14646_v20  ;;  %1985 = vmatprep.subr.bf16.mxu0 %v14651_v21  ;;  %v14736_v19 = vld [vmem:[%s19881_s23 + $0x10] ss:$24 sps:$4 sm:$0xff]   ;;  %v14739_v20 = vld [vmem:[#allocation17] ss:$8 sps:$4 sm:$0xff]   ;;  %v12518_v21 = vcombine.low %v17684_v27, %v17684_v27 }
 0x32e   : > { %3822 = vmatprep.subr.bf16.mxu1 %v14654_v22  ;;  %v17699_v22 = vld [vmem:[%s19883_s27 + $0x28] sm:$0xff] }
 0x32f   : > { %1971 = vmatmul.mubr.bf16.gmra.mrb[4].mxu0 %v14723_v24  ;;  %v14749_v24 = vld [vmem:[#allocation17 + $0x14] ss:$8 sps:$4 sm:$0xff]   ;;  %v14747_v27 = vld [vmem:[#allocation17 + $0x10] ss:$8 sps:$4 sm:$0xff]  }
 0x330   : > { %1986 = vmatpush1.bf16.msra.mxu0 %v14649_v23  ;;  %2013 = vmatprep.mubr.bf16.mxu0 %v14738_v30  ;;  %v14744_v23 = vld [vmem:[#allocation17 + $0x500] ss:$8 sps:$4 sm:$0xff]   ;;  %v14758_v30 = vld [vmem:[#allocation17 + $0x24] ss:$8 sps:$4 sm:$0xff]  }
 0x331   : > { %3823 = vmatpush1.bf16.msra.mxu1 %v14652_v25  ;;  %1987 = vmatprep.subr.bf16.mxu0 %v14657_v26  ;;  %v14752_v25 = vld [vmem:[#allocation17 + $0x514] ss:$8 sps:$4 sm:$0xff]   ;;  %v14753_v26 = vld [vmem:[%s19881_s23 + $0x44] ss:$24 sps:$4 sm:$0xff]  }
 0x332   : > { %3824 = vmatprep.subr.bf16.mxu1 %v14660_v28  ;;  %v12521_v28 = vcombine.high %v17699_v22, %v17699_v22 }
 0x334   : > { %1988 = vmatpush1.bf16.msra.mxu0 %v14655_v31  ;;  %v14761_v31 = vld [vmem:[#allocation17 + $0x524] ss:$8 sps:$4 sm:$0xff]  }
 0x335   : > { %3825 = vmatpush1.bf16.msra.mxu1 %v14658_v32  ;;  %1989 = vmatprep.subr.bf16.mxu0 %v14663_v33  ;;  %v14755_v32 = vld [vmem:[%s19881_s23 + $0x40] ss:$24 sps:$4 sm:$0xff]  }
 0x336   : > { %3826 = vmatprep.subr.bf16.mxu1 %v14666_v34  ;;  %v14756_v33 = vld [vmem:[#allocation17 + $0x20] ss:$8 sps:$4 sm:$0xff]  }
 0x337   : > { %v17712_v34 = vld [vmem:[%s19883_s27] sm:$0xff] }
 0x338   : > { %1990 = vmatpush1.bf16.msra.mxu0 %v14661_v35  ;;  %v14759_v35 = vld [vmem:[#allocation17 + $0x520] ss:$8 sps:$4 sm:$0xff]  }
 0x339   : > { %3827 = vmatpush1.bf16.msra.mxu1 %v14664_v36  ;;  %1991 = vmatprep.subr.bf16.mxu0 %v14669_v37  ;;  %v14764_v36 = vld [vmem:[#allocation17 + $0x34] ss:$8 sps:$4 sm:$0xff]  }
 0x33a   : > { %3828 = vmatprep.subr.bf16.mxu1 %v14672_v38  ;;  %v14767_v37 = vld [vmem:[#allocation17 + $0x534] ss:$8 sps:$4 sm:$0xff]   ;;  %v12511_v38 = vcombine.high %v17712_v34, %v17712_v34 }
 0x33c   : > { %1992 = vmatpush1.bf16.msra.mxu0 %v14667_v39  ;;  %v14762_v39 = vld [vmem:[#allocation17 + $0x30] ss:$8 sps:$4 sm:$0xff]  }
 0x33d   : > { %3829 = vmatpush1.bf16.msra.mxu1 %v14670_v40  ;;  %1993 = vmatprep.subr.bf16.mxu0 %v14675_v41  ;;  %v14765_v40 = vld [vmem:[#allocation17 + $0x530] ss:$8 sps:$4 sm:$0xff]   ;;  %v14770_v41 = vld [vmem:[#allocation17 + $0x44] ss:$8 sps:$4 sm:$0xff]  }
 0x33e   : > { %3830 = vmatprep.subr.bf16.mxu1 %v14678_v42  ;;  %v14773_v42 = vld [vmem:[#allocation17 + $0x544] ss:$8 sps:$4 sm:$0xff]  }
 0x340   : > { %1994 = vmatpush1.bf16.msra.mxu0 %v14673_v43  ;;  %v14768_v43 = vld [vmem:[#allocation17 + $0x40] ss:$8 sps:$4 sm:$0xff]  }
 0x341   : > { %3831 = vmatpush1.bf16.msra.mxu1 %v14676_v44  ;;  %1995 = vmatprep.subr.bf16.mxu0 %v14681_v45  ;;  %v14771_v44 = vld [vmem:[#allocation17 + $0x540] ss:$8 sps:$4 sm:$0xff]   ;;  %v14776_v45 = vld [vmem:[#allocation17 + $0x54] ss:$8 sps:$4 sm:$0xff]  }
 0x342   : > { %3832 = vmatprep.subr.bf16.mxu1 %v14684_v46  ;;  %v14779_v46 = vld [vmem:[#allocation17 + $0x554] ss:$8 sps:$4 sm:$0xff]  }
 0x344   : > { %1996 = vmatpush1.bf16.msra.mxu0 %v14679_v47  ;;  %v14774_v47 = vld [vmem:[#allocation17 + $0x50] ss:$8 sps:$4 sm:$0xff]  }
 0x345   : > { %3833 = vmatpush1.bf16.msra.mxu1 %v14682_v48  ;;  %1997 = vmatprep.subr.bf16.mxu0 %v14687_v49  ;;  %v14777_v48 = vld [vmem:[#allocation17 + $0x550] ss:$8 sps:$4 sm:$0xff]   ;;  %v14782_v49 = vld [vmem:[#allocation17 + $0x64] ss:$8 sps:$4 sm:$0xff]  }
 0x346   : > { %3834 = vmatprep.subr.bf16.mxu1 %v14690_v50  ;;  %v14785_v50 = vld [vmem:[#allocation17 + $0x564] ss:$8 sps:$4 sm:$0xff]  }
 0x348   : > { %1998 = vmatpush1.bf16.msra.mxu0 %v14685_v51  ;;  %v14780_v51 = vld [vmem:[#allocation17 + $0x60] ss:$8 sps:$4 sm:$0xff]  }
 0x349   : > { %3835 = vmatpush1.bf16.msra.mxu1 %v14688_v52  ;;  %1999 = vmatprep.subr.bf16.mxu0 %v14693_v53  ;;  %v14783_v52 = vld [vmem:[#allocation17 + $0x560] ss:$8 sps:$4 sm:$0xff]   ;;  %v14788_v53 = vld [vmem:[#allocation17 + $0x74] ss:$8 sps:$4 sm:$0xff]  }
 0x34a   : > { %3836 = vmatprep.subr.bf16.mxu1 %v14696_v54  ;;  %v14791_v54 = vld [vmem:[#allocation17 + $0x574] ss:$8 sps:$4 sm:$0xff]  }
 0x34c   : > { %2000 = vmatpush1.bf16.msra.mxu0 %v14691_v55  ;;  %v14786_v55 = vld [vmem:[#allocation17 + $0x70] ss:$8 sps:$4 sm:$0xff]  }
 0x34d   : > { %3837 = vmatpush1.bf16.msra.mxu1 %v14694_v56  ;;  %2001 = vmatprep.subr.bf16.mxu0 %v14699_v57  ;;  %v14789_v56 = vld [vmem:[#allocation17 + $0x570] ss:$8 sps:$4 sm:$0xff]   ;;  %v14794_v57 = vld [vmem:[#allocation17 + $0x84] ss:$8 sps:$4 sm:$0xff]  }
 0x34e   : > { %3838 = vmatprep.subr.bf16.mxu1 %v14702_v58  ;;  %v14797_v58 = vld [vmem:[#allocation17 + $0x584] ss:$8 sps:$4 sm:$0xff]  }
 0x350   : > { %2002 = vmatpush1.bf16.msra.mxu0 %v14697_v59  ;;  %v14792_v59 = vld [vmem:[#allocation17 + $0x80] ss:$8 sps:$4 sm:$0xff]  }
 0x351   : > { %3839 = vmatpush1.bf16.msra.mxu1 %v14700_v60  ;;  %2003 = vmatprep.subr.bf16.mxu0 %v14705_v61  ;;  %v14795_v60 = vld [vmem:[#allocation17 + $0x580] ss:$8 sps:$4 sm:$0xff]   ;;  %v14800_v61 = vld [vmem:[#allocation17 + $0x94] ss:$8 sps:$4 sm:$0xff]  }
 0x352   : > { %3840 = vmatprep.subr.bf16.mxu1 %v14708_v62  ;;  %v14803_v62 = vld [vmem:[#allocation17 + $0x594] ss:$8 sps:$4 sm:$0xff]  }
 0x354   : > { %2004 = vmatpush1.bf16.msra.mxu0 %v14703_v63  ;;  %v14798_v63 = vld [vmem:[#allocation17 + $0x90] ss:$8 sps:$4 sm:$0xff]  }
 0x355   : > { %3841 = vmatpush1.bf16.msra.mxu1 %v14706_v0  ;;  %2005 = vmatprep.subr.bf16.mxu0 %v14711_v1  ;;  %v14801_v0 = vld [vmem:[#allocation17 + $0x590] ss:$8 sps:$4 sm:$0xff]   ;;  %v14806_v1 = vld [vmem:[#allocation17 + $0xa4] ss:$8 sps:$4 sm:$0xff]  }
 0x356   : > { %3842 = vmatprep.subr.bf16.mxu1 %v14714_v2  ;;  %v14809_v2 = vld [vmem:[#allocation17 + $0x5a4] ss:$8 sps:$4 sm:$0xff]  }
 0x358   : > { %2006 = vmatpush1.bf16.msra.mxu0 %v14709_v3  ;;  %v14804_v3 = vld [vmem:[#allocation17 + $0xa0] ss:$8 sps:$4 sm:$0xff]  }
 0x359   : > { %3843 = vmatpush1.bf16.msra.mxu1 %v14712_v4  ;;  %2007 = vmatprep.subr.bf16.mxu0 %v14717_v5  ;;  %v14807_v4 = vld [vmem:[#allocation17 + $0x5a0] ss:$8 sps:$4 sm:$0xff]   ;;  %v14812_v5 = vld [vmem:[#allocation17 + $0xb4] ss:$8 sps:$4 sm:$0xff]  }
 0x35a   : > { %3844 = vmatprep.subr.bf16.mxu1 %v14720_v6  ;;  %v14815_v6 = vld [vmem:[#allocation17 + $0x5b4] ss:$8 sps:$4 sm:$0xff]  }
 0x35c   : > { %2008 = vmatpush1.bf16.msra.mxu0 %v14715_v7  ;;  %v14810_v7 = vld [vmem:[#allocation17 + $0xb0] ss:$8 sps:$4 sm:$0xff]  }
 0x35d   : > { %3845 = vmatpush1.bf16.msra.mxu1 %v14718_v8  ;;  %2009 = vmatprep.subr.bf16.mxu0 %v14726_v9  ;;  %v14813_v8 = vld [vmem:[#allocation17 + $0x5b0] ss:$8 sps:$4 sm:$0xff]   ;;  %v14818_v9 = vld [vmem:[#allocation17 + $0xc4] ss:$8 sps:$4 sm:$0xff]  }
 0x35e   : > { %3846 = vmatprep.subr.bf16.mxu1 %v14729_v10  ;;  %v14821_v10 = vld [vmem:[#allocation17 + $0x5c4] ss:$8 sps:$4 sm:$0xff]  }
 0x360   : > { %2010 = vmatpush1.bf16.msra.mxu0 %v14724_v11  ;;  %v14816_v11 = vld [vmem:[#allocation17 + $0xc0] ss:$8 sps:$4 sm:$0xff]  }
 0x361   : > { %3847 = vmatpush1.bf16.msra.mxu1 %v14727_v12  ;;  %2011 = vmatprep.subr.bf16.mxu0 %v14732_v13  ;;  %v14819_v12 = vld [vmem:[#allocation17 + $0x5c0] ss:$8 sps:$4 sm:$0xff]   ;;  %v14824_v13 = vld [vmem:[#allocation17 + $0xd4] ss:$8 sps:$4 sm:$0xff]  }
 0x362   : > { %3848 = vmatprep.subr.bf16.mxu1 %v14735_v14  ;;  %v14827_v14 = vld [vmem:[#allocation17 + $0x5d4] ss:$8 sps:$4 sm:$0xff]  }
 0x364   : > { %2012 = vmatpush1.bf16.msra.mxu0 %v14730_v15  ;;  %v14822_v15 = vld [vmem:[#allocation17 + $0xd0] ss:$8 sps:$4 sm:$0xff]  }
 0x365   : > { %3849 = vmatpush1.bf16.msra.mxu1 %v14733_v16  ;;  %3654 = vmatprep.subr.bf16.mxu0 %v14741_v17  ;;  %v14825_v16 = vld [vmem:[#allocation17 + $0x5d0] ss:$8 sps:$4 sm:$0xff]   ;;  %v14830_v17 = vld [vmem:[#allocation17 + $0xe4] ss:$8 sps:$4 sm:$0xff]  }
 0x366   : > { %3859 = vmatprep.subr.bf16.mxu1 %v14746_v18  ;;  %v14833_v18 = vld [vmem:[#allocation17 + $0x5e4] ss:$8 sps:$4 sm:$0xff]  }
 0x367   : > { %2014 = vmatmul.mubr.bf16.vlgmr.msra.gmra.mrb[0].mxu0 %v14736_v19  ;;  %v14828_v19 = vld [vmem:[#allocation17 + $0xe0] ss:$8 sps:$4 sm:$0xff]  }
 0x368   : > { %3851 = vmatmul.mubr.bf16.vlgmr.msra.gmra.mrb[0].mxu1 %v12518_v21  ;;  %3655 = vmatpush1.bf16.msra.mxu0 %v14739_v20  ;;  %v14831_v20 = vld [vmem:[#allocation17 + $0x5e0] ss:$8 sps:$4 sm:$0xff]   ;;  %v14836_v21 = vld [vmem:[#allocation17 + $0xf4] ss:$8 sps:$4 sm:$0xff]  }
 0x369   : > { %3860 = vmatpush1.bf16.msra.mxu1 %v14744_v23  ;;  %3656 = vmatprep.subr.bf16.mxu0 %v14749_v24  ;;  %v14839_v23 = vld [vmem:[#allocation17 + $0x5f4] ss:$8 sps:$4 sm:$0xff]   ;;  %v14834_v24 = vld [vmem:[#allocation17 + $0xf0] ss:$8 sps:$4 sm:$0xff]  }
 0x36a   : > { %3861 = vmatprep.subr.bf16.mxu1 %v14752_v25  ;;  %2023 = vmatprep.mubr.bf16.mxu0 %v14753_v26  ;;  %v14837_v25 = vld [vmem:[#allocation17 + $0x5f0] ss:$8 sps:$4 sm:$0xff]   ;;  %v14844_v26 = vld [vmem:[#allocation17 + $0x104] ss:$8 sps:$4 sm:$0xff]  }
 0x36b   : > { %3891 = vmatprep.mubr.bf16.mxu1 %v12521_v28  ;;  %v14849_v28 = vld [vmem:[#allocation17 + $0x604] ss:$8 sps:$4 sm:$0xff]  }
 0x36c   : > { %3657 = vmatpush1.bf16.msra.mxu0 %v14747_v27  ;;  %v17719_v27 = vld [vmem:[%s19883_s27 + $0x8] sm:$0xff] }
 0x36d   : > { %3862 = vmatpush1.bf16.msra.mxu1 %v14750_v29  ;;  %3658 = vmatprep.subr.bf16.mxu0 %v14758_v30  ;;  %v12510_v29 = vcombine.low %v17712_v34, %v17712_v34  ;;  %v12520_v30 = vcombine.low %v17699_v22, %v17699_v22  ;;  %v14850_v22 = vld [vmem:[#allocation17 + $0x110] ss:$8 sps:$4 sm:$0xff]  }
 0x36e   : > { %3863 = vmatprep.subr.bf16.mxu1 %v14761_v31  ;;  %v17728_v31 = vld [vmem:[%s19883_s27 + $0x30] sm:$0xff] }
 0x36f   : > { %2024 = vmatmul.mubr.bf16.gmra.mrb[4].mxu0 %v14755_v32  ;;  %v14842_v32 = vld [vmem:[#allocation17 + $0x100] ss:$8 sps:$4 sm:$0xff]   ;;  %v12523_v34 = vcombine.high %v17728_v31, %v17728_v31 }
 0x370   : > { %3659 = vmatpush1.bf16.msra.mxu0 %v14756_v33  ;;  %3686 = vmatprep.mubr.bf16.mxu0 %v12511_v38  ;;  %v14847_v33 = vld [vmem:[#allocation17 + $0x600] ss:$8 sps:$4 sm:$0xff]   ;;  %v14853_v38 = vld [vmem:[#allocation17 + $0x610] ss:$8 sps:$4 sm:$0xff]  }
 0x371   : > { %3864 = vmatpush1.bf16.msra.mxu1 %v14759_v35  ;;  %3660 = vmatprep.subr.bf16.mxu0 %v14764_v36  ;;  %v14852_v35 = vld [vmem:[#allocation17 + $0x114] ss:$8 sps:$4 sm:$0xff]  }
 0x372   : > { %3865 = vmatprep.subr.bf16.mxu1 %v14767_v37  ;;  %v14855_v36 = vld [vmem:[#allocation17 + $0x614] ss:$8 sps:$4 sm:$0xff]   ;;  %v12513_v37 = vcombine.high %v17719_v27, %v17719_v27 }
 0x374   : > { %3661 = vmatpush1.bf16.msra.mxu0 %v14762_v39  ;;  %v14858_v39 = vld [vmem:[#allocation17 + $0x124] ss:$8 sps:$4 sm:$0xff]  }
 0x375   : > { %3866 = vmatpush1.bf16.msra.mxu1 %v14765_v40  ;;  %3662 = vmatprep.subr.bf16.mxu0 %v14770_v41  ;;  %v14861_v40 = vld [vmem:[#allocation17 + $0x624] ss:$8 sps:$4 sm:$0xff]   ;;  %v14856_v41 = vld [vmem:[#allocation17 + $0x120] ss:$8 sps:$4 sm:$0xff]  }
 0x376   : > { %3867 = vmatprep.subr.bf16.mxu1 %v14773_v42  ;;  %v14859_v42 = vld [vmem:[#allocation17 + $0x620] ss:$8 sps:$4 sm:$0xff]  }
 0x378   : > { %3663 = vmatpush1.bf16.msra.mxu0 %v14768_v43  ;;  %v14864_v43 = vld [vmem:[#allocation17 + $0x134] ss:$8 sps:$4 sm:$0xff]  }
 0x379   : > { %3868 = vmatpush1.bf16.msra.mxu1 %v14771_v44  ;;  %3664 = vmatprep.subr.bf16.mxu0 %v14776_v45  ;;  %v14867_v44 = vld [vmem:[#allocation17 + $0x634] ss:$8 sps:$4 sm:$0xff]   ;;  %v14862_v45 = vld [vmem:[#allocation17 + $0x130] ss:$8 sps:$4 sm:$0xff]  }
 0x37a   : > { %3869 = vmatprep.subr.bf16.mxu1 %v14779_v46  ;;  %v14865_v46 = vld [vmem:[#allocation17 + $0x630] ss:$8 sps:$4 sm:$0xff]  }
 0x37c   : > { %3665 = vmatpush1.bf16.msra.mxu0 %v14774_v47  ;;  %v14870_v47 = vld [vmem:[#allocation17 + $0x144] ss:$8 sps:$4 sm:$0xff]  }
 0x37d   : > { %3870 = vmatpush1.bf16.msra.mxu1 %v14777_v48  ;;  %3666 = vmatprep.subr.bf16.mxu0 %v14782_v49  ;;  %v14873_v48 = vld [vmem:[#allocation17 + $0x644] ss:$8 sps:$4 sm:$0xff]   ;;  %v14868_v49 = vld [vmem:[#allocation17 + $0x140] ss:$8 sps:$4 sm:$0xff]  }
 0x37e   : > { %3871 = vmatprep.subr.bf16.mxu1 %v14785_v50  ;;  %v14871_v50 = vld [vmem:[#allocation17 + $0x640] ss:$8 sps:$4 sm:$0xff]  }
 0x380   : > { %3667 = vmatpush1.bf16.msra.mxu0 %v14780_v51  ;;  %v14876_v51 = vld [vmem:[#allocation17 + $0x154] ss:$8 sps:$4 sm:$0xff]  }
 0x381   : > { %3872 = vmatpush1.bf16.msra.mxu1 %v14783_v52  ;;  %3668 = vmatprep.subr.bf16.mxu0 %v14788_v53  ;;  %v14879_v52 = vld [vmem:[#allocation17 + $0x654] ss:$8 sps:$4 sm:$0xff]   ;;  %v14874_v53 = vld [vmem:[#allocation17 + $0x150] ss:$8 sps:$4 sm:$0xff]  }
 0x382   : > { %3873 = vmatprep.subr.bf16.mxu1 %v14791_v54  ;;  %v14877_v54 = vld [vmem:[#allocation17 + $0x650] ss:$8 sps:$4 sm:$0xff]  }
 0x384   : > { %3669 = vmatpush1.bf16.msra.mxu0 %v14786_v55  ;;  %v14882_v55 = vld [vmem:[#allocation17 + $0x164] ss:$8 sps:$4 sm:$0xff]  }
 0x385   : > { %3874 = vmatpush1.bf16.msra.mxu1 %v14789_v56  ;;  %3670 = vmatprep.subr.bf16.mxu0 %v14794_v57  ;;  %v14885_v56 = vld [vmem:[#allocation17 + $0x664] ss:$8 sps:$4 sm:$0xff]   ;;  %v14880_v57 = vld [vmem:[#allocation17 + $0x160] ss:$8 sps:$4 sm:$0xff]  }
 0x386   : > { %3875 = vmatprep.subr.bf16.mxu1 %v14797_v58  ;;  %v14883_v58 = vld [vmem:[#allocation17 + $0x660] ss:$8 sps:$4 sm:$0xff]  }
 0x388   : > { %3671 = vmatpush1.bf16.msra.mxu0 %v14792_v59  ;;  %v14888_v59 = vld [vmem:[#allocation17 + $0x174] ss:$8 sps:$4 sm:$0xff]  }
 0x389   : > { %3876 = vmatpush1.bf16.msra.mxu1 %v14795_v60  ;;  %3672 = vmatprep.subr.bf16.mxu0 %v14800_v61  ;;  %v14891_v60 = vld [vmem:[#allocation17 + $0x674] ss:$8 sps:$4 sm:$0xff]   ;;  %v14886_v61 = vld [vmem:[#allocation17 + $0x170] ss:$8 sps:$4 sm:$0xff]  }
 0x38a   : > { %3877 = vmatprep.subr.bf16.mxu1 %v14803_v62  ;;  %v14889_v62 = vld [vmem:[#allocation17 + $0x670] ss:$8 sps:$4 sm:$0xff]  }
 0x38c   : > { %3673 = vmatpush1.bf16.msra.mxu0 %v14798_v63  ;;  %v14894_v63 = vld [vmem:[#allocation17 + $0x184] ss:$8 sps:$4 sm:$0xff]  }
 0x38d   : > { %3878 = vmatpush1.bf16.msra.mxu1 %v14801_v0  ;;  %3674 = vmatprep.subr.bf16.mxu0 %v14806_v1  ;;  %v14897_v0 = vld [vmem:[#allocation17 + $0x684] ss:$8 sps:$4 sm:$0xff]   ;;  %v14892_v1 = vld [vmem:[#allocation17 + $0x180] ss:$8 sps:$4 sm:$0xff]  }
 0x38e   : > { %3879 = vmatprep.subr.bf16.mxu1 %v14809_v2  ;;  %v14895_v2 = vld [vmem:[#allocation17 + $0x680] ss:$8 sps:$4 sm:$0xff]  }
 0x390   : > { %3675 = vmatpush1.bf16.msra.mxu0 %v14804_v3  ;;  %v14900_v3 = vld [vmem:[#allocation17 + $0x194] ss:$8 sps:$4 sm:$0xff]  }
 0x391   : > { %3880 = vmatpush1.bf16.msra.mxu1 %v14807_v4  ;;  %3676 = vmatprep.subr.bf16.mxu0 %v14812_v5  ;;  %v14903_v4 = vld [vmem:[#allocation17 + $0x694] ss:$8 sps:$4 sm:$0xff]   ;;  %v14898_v5 = vld [vmem:[#allocation17 + $0x190] ss:$8 sps:$4 sm:$0xff]  }
 0x392   : > { %3881 = vmatprep.subr.bf16.mxu1 %v14815_v6  ;;  %v14901_v6 = vld [vmem:[#allocation17 + $0x690] ss:$8 sps:$4 sm:$0xff]  }
 0x394   : > { %3677 = vmatpush1.bf16.msra.mxu0 %v14810_v7  ;;  %v14906_v7 = vld [vmem:[#allocation17 + $0x1a4] ss:$8 sps:$4 sm:$0xff]  }
 0x395   : > { %3882 = vmatpush1.bf16.msra.mxu1 %v14813_v8  ;;  %3678 = vmatprep.subr.bf16.mxu0 %v14818_v9  ;;  %v14909_v8 = vld [vmem:[#allocation17 + $0x6a4] ss:$8 sps:$4 sm:$0xff]   ;;  %v14904_v9 = vld [vmem:[#allocation17 + $0x1a0] ss:$8 sps:$4 sm:$0xff]  }
 0x396   : > { %3883 = vmatprep.subr.bf16.mxu1 %v14821_v10  ;;  %v14907_v10 = vld [vmem:[#allocation17 + $0x6a0] ss:$8 sps:$4 sm:$0xff]  }
 0x398   : > { %3679 = vmatpush1.bf16.msra.mxu0 %v14816_v11  ;;  %v14912_v11 = vld [vmem:[#allocation17 + $0x1b4] ss:$8 sps:$4 sm:$0xff]  }
 0x399   : > { %3884 = vmatpush1.bf16.msra.mxu1 %v14819_v12  ;;  %3680 = vmatprep.subr.bf16.mxu0 %v14824_v13  ;;  %v14915_v12 = vld [vmem:[#allocation17 + $0x6b4] ss:$8 sps:$4 sm:$0xff]   ;;  %v14910_v13 = vld [vmem:[#allocation17 + $0x1b0] ss:$8 sps:$4 sm:$0xff]  }
 0x39a   : > { %3885 = vmatprep.subr.bf16.mxu1 %v14827_v14  ;;  %v14913_v14 = vld [vmem:[#allocation17 + $0x6b0] ss:$8 sps:$4 sm:$0xff]  }
 0x39c   : > { %3681 = vmatpush1.bf16.msra.mxu0 %v14822_v15  ;;  %v14918_v15 = vld [vmem:[#allocation17 + $0x1c4] ss:$8 sps:$4 sm:$0xff]  }
 0x39d   : > { %3886 = vmatpush1.bf16.msra.mxu1 %v14825_v16  ;;  %3682 = vmatprep.subr.bf16.mxu0 %v14830_v17  ;;  %v14921_v16 = vld [vmem:[#allocation17 + $0x6c4] ss:$8 sps:$4 sm:$0xff]   ;;  %v14916_v17 = vld [vmem:[#allocation17 + $0x1c0] ss:$8 sps:$4 sm:$0xff]  }
 0x39e   : > { %3887 = vmatprep.subr.bf16.mxu1 %v14833_v18  ;;  %v14919_v18 = vld [vmem:[#allocation17 + $0x6c0] ss:$8 sps:$4 sm:$0xff]  }
 0x3a0   : > { %3683 = vmatpush1.bf16.msra.mxu0 %v14828_v19  ;;  %v14924_v19 = vld [vmem:[#allocation17 + $0x1d4] ss:$8 sps:$4 sm:$0xff]  }
 0x3a1   : > { %3888 = vmatpush1.bf16.msra.mxu1 %v14831_v20  ;;  %3684 = vmatprep.subr.bf16.mxu0 %v14836_v21  ;;  %v14927_v20 = vld [vmem:[#allocation17 + $0x6d4] ss:$8 sps:$4 sm:$0xff]   ;;  %v14922_v21 = vld [vmem:[#allocation17 + $0x1d0] ss:$8 sps:$4 sm:$0xff]  }
 0x3a2   : > { %3889 = vmatprep.subr.bf16.mxu1 %v14839_v23  ;;  %v14925_v23 = vld [vmem:[#allocation17 + $0x6d0] ss:$8 sps:$4 sm:$0xff]  }
 0x3a4   : > { %3685 = vmatpush1.bf16.msra.mxu0 %v14834_v24  ;;  %v14930_v24 = vld [vmem:[#allocation17 + $0x1e4] ss:$8 sps:$4 sm:$0xff]  }
 0x3a5   : > { %3890 = vmatpush1.bf16.msra.mxu1 %v14837_v25  ;;  %3695 = vmatprep.subr.bf16.mxu0 %v14844_v26  ;;  %v14933_v25 = vld [vmem:[#allocation17 + $0x6e4] ss:$8 sps:$4 sm:$0xff]   ;;  %v14928_v26 = vld [vmem:[#allocation17 + $0x1e0] ss:$8 sps:$4 sm:$0xff]  }
 0x3a6   : > { %3900 = vmatprep.subr.bf16.mxu1 %v14849_v28  ;;  %v14931_v28 = vld [vmem:[#allocation17 + $0x6e0] ss:$8 sps:$4 sm:$0xff]  }
 0x3a7   : > { %3687 = vmatmul.mubr.bf16.vlgmr.msra.gmra.mrb[8].mxu0 %v12510_v29  ;;  %v14936_v29 = vld [vmem:[#allocation17 + $0x1f4] ss:$8 sps:$4 sm:$0xff]  }
 0x3a8   : > { %3892 = vmatmul.mubr.bf16.vlgmr.msra.gmra.mrb[0].mxu1 %v12520_v30  ;;  %3696 = vmatpush1.bf16.msra.mxu0 %v14842_v32  ;;  %v14939_v30 = vld [vmem:[#allocation17 + $0x6f4] ss:$8 sps:$4 sm:$0xff]   ;;  %v14934_v32 = vld [vmem:[#allocation17 + $0x1f0] ss:$8 sps:$4 sm:$0xff]  }
 0x3a9   : > { %3901 = vmatpush1.bf16.msra.mxu1 %v14847_v33  ;;  %3697 = vmatprep.subr.bf16.mxu0 %v14852_v35  ;;  %v14937_v33 = vld [vmem:[#allocation17 + $0x6f0] ss:$8 sps:$4 sm:$0xff]   ;;  %v14946_v35 = vld [vmem:[#allocation17 + $0x704] ss:$8 sps:$4 sm:$0xff]  }
 0x3aa   : > { %3902 = vmatprep.subr.bf16.mxu1 %v14855_v36  ;;  %3727 = vmatprep.mubr.bf16.mxu0 %v12513_v37  ;;  %v17737_v36 = vld [vmem:[%s19883_s27 + $0x38] sm:$0xff]  ;;  %v12512_v37 = vcombine.low %v17719_v27, %v17719_v27 }
 0x3ab   : > { %3932 = vmatprep.mubr.bf16.mxu1 %v12523_v34  ;;  %v12522_v34 = vcombine.low %v17728_v31, %v17728_v31  ;;  %v14950_v27 = vld [vmem:[#allocation17 + $0x720] ss:$8 sps:$4 sm:$0xff]   ;;  %v14953_v31 = vld [vmem:[#allocation17 + $0x730] ss:$8 sps:$4 sm:$0xff]  }
 0x3ac   : > { %3698 = vmatpush1.bf16.msra.mxu0 %v14850_v22  ;;  %v14944_v22 = vld [vmem:[#allocation17 + $0x700] ss:$8 sps:$4 sm:$0xff]  }
 0x3ad   : > { %3903 = vmatpush1.bf16.msra.mxu1 %v14853_v38  ;;  %3699 = vmatprep.subr.bf16.mxu0 %v14858_v39  ;;  %v12525_v38 = vcombine.high %v17737_v36, %v17737_v36  ;;  %v14949_v39 = vld [vmem:[#allocation17 + $0x714] ss:$8 sps:$4 sm:$0xff]  }
 0x3ae   : > { %3904 = vmatprep.subr.bf16.mxu1 %v14861_v40  ;;  %v14947_v40 = vld [vmem:[#allocation17 + $0x710] ss:$8 sps:$4 sm:$0xff]  }
 0x3b0   : > { %3700 = vmatpush1.bf16.msra.mxu0 %v14856_v41  ;;  %v14952_v41 = vld [vmem:[#allocation17 + $0x724] ss:$8 sps:$4 sm:$0xff]  }
 0x3b1   : > { %3905 = vmatpush1.bf16.msra.mxu1 %v14859_v42  ;;  %3701 = vmatprep.subr.bf16.mxu0 %v14864_v43  ;;  %v14955_v42 = vld [vmem:[#allocation17 + $0x734] ss:$8 sps:$4 sm:$0xff]   ;;  %v14958_v43 = vld [vmem:[#allocation17 + $0x744] ss:$8 sps:$4 sm:$0xff]  }
 0x3b2   : > { %3906 = vmatprep.subr.bf16.mxu1 %v14867_v44  ;;  %v14956_v44 = vld [vmem:[#allocation17 + $0x740] ss:$8 sps:$4 sm:$0xff]  }
 0x3b4   : > { %3702 = vmatpush1.bf16.msra.mxu0 %v14862_v45  ;;  %v14961_v45 = vld [vmem:[#allocation17 + $0x754] ss:$8 sps:$4 sm:$0xff]  }
 0x3b5   : > { %3907 = vmatpush1.bf16.msra.mxu1 %v14865_v46  ;;  %3703 = vmatprep.subr.bf16.mxu0 %v14870_v47  ;;  %v14959_v46 = vld [vmem:[#allocation17 + $0x750] ss:$8 sps:$4 sm:$0xff]   ;;  %v14964_v47 = vld [vmem:[#allocation17 + $0x764] ss:$8 sps:$4 sm:$0xff]  }
 0x3b6   : > { %3908 = vmatprep.subr.bf16.mxu1 %v14873_v48  ;;  %v14962_v48 = vld [vmem:[#allocation17 + $0x760] ss:$8 sps:$4 sm:$0xff]  }
 0x3b8   : > { %3704 = vmatpush1.bf16.msra.mxu0 %v14868_v49  ;;  %v14967_v49 = vld [vmem:[#allocation17 + $0x774] ss:$8 sps:$4 sm:$0xff]  }
 0x3b9   : > { %3909 = vmatpush1.bf16.msra.mxu1 %v14871_v50  ;;  %3705 = vmatprep.subr.bf16.mxu0 %v14876_v51  ;;  %v14965_v50 = vld [vmem:[#allocation17 + $0x770] ss:$8 sps:$4 sm:$0xff]   ;;  %v14970_v51 = vld [vmem:[#allocation17 + $0x784] ss:$8 sps:$4 sm:$0xff]  }
 0x3ba   : > { %3910 = vmatprep.subr.bf16.mxu1 %v14879_v52  ;;  %v14968_v52 = vld [vmem:[#allocation17 + $0x780] ss:$8 sps:$4 sm:$0xff]  }
 0x3bc   : > { %3706 = vmatpush1.bf16.msra.mxu0 %v14874_v53  ;;  %v14973_v53 = vld [vmem:[#allocation17 + $0x794] ss:$8 sps:$4 sm:$0xff]  }
 0x3bd   : > { %3911 = vmatpush1.bf16.msra.mxu1 %v14877_v54  ;;  %3707 = vmatprep.subr.bf16.mxu0 %v14882_v55  ;;  %v14971_v54 = vld [vmem:[#allocation17 + $0x790] ss:$8 sps:$4 sm:$0xff]   ;;  %v14976_v55 = vld [vmem:[#allocation17 + $0x7a4] ss:$8 sps:$4 sm:$0xff]  }
 0x3be   : > { %3912 = vmatprep.subr.bf16.mxu1 %v14885_v56  ;;  %v14974_v56 = vld [vmem:[#allocation17 + $0x7a0] ss:$8 sps:$4 sm:$0xff]  }
 0x3c0   : > { %3708 = vmatpush1.bf16.msra.mxu0 %v14880_v57  ;;  %v14979_v57 = vld [vmem:[#allocation17 + $0x7b4] ss:$8 sps:$4 sm:$0xff]  }
 0x3c1   : > { %3913 = vmatpush1.bf16.msra.mxu1 %v14883_v58  ;;  %3709 = vmatprep.subr.bf16.mxu0 %v14888_v59  ;;  %v14977_v58 = vld [vmem:[#allocation17 + $0x7b0] ss:$8 sps:$4 sm:$0xff]   ;;  %v14982_v59 = vld [vmem:[#allocation17 + $0x7c4] ss:$8 sps:$4 sm:$0xff]  }
 0x3c2   : > { %3914 = vmatprep.subr.bf16.mxu1 %v14891_v60  ;;  %v14980_v60 = vld [vmem:[#allocation17 + $0x7c0] ss:$8 sps:$4 sm:$0xff]  }
 0x3c4   : > { %3710 = vmatpush1.bf16.msra.mxu0 %v14886_v61  ;;  %v14985_v61 = vld [vmem:[#allocation17 + $0x7d4] ss:$8 sps:$4 sm:$0xff]  }
 0x3c5   : > { %3915 = vmatpush1.bf16.msra.mxu1 %v14889_v62  ;;  %3711 = vmatprep.subr.bf16.mxu0 %v14894_v63  ;;  %v14983_v62 = vld [vmem:[#allocation17 + $0x7d0] ss:$8 sps:$4 sm:$0xff]   ;;  %v14988_v63 = vld [vmem:[#allocation17 + $0x7e4] ss:$8 sps:$4 sm:$0xff]  }
 0x3c6   : > { %3916 = vmatprep.subr.bf16.mxu1 %v14897_v0  ;;  %v14986_v0 = vld [vmem:[#allocation17 + $0x7e0] ss:$8 sps:$4 sm:$0xff]  }
 0x3c8   : > { %3712 = vmatpush1.bf16.msra.mxu0 %v14892_v1  ;;  %v14991_v1 = vld [vmem:[#allocation17 + $0x7f4] ss:$8 sps:$4 sm:$0xff]  }
 0x3c9   : > { %3917 = vmatpush1.bf16.msra.mxu1 %v14895_v2  ;;  %3713 = vmatprep.subr.bf16.mxu0 %v14900_v3  ;;  %v14989_v2 = vld [vmem:[#allocation17 + $0x7f0] ss:$8 sps:$4 sm:$0xff]   ;;  %v12524_v3 = vcombine.low %v17737_v36, %v17737_v36 }
 0x3ca   : > { %3918 = vmatprep.subr.bf16.mxu1 %v14903_v4  ;;  %v1325_v4 = vlaneseq  ;;  %v15005_v36 = vld [vmem:[#allocation20 + $0x34] ss:$8 sps:$4 sm:$0xff]  }
 0x3cc   : > { %3714 = vmatpush1.bf16.msra.mxu0 %v14898_v5  ;;  %v1326_v5 = vshrl.u32 %v1325_v4, 7 }
 0x3cd   : > { %3919 = vmatpush1.bf16.msra.mxu1 %v14901_v6  ;;  %3715 = vmatprep.subr.bf16.mxu0 %v14906_v7  ;;  %v1323_v7 = vld [vmem:[#allocation15] sm:$0x3] }
 0x3ce   : > { %3920 = vmatprep.subr.bf16.mxu1 %v14909_v8  ;;  %v17747_v6 = vsub.s32 0, %v1326_v5  ;;  %v17749_v8 = vsub.s32 1, %v1326_v5 }
 0x3d0   : > { %3716 = vmatpush1.bf16.msra.mxu0 %v14904_v9  ;;  %v1328_v9 = vrot.slane %v1323_v7, %v17747_v6 }
 0x3d1   : > { %3921 = vmatpush1.bf16.msra.mxu1 %v14907_v10  ;;  %3717 = vmatprep.subr.bf16.mxu0 %v14912_v11  ;;  %v1332_v10 = vrot.slane %v1323_v7, %v17749_v8 }
 0x3d2   : > { %3922 = vmatprep.subr.bf16.mxu1 %v14915_v12 }
 0x3d4   : > { %3718 = vmatpush1.bf16.msra.mxu0 %v14910_v13 }
 0x3d5   : > { %3923 = vmatpush1.bf16.msra.mxu1 %v14913_v14  ;;  %3719 = vmatprep.subr.bf16.mxu0 %v14918_v15 }
 0x3d6   : > { %3924 = vmatprep.subr.bf16.mxu1 %v14921_v16 }
 0x3d8   : > { %3720 = vmatpush1.bf16.msra.mxu0 %v14916_v17 }
 0x3d9   : > { %3925 = vmatpush1.bf16.msra.mxu1 %v14919_v18  ;;  %3721 = vmatprep.subr.bf16.mxu0 %v14924_v19  ;;  %v14994_v18 = vld [vmem:[#allocation20] ss:$8 sps:$4 sm:$0xff]   ;;  %v14996_v19 = vld [vmem:[#allocation20 + $0x4] ss:$8 sps:$4 sm:$0xff]  }
 0x3da   : > { %3926 = vmatprep.subr.bf16.mxu1 %v14927_v20 }
 0x3dc   : > { %3722 = vmatpush1.bf16.msra.mxu0 %v14922_v21  ;;  %v14999_v21 = vld [vmem:[#allocation20 + $0x14] ss:$8 sps:$4 sm:$0xff]  }
 0x3dd   : > { %3927 = vmatpush1.bf16.msra.mxu1 %v14925_v23  ;;  %3723 = vmatprep.subr.bf16.mxu0 %v14930_v24  ;;  %v14997_v23 = vld [vmem:[#allocation20 + $0x10] ss:$8 sps:$4 sm:$0xff]   ;;  %v15002_v24 = vld [vmem:[#allocation20 + $0x24] ss:$8 sps:$4 sm:$0xff]  }
 0x3de   : > { %3928 = vmatprep.subr.bf16.mxu1 %v14933_v25 }
 0x3e0   : > { %3724 = vmatpush1.bf16.msra.mxu0 %v14928_v26 }
 0x3e1   : > { %3929 = vmatpush1.bf16.msra.mxu1 %v14931_v28  ;;  %3725 = vmatprep.subr.bf16.mxu0 %v14936_v29 }
 0x3e2   : > { %3930 = vmatprep.subr.bf16.mxu1 %v14939_v30 }
 0x3e4   : > { %3726 = vmatpush1.bf16.msra.mxu0 %v14934_v32  ;;  %v15000_v32 = vld [vmem:[#allocation20 + $0x20] ss:$8 sps:$4 sm:$0xff]  }
 0x3e5   : > { %3931 = vmatpush1.bf16.msra.mxu1 %v14937_v33  ;;  %4190 = vmatprep.subr.bf16.mxu0 %v14996_v19 }
 0x3e6   : > { %3941 = vmatprep.subr.bf16.mxu1 %v14946_v35 }
 0x3e7   : > { %3728 = vmatmul.mubr.bf16.vlgmr.msra.gmra.mrb[8].mxu0 %v12512_v37 }
 0x3e8   : > { %3933 = vmatmul.mubr.bf16.vlgmr.msra.gmra.mrb[0].mxu1 %v12522_v34  ;;  %4191 = vmatpush1.bf16.msra.mxu0 %v14994_v18  ;;  %v15003_v34 = vld [vmem:[#allocation20 + $0x30] ss:$8 sps:$4 sm:$0xff]  }
 0x3e9   : > { %3942 = vmatpush1.bf16.msra.mxu1 %v14944_v22  ;;  %3973 = vmatprep.mubr.bf16.mxu1 %v12525_v38  ;;  %v15008_v22 = vld [vmem:[#allocation20 + $0x44] ss:$8 sps:$4 sm:$0xff]   ;;  %v15006_v38 = vld [vmem:[#allocation20 + $0x40] ss:$8 sps:$4 sm:$0xff]  }
 0x3ea   : > { %3943 = vmatprep.subr.bf16.mxu1 %v14949_v39  ;;  %4192 = vmatprep.subr.bf16.mxu0 %v14999_v21  ;;  %v15011_v39 = vld [vmem:[#allocation20 + $0x54] ss:$8 sps:$4 sm:$0xff]  }
 0x3ec   : > { %4193 = vmatpush1.bf16.msra.mxu0 %v14997_v23 }
 0x3ed   : > { %3944 = vmatpush1.bf16.msra.mxu1 %v14947_v40  ;;  %4194 = vmatprep.subr.bf16.mxu0 %v15002_v24  ;;  %v15009_v40 = vld [vmem:[#allocation20 + $0x50] ss:$8 sps:$4 sm:$0xff]  }
 0x3ee   : > { %3945 = vmatprep.subr.bf16.mxu1 %v14952_v41  ;;  %v15014_v41 = vld [vmem:[#allocation20 + $0x64] ss:$8 sps:$4 sm:$0xff]  }
 0x3f0   : > { %4195 = vmatpush1.bf16.msra.mxu0 %v15000_v32 }
 0x3f1   : > { %3946 = vmatpush1.bf16.msra.mxu1 %v14950_v27  ;;  %4196 = vmatprep.subr.bf16.mxu0 %v15005_v36  ;;  %v15012_v27 = vld [vmem:[#allocation20 + $0x60] ss:$8 sps:$4 sm:$0xff]  }
 0x3f2   : > { %3947 = vmatprep.subr.bf16.mxu1 %v14955_v42  ;;  %v15017_v42 = vld [vmem:[#allocation20 + $0x74] ss:$8 sps:$4 sm:$0xff]  }
 0x3f4   : > { %4197 = vmatpush1.bf16.msra.mxu0 %v15003_v34 }
 0x3f5   : > { %3948 = vmatpush1.bf16.msra.mxu1 %v14953_v31  ;;  %4198 = vmatprep.subr.bf16.mxu0 %v15008_v22  ;;  %v15015_v31 = vld [vmem:[#allocation20 + $0x70] ss:$8 sps:$4 sm:$0xff]  }
 0x3f6   : > { %3949 = vmatprep.subr.bf16.mxu1 %v14958_v43  ;;  %v15020_v43 = vld [vmem:[#allocation20 + $0x84] ss:$8 sps:$4 sm:$0xff]  }
 0x3f8   : > { %4199 = vmatpush1.bf16.msra.mxu0 %v15006_v38 }
 0x3f9   : > { %3950 = vmatpush1.bf16.msra.mxu1 %v14956_v44  ;;  %4200 = vmatprep.subr.bf16.mxu0 %v15011_v39  ;;  %v15018_v44 = vld [vmem:[#allocation20 + $0x80] ss:$8 sps:$4 sm:$0xff]  }
 0x3fa   : > { %3951 = vmatprep.subr.bf16.mxu1 %v14961_v45  ;;  %v15023_v45 = vld [vmem:[#allocation20 + $0x94] ss:$8 sps:$4 sm:$0xff]  }
 0x3fc   : > { %4201 = vmatpush1.bf16.msra.mxu0 %v15009_v40 }
 0x3fd   : > { %3952 = vmatpush1.bf16.msra.mxu1 %v14959_v46  ;;  %4202 = vmatprep.subr.bf16.mxu0 %v15014_v41  ;;  %v15021_v46 = vld [vmem:[#allocation20 + $0x90] ss:$8 sps:$4 sm:$0xff]  }
 0x3fe   : > { %3953 = vmatprep.subr.bf16.mxu1 %v14964_v47  ;;  %v15026_v47 = vld [vmem:[#allocation20 + $0xa4] ss:$8 sps:$4 sm:$0xff]  }
 0x400   : > { %4203 = vmatpush1.bf16.msra.mxu0 %v15012_v27 }
 0x401   : > { %3954 = vmatpush1.bf16.msra.mxu1 %v14962_v48  ;;  %4204 = vmatprep.subr.bf16.mxu0 %v15017_v42  ;;  %v15024_v48 = vld [vmem:[#allocation20 + $0xa0] ss:$8 sps:$4 sm:$0xff]  }
 0x402   : > { %3955 = vmatprep.subr.bf16.mxu1 %v14967_v49  ;;  %v15029_v49 = vld [vmem:[#allocation20 + $0xb4] ss:$8 sps:$4 sm:$0xff]  }
 0x404   : > { %4205 = vmatpush1.bf16.msra.mxu0 %v15015_v31 }
 0x405   : > { %3956 = vmatpush1.bf16.msra.mxu1 %v14965_v50  ;;  %4206 = vmatprep.subr.bf16.mxu0 %v15020_v43  ;;  %v15027_v50 = vld [vmem:[#allocation20 + $0xb0] ss:$8 sps:$4 sm:$0xff]  }
 0x406   : > { %3957 = vmatprep.subr.bf16.mxu1 %v14970_v51  ;;  %v15032_v51 = vld [vmem:[#allocation20 + $0xc4] ss:$8 sps:$4 sm:$0xff]  }
 0x408   : > { %4207 = vmatpush1.bf16.msra.mxu0 %v15018_v44 }
 0x409   : > { %3958 = vmatpush1.bf16.msra.mxu1 %v14968_v52  ;;  %4208 = vmatprep.subr.bf16.mxu0 %v15023_v45  ;;  %v15030_v52 = vld [vmem:[#allocation20 + $0xc0] ss:$8 sps:$4 sm:$0xff]  }
 0x40a   : > { %3959 = vmatprep.subr.bf16.mxu1 %v14973_v53  ;;  %v15035_v53 = vld [vmem:[#allocation20 + $0xd4] ss:$8 sps:$4 sm:$0xff]  }
 0x40c   : > { %4209 = vmatpush1.bf16.msra.mxu0 %v15021_v46 }
 0x40d   : > { %3960 = vmatpush1.bf16.msra.mxu1 %v14971_v54  ;;  %4210 = vmatprep.subr.bf16.mxu0 %v15026_v47  ;;  %v15033_v54 = vld [vmem:[#allocation20 + $0xd0] ss:$8 sps:$4 sm:$0xff]  }
 0x40e   : > { %3961 = vmatprep.subr.bf16.mxu1 %v14976_v55  ;;  %v15038_v55 = vld [vmem:[#allocation20 + $0xe4] ss:$8 sps:$4 sm:$0xff]  }
 0x410   : > { %4211 = vmatpush1.bf16.msra.mxu0 %v15024_v48 }
 0x411   : > { %3962 = vmatpush1.bf16.msra.mxu1 %v14974_v56  ;;  %4212 = vmatprep.subr.bf16.mxu0 %v15029_v49  ;;  %v15036_v56 = vld [vmem:[#allocation20 + $0xe0] ss:$8 sps:$4 sm:$0xff]  }
 0x412   : > { %3963 = vmatprep.subr.bf16.mxu1 %v14979_v57  ;;  %v15041_v57 = vld [vmem:[#allocation20 + $0xf4] ss:$8 sps:$4 sm:$0xff]  }
 0x414   : > { %4213 = vmatpush1.bf16.msra.mxu0 %v15027_v50 }
 0x415   : > { %3964 = vmatpush1.bf16.msra.mxu1 %v14977_v58  ;;  %4214 = vmatprep.subr.bf16.mxu0 %v15032_v51  ;;  %v15039_v58 = vld [vmem:[#allocation20 + $0xf0] ss:$8 sps:$4 sm:$0xff]  }
 0x416   : > { %3965 = vmatprep.subr.bf16.mxu1 %v14982_v59 }
 0x418   : > { %4215 = vmatpush1.bf16.msra.mxu0 %v15030_v52 }
 0x419   : > { %3966 = vmatpush1.bf16.msra.mxu1 %v14980_v60  ;;  %4216 = vmatprep.subr.bf16.mxu0 %v15035_v53 }
 0x41a   : > { %3967 = vmatprep.subr.bf16.mxu1 %v14985_v61 }
 0x41c   : > { %4217 = vmatpush1.bf16.msra.mxu0 %v15033_v54 }
 0x41d   : > { %3968 = vmatpush1.bf16.msra.mxu1 %v14983_v62  ;;  %4218 = vmatprep.subr.bf16.mxu0 %v15038_v55 }
 0x41e   : > { %3969 = vmatprep.subr.bf16.mxu1 %v14988_v63  ;;  %v2306_v63 = vld [vmem:[#allocation18] sm:$0x3] }
 0x420   : > { %4219 = vmatpush1.bf16.msra.mxu0 %v15036_v56 }
 0x421   : > { %3970 = vmatpush1.bf16.msra.mxu1 %v14986_v0  ;;  %4220 = vmatprep.subr.bf16.mxu0 %v15041_v57  ;;  %v2311_v0 = vrot.slane %v2306_v63, %v17747_v6 }
 0x422   : > { %3971 = vmatprep.subr.bf16.mxu1 %v14991_v1  ;;  %v2315_v1 = vrot.slane %v2306_v63, %v17749_v8 }
 0x424   : > { %4221 = vmatpush1.bf16.msra.mxu0 %v15039_v58 }
 0x425   : > { %3972 = vmatpush1.bf16.msra.mxu1 %v14989_v2 }
 0x428   : > { %3974 = vmatmul.mubr.bf16.vlgmr.msra.gmra.mrb[0].mxu1 %v12524_v3 }
 0x43a   : > { %v2015_v11 = vpop.f32.mrb[0].mxu0 }
 0x43b   : > { %v14091_v12 = vadd.f32 %v2015_v11, %v1328_v9  ;;  %v2017_v13 = vpop.f32.mrb[1].mxu0 }
 0x43c   : > { %v14092_v14 = vadd.f32 %v2017_v13, %v1332_v10  ;;  %v2019_v15 = vpop.f32.mrb[2].mxu0 }
 0x43d   : > { %2034 = vst [vmem:[#allocation2] sm:$0xff] %v14091_v12  ;;  %v14093_v16 = vadd.f32 %v2019_v15, %v1328_v9  ;;  %v2021_v17 = vpop.f32.mrb[3].mxu0 }
 0x43e   : > { %2035 = vst [vmem:[#allocation2 + $0x8] sm:$0xff] %v14092_v14  ;;  %v14094_v20 = vadd.f32 %v2021_v17, %v1332_v10 }
 0x43f   : > { %2036 = vst [vmem:[#allocation2 + $0x10] sm:$0xff] %v14093_v16  ;;  %v4018_v16 = vld [vmem:[#allocation21] sm:$0x3] }
 0x440   : > { %2037 = vst [vmem:[#allocation2 + $0x18] sm:$0xff] %v14094_v20  ;;  %v4023_v17 = vrot.slane %v4018_v16, %v17747_v6  ;;  %v4027_v18 = vrot.slane %v4018_v16, %v17749_v8 }
 0x442   : > { %v2025_v25 = vpop.f32.mrb[4].mxu0 }
 0x443   : > { %v14095_v26 = vadd.f32 %v2025_v25, %v1328_v9  ;;  %v2027_v28 = vpop.f32.mrb[5].mxu0 }
 0x444   : > { %v14096_v29 = vadd.f32 %v2027_v28, %v1332_v10  ;;  %v2029_v30 = vpop.f32.mrb[6].mxu0 }
 0x445   : > { %2038 = vst [vmem:[#allocation2 + $0x20] sm:$0xff] %v14095_v26  ;;  %v14097_v33 = vadd.f32 %v2029_v30, %v1328_v9  ;;  %v2031_v35 = vpop.f32.mrb[7].mxu0 }
 0x446   : > { %2039 = vst [vmem:[#allocation2 + $0x28] sm:$0xff] %v14096_v29  ;;  %v14098_v37 = vadd.f32 %v2031_v35, %v1332_v10 }
 0x447   : > { %2040 = vst [vmem:[#allocation2 + $0x30] sm:$0xff] %v14097_v33 }
 0x448   : > { %2041 = vst [vmem:[#allocation2 + $0x38] sm:$0xff] %v14098_v37 }
 0x4ba   : > { %v3729_v59 = vpop.f32.mrb[8].mxu0 }
 0x4bb   : > { %v3731_v60 = vpop.f32.mrb[9].mxu0  ;;  %v14099_v2 = vadd.f32 %v3729_v59, %v2311_v0 }
 0x4bc   : > { %v3733_v61 = vpop.f32.mrb[10].mxu0  ;;  %v14101_v3 = vadd.f32 %v3731_v60, %v2315_v1 }
 0x4bd   : > { %v3734_v62 = vpop.f32.mrb[11].mxu0 }
 0x4fb   : > { %v3975_v4 = vpop.f32.mrb[0].mxu1 }
 0x4fc   : > { %v14100_v5 = vadd.f32 %v14099_v2, %v3975_v4  ;;  %v3977_v7 = vpop.f32.mrb[1].mxu1 }
 0x4fd   : > { %v14102_v9 = vadd.f32 %v14101_v3, %v3977_v7  ;;  %v3979_v10 = vpop.f32.mrb[2].mxu1 }
 0x4fe   : > { %v3982_v11 = vmax.f32 %v14100_v5, 0.0  ;;  %v3980_v12 = vpop.f32.mrb[3].mxu1 }
 0x4ff   : > { %v3983_v13 = vmax.f32 %v14102_v9, 0.0 }
 0x500   : > { %v3984_v15 = vpack.c.bf16 %v3982_v11, %v3982_v11 }
 0x501   : > { %v3985_v14 = vpack.c.bf16 %v3983_v13, %v3983_v13 }
 0x503   : > { %4222 = vmatprep.mubr.bf16.mxu0 %v3985_v14 }
 0x504   : > { %4223 = vmatmul.mubr.bf16.vlgmr.msra.gmra.mrb[12].mxu0 %v3984_v15 }
 0x5d7   : > { %v4224_v19 = vpop.f32.mrb[12].mxu0 }
 0x5d8   : > { %v4225_v20 = vadd.f32 %v4224_v19, %v4023_v17  ;;  %v4226_v21 = vpop.f32.mrb[13].mxu0 }
 0x5d9   : > { %v4227_v23 = vadd.f32 %v4226_v21, %v4027_v18  ;;  %v4228_v24 = vpop.f32.mrb[14].mxu0 }
 0x5da   : > { %v4231_v25 = vmax.f32 %v4225_v20, 0.0  ;;  %v4229_v26 = vpop.f32.mrb[15].mxu0 }
 0x5db   : > { %v4232_v28 = vmax.f32 %v4227_v23, 0.0 }
 0x5dc   : > { %4233 = vst [vmem:[#allocation3] sm:$0xff] %v4231_v25 }
 0x5dd   : > { %4234 = vst [vmem:[#allocation3 + $0x8] sm:$0xff] %v4232_v28 }
 0x5de PF: > { %v15042_v6 = vld [vmem:[%s17621_s28 + $0x104] ss:$8 sps:$4 sm:$0xff]   ;;  %v15044_v8 = vld [vmem:[%s17621_s28 + $0x100] ss:$8 sps:$4 sm:$0xff]   ;;  %v15045_v29 = vld [vmem:[%s17621_s28 + $0x114] ss:$8 sps:$4 sm:$0xff]  }
 0x5df   : > { %4718 = vmatprep.subr.bf16.mxu1 %v15042_v6  ;;  %v15047_v30 = vld [vmem:[%s17621_s28 + $0x110] ss:$8 sps:$4 sm:$0xff]   ;;  %v15048_v32 = vld [vmem:[%s17621_s28 + $0x124] ss:$8 sps:$4 sm:$0xff]   ;;  %v15050_v33 = vld [vmem:[%s17621_s28 + $0x120] ss:$8 sps:$4 sm:$0xff]   ;;  %v4285_v6 = vlaneseq }
 0x5e0   : > { %4719 = vmatpush1.bf16.msra.mxu1 %v15044_v8  ;;  %v15051_v35 = vld [vmem:[%s17621_s28 + $0x134] ss:$8 sps:$4 sm:$0xff]   ;;  %v15053_v36 = vld [vmem:[%s17621_s28 + $0x130] ss:$8 sps:$4 sm:$0xff]   ;;  %v15054_v37 = vld [vmem:[%s17621_s28 + $0x144] ss:$8 sps:$4 sm:$0xff]  }
 0x5e1   : > { %4720 = vmatprep.subr.bf16.mxu1 %v15045_v29  ;;  %v15056_v34 = vld [vmem:[%s17621_s28 + $0x140] ss:$8 sps:$4 sm:$0xff]   ;;  %v15057_v22 = vld [vmem:[%s17621_s28 + $0x154] ss:$8 sps:$4 sm:$0xff]   ;;  %v15059_v38 = vld [vmem:[%s17621_s28 + $0x150] ss:$8 sps:$4 sm:$0xff]  }
 0x5e2   : > { %v15060_v39 = vld [vmem:[%s17621_s28 + $0x164] ss:$8 sps:$4 sm:$0xff]   ;;  %v4238_v41 = vld [vmem:[#allocation2 + $0x18] sm:$0xff]  ;;  %v15062_v42 = vld [vmem:[%s17621_s28 + $0x160] ss:$8 sps:$4 sm:$0xff]   ;;  %v19761_v5 = vmov 0  }
 0x5e3   : > { %v4236_v40 = vld [vmem:[#allocation2 + $0x8] sm:$0xff]  ;;  %v15063_v31 = vld [vmem:[%s17621_s28 + $0x174] ss:$8 sps:$4 sm:$0xff]   ;;  %v15065_v43 = vld [vmem:[%s17621_s28 + $0x170] ss:$8 sps:$4 sm:$0xff]   ;;  %vm5222_vm0 = vcmask 261120  }
 0x5e4   : > { %4721 = vmatpush1.bf16.msra.mxu1 %v15047_v30  ;;  %v17770_v27 = vpack.c.bf16 %v4238_v41, %v4236_v40  ;;  %v15066_v44 = vld [vmem:[%s17621_s28 + $0x184] ss:$8 sps:$4 sm:$0xff]   ;;  %v15068_v45 = vld [vmem:[%s17621_s28 + $0x180] ss:$8 sps:$4 sm:$0xff]   ;;  %v15069_v46 = vld [vmem:[%s17621_s28 + $0x194] ss:$8 sps:$4 sm:$0xff]  }
 0x5e5   : > { %4722 = vmatprep.subr.bf16.mxu1 %v15048_v32  ;;  %v15071_v47 = vld [vmem:[%s17621_s28 + $0x190] ss:$8 sps:$4 sm:$0xff]   ;;  %v15072_v48 = vld [vmem:[%s17621_s28 + $0x1a4] ss:$8 sps:$4 sm:$0xff]   ;;  %v15074_v49 = vld [vmem:[%s17621_s28 + $0x1a0] ss:$8 sps:$4 sm:$0xff]  }
 0x5e6   : > { %4750 = vmatprep.mubr.bf16.mxu1 %v17770_v27  ;;  %4487 = vmatprep.mubr.bf16.mxu0 %v17770_v27  ;;  %v15075_v50 = vld [vmem:[%s17621_s28 + $0x1b4] ss:$8 sps:$4 sm:$0xff]   ;;  %v15077_v51 = vld [vmem:[%s17621_s28 + $0x1b0] ss:$8 sps:$4 sm:$0xff]   ;;  %v15078_v52 = vld [vmem:[%s17621_s28 + $0x1c4] ss:$8 sps:$4 sm:$0xff]  }
 0x5e7   : > { %v15080_v53 = vld [vmem:[%s17621_s28 + $0x1c0] ss:$8 sps:$4 sm:$0xff]   ;;  %v15081_v54 = vld [vmem:[%s17621_s28 + $0x1d4] ss:$8 sps:$4 sm:$0xff]   ;;  %v15083_v55 = vld [vmem:[%s17621_s28 + $0x1d0] ss:$8 sps:$4 sm:$0xff]  }
 0x5e8   : > { %4723 = vmatpush1.bf16.msra.mxu1 %v15050_v33  ;;  %v15084_v56 = vld [vmem:[%s17621_s28 + $0x1e4] ss:$8 sps:$4 sm:$0xff]   ;;  %v15086_v57 = vld [vmem:[%s17621_s28 + $0x1e0] ss:$8 sps:$4 sm:$0xff]   ;;  %v15087_v58 = vld [vmem:[%s17621_s28 + $0x1f4] ss:$8 sps:$4 sm:$0xff]  }
 0x5e9   : > { %4724 = vmatprep.subr.bf16.mxu1 %v15051_v35  ;;  %v15089_v59 = vld [vmem:[%s17621_s28 + $0x1f0] ss:$8 sps:$4 sm:$0xff]   ;;  %v4235_v60 = vld [vmem:[#allocation2] sm:$0xff]  ;;  %v4240_v62 = vld [vmem:[#allocation2 + $0x28] sm:$0xff]  ;;  %v4286_v33 = vshrl.u32 %v4285_v6, 7  ;;  %s19886_s20 = sld [smem:[#allocation77_spill]] }
 0x5ea   : > { %v4237_v61 = vld [vmem:[#allocation2 + $0x10] sm:$0xff]  ;;  %v4242_v63 = vld [vmem:[#allocation2 + $0x38] sm:$0xff]  ;;  %v4239_v2 = vld [vmem:[#allocation2 + $0x20] sm:$0xff]  ;;  %s19896_s5 = sld [smem:[#allocation78_spill]]  ;;  %s19899_s4 = sld [smem:[#allocation72_spill]]  ;;  %vm7298_vm1 = vcmask 1043456  }
 0x5eb   : > { %v17793_v0 = vpack.c.bf16 %v4237_v61, %v4235_v60  ;;  %v17795_v1 = vpack.c.bf16 %v4242_v63, %v4240_v62  ;;  %v4241_v3 = vld [vmem:[#allocation2 + $0x30] sm:$0xff]  ;;  %v15098_v7 = vld [vmem:[%s17621_s28 + $0x4] ss:$8 sps:$4 sm:$0xff]   ;;  %v15100_v9 = vld [vmem:[%s17621_s28] ss:$8 sps:$4 sm:$0xff]   ;;  %v17826_v35 = vsub.s32 0, %v4286_v33 }
 0x5ec   : > { %4725 = vmatpush1.bf16.msra.mxu1 %v15053_v36  ;;  %v17799_v4 = vpack.c.bf16 %v4241_v3, %v4239_v2  ;;  %v15101_v10 = vld [vmem:[%s17621_s28 + $0x14] ss:$8 sps:$4 sm:$0xff]   ;;  %4455 = vmatprep.subr.bf16.mxu0 %v15098_v7  ;;  %v15104_v11 = vld [vmem:[%s17621_s28 + $0x10] ss:$8 sps:$4 sm:$0xff]   ;;  %v15105_v12 = vld [vmem:[%s17621_s28 + $0x24] ss:$8 sps:$4 sm:$0xff]  }
 0x5ed   : > { %4726 = vmatprep.subr.bf16.mxu1 %v15054_v37  ;;  %4456 = vmatpush1.bf16.msra.mxu0 %v15100_v9  ;;  %v15107_v13 = vld [vmem:[%s17621_s28 + $0x20] ss:$8 sps:$4 sm:$0xff]   ;;  %v15108_v14 = vld [vmem:[%s17621_s28 + $0x34] ss:$8 sps:$4 sm:$0xff]   ;;  %v15111_v15 = vld [vmem:[%s17621_s28 + $0x30] ss:$8 sps:$4 sm:$0xff]  }
 0x5ee   : > { %4457 = vmatprep.subr.bf16.mxu0 %v15101_v10  ;;  %v15112_v16 = vld [vmem:[%s17621_s28 + $0x44] ss:$8 sps:$4 sm:$0xff]   ;;  %v15114_v17 = vld [vmem:[%s17621_s28 + $0x40] ss:$8 sps:$4 sm:$0xff]   ;;  %v15115_v18 = vld [vmem:[%s17621_s28 + $0x54] ss:$8 sps:$4 sm:$0xff]  }
 0x5ef   : > { %v15118_v19 = vld [vmem:[%s17621_s28 + $0x50] ss:$8 sps:$4 sm:$0xff]   ;;  %v15119_v20 = vld [vmem:[%s17621_s28 + $0x64] ss:$8 sps:$4 sm:$0xff]   ;;  %v15121_v21 = vld [vmem:[%s17621_s28 + $0x60] ss:$8 sps:$4 sm:$0xff]  }
 0x5f0   : > { %4727 = vmatpush1.bf16.msra.mxu1 %v15056_v34  ;;  %v15122_v23 = vld [vmem:[%s17621_s28 + $0x74] ss:$8 sps:$4 sm:$0xff]   ;;  %v15125_v24 = vld [vmem:[%s17621_s28 + $0x70] ss:$8 sps:$4 sm:$0xff]   ;;  %v15126_v25 = vld [vmem:[%s17621_s28 + $0x84] ss:$8 sps:$4 sm:$0xff]   ;;  %s19897_s2 = smov %s19896_s5 }
 0x5f1   : > { %4728 = vmatprep.subr.bf16.mxu1 %v15057_v22  ;;  %4458 = vmatpush1.bf16.msra.mxu0 %v15104_v11  ;;  %v15128_v26 = vld [vmem:[%s17621_s28 + $0x80] ss:$8 sps:$4 sm:$0xff]   ;;  %v15129_v28 = vld [vmem:[%s17621_s28 + $0x94] ss:$8 sps:$4 sm:$0xff]   ;;  %v15132_v8 = vld [vmem:[%s17621_s28 + $0x90] ss:$8 sps:$4 sm:$0xff]  }
 0x5f2   : > { %4459 = vmatprep.subr.bf16.mxu0 %v15105_v12  ;;  %v15133_v29 = vld [vmem:[%s17621_s28 + $0xa4] ss:$8 sps:$4 sm:$0xff]   ;;  %v15135_v30 = vld [vmem:[%s17621_s28 + $0xa0] ss:$8 sps:$4 sm:$0xff]   ;;  %v15136_v32 = vld [vmem:[%s17621_s28 + $0xb4] ss:$8 sps:$4 sm:$0xff]  }
 0x5f3   : > { %19884 = vst [vmem:[#allocation52_spill] sm:$0xff] %v17826_v35  ;;  %v15139_v36 = vld [vmem:[%s17621_s28 + $0xb0] ss:$8 sps:$4 sm:$0xff]   ;;  %v17830_v34 = vsub.s32 1, %v4286_v33  ;;  %v15140_v22 = vld [vmem:[%s17621_s28 + $0xc4] ss:$8 sps:$4 sm:$0xff]  }
 0x5f4   : > { %4729 = vmatpush1.bf16.msra.mxu1 %v15059_v38  ;;  %v12878_v37 = vld [vmem:[%s17635_s19 + $0x1] ss:$8 sm:$0x3]  ;;  %v15198_v6 = vld [vmem:[%s17621_s28 + $0x224] ss:$8 sps:$4 sm:$0xff]   ;;  %vm7285_vm2 = vcmask 64512  }
 0x5f5   : > { %4730 = vmatprep.subr.bf16.mxu1 %v15060_v39  ;;  %4460 = vmatpush1.bf16.msra.mxu0 %v15107_v13  ;;  %19885 = vst [vmem:[#allocation53_spill] sm:$0xff] %v17830_v34  ;;  %v15142_v38 = vld [vmem:[%s17621_s28 + $0xc0] ss:$8 sps:$4 sm:$0xff]   ;;  %v15143_v39 = vld [vmem:[%s17621_s28 + $0xd4] ss:$8 sps:$4 sm:$0xff]   ;;  %v4551_v40 = vrot.slane %v12878_v37, %v17826_v35  ;;  %s19907_s26 = sld [smem:[#allocation80_spill]] }
 0x5f6   : > { %4461 = vmatprep.subr.bf16.mxu0 %v15108_v14  ;;  %v15153_v61 = vld [vmem:[%s17621_s28 + $0xf0] ss:$8 sps:$4 sm:$0xff]   ;;  %v17849_v9 = vld [vmem:[#allocation6 + $0x8] sm:$0xff]   ;;  %v17856_v10 = vld [vmem:[#allocation6 + $0x10] sm:$0xff]   ;;  %vm7569_vm3 = vcmask 523264   ;;  %vm16868_vm4 = vmmov 0  }
 0x5f7   : > { %v17842_v7 = vld [vmem:[#allocation6] sm:$0xff]   ;;  %v17861_v11 = vld [vmem:[#allocation6 + $0x18] sm:$0xff]   ;;  %v17871_v12 = vld [vmem:[#allocation6 + $0x28] sm:$0xff]   ;;  %s19930_s21 = sld [smem:[#allocation74_spill]]  ;;  %s19931_s18 = sld [smem:[#allocation75_spill]] }
 0x5f8   : > { %4731 = vmatpush1.bf16.msra.mxu1 %v15062_v42  ;;  %v4555_v42 = vrot.slane %v12878_v37, %v17830_v34  ;;  %v17876_v13 = vld [vmem:[#allocation6 + $0x30] sm:$0xff]   ;;  %v17881_v14 = vld [vmem:[#allocation6 + $0x38] sm:$0xff]   ;;  %p13830_p9 = scmp.ne.s32.totalorder %s17035_s10, 5 }
 0x5f9   : > { %4732 = vmatprep.subr.bf16.mxu1 %v15063_v31  ;;  %4462 = vmatpush1.bf16.msra.mxu0 %v15111_v15  ;;  %v17886_v15 = vld [vmem:[#allocation6 + $0x40] sm:$0xff]   ;;  %v15205_v33 = vld [vmem:[%s17621_s28 + $0x240] ss:$8 sps:$4 sm:$0xff]   ;;  %s19946_s22 = sld [smem:[#allocation97_spill]] (!%p13830_p9) }
 0x5fa   : > { %4463 = vmatprep.subr.bf16.mxu0 %v15112_v16  ;;  %v17891_v16 = vld [vmem:[#allocation6 + $0x48] sm:$0xff]   ;;  %v15211_v37 = vld [vmem:[%s17621_s28 + $0x250] ss:$8 sps:$4 sm:$0xff]  }
 0x5fc   : > { %4733 = vmatpush1.bf16.msra.mxu1 %v15065_v43 }
 0x5fd   : > { %4734 = vmatprep.subr.bf16.mxu1 %v15066_v44  ;;  %4464 = vmatpush1.bf16.msra.mxu0 %v15114_v17  ;;  %v17896_v17 = vld [vmem:[#allocation6 + $0x50] sm:$0xff]  }
 0x5fe   : > { %4465 = vmatprep.subr.bf16.mxu0 %v15115_v18  ;;  %v17901_v18 = vld [vmem:[#allocation6 + $0x58] sm:$0xff]  }
 0x600   : > { %4735 = vmatpush1.bf16.msra.mxu1 %v15068_v45 }
 0x601   : > { %4736 = vmatprep.subr.bf16.mxu1 %v15069_v46  ;;  %4466 = vmatpush1.bf16.msra.mxu0 %v15118_v19  ;;  %v17906_v19 = vld [vmem:[#allocation6 + $0x60] sm:$0xff]  }
 0x602   : > { %4467 = vmatprep.subr.bf16.mxu0 %v15119_v20  ;;  %v17911_v20 = vld [vmem:[#allocation6 + $0x68] sm:$0xff]  }
 0x604   : > { %4737 = vmatpush1.bf16.msra.mxu1 %v15071_v47  ;;  %v15146_v47 = vld [vmem:[%s17621_s28 + $0xd0] ss:$8 sps:$4 sm:$0xff]  }
 0x605   : > { %4738 = vmatprep.subr.bf16.mxu1 %v15072_v48  ;;  %4468 = vmatpush1.bf16.msra.mxu0 %v15121_v21  ;;  %v17916_v21 = vld [vmem:[#allocation6 + $0x70] sm:$0xff]  }
 0x606   : > { %4469 = vmatprep.subr.bf16.mxu0 %v15122_v23  ;;  %v17921_v23 = vld [vmem:[#allocation6 + $0x78] sm:$0xff]  }
 0x608   : > { %4739 = vmatpush1.bf16.msra.mxu1 %v15074_v49 }
 0x609   : > { %4740 = vmatprep.subr.bf16.mxu1 %v15075_v50  ;;  %4470 = vmatpush1.bf16.msra.mxu0 %v15125_v24  ;;  %v15147_v50 = vld [vmem:[%s17621_s28 + $0xe4] ss:$8 sps:$4 sm:$0xff]  }
 0x60a   : > { %4471 = vmatprep.subr.bf16.mxu0 %v15126_v25  ;;  %v15189_v24 = vld [vmem:[%s17621_s28 + $0x204] ss:$8 sps:$4 sm:$0xff]   ;;  %v15187_v25 = vld [vmem:[%s17621_s28 + $0x200] ss:$8 sps:$4 sm:$0xff]  }
 0x60c   : > { %4741 = vmatpush1.bf16.msra.mxu1 %v15077_v51 }
 0x60d   : > { %4742 = vmatprep.subr.bf16.mxu1 %v15078_v52  ;;  %4472 = vmatpush1.bf16.msra.mxu0 %v15128_v26  ;;  %v15149_v52 = vld [vmem:[%s17621_s28 + $0xe0] ss:$8 sps:$4 sm:$0xff]   ;;  %v15195_v26 = vld [vmem:[%s17621_s28 + $0x214] ss:$8 sps:$4 sm:$0xff]  }
 0x60e   : > { %4473 = vmatprep.subr.bf16.mxu0 %v15129_v28  ;;  %v15193_v28 = vld [vmem:[%s17621_s28 + $0x210] ss:$8 sps:$4 sm:$0xff]  }
 0x610   : > { %4743 = vmatpush1.bf16.msra.mxu1 %v15080_v53 }
 0x611   : > { %4744 = vmatprep.subr.bf16.mxu1 %v15081_v54  ;;  %4474 = vmatpush1.bf16.msra.mxu0 %v15132_v8  ;;  %v15150_v54 = vld [vmem:[%s17621_s28 + $0xf4] ss:$8 sps:$4 sm:$0xff]   ;;  %v15196_v8 = vld [vmem:[%s17621_s28 + $0x220] ss:$8 sps:$4 sm:$0xff]  }
 0x612   : > { %4475 = vmatprep.subr.bf16.mxu0 %v15133_v29  ;;  %v15204_v29 = vld [vmem:[%s17621_s28 + $0x234] ss:$8 sps:$4 sm:$0xff]  }
 0x614   : > { %4745 = vmatpush1.bf16.msra.mxu1 %v15083_v55 }
 0x615   : > { %4746 = vmatprep.subr.bf16.mxu1 %v15084_v56  ;;  %4476 = vmatpush1.bf16.msra.mxu0 %v15135_v30  ;;  %v15202_v30 = vld [vmem:[%s17621_s28 + $0x230] ss:$8 sps:$4 sm:$0xff]  }
 0x616   : > { %4477 = vmatprep.subr.bf16.mxu0 %v15136_v32  ;;  %v15207_v32 = vld [vmem:[%s17621_s28 + $0x244] ss:$8 sps:$4 sm:$0xff]  }
 0x618   : > { %4747 = vmatpush1.bf16.msra.mxu1 %v15086_v57 }
 0x619   : > { %4748 = vmatprep.subr.bf16.mxu1 %v15087_v58  ;;  %4478 = vmatpush1.bf16.msra.mxu0 %v15139_v36  ;;  %v15213_v36 = vld [vmem:[%s17621_s28 + $0x254] ss:$8 sps:$4 sm:$0xff]  }
 0x61a   : > { %4479 = vmatprep.subr.bf16.mxu0 %v15140_v22  ;;  %v15216_v22 = vld [vmem:[%s17621_s28 + $0x264] ss:$8 sps:$4 sm:$0xff]  }
 0x61c   : > { %4749 = vmatpush1.bf16.msra.mxu1 %v15089_v59 }
 0x61d   : > { %4480 = vmatpush1.bf16.msra.mxu0 %v15142_v38  ;;  %v15214_v38 = vld [vmem:[%s17621_s28 + $0x260] ss:$8 sps:$4 sm:$0xff]  }
 0x61e   : > { %4481 = vmatprep.subr.bf16.mxu0 %v15143_v39  ;;  %v15222_v39 = vld [vmem:[%s17621_s28 + $0x274] ss:$8 sps:$4 sm:$0xff]  }
 0x61f   : > { %4751 = vmatmul.mubr.bf16.vlgmr.msra.gmra.mrb[0].mxu1 %v17793_v0 }
 0x620   : > { %4760 = vmatprep.mubr.bf16.mxu1 %v17795_v1 }
 0x621   : > { %4482 = vmatpush1.bf16.msra.mxu0 %v15146_v47 }
 0x622   : > { %4483 = vmatprep.subr.bf16.mxu0 %v15147_v50 }
 0x625   : > { %4484 = vmatpush1.bf16.msra.mxu0 %v15149_v52 }
 0x626   : > { %4485 = vmatprep.subr.bf16.mxu0 %v15150_v54 }
 0x627   : > { %4761 = vmatmul.mubr.bf16.gmra.mrb[4].mxu1 %v17799_v4 }
 0x628   : > { %5303 = vmatprep.mubr.bf16.mxu1 %v19761_v5 }
 0x629   : > { %4486 = vmatpush1.bf16.msra.mxu0 %v15153_v61  ;;  %v18158_v61 = vld [vmem:[%s19886_s20 + $0xe0] ss:$8 sps:$4 sm:$0xff]  }
 0x62a   : > { %4981 = vmatprep.subr.bf16.mxu0 %v15189_v24  ;;  %19890 = vst [vmem:[#allocation57_spill] sm:$0xff] %v18158_v61 }
 0x62c   : > { %4488 = vmatmul.mubr.bf16.vlgmr.msra.gmra.mrb[0].mxu0 %v17793_v0 }
 0x62d   : > { %4497 = vmatprep.mubr.bf16.mxu0 %v17795_v1  ;;  %4982 = vmatpush1.bf16.msra.mxu0 %v15187_v25  ;;  %v15235_v25 = vld [vmem:[%s17621_s28 + $0x2b0] ss:$8 sps:$4 sm:$0xff]  }
 0x62e   : > { %4983 = vmatprep.subr.bf16.mxu0 %v15195_v26 }
 0x631   : > { %4984 = vmatpush1.bf16.msra.mxu0 %v15193_v28 }
 0x632   : > { %4985 = vmatprep.subr.bf16.mxu0 %v15198_v6 }
 0x634   : > { %4498 = vmatmul.mubr.bf16.gmra.mrb[4].mxu0 %v17799_v4 }
 0x635   : > { %5013 = vmatprep.mubr.bf16.mxu0 %v17770_v27  ;;  %v17866_v27 = vld [vmem:[#allocation6 + $0x20] sm:$0xff]   ;;  %4986 = vmatpush1.bf16.msra.mxu0 %v15196_v8 }
 0x636   : > { %4987 = vmatprep.subr.bf16.mxu0 %v15204_v29 }
 0x639   : > { %4988 = vmatpush1.bf16.msra.mxu0 %v15202_v30 }
 0x63a   : > { %4989 = vmatprep.subr.bf16.mxu0 %v15207_v32 }
 0x63d   : > { %4990 = vmatpush1.bf16.msra.mxu0 %v15205_v33 }
 0x63e   : > { %4991 = vmatprep.subr.bf16.mxu0 %v15213_v36 }
 0x641   : > { %4992 = vmatpush1.bf16.msra.mxu0 %v15211_v37  ;;  %v15238_v37 = vld [vmem:[%s17621_s28 + $0x2c0] ss:$8 sps:$4 sm:$0xff]  }
 0x642   : > { %4993 = vmatprep.subr.bf16.mxu0 %v15216_v22  ;;  %v15240_v22 = vld [vmem:[%s17621_s28 + $0x2c4] ss:$8 sps:$4 sm:$0xff]  }
 0x645   : > { %4994 = vmatpush1.bf16.msra.mxu0 %v15214_v38 }
 0x646   : > { %4995 = vmatprep.subr.bf16.mxu0 %v15222_v39 }
 0x6f2   : > { %v4752_v41 = vpop.f32.mrb[0].mxu1 }
 0x6f3   : > { %v4754_v31 = vpop.f32.mrb[1].mxu1  ;;  %v4753_v44 = vadd.f32 %v4752_v41, %v4551_v40  ;;  %v15225_v41 = vld [vmem:[%s17621_s28 + $0x284] ss:$8 sps:$4 sm:$0xff]  }
 0x6f4   : > { %v4756_v43 = vpop.f32.mrb[2].mxu1  ;;  %v4755_v48 = vadd.f32 %v4754_v31, %v4555_v42 }
 0x6f5   : > { %v4757_v45 = vadd.f32 %v4756_v43, %v4551_v40  ;;  %v4758_v46 = vpop.f32.mrb[3].mxu1  ;;  %v15231_v43 = vld [vmem:[%s17621_s28 + $0x294] ss:$8 sps:$4 sm:$0xff]  }
 0x6f6   : > { %v4759_v49 = vadd.f32 %v4758_v46, %v4555_v42  ;;  %v15229_v46 = vld [vmem:[%s17621_s28 + $0x290] ss:$8 sps:$4 sm:$0xff]  }
 0x6f7   : > { %v4771_v51 = vpack.c.bf16 %v4757_v45, %v4753_v44  ;;  %v4283_v44 = vld [vmem:[%s17635_s19] ss:$8 sm:$0x3] }
 0x6f8   : > { %v4772_v53 = vpack.c.bf16 %v4759_v49, %v4755_v48  ;;  %v4288_v47 = vrot.slane %v4283_v44, %v17826_v35  ;;  %v4292_v48 = vrot.slane %v4283_v44, %v17830_v34 }
 0x6fa   : > { %v4762_v55 = vpop.f32.mrb[4].mxu1  ;;  %5271 = vmatprep.subr.bf16.mxu1 %v4772_v53 }
 0x6fb   : > { %v4764_v56 = vpop.f32.mrb[5].mxu1  ;;  %5272 = vmatpush1.bf16.msra.mxu1 %v4771_v51  ;;  %v4763_v58 = vadd.f32 %v4762_v55, %v4551_v40 }
 0x6fc   : > { %v4766_v57 = vpop.f32.mrb[6].mxu1  ;;  %v4765_v62 = vadd.f32 %v4764_v56, %v4555_v42  ;;  %v15234_v56 = vld [vmem:[%s17621_s28 + $0x2a4] ss:$8 sps:$4 sm:$0xff]  }
 0x6fd   : > { %v4767_v59 = vadd.f32 %v4766_v57, %v4551_v40  ;;  %v4768_v60 = vpop.f32.mrb[7].mxu1  ;;  %v15220_v40 = vld [vmem:[%s17621_s28 + $0x270] ss:$8 sps:$4 sm:$0xff]  }
 0x6fe   : > { %v4769_v63 = vadd.f32 %v4768_v60, %v4555_v42  ;;  %4996 = vmatpush1.bf16.msra.mxu0 %v15220_v40  ;;  %v15223_v42 = vld [vmem:[%s17621_s28 + $0x280] ss:$8 sps:$4 sm:$0xff]   ;;  %v17957_v60 = vld [vmem:[%s19886_s20 + $0x4] ss:$8 sps:$4 sm:$0xff]  }
 0x6ff   : > { %v4773_v2 = vpack.c.bf16 %v4767_v59, %v4763_v58  ;;  %4997 = vmatprep.subr.bf16.mxu0 %v15225_v41  ;;  %v4489_v31 = vpop.f32.mrb[0].mxu0  ;;  %v15232_v58 = vld [vmem:[%s17621_s28 + $0x2a0] ss:$8 sps:$4 sm:$0xff]   ;;  %v15243_v41 = vld [vmem:[%s17621_s28 + $0x2d4] ss:$8 sps:$4 sm:$0xff]  }
 0x700   : > { %v4774_v3 = vpack.c.bf16 %v4769_v63, %v4765_v62  ;;  %v4491_v45 = vpop.f32.mrb[1].mxu0  ;;  %v17948_v52 = vadd.f32 %v4489_v31, %v4288_v47  ;;  %v15237_v63 = vld [vmem:[%s17621_s28 + $0x2b4] ss:$8 sps:$4 sm:$0xff]  }
 0x701   : > { %v4493_v49 = vpop.f32.mrb[2].mxu0  ;;  %v4492_v53 = vadd.f32 %v4491_v45, %v4292_v48  ;;  %v17982_v31 = vld [vmem:[%s19886_s20 + $0x14] ss:$8 sps:$4 sm:$0xff]   ;;  %v17989_v45 = vld [vmem:[%s19886_s20 + $0x10] ss:$8 sps:$4 sm:$0xff]  }
 0x702   : > { %5273 = vmatprep.subr.bf16.mxu1 %v4774_v3  ;;  %4998 = vmatpush1.bf16.msra.mxu0 %v15223_v42  ;;  %v4495_v50 = vpop.f32.mrb[3].mxu0  ;;  %v17950_v54 = vadd.f32 %v4493_v49, %v4288_v47  ;;  %v17965_v3 = vld [vmem:[%s19886_s20] ss:$8 sps:$4 sm:$0xff]   ;;  %v15241_v49 = vld [vmem:[%s17621_s28 + $0x2d0] ss:$8 sps:$4 sm:$0xff]  }
 0x703   : > { %5274 = vmatpush1.bf16.msra.mxu1 %v4773_v2  ;;  %4999 = vmatprep.subr.bf16.mxu0 %v15231_v43  ;;  %v4496_v55 = vadd.f32 %v4495_v50, %v4292_v48 }
 0x705   : > { %v4509_v62 = vpack.c.bf16 %v4496_v55, %v4492_v53 }
 0x706   : > { %12992 = vmatmul.mubr.msk.bf16.vlgmr.msra.gmra.mrb[8].mxu1 %vm5222_vm0, %v17842_v7  ;;  %5000 = vmatpush1.bf16.msra.mxu0 %v15229_v46 }
 0x707   : > { %5313 = vmatprep.mubr.bf16.mxu1 %v19761_v5  ;;  %5001 = vmatprep.subr.bf16.mxu0 %v15234_v56  ;;  %v4499_v28 = vpop.f32.mrb[4].mxu0  ;;  %v15244_v56 = vld [vmem:[%s17621_s28 + $0x2e0] ss:$8 sps:$4 sm:$0xff]  }
 0x708   : > { %v17968_v6 = vadd.f32 %v4499_v28, %v4288_v47  ;;  %v4501_v8 = vpop.f32.mrb[5].mxu0 }
 0x709   : > { %v17971_v30 = vadd.f32 %v4501_v8, %v4292_v48  ;;  %v4503_v36 = vpop.f32.mrb[6].mxu0 }
 0x70a   : > { %5002 = vmatpush1.bf16.msra.mxu0 %v15232_v58  ;;  %v17976_v39 = vadd.f32 %v4503_v36, %v4288_v47  ;;  %v4505_v40 = vpop.f32.mrb[7].mxu0  ;;  %v18146_v47 = vld [vmem:[%s19886_s20 + $0xd0] ss:$8 sps:$4 sm:$0xff]  }
 0x70b   : > { %5003 = vmatprep.subr.bf16.mxu0 %v15237_v63  ;;  %v17984_v43 = vadd.f32 %v4505_v40, %v4292_v48  ;;  %v18004_v63 = vld [vmem:[%s19886_s20 + $0x24] ss:$8 sps:$4 sm:$0xff]   ;;  %19888 = vst [vmem:[#allocation55_spill] sm:$0xff] %v18146_v47 }
 0x70e   : > { %12993 = vmatmul.mubr.msk.bf16.gmra.mrb[12].mxu1 %vm5222_vm0, %v17849_v9  ;;  %5004 = vmatpush1.bf16.msra.mxu0 %v15235_v25 }
 0x70f   : > { %5323 = vmatprep.mubr.bf16.mxu1 %v19761_v5  ;;  %5005 = vmatprep.subr.bf16.mxu0 %v15240_v22 }
 0x712   : > { %5006 = vmatpush1.bf16.msra.mxu0 %v15238_v37  ;;  %v18017_v37 = vld [vmem:[%s19886_s20 + $0x34] ss:$8 sps:$4 sm:$0xff]  }
 0x713   : > { %5007 = vmatprep.subr.bf16.mxu0 %v15243_v41 }
 0x716   : > { %12994 = vmatmul.mubr.msk.bf16.gmra.mrb[16].mxu1 %vm5222_vm0, %v17856_v10  ;;  %5008 = vmatpush1.bf16.msra.mxu0 %v15241_v49 }
 0x717   : > { %5333 = vmatprep.mubr.bf16.mxu1 %v19761_v5 }
 0x71e   : > { %12995 = vmatmul.mubr.msk.bf16.gmra.mrb[20].mxu1 %vm5222_vm0, %v17861_v11 }
 0x71f   : > { %5343 = vmatprep.mubr.bf16.mxu1 %v19761_v5 }
 0x726   : > { %12996 = vmatmul.mubr.msk.bf16.gmra.mrb[24].mxu1 %vm5222_vm0, %v17866_v27 }
 0x727   : > { %5353 = vmatprep.mubr.bf16.mxu1 %v19761_v5 }
 0x72e   : > { %12997 = vmatmul.mubr.msk.bf16.gmra.mrb[28].mxu1 %vm5222_vm0, %v17871_v12 }
 0x72f   : > { %5363 = vmatprep.mubr.bf16.mxu1 %v19761_v5 }
 0x736   : > { %12998 = vmatmul.mubr.msk.bf16.gmra.mrb[32].mxu1 %vm5222_vm0, %v17876_v13 }
 0x737   : > { %5373 = vmatprep.mubr.bf16.mxu1 %v19761_v5 }
 0x73e   : > { %12999 = vmatmul.mubr.msk.bf16.gmra.mrb[36].mxu1 %vm5222_vm0, %v17881_v14 }
 0x73f   : > { %5383 = vmatprep.mubr.bf16.mxu1 %v19761_v5 }
 0x746   : > { %13000 = vmatmul.mubr.msk.bf16.gmra.mrb[40].mxu1 %vm5222_vm0, %v17886_v15 }
 0x747   : > { %5393 = vmatprep.mubr.bf16.mxu1 %v19761_v5 }
 0x74e   : > { %13001 = vmatmul.mubr.msk.bf16.gmra.mrb[44].mxu1 %vm5222_vm0, %v17891_v16 }
 0x74f   : > { %5403 = vmatprep.mubr.bf16.mxu1 %v19761_v5 }
 0x756   : > { %13002 = vmatmul.mubr.msk.bf16.gmra.mrb[48].mxu1 %vm5222_vm0, %v17896_v17 }
 0x757   : > { %5413 = vmatprep.mubr.bf16.mxu1 %v19761_v5 }
 0x75e   : > { %13003 = vmatmul.mubr.msk.bf16.gmra.mrb[52].mxu1 %vm5222_vm0, %v17901_v18 }
 0x75f   : > { %5423 = vmatprep.mubr.bf16.mxu1 %v19761_v5 }
 0x766   : > { %13004 = vmatmul.mubr.msk.bf16.gmra.mrb[56].mxu1 %vm5222_vm0, %v17906_v19 }
 0x767   : > { %5433 = vmatprep.mubr.bf16.mxu1 %v19761_v5 }
 0x76e   : > { %13005 = vmatmul.mubr.msk.bf16.gmra.mrb[60].mxu1 %vm5222_vm0, %v17911_v20 }
 0x76f   : > { %5443 = vmatprep.mubr.bf16.mxu1 %v19761_v5 }
 0x776   : > { %13006 = vmatmul.mubr.msk.bf16.gmra.mrb[64].mxu1 %vm5222_vm0, %v17916_v21 }
 0x777   : > { %5453 = vmatprep.mubr.bf16.mxu1 %v19761_v5 }
 0x77e   : > { %13007 = vmatmul.mubr.msk.bf16.gmra.mrb[68].mxu1 %vm5222_vm0, %v17921_v23 }
 0x77f   : > { %5977 = vmatprep.mubr.bf16.mxu1 %v4509_v62 }
 0x7d9   : > { %v5305_v51 = vpop.f32.mrb[8].mxu1 }
 0x7da   : > { %v5307_v57 = vpop.f32.mrb[9].mxu1 }
 0x7db   : > { %v5309_v59 = vpop.f32.mrb[10].mxu1 }
 0x7dc   : > { %v5464_v2 = vpack.c.bf16 %v5309_v59, %v5305_v51  ;;  %v5311_v24 = vpop.f32.mrb[11].mxu1  ;;  %v15249_v59 = vld [vmem:[%s17621_s28 + $0x2f4] ss:$8 sps:$4 sm:$0xff]  }
 0x7dd   : > { %v5465_v26 = vpack.c.bf16 %v5311_v24, %v5307_v57  ;;  %v15246_v57 = vld [vmem:[%s17621_s28 + $0x2e4] ss:$8 sps:$4 sm:$0xff]   ;;  %v18009_v24 = vld [vmem:[%s19886_s20 + $0x20] ss:$8 sps:$4 sm:$0xff]  }
 0x7de   : > { %v5656_v32 = vmul.bf16 %v17965_v3, %v5464_v2  ;;  %5009 = vmatprep.subr.bf16.mxu0 %v15246_v57 }
 0x7df   : > { %v5657_v29 = vmul.bf16 %v17957_v60, %v5465_v26  ;;  %5010 = vmatpush1.bf16.msra.mxu0 %v15244_v56  ;;  %v15247_v26 = vld [vmem:[%s17621_s28 + $0x2f0] ss:$8 sps:$4 sm:$0xff]  }
 0x7e0   : > { %5011 = vmatprep.subr.bf16.mxu0 %v15249_v59 }
 0x7e1   : > { %v5315_v33 = vpop.f32.mrb[12].mxu1  ;;  %5945 = vmatprep.subr.bf16.mxu1 %v5657_v29 }
 0x7e2   : > { %v5317_v38 = vpop.f32.mrb[13].mxu1  ;;  %5946 = vmatpush1.bf16.xpose.msra.mxu1 %v5656_v32 }
 0x7e3   : > { %v5319_v42 = vpop.f32.mrb[14].mxu1  ;;  %5012 = vmatpush1.bf16.msra.mxu0 %v15247_v26 }
 0x7e4   : > { %v5466_v44 = vpack.c.bf16 %v5319_v42, %v5315_v33  ;;  %v5321_v46 = vpop.f32.mrb[15].mxu1 }
 0x7e5   : > { %v5467_v50 = vpack.c.bf16 %v5321_v46, %v5317_v38  ;;  %v18023_v38 = vld [vmem:[%s19886_s20 + $0x30] ss:$8 sps:$4 sm:$0xff]  }
 0x7e6   : > { %v5658_v53 = vmul.bf16 %v17989_v45, %v5466_v44  ;;  %5014 = vmatmul.mubr.bf16.vlgmr.msra.gmra.mrb[8].mxu0 %v17793_v0  ;;  %v18031_v0 = vld [vmem:[%s19886_s20 + $0x44] ss:$8 sps:$4 sm:$0xff]  }
 0x7e7   : > { %v5659_v51 = vmul.bf16 %v17982_v31, %v5467_v50  ;;  %5023 = vmatprep.mubr.bf16.mxu0 %v17795_v1  ;;  %v18037_v1 = vld [vmem:[%s19886_s20 + $0x40] ss:$8 sps:$4 sm:$0xff]  }
 0x7e9   : > { %v5325_v55 = vpop.f32.mrb[16].mxu1  ;;  %5947 = vmatprep.subr.bf16.mxu1 %v5659_v51 }
 0x7ea   : > { %v5327_v58 = vpop.f32.mrb[17].mxu1  ;;  %5948 = vmatpush1.bf16.xpose.msra.mxu1 %v5658_v53 }
 0x7eb   : > { %v5329_v62 = vpop.f32.mrb[18].mxu1 }
 0x7ec   : > { %v5468_v2 = vpack.c.bf16 %v5329_v62, %v5325_v55  ;;  %v5331_v25 = vpop.f32.mrb[19].mxu1 }
 0x7ed   : > { %v5469_v28 = vpack.c.bf16 %v5331_v25, %v5327_v58  ;;  %v18050_v25 = vld [vmem:[%s19886_s20 + $0x50] ss:$8 sps:$4 sm:$0xff]  }
 0x7ee   : > { %v5660_v29 = vmul.bf16 %v18009_v24, %v5468_v2  ;;  %5024 = vmatmul.mubr.bf16.gmra.mrb[12].mxu0 %v17799_v4  ;;  %v18045_v4 = vld [vmem:[%s19886_s20 + $0x54] ss:$8 sps:$4 sm:$0xff]  }
 0x7ef   : > { %v5661_v8 = vmul.bf16 %v18004_v63, %v5469_v28  ;;  %5720 = vmatprep.mubr.bf16.mxu0 %v19761_v5 }
 0x7f1   : > { %v5335_v32 = vpop.f32.mrb[20].mxu1  ;;  %5949 = vmatprep.subr.bf16.mxu1 %v5661_v8 }
 0x7f2   : > { %v5337_v33 = vpop.f32.mrb[21].mxu1  ;;  %5950 = vmatpush1.bf16.xpose.msra.mxu1 %v5660_v29 }
 0x7f3   : > { %v5339_v36 = vpop.f32.mrb[22].mxu1 }
 0x7f4   : > { %v5470_v22 = vpack.c.bf16 %v5339_v36, %v5335_v32  ;;  %v5341_v40 = vpop.f32.mrb[23].mxu1 }
 0x7f5   : > { %v5471_v41 = vpack.c.bf16 %v5341_v40, %v5337_v33 }
 0x7f6   : > { %v5662_v44 = vmul.bf16 %v18023_v38, %v5470_v22  ;;  %v18057_v22 = vld [vmem:[%s19886_s20 + $0x64] ss:$8 sps:$4 sm:$0xff]  }
 0x7f7   : > { %v5663_v42 = vmul.bf16 %v18017_v37, %v5471_v41  ;;  %v18062_v41 = vld [vmem:[%s19886_s20 + $0x60] ss:$8 sps:$4 sm:$0xff]  }
 0x7f9   : > { %v5345_v46 = vpop.f32.mrb[24].mxu1  ;;  %5951 = vmatprep.subr.bf16.mxu1 %v5663_v42 }
 0x7fa   : > { %v5347_v49 = vpop.f32.mrb[25].mxu1  ;;  %5952 = vmatpush1.bf16.xpose.msra.mxu1 %v5662_v44 }
 0x7fb   : > { %v5349_v50 = vpop.f32.mrb[26].mxu1 }
 0x7fc   : > { %v5472_v51 = vpack.c.bf16 %v5349_v50, %v5345_v46  ;;  %v5351_v53 = vpop.f32.mrb[27].mxu1 }
 0x7fd   : > { %v5473_v55 = vpack.c.bf16 %v5351_v53, %v5347_v49 }
 0x7fe   : > { %v5664_v57 = vmul.bf16 %v18037_v1, %v5472_v51 }
 0x7ff   : > { %v5665_v56 = vmul.bf16 %v18031_v0, %v5473_v55  ;;  %v18069_v55 = vld [vmem:[%s19886_s20 + $0x74] ss:$8 sps:$4 sm:$0xff]  }
 0x801   : > { %v5355_v58 = vpop.f32.mrb[28].mxu1  ;;  %5953 = vmatprep.subr.bf16.mxu1 %v5665_v56 }
 0x802   : > { %v5357_v59 = vpop.f32.mrb[29].mxu1  ;;  %5954 = vmatpush1.bf16.xpose.msra.mxu1 %v5664_v57  ;;  %v18074_v57 = vld [vmem:[%s19886_s20 + $0x70] ss:$8 sps:$4 sm:$0xff]  }
 0x803   : > { %v5359_v62 = vpop.f32.mrb[30].mxu1 }
 0x804   : > { %v5474_v2 = vpack.c.bf16 %v5359_v62, %v5355_v58  ;;  %v5361_v26 = vpop.f32.mrb[31].mxu1 }
 0x805   : > { %v5475_v28 = vpack.c.bf16 %v5361_v26, %v5357_v59 }
 0x806   : > { %v5666_v29 = vmul.bf16 %v18050_v25, %v5474_v2 }
 0x807   : > { %v5667_v8 = vmul.bf16 %v18045_v4, %v5475_v28 }
 0x809   : > { %v5365_v32 = vpop.f32.mrb[32].mxu1  ;;  %5955 = vmatprep.subr.bf16.mxu1 %v5667_v8 }
 0x80a   : > { %v5367_v33 = vpop.f32.mrb[33].mxu1  ;;  %5956 = vmatpush1.bf16.xpose.msra.mxu1 %v5666_v29  ;;  %v18081_v29 = vld [vmem:[%s19886_s20 + $0x84] ss:$8 sps:$4 sm:$0xff]  }
 0x80b   : > { %v5369_v36 = vpop.f32.mrb[34].mxu1 }
 0x80c   : > { %v5476_v40 = vpack.c.bf16 %v5369_v36, %v5365_v32  ;;  %v5371_v42 = vpop.f32.mrb[35].mxu1 }
 0x80d   : > { %v5477_v44 = vpack.c.bf16 %v5371_v42, %v5367_v33  ;;  %v18086_v33 = vld [vmem:[%s19886_s20 + $0x80] ss:$8 sps:$4 sm:$0xff]  }
 0x80e   : > { %v5668_v49 = vmul.bf16 %v18062_v41, %v5476_v40 }
 0x80f   : > { %v5669_v46 = vmul.bf16 %v18057_v22, %v5477_v44 }
 0x811   : > { %v5375_v50 = vpop.f32.mrb[36].mxu1  ;;  %5957 = vmatprep.subr.bf16.mxu1 %v5669_v46 }
 0x812   : > { %v5377_v51 = vpop.f32.mrb[37].mxu1  ;;  %5958 = vmatpush1.bf16.xpose.msra.mxu1 %v5668_v49 }
 0x813   : > { %v5379_v53 = vpop.f32.mrb[38].mxu1 }
 0x814   : > { %v5478_v56 = vpack.c.bf16 %v5379_v53, %v5375_v50  ;;  %v5381_v58 = vpop.f32.mrb[39].mxu1 }
 0x815   : > { %v5479_v59 = vpack.c.bf16 %v5381_v58, %v5377_v51  ;;  %v18093_v51 = vld [vmem:[%s19886_s20 + $0x94] ss:$8 sps:$4 sm:$0xff]  }
 0x816   : > { %v5670_v2 = vmul.bf16 %v18074_v57, %v5478_v56  ;;  %v18098_v56 = vld [vmem:[%s19886_s20 + $0x90] ss:$8 sps:$4 sm:$0xff]  }
 0x817   : > { %v5671_v62 = vmul.bf16 %v18069_v55, %v5479_v59 }
 0x819   : > { %v5385_v26 = vpop.f32.mrb[40].mxu1  ;;  %5959 = vmatprep.subr.bf16.mxu1 %v5671_v62 }
 0x81a   : > { %v5387_v28 = vpop.f32.mrb[41].mxu1  ;;  %5960 = vmatpush1.bf16.xpose.msra.mxu1 %v5670_v2 }
 0x81b   : > { %v5389_v8 = vpop.f32.mrb[42].mxu1 }
 0x81c   : > { %v5480_v32 = vpack.c.bf16 %v5389_v8, %v5385_v26  ;;  %v5391_v36 = vpop.f32.mrb[43].mxu1 }
 0x81d   : > { %v5481_v40 = vpack.c.bf16 %v5391_v36, %v5387_v28 }
 0x81e   : > { %v5672_v44 = vmul.bf16 %v18086_v33, %v5480_v32  ;;  %v18105_v32 = vld [vmem:[%s19886_s20 + $0xa4] ss:$8 sps:$4 sm:$0xff]  }
 0x81f   : > { %v5673_v42 = vmul.bf16 %v18081_v29, %v5481_v40  ;;  %v18110_v40 = vld [vmem:[%s19886_s20 + $0xa0] ss:$8 sps:$4 sm:$0xff]  }
 0x821   : > { %v5395_v46 = vpop.f32.mrb[44].mxu1  ;;  %5961 = vmatprep.subr.bf16.mxu1 %v5673_v42 }
 0x822   : > { %v5397_v49 = vpop.f32.mrb[45].mxu1  ;;  %5962 = vmatpush1.bf16.xpose.msra.mxu1 %v5672_v44 }
 0x823   : > { %v5399_v50 = vpop.f32.mrb[46].mxu1 }
 0x824   : > { %v5482_v53 = vpack.c.bf16 %v5399_v50, %v5395_v46  ;;  %v5401_v58 = vpop.f32.mrb[47].mxu1 }
 0x825   : > { %v5483_v59 = vpack.c.bf16 %v5401_v58, %v5397_v49 }
 0x826   : > { %v5674_v2 = vmul.bf16 %v18098_v56, %v5482_v53 }
 0x827   : > { %v5675_v62 = vmul.bf16 %v18093_v51, %v5483_v59  ;;  %v18117_v59 = vld [vmem:[%s19886_s20 + $0xb4] ss:$8 sps:$4 sm:$0xff]  }
 0x829   : > { %v5405_v26 = vpop.f32.mrb[48].mxu1  ;;  %5963 = vmatprep.subr.bf16.mxu1 %v5675_v62 }
 0x82a   : > { %v5407_v28 = vpop.f32.mrb[49].mxu1  ;;  %5964 = vmatpush1.bf16.xpose.msra.mxu1 %v5674_v2  ;;  %v18122_v2 = vld [vmem:[%s19886_s20 + $0xb0] ss:$8 sps:$4 sm:$0xff]  }
 0x82b   : > { %v5409_v8 = vpop.f32.mrb[50].mxu1 }
 0x82c   : > { %v5484_v36 = vpack.c.bf16 %v5409_v8, %v5405_v26  ;;  %v5411_v42 = vpop.f32.mrb[51].mxu1 }
 0x82d   : > { %v5485_v44 = vpack.c.bf16 %v5411_v42, %v5407_v28 }
 0x82e   : > { %v5676_v49 = vmul.bf16 %v18110_v40, %v5484_v36 }
 0x82f   : > { %v5677_v46 = vmul.bf16 %v18105_v32, %v5485_v44 }
 0x831   : > { %v5415_v50 = vpop.f32.mrb[52].mxu1  ;;  %5965 = vmatprep.subr.bf16.mxu1 %v5677_v46 }
 0x832   : > { %v5417_v53 = vpop.f32.mrb[53].mxu1  ;;  %5966 = vmatpush1.bf16.xpose.msra.mxu1 %v5676_v49  ;;  %v18129_v49 = vld [vmem:[%s19886_s20 + $0xc4] ss:$8 sps:$4 sm:$0xff]  }
 0x833   : > { %v5419_v58 = vpop.f32.mrb[54].mxu1 }
 0x834   : > { %v5486_v62 = vpack.c.bf16 %v5419_v58, %v5415_v50  ;;  %v5421_v26 = vpop.f32.mrb[55].mxu1  ;;  %v18134_v58 = vld [vmem:[%s19886_s20 + $0xc0] ss:$8 sps:$4 sm:$0xff]  }
 0x835   : > { %v5487_v28 = vpack.c.bf16 %v5421_v26, %v5417_v53 }
 0x836   : > { %v5678_v36 = vmul.bf16 %v18122_v2, %v5486_v62 }
 0x837   : > { %v5679_v8 = vmul.bf16 %v18117_v59, %v5487_v28 }
 0x839   : > { %v5425_v42 = vpop.f32.mrb[56].mxu1  ;;  %5967 = vmatprep.subr.bf16.mxu1 %v5679_v8 }
 0x83a   : > { %v5427_v44 = vpop.f32.mrb[57].mxu1  ;;  %5968 = vmatpush1.bf16.xpose.msra.mxu1 %v5678_v36 }
 0x83b   : > { %v5429_v46 = vpop.f32.mrb[58].mxu1 }
 0x83c   : > { %v5488_v50 = vpack.c.bf16 %v5429_v46, %v5425_v42  ;;  %v5431_v53 = vpop.f32.mrb[59].mxu1  ;;  %v18141_v42 = vld [vmem:[%s19886_s20 + $0xd4] ss:$8 sps:$4 sm:$0xff]  }
 0x83d   : > { %v5489_v26 = vpack.c.bf16 %v5431_v53, %v5427_v44  ;;  %19887 = vst [vmem:[#allocation54_spill] sm:$0xff] %v18141_v42 }
 0x83e   : > { %v5680_v28 = vmul.bf16 %v18134_v58, %v5488_v50 }
 0x83f   : > { %v5681_v62 = vmul.bf16 %v18129_v49, %v5489_v26 }
 0x841   : > { %v5435_v8 = vpop.f32.mrb[60].mxu1  ;;  %5969 = vmatprep.subr.bf16.mxu1 %v5681_v62 }
 0x842   : > { %v5437_v36 = vpop.f32.mrb[61].mxu1  ;;  %5970 = vmatpush1.bf16.xpose.msra.mxu1 %v5680_v28 }
 0x843   : > { %v5439_v5 = vpop.f32.mrb[62].mxu1 }
 0x844   : > { %v5490_v46 = vpack.c.bf16 %v5439_v5, %v5435_v8  ;;  %v5441_v44 = vpop.f32.mrb[63].mxu1  ;;  %v18153_v5 = vld [vmem:[%s19886_s20 + $0xe4] ss:$8 sps:$4 sm:$0xff]  }
 0x845   : > { %v5491_v53 = vpack.c.bf16 %v5441_v44, %v5437_v36  ;;  %19889 = vst [vmem:[#allocation56_spill] sm:$0xff] %v18153_v5 }
 0x846   : > { %v5682_v26 = vmul.bf16 %v18146_v47, %v5490_v46 }
 0x847   : > { %v5683_v50 = vmul.bf16 %v18141_v42, %v5491_v53 }
 0x849   : > { %v5445_v62 = vpop.f32.mrb[64].mxu1  ;;  %5971 = vmatprep.subr.bf16.mxu1 %v5683_v50 }
 0x84a   : > { %v5447_v28 = vpop.f32.mrb[65].mxu1  ;;  %5972 = vmatpush1.bf16.xpose.msra.mxu1 %v5682_v26 }
 0x84b   : > { %v5449_v48 = vpop.f32.mrb[66].mxu1 }
 0x84c   : > { %v5492_v8 = vpack.c.bf16 %v5449_v48, %v5445_v62  ;;  %v5451_v36 = vpop.f32.mrb[67].mxu1  ;;  %v18165_v48 = vld [vmem:[%s19886_s20 + $0xf4] ss:$8 sps:$4 sm:$0xff]  }
 0x84d   : > { %v5493_v44 = vpack.c.bf16 %v5451_v36, %v5447_v28  ;;  %19891 = vst [vmem:[#allocation58_spill] sm:$0xff] %v18165_v48  ;;  %v18170_v28 = vld [vmem:[%s19886_s20 + $0xf0] ss:$8 sps:$4 sm:$0xff]  }
 0x84e   : > { %v5684_v53 = vmul.bf16 %v18158_v61, %v5492_v8  ;;  %19892 = vst [vmem:[#allocation59_spill] sm:$0xff] %v18170_v28 }
 0x84f   : > { %v5685_v46 = vmul.bf16 %v18153_v5, %v5493_v44  ;;  %v12943_v5 = vld [vmem:[%s17635_s19 + $0x2] ss:$8 sm:$0x3] }
 0x851   : > { %v5455_v50 = vpop.f32.mrb[68].mxu1  ;;  %5973 = vmatprep.subr.bf16.mxu1 %v5685_v46 }
 0x852   : > { %v5457_v26 = vpop.f32.mrb[69].mxu1  ;;  %5974 = vmatpush1.bf16.xpose.msra.mxu1 %v5684_v53  ;;  %v19893_v53 = vpack.c.bf16 %v17950_v54, %v17948_v52 }
 0x853   : > { %v5459_v42 = vpop.f32.mrb[70].mxu1 }
 0x854   : > { %v5494_v62 = vpack.c.bf16 %v5459_v42, %v5455_v50  ;;  %v5461_v36 = vpop.f32.mrb[71].mxu1  ;;  %v19894_v42 = vpack.c.bf16 %v17984_v43, %v17971_v30  ;;  %v19895_v50 = vpack.c.bf16 %v17976_v39, %v17968_v6 }
 0x855   : > { %v5495_v44 = vpack.c.bf16 %v5461_v36, %v5457_v26  ;;  %v4814_v26 = vrot.slane %v12943_v5, %v17826_v35 }
 0x856   : > { %v5686_v46 = vmul.bf16 %v18170_v28, %v5494_v62  ;;  %v4818_v62 = vrot.slane %v12943_v5, %v17830_v34 }
 0x857   : > { %v5687_v8 = vmul.bf16 %v18165_v48, %v5495_v44 }
 0x859   : > { %5975 = vmatprep.subr.bf16.mxu1 %v5687_v8 }
 0x85a   : > { %5976 = vmatpush1.bf16.xpose.msra.mxu1 %v5686_v46 }
 0x861   : > { %5978 = vmatmul.mubr.bf16.vlgmr.msra.gmra.mrb[72].mxu1 %v19893_v53 }
 0x862   : > { %5987 = vmatprep.mubr.bf16.mxu1 %v19894_v42 }
 0x869   : > { %5988 = vmatmul.mubr.bf16.gmra.mrb[76].mxu1 %v19895_v50 }
 0x8b9   : > { %v5015_v36 = vpop.f32.mrb[8].mxu0 }
 0x8ba   : > { %v5016_v44 = vadd.f32 %v5015_v36, %v4814_v26  ;;  %v5017_v8 = vpop.f32.mrb[9].mxu0 }
 0x8bb   : > { %v5018_v46 = vadd.f32 %v5017_v8, %v4818_v62  ;;  %v5019_v48 = vpop.f32.mrb[10].mxu0  ;;  %v15264_v8 = vld [vmem:[%s19897_s2 + $0x44] ss:$8 sps:$4 sm:$0xff]  }
 0x8bc   : > { %v5020_v52 = vadd.f32 %v5019_v48, %v4814_v26  ;;  %v5021_v54 = vpop.f32.mrb[11].mxu0  ;;  %v15252_v48 = vld [vmem:[%s19896_s5 + $0x4] ss:$8 sps:$4 sm:$0xff]  }
 0x8bd   : > { %v5022_v53 = vadd.f32 %v5021_v54, %v4818_v62  ;;  %v15270_v54 = vld [vmem:[%s19897_s2 + $0x64] ss:$8 sps:$4 sm:$0xff]  }
 0x8be   : > { %v5034_v28 = vpack.c.bf16 %v5020_v52, %v5016_v44  ;;  %v15250_v44 = vld [vmem:[%s19897_s2] ss:$8 sps:$4 sm:$0xff]   ;;  %v15265_v52 = vld [vmem:[%s19897_s2 + $0x50] ss:$8 sps:$4 sm:$0xff]  }
 0x8bf   : > { %v5035_v30 = vpack.c.bf16 %v5022_v53, %v5018_v46  ;;  %v15262_v46 = vld [vmem:[%s19897_s2 + $0x40] ss:$8 sps:$4 sm:$0xff]  }
 0x8c0   : > { %v15268_v53 = vld [vmem:[%s19897_s2 + $0x60] ss:$8 sps:$4 sm:$0xff]  }
 0x8c1   : > { %v5025_v43 = vpop.f32.mrb[12].mxu0  ;;  %5688 = vmatprep.subr.bf16.mxu0 %v5035_v30  ;;  %v15271_v30 = vld [vmem:[%s19897_s2 + $0x70] ss:$8 sps:$4 sm:$0xff]  }
 0x8c2   : > { %v5026_v42 = vadd.f32 %v5025_v43, %v4814_v26  ;;  %v5027_v6 = vpop.f32.mrb[13].mxu0  ;;  %5689 = vmatpush1.bf16.msra.mxu0 %v5034_v28  ;;  %v15255_v28 = vld [vmem:[%s19897_s2 + $0x14] ss:$8 sps:$4 sm:$0xff]   ;;  %v15276_v43 = vld [vmem:[%s19897_s2 + $0x84] ss:$8 sps:$4 sm:$0xff]  }
 0x8c3   : > { %v5028_v39 = vadd.f32 %v5027_v6, %v4818_v62  ;;  %v5029_v50 = vpop.f32.mrb[14].mxu0  ;;  %v15277_v6 = vld [vmem:[%s19897_s2 + $0x90] ss:$8 sps:$4 sm:$0xff]  }
 0x8c4   : > { %v5030_v35 = vadd.f32 %v5029_v50, %v4814_v26  ;;  %v5031_v61 = vpop.f32.mrb[15].mxu0  ;;  %v15256_v26 = vld [vmem:[%s19897_s2 + $0x20] ss:$8 sps:$4 sm:$0xff]  }
 0x8c5   : > { %v5032_v47 = vadd.f32 %v5031_v61, %v4818_v62  ;;  %v15253_v61 = vld [vmem:[%s19897_s2 + $0x10] ss:$8 sps:$4 sm:$0xff]   ;;  %v15280_v50 = vld [vmem:[%s19897_s2 + $0xa0] ss:$8 sps:$4 sm:$0xff]  }
 0x8c6   : > { %v5036_v5 = vpack.c.bf16 %v5030_v35, %v5026_v42  ;;  %v19898_v35 = vmov 0   ;;  %v15259_v62 = vld [vmem:[%s19897_s2 + $0x30] ss:$8 sps:$4 sm:$0xff]   ;;  %v15274_v42 = vld [vmem:[%s19897_s2 + $0x80] ss:$8 sps:$4 sm:$0xff]  }
 0x8c7   : > { %v5037_v36 = vpack.c.bf16 %v5032_v47, %v5028_v39  ;;  %v15258_v47 = vld [vmem:[%s19897_s2 + $0x24] ss:$8 sps:$4 sm:$0xff]  }
 0x8c8   : > { %v15282_v39 = vld [vmem:[%s19897_s2 + $0xa4] ss:$8 sps:$4 sm:$0xff]  }
 0x8c9   : > { %5690 = vmatprep.subr.bf16.mxu0 %v5037_v36  ;;  %v15288_v36 = vld [vmem:[%s19897_s2 + $0xc4] ss:$8 sps:$4 sm:$0xff]  }
 0x8ca   : > { %5691 = vmatpush1.bf16.msra.mxu0 %v5036_v5  ;;  %v15283_v5 = vld [vmem:[%s19897_s2 + $0xb0] ss:$8 sps:$4 sm:$0xff]  }
 0x8cb   : > { %6198 = vmatprep.subr.bf16.mxu0 %v15252_v48  ;;  %v15286_v48 = vld [vmem:[%s19897_s2 + $0xc0] ss:$8 sps:$4 sm:$0xff]  }
 0x8cd   : > { %13040 = vmatmul.mubr.msk.bf16.vlgmr.msra.gmra.mrb[16].mxu0 %vm5222_vm0, %v17842_v7  ;;  %v15261_v7 = vld [vmem:[%s19897_s2 + $0x34] ss:$8 sps:$4 sm:$0xff]  }
 0x8ce   : > { %5730 = vmatprep.mubr.bf16.mxu0 %v19898_v35  ;;  %6199 = vmatpush1.bf16.msra.mxu0 %v15250_v44  ;;  %v5137_v44 = vld [vmem:[%s19899_s4 + $0x18] sm:$0xff] }
 0x8cf   : > { %6200 = vmatprep.subr.bf16.mxu0 %v15255_v28 }
 0x8d2   : > { %6201 = vmatpush1.bf16.msra.mxu0 %v15253_v61 }
 0x8d3   : > { %6202 = vmatprep.subr.bf16.mxu0 %v15258_v47 }
 0x8d5   : > { %13041 = vmatmul.mubr.msk.bf16.gmra.mrb[20].mxu0 %vm5222_vm0, %v17849_v9  ;;  %v15267_v9 = vld [vmem:[%s19897_s2 + $0x54] ss:$8 sps:$4 sm:$0xff]  }
 0x8d6   : > { %5740 = vmatprep.mubr.bf16.mxu0 %v19898_v35  ;;  %6203 = vmatpush1.bf16.msra.mxu0 %v15256_v26 }
 0x8d7   : > { %6204 = vmatprep.subr.bf16.mxu0 %v15261_v7 }
 0x8da   : > { %6205 = vmatpush1.bf16.msra.mxu0 %v15259_v62  ;;  %v5138_v62 = vld [vmem:[%s19899_s4 + $0x20] sm:$0xff] }
 0x8db   : > { %6206 = vmatprep.subr.bf16.mxu0 %v15264_v8  ;;  %v5139_v8 = vld [vmem:[%s19899_s4 + $0x28] sm:$0xff] }
 0x8dd   : > { %13042 = vmatmul.mubr.msk.bf16.gmra.mrb[24].mxu0 %vm5222_vm0, %v17856_v10  ;;  %v15273_v10 = vld [vmem:[%s19897_s2 + $0x74] ss:$8 sps:$4 sm:$0xff]  }
 0x8de   : > { %5750 = vmatprep.mubr.bf16.mxu0 %v19898_v35  ;;  %6207 = vmatpush1.bf16.msra.mxu0 %v15262_v46 }
 0x8df   : > { %6208 = vmatprep.subr.bf16.mxu0 %v15267_v9 }
 0x8e2   : > { %6209 = vmatpush1.bf16.msra.mxu0 %v15265_v52  ;;  %v5140_v52 = vld [vmem:[%s19899_s4 + $0x30] sm:$0xff] }
 0x8e3   : > { %6210 = vmatprep.subr.bf16.mxu0 %v15270_v54 }
 0x8e5   : > { %13043 = vmatmul.mubr.msk.bf16.gmra.mrb[28].mxu0 %vm5222_vm0, %v17861_v11  ;;  %v15279_v11 = vld [vmem:[%s19897_s2 + $0x94] ss:$8 sps:$4 sm:$0xff]  }
 0x8e6   : > { %5760 = vmatprep.mubr.bf16.mxu0 %v19898_v35  ;;  %6211 = vmatpush1.bf16.msra.mxu0 %v15268_v53 }
 0x8e7   : > { %6212 = vmatprep.subr.bf16.mxu0 %v15273_v10 }
 0x8ea   : > { %6213 = vmatpush1.bf16.msra.mxu0 %v15271_v30 }
 0x8eb   : > { %6214 = vmatprep.subr.bf16.mxu0 %v15276_v43 }
 0x8ed   : > { %13044 = vmatmul.mubr.msk.bf16.gmra.mrb[32].mxu0 %vm5222_vm0, %v17866_v27  ;;  %v15285_v27 = vld [vmem:[%s19897_s2 + $0xb4] ss:$8 sps:$4 sm:$0xff]  }
 0x8ee   : > { %5770 = vmatprep.mubr.bf16.mxu0 %v19898_v35  ;;  %6215 = vmatpush1.bf16.msra.mxu0 %v15274_v42 }
 0x8ef   : > { %6216 = vmatprep.subr.bf16.mxu0 %v15279_v11 }
 0x8f2   : > { %6217 = vmatpush1.bf16.msra.mxu0 %v15277_v6 }
 0x8f3   : > { %6218 = vmatprep.subr.bf16.mxu0 %v15282_v39 }
 0x8f5   : > { %13045 = vmatmul.mubr.msk.bf16.gmra.mrb[36].mxu0 %vm5222_vm0, %v17871_v12  ;;  %v5134_v12 = vld [vmem:[%s19899_s4] sm:$0xff] }
 0x8f6   : > { %5780 = vmatprep.mubr.bf16.mxu0 %v19898_v35  ;;  %6219 = vmatpush1.bf16.msra.mxu0 %v15280_v50  ;;  %v15289_v50 = vld [vmem:[%s19897_s2 + $0xd0] ss:$8 sps:$4 sm:$0xff]  }
 0x8f7   : > { %6220 = vmatprep.subr.bf16.mxu0 %v15285_v27  ;;  %v15291_v27 = vld [vmem:[%s19897_s2 + $0xd4] ss:$8 sps:$4 sm:$0xff]  }
 0x8fa   : > { %6221 = vmatpush1.bf16.msra.mxu0 %v15283_v5  ;;  %v15295_v5 = vld [vmem:[%s19897_s2 + $0xf0] ss:$8 sps:$4 sm:$0xff]  }
 0x8fb   : > { %6222 = vmatprep.subr.bf16.mxu0 %v15288_v36  ;;  %v15297_v36 = vld [vmem:[%s19897_s2 + $0xf4] ss:$8 sps:$4 sm:$0xff]  }
 0x8fd   : > { %13046 = vmatmul.mubr.msk.bf16.gmra.mrb[40].mxu0 %vm5222_vm0, %v17876_v13  ;;  %v5135_v13 = vld [vmem:[%s19899_s4 + $0x8] sm:$0xff] }
 0x8fe   : > { %5790 = vmatprep.mubr.bf16.mxu0 %v19898_v35  ;;  %6223 = vmatpush1.bf16.msra.mxu0 %v15286_v48 }
 0x8ff   : > { %6224 = vmatprep.subr.bf16.mxu0 %v15291_v27 }
 0x902   : > { %6225 = vmatpush1.bf16.msra.mxu0 %v15289_v50 }
 0x905   : > { %13047 = vmatmul.mubr.msk.bf16.gmra.mrb[44].mxu0 %vm5222_vm0, %v17881_v14 }
 0x906   : > { %5800 = vmatprep.mubr.bf16.mxu0 %v19898_v35 }
 0x90d   : > { %13048 = vmatmul.mubr.msk.bf16.gmra.mrb[48].mxu0 %vm5222_vm0, %v17886_v15 }
 0x90e   : > { %5810 = vmatprep.mubr.bf16.mxu0 %v19898_v35 }
 0x915   : > { %13049 = vmatmul.mubr.msk.bf16.gmra.mrb[52].mxu0 %vm5222_vm0, %v17891_v16 }
 0x916   : > { %5820 = vmatprep.mubr.bf16.mxu0 %v19898_v35 }
 0x91d   : > { %13050 = vmatmul.mubr.msk.bf16.gmra.mrb[56].mxu0 %vm5222_vm0, %v17896_v17  ;;  %v5136_v17 = vld [vmem:[%s19899_s4 + $0x10] sm:$0xff] }
 0x91e   : > { %5830 = vmatprep.mubr.bf16.mxu0 %v19898_v35 }
 0x925   : > { %13051 = vmatmul.mubr.msk.bf16.gmra.mrb[60].mxu0 %vm5222_vm0, %v17901_v18 }
 0x926   : > { %5840 = vmatprep.mubr.bf16.mxu0 %v19898_v35 }
 0x92d   : > { %13052 = vmatmul.mubr.msk.bf16.gmra.mrb[64].mxu0 %vm5222_vm0, %v17906_v19  ;;  %v5141_v19 = vld [vmem:[%s19899_s4 + $0x38] sm:$0xff] }
 0x92e   : > { %5850 = vmatprep.mubr.bf16.mxu0 %v19898_v35 }
 0x934   : > { %v5979_v14 = vpop.f32.mrb[72].mxu1 }
 0x935   : > { %v18306_v15 = vadd.f32 %v5979_v14, %v5134_v12  ;;  %v5981_v16 = vpop.f32.mrb[73].mxu1  ;;  %13053 = vmatmul.mubr.msk.bf16.gmra.mrb[68].mxu0 %vm5222_vm0, %v17911_v20  ;;  %v15292_v20 = vld [vmem:[%s19897_s2 + $0xe0] ss:$8 sps:$4 sm:$0xff]  }
 0x936   : > { %v18314_v28 = vadd.f32 %v5981_v16, %v5135_v13  ;;  %v5983_v18 = vpop.f32.mrb[74].mxu1  ;;  %5860 = vmatprep.mubr.bf16.mxu0 %v19898_v35 }
 0x937   : > { %v5985_v61 = vpop.f32.mrb[75].mxu1  ;;  %v18316_v47 = vadd.f32 %v5983_v18, %v5136_v17 }
 0x938   : > { %v18318_v26 = vadd.f32 %v5985_v61, %v5137_v44  ;;  %v5998_v7 = vmax.f32 %v18306_v15, %v18314_v28 }
 0x93a   : > { %5999 = vmax.xlane.f32.xlu0 %v5998_v7  ;;  %v6001_v9 = vmax.f32 %v18316_v47, %v18318_v26 }
 0x93c   : > { %v5989_v46 = vpop.f32.mrb[76].mxu1 }
 0x93d   : > { %v18336_v54 = vadd.f32 %v5989_v46, %v5138_v62  ;;  %v5991_v53 = vpop.f32.mrb[77].mxu1  ;;  %13054 = vmatmul.mubr.msk.bf16.gmra.mrb[72].mxu0 %vm5222_vm0, %v17916_v21  ;;  %v15294_v21 = vld [vmem:[%s19897_s2 + $0xe4] ss:$8 sps:$4 sm:$0xff]  }
 0x93e   : > { %v18341_v10 = vadd.f32 %v5991_v53, %v5139_v8  ;;  %6002 = vmax.xlane.f32.xlu0 %v6001_v9  ;;  %v5993_v30 = vpop.f32.mrb[78].mxu1  ;;  %5870 = vmatprep.mubr.bf16.mxu0 %v19898_v35 }
 0x93f   : > { %v18343_v43 = vadd.f32 %v5993_v30, %v5140_v52  ;;  %v5995_v42 = vpop.f32.mrb[79].mxu1  ;;  %6226 = vmatprep.subr.bf16.mxu0 %v15294_v21 }
 0x940   : > { %v18345_v11 = vadd.f32 %v5995_v42, %v5141_v19  ;;  %v6004_v6 = vmax.f32 %v18336_v54, %v18341_v10  ;;  %6227 = vmatpush1.bf16.msra.mxu0 %v15292_v20 }
 0x941   : > { %6228 = vmatprep.subr.bf16.mxu0 %v15297_v36 }
 0x942   : > { %6005 = vmax.xlane.f32.xlu1 %v6004_v6  ;;  %v6007_v39 = vmax.f32 %v18343_v43, %v18345_v11 }
 0x944   : > { %6229 = vmatpush1.bf16.msra.mxu0 %v15295_v5 }
 0x945   : > { %13055 = vmatmul.mubr.msk.bf16.gmra.mrb[76].mxu0 %vm5222_vm0, %v17921_v23 }
 0x946   : > { %6008 = vmax.xlane.f32.xlu1 %v6007_v39 }
 0x9a0   : > { %v5722_v23 = vpop.f32.mrb[16].mxu0 }
 0x9a1   : > { %v5724_v48 = vpop.f32.mrb[17].mxu0 }
 0x9a2   : > { %v5726_v12 = vpop.f32.mrb[18].mxu0 }
 0x9a3   : > { %v5881_v13 = vpack.c.bf16 %v5726_v12, %v5722_v23  ;;  %v5728_v14 = vpop.f32.mrb[19].mxu0 }
 0x9a4   : > { %v5882_v16 = vpack.c.bf16 %v5728_v14, %v5724_v48 }
 0x9a5   : > { %v5913_v17 = vmul.bf16 %v17965_v3, %v5881_v13 }
 0x9a6   : > { %v5914_v44 = vmul.bf16 %v17957_v60, %v5882_v16 }
 0x9a8   : > { %v5732_v18 = vpop.f32.mrb[20].mxu0  ;;  %6279 = vmatprep.subr.bf16.mxu1 %v5914_v44 }
 0x9a9   : > { %v5734_v61 = vpop.f32.mrb[21].mxu0  ;;  %6280 = vmatpush1.bf16.msra.mxu1 %v5913_v17 }
 0x9aa   : > { %v5736_v7 = vpop.f32.mrb[22].mxu0 }
 0x9ab   : > { %v5883_v62 = vpack.c.bf16 %v5736_v7, %v5732_v18  ;;  %v5738_v8 = vpop.f32.mrb[23].mxu0 }
 0x9ac   : > { %v5884_v46 = vpack.c.bf16 %v5738_v8, %v5734_v61 }
 0x9ad   : > { %v5915_v9 = vmul.bf16 %v17989_v45, %v5883_v62 }
 0x9ae   : > { %v5916_v52 = vmul.bf16 %v17982_v31, %v5884_v46 }
 0x9b0   : > { %v5742_v53 = vpop.f32.mrb[24].mxu0  ;;  %6281 = vmatprep.subr.bf16.mxu1 %v5916_v52 }
 0x9b1   : > { %v5744_v19 = vpop.f32.mrb[25].mxu0  ;;  %6282 = vmatpush1.bf16.msra.mxu1 %v5915_v9 }
 0x9b2   : > { %v5746_v30 = vpop.f32.mrb[26].mxu0 }
 0x9b3   : > { %v5885_v3 = vpack.c.bf16 %v5746_v30, %v5742_v53  ;;  %v5748_v42 = vpop.f32.mrb[27].mxu0 }
 0x9b4   : > { %v5886_v60 = vpack.c.bf16 %v5748_v42, %v5744_v19 }
 0x9b5   : > { %v5917_v6 = vmul.bf16 %v18009_v24, %v5885_v3 }
 0x9b6   : > { %v5918_v39 = vmul.bf16 %v18004_v63, %v5886_v60 }
 0x9b8   : > { %v5752_v50 = vpop.f32.mrb[28].mxu0  ;;  %6283 = vmatprep.subr.bf16.mxu1 %v5918_v39 }
 0x9b9   : > { %v5754_v27 = vpop.f32.mrb[29].mxu0  ;;  %6284 = vmatpush1.bf16.msra.mxu1 %v5917_v6 }
 0x9ba   : > { %v5756_v45 = vpop.f32.mrb[30].mxu0 }
 0x9bb   : > { %v5887_v5 = vpack.c.bf16 %v5756_v45, %v5752_v50  ;;  %v5758_v36 = vpop.f32.mrb[31].mxu0 }
 0x9bc   : > { %v5888_v23 = vpack.c.bf16 %v5758_v36, %v5754_v27 }
 0x9bd   : > { %v5919_v12 = vmul.bf16 %v18023_v38, %v5887_v5 }
 0x9be   : > { %v5920_v63 = vmul.bf16 %v18017_v37, %v5888_v23 }
 0x9c0   : > { %v5762_v17 = vpop.f32.mrb[32].mxu0  ;;  %6285 = vmatprep.subr.bf16.mxu1 %v5920_v63 }
 0x9c1   : > { %6286 = vmatpush1.bf16.msra.mxu1 %v5919_v12 }
 0x9c7   : > { %v6000_v20 = vpop.xlane.xlu0 %5999 }
 0x9c8   : > { %v6010_v31 = vsub.f32 %v18306_v15, %v6000_v20  ;;  %v6011_v21 = vsub.f32 %v18314_v28, %v6000_v20  ;;  %v5764_v28 = vpop.f32.mrb[33].mxu0 }
 0x9c9   : > { %v5766_v61 = vpop.f32.mrb[34].mxu0 }
 0x9ca   : > { %v6018_v48 = vmul.f32 1.442695, %v6010_v31  ;;  %v6020_v13 = vmul.f32 1.442695, %v6011_v21  ;;  %v5889_v37 = vpack.c.bf16 %v5766_v61, %v5762_v17  ;;  %v5768_v62 = vpop.f32.mrb[35].mxu0 }
 0x9cb   : > { %v6003_v24 = vpop.xlane.xlu0 %6002  ;;  %v5772_v30 = vpop.f32.mrb[36].mxu0 }
 0x9cc   : > { %v6012_v14 = vsub.f32 %v18316_v47, %v6003_v24  ;;  %v6013_v16 = vsub.f32 %v18318_v26, %v6003_v24  ;;  %15752 = vpow2.f32 %v6018_v48  ;;  %v5890_v47 = vpack.c.bf16 %v5768_v62, %v5764_v28  ;;  %v5774_v3 = vpop.f32.mrb[37].mxu0 }
 0x9cd   : > { %15754 = vpow2.f32 %v6020_v13  ;;  %v5921_v8 = vmul.bf16 %v18037_v1, %v5889_v37  ;;  %v5776_v42 = vpop.f32.mrb[38].mxu0 }
 0x9ce   : > { %v6022_v15 = vmul.f32 1.442695, %v6012_v14  ;;  %v6024_v44 = vmul.f32 1.442695, %v6013_v16  ;;  %v5922_v52 = vmul.bf16 %v18031_v0, %v5890_v47  ;;  %v5891_v1 = vpack.c.bf16 %v5776_v42, %v5772_v30  ;;  %v5778_v6 = vpop.f32.mrb[39].mxu0 }
 0x9cf   : > { %v6006_v18 = vpop.xlane.xlu1 %6005  ;;  %v5892_v0 = vpack.c.bf16 %v5778_v6, %v5774_v3 }
 0x9d0   : > { %15756 = vpow2.f32 %v6022_v15  ;;  %v6014_v38 = vsub.f32 %v18336_v54, %v6006_v18  ;;  %v6015_v7 = vsub.f32 %v18341_v10, %v6006_v18  ;;  %6287 = vmatprep.subr.bf16.mxu1 %v5922_v52  ;;  %v5782_v31 = vpop.f32.mrb[40].mxu0 }
 0x9d1   : > { %15758 = vpow2.f32 %v6024_v44  ;;  %6288 = vmatpush1.bf16.msra.mxu1 %v5921_v8  ;;  %v5924_v20 = vmul.bf16 %v18045_v4, %v5892_v0  ;;  %v5784_v21 = vpop.f32.mrb[41].mxu0 }
 0x9d2   : > { %v6026_v26 = vmul.f32 1.442695, %v6014_v38  ;;  %v6028_v46 = vmul.f32 1.442695, %v6015_v7  ;;  %v5786_v5 = vpop.f32.mrb[42].mxu0 }
 0x9d3   : > { %v6009_v9 = vpop.xlane.xlu1 %6008  ;;  %6289 = vmatprep.subr.bf16.mxu1 %v5924_v20  ;;  %v5788_v23 = vpop.f32.mrb[43].mxu0 }
 0x9d4   : > { %v6016_v53 = vsub.f32 %v18343_v43, %v6009_v9  ;;  %v6017_v19 = vsub.f32 %v18345_v11, %v6009_v9  ;;  %15760 = vpow2.f32 %v6026_v26  ;;  %v5923_v11 = vmul.bf16 %v18050_v25, %v5891_v1 }
 0x9d5   : > { %15762 = vpow2.f32 %v6028_v46  ;;  %v5893_v25 = vpack.c.bf16 %v5786_v5, %v5782_v31  ;;  %v5894_v12 = vpack.c.bf16 %v5788_v23, %v5784_v21 }
 0x9d6   : > { %v6030_v54 = vmul.f32 1.442695, %v6016_v53  ;;  %v6032_v10 = vmul.f32 1.442695, %v6017_v19  ;;  %v18395_v60 = vpop.eup %15752  ;;  %6290 = vmatpush1.bf16.msra.mxu1 %v5923_v11 }
 0x9d7   : > { %v18397_v39 = vpop.eup %15754  ;;  %v5925_v4 = vmul.bf16 %v18062_v41, %v5893_v25  ;;  %v5926_v14 = vmul.bf16 %v18057_v22, %v5894_v12 }
 0x9d8   : > { %15764 = vpow2.f32 %v6030_v54  ;;  %v5792_v17 = vpop.f32.mrb[44].mxu0 }
 0x9d9   : > { %15766 = vpow2.f32 %v6032_v10  ;;  %6291 = vmatprep.subr.bf16.mxu1 %v5926_v14  ;;  %v5794_v15 = vpop.f32.mrb[45].mxu0 }
 0x9da   : > { %v18399_v43 = vpop.eup %15756  ;;  %6292 = vmatpush1.bf16.msra.mxu1 %v5925_v4  ;;  %v5796_v44 = vpop.f32.mrb[46].mxu0 }
 0x9db   : > { %v18402_v50 = vpop.eup %15758  ;;  %v6034_v27 = vpack.c.bf16 %v18399_v43, %v18395_v60  ;;  %v5895_v28 = vpack.c.bf16 %v5796_v44, %v5792_v17  ;;  %v5798_v18 = vpop.f32.mrb[47].mxu0  ;;  %v19900_v44 = vld [vmem:[#allocation55_spill] sm:$0xff] }
 0x9dc   : > { %v6035_v45 = vpack.c.bf16 %v18402_v50, %v18397_v39  ;;  %v5896_v41 = vpack.c.bf16 %v5798_v18, %v5794_v15  ;;  %v19901_v18 = vld [vmem:[#allocation54_spill] sm:$0xff] }
 0x9dd   : > { %v5927_v61 = vmul.bf16 %v18074_v57, %v5895_v28 }
 0x9de   : > { %6230 = vmatprep.mubr.bf16.mxu0 %v6035_v45  ;;  %v18409_v36 = vpop.eup %15760  ;;  %v5928_v38 = vmul.bf16 %v18069_v55, %v5896_v41 }
 0x9df   : > { %6231 = vmatmul.mubr.bf16.vlgmr.msra.gmra.mrb[80].mxu0 %v6034_v27  ;;  %v18411_v48 = vpop.eup %15762 }
 0x9e0   : > { %v5802_v7 = vpop.f32.mrb[48].mxu0  ;;  %6293 = vmatprep.subr.bf16.mxu1 %v5928_v38 }
 0x9e1   : > { %v5804_v22 = vpop.f32.mrb[49].mxu0  ;;  %6294 = vmatpush1.bf16.msra.mxu1 %v5927_v61 }
 0x9e2   : > { %v18413_v13 = vpop.eup %15764  ;;  %v5806_v37 = vpop.f32.mrb[50].mxu0 }
 0x9e3   : > { %v18416_v24 = vpop.eup %15766  ;;  %v6036_v63 = vpack.c.bf16 %v18413_v13, %v18409_v36  ;;  %v5897_v62 = vpack.c.bf16 %v5806_v37, %v5802_v7  ;;  %v5808_v47 = vpop.f32.mrb[51].mxu0  ;;  %v19902_v37 = vld [vmem:[#allocation57_spill] sm:$0xff] }
 0x9e4   : > { %v6037_v16 = vpack.c.bf16 %v18416_v24, %v18411_v48  ;;  %v5898_v26 = vpack.c.bf16 %v5808_v47, %v5804_v22  ;;  %v19903_v47 = vld [vmem:[#allocation56_spill] sm:$0xff] }
 0x9e5   : > { %v5929_v8 = vmul.bf16 %v18086_v33, %v5897_v62 }
 0x9e6   : > { %6240 = vmatprep.mubr.bf16.mxu0 %v6037_v16  ;;  %v5930_v46 = vmul.bf16 %v18081_v29, %v5898_v26 }
 0x9e7   : > { %6241 = vmatmul.mubr.bf16.gmra.mrb[84].mxu0 %v6036_v63 }
 0x9e8   : > { %v5812_v9 = vpop.f32.mrb[52].mxu0  ;;  %6295 = vmatprep.subr.bf16.mxu1 %v5930_v46 }
 0x9e9   : > { %v5814_v52 = vpop.f32.mrb[53].mxu0  ;;  %6296 = vmatpush1.bf16.msra.mxu1 %v5929_v8 }
 0x9ea   : > { %v5816_v53 = vpop.f32.mrb[54].mxu0 }
 0x9eb   : > { %v5899_v57 = vpack.c.bf16 %v5816_v53, %v5812_v9  ;;  %v5818_v19 = vpop.f32.mrb[55].mxu0 }
 0x9ec   : > { %v5900_v55 = vpack.c.bf16 %v5818_v19, %v5814_v52  ;;  %v19904_v19 = vld [vmem:[#allocation59_spill] sm:$0xff] }
 0x9ed   : > { %v5931_v30 = vmul.bf16 %v18098_v56, %v5899_v57 }
 0x9ee   : > { %v5932_v54 = vmul.bf16 %v18093_v51, %v5900_v55 }
 0x9f0   : > { %v5822_v10 = vpop.f32.mrb[56].mxu0  ;;  %6297 = vmatprep.subr.bf16.mxu1 %v5932_v54 }
 0x9f1   : > { %v5824_v3 = vpop.f32.mrb[57].mxu0  ;;  %6298 = vmatpush1.bf16.msra.mxu1 %v5931_v30  ;;  %v19905_v30 = vld [vmem:[#allocation58_spill] sm:$0xff] }
 0x9f2   : > { %v5826_v42 = vpop.f32.mrb[58].mxu0 }
 0x9f3   : > { %v5901_v33 = vpack.c.bf16 %v5826_v42, %v5822_v10  ;;  %v5828_v1 = vpop.f32.mrb[59].mxu0  ;;  %v15298_v10 = vld [vmem:[%s17621_s28 + $0x300] ss:$8 sps:$4 sm:$0xff]   ;;  %v15303_v42 = vld [vmem:[%s17621_s28 + $0x314] ss:$8 sps:$4 sm:$0xff]  }
 0x9f4   : > { %v5902_v29 = vpack.c.bf16 %v5828_v1, %v5824_v3  ;;  %v15300_v3 = vld [vmem:[%s17621_s28 + $0x304] ss:$8 sps:$4 sm:$0xff]  }
 0x9f5   : > { %v5933_v6 = vmul.bf16 %v18110_v40, %v5901_v33  ;;  %6542 = vmatprep.subr.bf16.mxu0 %v15300_v3  ;;  %v15301_v33 = vld [vmem:[%s17621_s28 + $0x310] ss:$8 sps:$4 sm:$0xff]   ;;  %v15306_v1 = vld [vmem:[%s17621_s28 + $0x324] ss:$8 sps:$4 sm:$0xff]  }
 0x9f6   : > { %v5934_v0 = vmul.bf16 %v18105_v32, %v5902_v29  ;;  %6543 = vmatpush1.bf16.msra.mxu0 %v15298_v10  ;;  %v15304_v29 = vld [vmem:[%s17621_s28 + $0x320] ss:$8 sps:$4 sm:$0xff]  }
 0x9f7   : > { %6544 = vmatprep.subr.bf16.mxu0 %v15303_v42 }
 0x9f8   : > { %v5832_v11 = vpop.f32.mrb[60].mxu0  ;;  %6299 = vmatprep.subr.bf16.mxu1 %v5934_v0  ;;  %v15307_v0 = vld [vmem:[%s17621_s28 + $0x330] ss:$8 sps:$4 sm:$0xff]  }
 0x9f9   : > { %v5834_v27 = vpop.f32.mrb[61].mxu0  ;;  %6300 = vmatpush1.bf16.msra.mxu1 %v5933_v6  ;;  %v15309_v6 = vld [vmem:[%s17621_s28 + $0x334] ss:$8 sps:$4 sm:$0xff]  }
 0x9fa   : > { %v5836_v20 = vpop.f32.mrb[62].mxu0  ;;  %6545 = vmatpush1.bf16.msra.mxu0 %v15301_v33 }
 0x9fb   : > { %v5903_v56 = vpack.c.bf16 %v5836_v20, %v5832_v11  ;;  %v5838_v45 = vpop.f32.mrb[63].mxu0  ;;  %6546 = vmatprep.subr.bf16.mxu0 %v15306_v1  ;;  %v15312_v11 = vld [vmem:[%s17621_s28 + $0x344] ss:$8 sps:$4 sm:$0xff]   ;;  %v15315_v20 = vld [vmem:[%s17621_s28 + $0x354] ss:$8 sps:$4 sm:$0xff]  }
 0x9fc   : > { %v5904_v51 = vpack.c.bf16 %v5838_v45, %v5834_v27  ;;  %v15310_v27 = vld [vmem:[%s17621_s28 + $0x340] ss:$8 sps:$4 sm:$0xff]   ;;  %v15318_v45 = vld [vmem:[%s17621_s28 + $0x364] ss:$8 sps:$4 sm:$0xff]  }
 0x9fd   : > { %v5935_v31 = vmul.bf16 %v18122_v2, %v5903_v56  ;;  %v15313_v56 = vld [vmem:[%s17621_s28 + $0x350] ss:$8 sps:$4 sm:$0xff]  }
 0x9fe   : > { %v5936_v21 = vmul.bf16 %v18117_v59, %v5904_v51  ;;  %6547 = vmatpush1.bf16.msra.mxu0 %v15304_v29  ;;  %v15316_v51 = vld [vmem:[%s17621_s28 + $0x360] ss:$8 sps:$4 sm:$0xff]  }
 0x9ff   : > { %6548 = vmatprep.subr.bf16.mxu0 %v15309_v6 }
 0xa00   : > { %v5842_v5 = vpop.f32.mrb[64].mxu0  ;;  %6301 = vmatprep.subr.bf16.mxu1 %v5936_v21  ;;  %v15319_v21 = vld [vmem:[%s17621_s28 + $0x370] ss:$8 sps:$4 sm:$0xff]  }
 0xa01   : > { %v5844_v25 = vpop.f32.mrb[65].mxu0  ;;  %6302 = vmatpush1.bf16.msra.mxu1 %v5935_v31  ;;  %v15321_v31 = vld [vmem:[%s17621_s28 + $0x374] ss:$8 sps:$4 sm:$0xff]  }
 0xa02   : > { %v5846_v23 = vpop.f32.mrb[66].mxu0  ;;  %6549 = vmatpush1.bf16.msra.mxu0 %v15307_v0 }
 0xa03   : > { %v5905_v40 = vpack.c.bf16 %v5846_v23, %v5842_v5  ;;  %v5848_v12 = vpop.f32.mrb[67].mxu0  ;;  %6550 = vmatprep.subr.bf16.mxu0 %v15312_v11  ;;  %v15324_v5 = vld [vmem:[%s17621_s28 + $0x384] ss:$8 sps:$4 sm:$0xff]   ;;  %v15327_v23 = vld [vmem:[%s17621_s28 + $0x394] ss:$8 sps:$4 sm:$0xff]  }
 0xa04   : > { %v5906_v32 = vpack.c.bf16 %v5848_v12, %v5844_v25  ;;  %v15322_v25 = vld [vmem:[%s17621_s28 + $0x380] ss:$8 sps:$4 sm:$0xff]   ;;  %v15330_v12 = vld [vmem:[%s17621_s28 + $0x3a4] ss:$8 sps:$4 sm:$0xff]   ;;  %v15345_v11 = vld [vmem:[%s17621_s28 + $0x3f4] ss:$8 sps:$4 sm:$0xff]  }
 0xa05   : > { %v5937_v4 = vmul.bf16 %v18134_v58, %v5905_v40  ;;  %v15325_v40 = vld [vmem:[%s17621_s28 + $0x390] ss:$8 sps:$4 sm:$0xff]  }
 0xa06   : > { %v5938_v63 = vmul.bf16 %v18129_v49, %v5906_v32  ;;  %6551 = vmatpush1.bf16.msra.mxu0 %v15310_v27  ;;  %v15328_v32 = vld [vmem:[%s17621_s28 + $0x3a0] ss:$8 sps:$4 sm:$0xff]   ;;  %v15343_v27 = vld [vmem:[%s17621_s28 + $0x3f0] ss:$8 sps:$4 sm:$0xff]  }
 0xa07   : > { %6552 = vmatprep.subr.bf16.mxu0 %v15315_v20  ;;  %v15348_v20 = vld [vmem:[%s17621_s28 + $0x504] ss:$8 sps:$4 sm:$0xff]  }
 0xa08   : > { %v5852_v14 = vpop.f32.mrb[68].mxu0  ;;  %6303 = vmatprep.subr.bf16.mxu1 %v5938_v63  ;;  %v15331_v63 = vld [vmem:[%s17621_s28 + $0x3b0] ss:$8 sps:$4 sm:$0xff]  }
 0xa09   : > { %v5854_v16 = vpop.f32.mrb[69].mxu0  ;;  %6304 = vmatpush1.bf16.msra.mxu1 %v5937_v4  ;;  %v15333_v4 = vld [vmem:[%s17621_s28 + $0x3b4] ss:$8 sps:$4 sm:$0xff]  }
 0xa0a   : > { %v5856_v17 = vpop.f32.mrb[70].mxu0  ;;  %6553 = vmatpush1.bf16.msra.mxu0 %v15313_v56 }
 0xa0b   : > { %v5907_v2 = vpack.c.bf16 %v5856_v17, %v5852_v14  ;;  %v5858_v15 = vpop.f32.mrb[71].mxu0  ;;  %6554 = vmatprep.subr.bf16.mxu0 %v15318_v45  ;;  %v15336_v14 = vld [vmem:[%s17621_s28 + $0x3c4] ss:$8 sps:$4 sm:$0xff]   ;;  %v15339_v17 = vld [vmem:[%s17621_s28 + $0x3d4] ss:$8 sps:$4 sm:$0xff]  }
 0xa0c   : > { %v5908_v59 = vpack.c.bf16 %v5858_v15, %v5854_v16  ;;  %v15334_v16 = vld [vmem:[%s17621_s28 + $0x3c0] ss:$8 sps:$4 sm:$0xff]   ;;  %v15342_v15 = vld [vmem:[%s17621_s28 + $0x3e4] ss:$8 sps:$4 sm:$0xff]  }
 0xa0d   : > { %v5939_v28 = vmul.bf16 %v19900_v44, %v5907_v2  ;;  %v15337_v2 = vld [vmem:[%s17621_s28 + $0x3d0] ss:$8 sps:$4 sm:$0xff]  }
 0xa0e   : > { %v5940_v41 = vmul.bf16 %v19901_v18, %v5908_v59  ;;  %6555 = vmatpush1.bf16.msra.mxu0 %v15316_v51  ;;  %v15340_v59 = vld [vmem:[%s17621_s28 + $0x3e0] ss:$8 sps:$4 sm:$0xff]  }
 0xa0f   : > { %6556 = vmatprep.subr.bf16.mxu0 %v15321_v31 }
 0xa10   : > { %v5862_v61 = vpop.f32.mrb[72].mxu0  ;;  %6305 = vmatprep.subr.bf16.mxu1 %v5940_v41 }
 0xa11   : > { %v5864_v38 = vpop.f32.mrb[73].mxu0  ;;  %6306 = vmatpush1.bf16.msra.mxu1 %v5939_v28 }
 0xa12   : > { %v5866_v7 = vpop.f32.mrb[74].mxu0  ;;  %6557 = vmatpush1.bf16.msra.mxu0 %v15319_v21 }
 0xa13   : > { %v5909_v58 = vpack.c.bf16 %v5866_v7, %v5862_v61  ;;  %v5868_v22 = vpop.f32.mrb[75].mxu0  ;;  %6558 = vmatprep.subr.bf16.mxu0 %v15324_v5 }
 0xa14   : > { %v5910_v49 = vpack.c.bf16 %v5868_v22, %v5864_v38 }
 0xa15   : > { %v5941_v62 = vmul.bf16 %v19902_v37, %v5909_v58 }
 0xa16   : > { %v5942_v26 = vmul.bf16 %v19903_v47, %v5910_v49  ;;  %6559 = vmatpush1.bf16.msra.mxu0 %v15322_v25  ;;  %v15346_v25 = vld [vmem:[%s17621_s28 + $0x500] ss:$8 sps:$4 sm:$0xff]  }
 0xa17   : > { %6560 = vmatprep.subr.bf16.mxu0 %v15327_v23  ;;  %v15351_v23 = vld [vmem:[%s17621_s28 + $0x514] ss:$8 sps:$4 sm:$0xff]  }
 0xa18   : > { %v5872_v8 = vpop.f32.mrb[76].mxu0  ;;  %6307 = vmatprep.subr.bf16.mxu1 %v5942_v26 }
 0xa19   : > { %v5874_v46 = vpop.f32.mrb[77].mxu0  ;;  %6308 = vmatpush1.bf16.msra.mxu1 %v5941_v62 }
 0xa1a   : > { %v5876_v9 = vpop.f32.mrb[78].mxu0  ;;  %6561 = vmatpush1.bf16.msra.mxu0 %v15325_v40 }
 0xa1b   : > { %v5911_v52 = vpack.c.bf16 %v5876_v9, %v5872_v8  ;;  %v5878_v53 = vpop.f32.mrb[79].mxu0  ;;  %6562 = vmatprep.subr.bf16.mxu0 %v15330_v12  ;;  %v15349_v12 = vld [vmem:[%s17621_s28 + $0x510] ss:$8 sps:$4 sm:$0xff]  }
 0xa1c   : > { %v5912_v57 = vpack.c.bf16 %v5878_v53, %v5874_v46 }
 0xa1d   : > { %v5943_v55 = vmul.bf16 %v19904_v19, %v5911_v52 }
 0xa1e   : > { %v5944_v54 = vmul.bf16 %v19905_v30, %v5912_v57  ;;  %6563 = vmatpush1.bf16.msra.mxu0 %v15328_v32 }
 0xa1f   : > { %6564 = vmatprep.subr.bf16.mxu0 %v15333_v4  ;;  %v15354_v4 = vld [vmem:[%s17621_s28 + $0x524] ss:$8 sps:$4 sm:$0xff]  }
 0xa20   : > { %6309 = vmatprep.subr.bf16.mxu1 %v5944_v54 }
 0xa21   : > { %6310 = vmatpush1.bf16.msra.mxu1 %v5943_v55 }
 0xa22   : > { %6565 = vmatpush1.bf16.msra.mxu0 %v15331_v63 }
 0xa23   : > { %6566 = vmatprep.subr.bf16.mxu0 %v15336_v14 }
 0xa26   : > { %6567 = vmatpush1.bf16.msra.mxu0 %v15334_v16 }
 0xa27   : > { %6568 = vmatprep.subr.bf16.mxu0 %v15339_v17 }
 0xa2a   : > { %6569 = vmatpush1.bf16.msra.mxu0 %v15337_v2  ;;  %v15352_v2 = vld [vmem:[%s17621_s28 + $0x520] ss:$8 sps:$4 sm:$0xff]  }
 0xa2b   : > { %6570 = vmatprep.subr.bf16.mxu0 %v15342_v15  ;;  %v15357_v15 = vld [vmem:[%s17621_s28 + $0x534] ss:$8 sps:$4 sm:$0xff]  }
 0xa2e   : > { %6571 = vmatpush1.bf16.msra.mxu0 %v15340_v59  ;;  %v15355_v59 = vld [vmem:[%s17621_s28 + $0x530] ss:$8 sps:$4 sm:$0xff]  }
 0xa2f   : > { %6572 = vmatprep.subr.bf16.mxu0 %v15345_v11  ;;  %v15414_v11 = vld [vmem:[%s17621_s28 + $0x464] ss:$8 sps:$4 sm:$0xff]  }
 0xa32   : > { %6573 = vmatpush1.bf16.msra.mxu0 %v15343_v27  ;;  %v15412_v27 = vld [vmem:[%s17621_s28 + $0x460] ss:$8 sps:$4 sm:$0xff]  }
 0xa33   : > { %7197 = vmatprep.subr.bf16.mxu0 %v15348_v20  ;;  %v15417_v20 = vld [vmem:[%s17621_s28 + $0x474] ss:$8 sps:$4 sm:$0xff]  }
 0xab2   : > { %v6232_v44 = vpop.f32.mrb[80].mxu0 }
 0xab3   : > { %v6251_v28 = vmax.f32 %v6232_v44, 1e-30  ;;  %v6234_v18 = vpop.f32.mrb[81].mxu0  ;;  %v15360_v44 = vld [vmem:[%s17621_s28 + $0x544] ss:$8 sps:$4 sm:$0xff]  }
 0xab4   : > { %v6252_v41 = vmax.f32 %v6234_v18, 1e-30  ;;  %v6236_v61 = vpop.f32.mrb[82].mxu0  ;;  %v15363_v18 = vld [vmem:[%s17621_s28 + $0x554] ss:$8 sps:$4 sm:$0xff]  }
 0xab5   : > { %15768 = vrcp.f32 %v6251_v28  ;;  %v6253_v38 = vmax.f32 %v6236_v61, 1e-30  ;;  %v6238_v7 = vpop.f32.mrb[83].mxu0  ;;  %v15358_v28 = vld [vmem:[%s17621_s28 + $0x540] ss:$8 sps:$4 sm:$0xff]  }
 0xab6   : > { %15770 = vrcp.f32 %v6252_v41  ;;  %v6254_v58 = vmax.f32 %v6238_v7, 1e-30  ;;  %v15361_v41 = vld [vmem:[%s17621_s28 + $0x550] ss:$8 sps:$4 sm:$0xff]   ;;  %v15366_v61 = vld [vmem:[%s17621_s28 + $0x564] ss:$8 sps:$4 sm:$0xff]  }
 0xab7   : > { %15772 = vrcp.f32 %v6253_v38  ;;  %v15364_v38 = vld [vmem:[%s17621_s28 + $0x560] ss:$8 sps:$4 sm:$0xff]   ;;  %v15369_v7 = vld [vmem:[%s17621_s28 + $0x574] ss:$8 sps:$4 sm:$0xff]  }
 0xab8   : > { %15774 = vrcp.f32 %v6254_v58  ;;  %v15367_v58 = vld [vmem:[%s17621_s28 + $0x570] ss:$8 sps:$4 sm:$0xff]  }
 0xaba   : > { %v6242_v22 = vpop.f32.mrb[84].mxu0 }
 0xabb   : > { %v6255_v49 = vmax.f32 %v6242_v22, 1e-30  ;;  %v6244_v37 = vpop.f32.mrb[85].mxu0  ;;  %v15372_v22 = vld [vmem:[%s17621_s28 + $0x584] ss:$8 sps:$4 sm:$0xff]  }
 0xabc   : > { %v6256_v62 = vmax.f32 %v6244_v37, 1e-30  ;;  %v6246_v47 = vpop.f32.mrb[86].mxu0  ;;  %v15375_v37 = vld [vmem:[%s17621_s28 + $0x594] ss:$8 sps:$4 sm:$0xff]  }
 0xabd   : > { %15776 = vrcp.f32 %v6255_v49  ;;  %v6257_v26 = vmax.f32 %v6246_v47, 1e-30  ;;  %v6248_v8 = vpop.f32.mrb[87].mxu0  ;;  %v15370_v49 = vld [vmem:[%s17621_s28 + $0x580] ss:$8 sps:$4 sm:$0xff]  }
 0xabe   : > { %15778 = vrcp.f32 %v6256_v62  ;;  %v6258_v46 = vmax.f32 %v6248_v8, 1e-30  ;;  %v15373_v62 = vld [vmem:[%s17621_s28 + $0x590] ss:$8 sps:$4 sm:$0xff]   ;;  %v15378_v47 = vld [vmem:[%s17621_s28 + $0x5a4] ss:$8 sps:$4 sm:$0xff]  }
 0xabf   : > { %v15769_v9 = vpop.eup %15768  ;;  %15780 = vrcp.f32 %v6257_v26  ;;  %v15376_v26 = vld [vmem:[%s17621_s28 + $0x5a0] ss:$8 sps:$4 sm:$0xff]   ;;  %v15381_v8 = vld [vmem:[%s17621_s28 + $0x5b4] ss:$8 sps:$4 sm:$0xff]  }
 0xac0   : > { %v15771_v52 = vpop.eup %15770  ;;  %15782 = vrcp.f32 %v6258_v46  ;;  %v6267_v19 = vmul.f32 %v15769_v9, %v18395_v60  ;;  %v15379_v46 = vld [vmem:[%s17621_s28 + $0x5b0] ss:$8 sps:$4 sm:$0xff]   ;;  %v15384_v9 = vld [vmem:[%s17621_s28 + $0x5c4] ss:$8 sps:$4 sm:$0xff]  }
 0xac1   : > { %v15773_v53 = vpop.eup %15772  ;;  %v6268_v30 = vmul.f32 %v15771_v52, %v18397_v39  ;;  %v15382_v52 = vld [vmem:[%s17621_s28 + $0x5c0] ss:$8 sps:$4 sm:$0xff]  }
 0xac2   : > { %v15775_v57 = vpop.eup %15774  ;;  %v6269_v55 = vmul.f32 %v15773_v53, %v18399_v43  ;;  %v15387_v53 = vld [vmem:[%s17621_s28 + $0x5d4] ss:$8 sps:$4 sm:$0xff]  }
 0xac3   : > { %v6270_v54 = vmul.f32 %v15775_v57, %v18402_v50  ;;  %v15385_v57 = vld [vmem:[%s17621_s28 + $0x5d0] ss:$8 sps:$4 sm:$0xff]  }
 0xac4   : > { %v6275_v10 = vpack.c.bf16 %v6269_v55, %v6267_v19  ;;  %v15390_v19 = vld [vmem:[%s17621_s28 + $0x5e4] ss:$8 sps:$4 sm:$0xff]   ;;  %v15388_v55 = vld [vmem:[%s17621_s28 + $0x5e0] ss:$8 sps:$4 sm:$0xff]  }
 0xac5   : > { %v6276_v3 = vpack.c.bf16 %v6270_v54, %v6268_v30  ;;  %v15393_v30 = vld [vmem:[%s17621_s28 + $0x5f4] ss:$8 sps:$4 sm:$0xff]   ;;  %v15391_v54 = vld [vmem:[%s17621_s28 + $0x5f0] ss:$8 sps:$4 sm:$0xff]  }
 0xac7   : > { %v15777_v42 = vpop.eup %15776  ;;  %6311 = vmatprep.mubr.bf16.mxu1 %v6276_v3 }
 0xac8   : > { %v15779_v33 = vpop.eup %15778  ;;  %6312 = vmatmul.mubr.bf16.vlgmr.msra.gmra.mrb[80].mxu1 %v6275_v10  ;;  %v6271_v6 = vmul.f32 %v15777_v42, %v18409_v36  ;;  %v18482_v36 = vld [vmem:[#allocation3 + $0x8] sm:$0xff]  ;;  %v18523_v10 = vld [vmem:[#allocation3] sm:$0xff]  ;;  %v15399_v42 = vld [vmem:[%s17621_s28 + $0x414] ss:$8 sps:$4 sm:$0xff]  }
 0xac9   : > { %v15781_v1 = vpop.eup %15780  ;;  %v6272_v39 = vmul.f32 %v15779_v33, %v18411_v48  ;;  %v18486_v48 = vpack.c.bf16 %v18482_v36, %v18482_v36  ;;  %v18527_v3 = vpack.c.bf16 %v18523_v10, %v18523_v10  ;;  %v15397_v33 = vld [vmem:[%s17621_s28 + $0x410] ss:$8 sps:$4 sm:$0xff]  }
 0xaca   : > { %v15783_v29 = vpop.eup %15782  ;;  %v6273_v60 = vmul.f32 %v15781_v1, %v18413_v13  ;;  %v15394_v13 = vld [vmem:[%s17621_s28 + $0x400] ss:$8 sps:$4 sm:$0xff]   ;;  %v15402_v1 = vld [vmem:[%s17621_s28 + $0x424] ss:$8 sps:$4 sm:$0xff]  }
 0xacb   : > { %v6274_v43 = vmul.f32 %v15783_v29, %v18416_v24  ;;  %v15396_v24 = vld [vmem:[%s17621_s28 + $0x404] ss:$8 sps:$4 sm:$0xff]   ;;  %v15400_v29 = vld [vmem:[%s17621_s28 + $0x420] ss:$8 sps:$4 sm:$0xff]  }
 0xacc   : > { %v6277_v50 = vpack.c.bf16 %v6273_v60, %v6271_v6  ;;  %6948 = vmatprep.subr.bf16.mxu1 %v15396_v24  ;;  %v15405_v6 = vld [vmem:[%s17621_s28 + $0x434] ss:$8 sps:$4 sm:$0xff]   ;;  %v15403_v60 = vld [vmem:[%s17621_s28 + $0x430] ss:$8 sps:$4 sm:$0xff]   ;;  %v15420_v24 = vld [vmem:[%s17621_s28 + $0x484] ss:$8 sps:$4 sm:$0xff]  }
 0xacd   : > { %v6278_v0 = vpack.c.bf16 %v6274_v43, %v6272_v39  ;;  %6949 = vmatpush1.bf16.msra.mxu1 %v15394_v13  ;;  %v15408_v39 = vld [vmem:[%s17621_s28 + $0x444] ss:$8 sps:$4 sm:$0xff]   ;;  %v15406_v43 = vld [vmem:[%s17621_s28 + $0x440] ss:$8 sps:$4 sm:$0xff]   ;;  %v15415_v13 = vld [vmem:[%s17621_s28 + $0x470] ss:$8 sps:$4 sm:$0xff]  }
 0xace   : > { %6950 = vmatprep.subr.bf16.mxu1 %v15399_v42 }
 0xacf   : > { %6321 = vmatprep.mubr.bf16.mxu1 %v6278_v0  ;;  %v15411_v0 = vld [vmem:[%s17621_s28 + $0x454] ss:$8 sps:$4 sm:$0xff]  }
 0xad0   : > { %6322 = vmatmul.mubr.bf16.gmra.mrb[84].mxu1 %v6277_v50  ;;  %v15409_v50 = vld [vmem:[%s17621_s28 + $0x450] ss:$8 sps:$4 sm:$0xff]  }
 0xad1   : > { %6980 = vmatprep.mubr.bf16.mxu1 %v18486_v48  ;;  %6951 = vmatpush1.bf16.msra.mxu1 %v15397_v33 }
 0xad2   : > { %6952 = vmatprep.subr.bf16.mxu1 %v15402_v1  ;;  %v13252_v1 = vld [vmem:[%s17635_s19 + $0x5] ss:$8 sm:$0x3] }
 0xad5   : > { %6953 = vmatpush1.bf16.msra.mxu1 %v15400_v29 }
 0xad6   : > { %6954 = vmatprep.subr.bf16.mxu1 %v15405_v6  ;;  %v7034_v6 = vrot.slane %v13252_v1, %v17830_v34 }
 0xad9   : > { %6955 = vmatpush1.bf16.msra.mxu1 %v15403_v60 }
 0xada   : > { %6956 = vmatprep.subr.bf16.mxu1 %v15408_v39 }
 0xadd   : > { %6957 = vmatpush1.bf16.msra.mxu1 %v15406_v43 }
 0xade   : > { %6958 = vmatprep.subr.bf16.mxu1 %v15411_v0 }
 0xae1   : > { %6959 = vmatpush1.bf16.msra.mxu1 %v15409_v50 }
 0xae2   : > { %6960 = vmatprep.subr.bf16.mxu1 %v15414_v11 }
 0xae5   : > { %6961 = vmatpush1.bf16.msra.mxu1 %v15412_v27 }
 0xae6   : > { %6962 = vmatprep.subr.bf16.mxu1 %v15417_v20 }
 0xae9   : > { %6963 = vmatpush1.bf16.msra.mxu1 %v15415_v13 }
 0xaea   : > { %6964 = vmatprep.subr.bf16.mxu1 %v15420_v24  ;;  %v15442_v24 = vld [vmem:[#allocation8] sm:$0xff]  }
 0xb9b   : > { %v6313_v56 = vpop.f32.mrb[80].mxu1 }
 0xb9c   : > { %v6315_v45 = vpop.f32.mrb[81].mxu1 }
 0xb9d   : > { %v6317_v51 = vpop.f32.mrb[82].mxu1 }
 0xb9e   : > { %v6332_v31 = vpack.c.bf16 %v6317_v51, %v6313_v56  ;;  %v6319_v21 = vpop.f32.mrb[83].mxu1  ;;  %v15418_v56 = vld [vmem:[%s17621_s28 + $0x480] ss:$8 sps:$4 sm:$0xff]   ;;  %v15421_v51 = vld [vmem:[%s17621_s28 + $0x490] ss:$8 sps:$4 sm:$0xff]  }
 0xb9f   : > { %v6333_v5 = vpack.c.bf16 %v6319_v21, %v6315_v45  ;;  %v15423_v45 = vld [vmem:[%s17621_s28 + $0x494] ss:$8 sps:$4 sm:$0xff]   ;;  %6965 = vmatpush1.bf16.msra.mxu1 %v15418_v56  ;;  %v15424_v21 = vld [vmem:[%s17621_s28 + $0x4a0] ss:$8 sps:$4 sm:$0xff]   ;;  %v7435_v56 = vsel %vm7298_vm1, %v18527_v3, 0 }
 0xba0   : > { %6966 = vmatprep.subr.bf16.mxu1 %v15423_v45  ;;  %v15443_v45 = vld [vmem:[#allocation8 + $0x8] sm:$0xff]  }
 0xba1   : > { %6574 = vmatprep.mubr.bf16.mxu0 %v6333_v5  ;;  %v15429_v5 = vld [vmem:[%s17621_s28 + $0x4b4] ss:$8 sps:$4 sm:$0xff]  }
 0xba2   : > { %6575 = vmatmul.mubr.bf16.vlgmr.msra.gmra.mrb[88].mxu0 %v6332_v31  ;;  %v15426_v31 = vld [vmem:[%s17621_s28 + $0x4a4] ss:$8 sps:$4 sm:$0xff]  }
 0xba3   : > { %7198 = vmatpush1.bf16.msra.mxu0 %v15346_v25  ;;  %v6323_v40 = vpop.f32.mrb[84].mxu1  ;;  %6967 = vmatpush1.bf16.msra.mxu1 %v15421_v51  ;;  %v15427_v25 = vld [vmem:[%s17621_s28 + $0x4b0] ss:$8 sps:$4 sm:$0xff]   ;;  %v15444_v51 = vld [vmem:[#allocation8 + $0x10] sm:$0xff]  }
 0xba4   : > { %v6325_v32 = vpop.f32.mrb[85].mxu1  ;;  %7199 = vmatprep.subr.bf16.mxu0 %v15351_v23  ;;  %6968 = vmatprep.subr.bf16.mxu1 %v15426_v31  ;;  %v15432_v23 = vld [vmem:[%s17621_s28 + $0x4c4] ss:$8 sps:$4 sm:$0xff]  }
 0xba5   : > { %v6327_v63 = vpop.f32.mrb[86].mxu1 }
 0xba6   : > { %v6334_v14 = vpack.c.bf16 %v6327_v63, %v6323_v40  ;;  %v6329_v16 = vpop.f32.mrb[87].mxu1  ;;  %v15430_v40 = vld [vmem:[%s17621_s28 + $0x4c0] ss:$8 sps:$4 sm:$0xff]  }
 0xba7   : > { %v6335_v17 = vpack.c.bf16 %v6329_v16, %v6325_v32  ;;  %7200 = vmatpush1.bf16.msra.mxu0 %v15349_v12  ;;  %6969 = vmatpush1.bf16.msra.mxu1 %v15424_v21  ;;  %v15435_v12 = vld [vmem:[%s17621_s28 + $0x4d4] ss:$8 sps:$4 sm:$0xff]   ;;  %v15433_v32 = vld [vmem:[%s17621_s28 + $0x4d0] ss:$8 sps:$4 sm:$0xff]   ;;  %v15436_v63 = vld [vmem:[%s17621_s28 + $0x4e0] ss:$8 sps:$4 sm:$0xff]  }
 0xba8   : > { %7201 = vmatprep.subr.bf16.mxu0 %v15354_v4  ;;  %6970 = vmatprep.subr.bf16.mxu1 %v15429_v5  ;;  %v15438_v4 = vld [vmem:[%s17621_s28 + $0x4e4] ss:$8 sps:$4 sm:$0xff]   ;;  %v15439_v16 = vld [vmem:[%s17621_s28 + $0x4f0] ss:$8 sps:$4 sm:$0xff]  }
 0xba9   : > { %6584 = vmatprep.mubr.bf16.mxu0 %v6335_v17  ;;  %v13120_v17 = vld [vmem:[%s17635_s19 + $0x3] ss:$8 sm:$0x3] }
 0xbaa   : > { %6585 = vmatmul.mubr.bf16.gmra.mrb[92].mxu0 %v6334_v14  ;;  %v15441_v14 = vld [vmem:[%s17621_s28 + $0x4f4] ss:$8 sps:$4 sm:$0xff]  }
 0xbab   : > { %7202 = vmatpush1.bf16.msra.mxu0 %v15352_v2  ;;  %7229 = vmatprep.mubr.bf16.mxu0 %v18486_v48  ;;  %v19906_v2 = vld [vmem:[#allocation52_spill] sm:$0xff] }
 0xbac   : > { %7203 = vmatprep.subr.bf16.mxu0 %v15357_v15  ;;  %6971 = vmatpush1.bf16.msra.mxu1 %v15427_v25  ;;  %v6375_v15 = vrot.slane %v13120_v17, %v19906_v2  ;;  %v7030_v29 = vrot.slane %v13252_v1, %v19906_v2 }
 0xbad   : > { %6972 = vmatprep.subr.bf16.mxu1 %v15432_v23 }
 0xbaf   : > { %7204 = vmatpush1.bf16.msra.mxu0 %v15355_v59  ;;  %v6379_v59 = vrot.slane %v13120_v17, %v17830_v34  ;;  %v15448_v17 = vld [vmem:[%s19907_s26 + $0x4] ss:$8 sps:$4 sm:$0xff]  }
 0xbb0   : > { %7205 = vmatprep.subr.bf16.mxu0 %v15360_v44  ;;  %6973 = vmatpush1.bf16.msra.mxu1 %v15430_v40 }
 0xbb1   : > { %6974 = vmatprep.subr.bf16.mxu1 %v15435_v12 }
 0xbb3   : > { %7206 = vmatpush1.bf16.msra.mxu0 %v15358_v28 }
 0xbb4   : > { %7207 = vmatprep.subr.bf16.mxu0 %v15363_v18  ;;  %6975 = vmatpush1.bf16.msra.mxu1 %v15433_v32 }
 0xbb5   : > { %6976 = vmatprep.subr.bf16.mxu1 %v15438_v4 }
 0xbb7   : > { %7208 = vmatpush1.bf16.msra.mxu0 %v15361_v41 }
 0xbb8   : > { %7209 = vmatprep.subr.bf16.mxu0 %v15366_v61  ;;  %6977 = vmatpush1.bf16.msra.mxu1 %v15436_v63 }
 0xbb9   : > { %6978 = vmatprep.subr.bf16.mxu1 %v15441_v14 }
 0xbbb   : > { %7210 = vmatpush1.bf16.msra.mxu0 %v15364_v38  ;;  %v16104_v38 = vld [vmem:[#allocation2] sm:$0xff] }
 0xbbc   : > { %7211 = vmatprep.subr.bf16.mxu0 %v15369_v7  ;;  %6979 = vmatpush1.bf16.msra.mxu1 %v15439_v16 }
 0xbbf   : > { %7212 = vmatpush1.bf16.msra.mxu0 %v15367_v58  ;;  %6981 = vmatmul.mubr.bf16.vlgmr.msra.gmra.mrb[88].mxu1 %v18527_v3 }
 0xbc0   : > { %7213 = vmatprep.subr.bf16.mxu0 %v15372_v22  ;;  %7337 = vmatprep.mubr.bf16.mxu1 %v19898_v35 }
 0xbc3   : > { %7214 = vmatpush1.bf16.msra.mxu0 %v15370_v49  ;;  %v16105_v49 = vld [vmem:[#allocation2 + $0x8] sm:$0xff] }
 0xbc4   : > { %7215 = vmatprep.subr.bf16.mxu0 %v15375_v37 }
 0xbc7   : > { %7216 = vmatpush1.bf16.msra.mxu0 %v15373_v62 }
 0xbc8   : > { %7217 = vmatprep.subr.bf16.mxu0 %v15378_v47 }
 0xbcb   : > { %7218 = vmatpush1.bf16.msra.mxu0 %v15376_v26 }
 0xbcc   : > { %7219 = vmatprep.subr.bf16.mxu0 %v15381_v8 }
 0xbcf   : > { %7220 = vmatpush1.bf16.msra.mxu0 %v15379_v46 }
 0xbd0   : > { %7221 = vmatprep.subr.bf16.mxu0 %v15384_v9 }
 0xbd3   : > { %7222 = vmatpush1.bf16.msra.mxu0 %v15382_v52 }
 0xbd4   : > { %7223 = vmatprep.subr.bf16.mxu0 %v15387_v53  ;;  %v16106_v53 = vld [vmem:[#allocation2 + $0x20] sm:$0xff] }
 0xbd7   : > { %7224 = vmatpush1.bf16.msra.mxu0 %v15385_v57 }
 0xbd8   : > { %7225 = vmatprep.subr.bf16.mxu0 %v15390_v19 }
 0xbdb   : > { %7226 = vmatpush1.bf16.msra.mxu0 %v15388_v55 }
 0xbdc   : > { %7227 = vmatprep.subr.bf16.mxu0 %v15393_v30  ;;  %v16107_v30 = vld [vmem:[#allocation2 + $0x28] sm:$0xff] }
 0xbdf   : > { %7228 = vmatpush1.bf16.msra.mxu0 %v15391_v54 }
 0xbe2   : > { %7230 = vmatmul.mubr.bf16.vlgmr.msra.gmra.mrb[96].mxu0 %v18527_v3  ;;  %v13187_v3 = vld [vmem:[%s17635_s19 + $0x4] ss:$8 sm:$0x3] }
 0xbe3   : > { %v6781_v31 = vrot.slane %v13187_v3, %v19906_v2  ;;  %v6785_v21 = vrot.slane %v13187_v3, %v17830_v34 }
 0xc75   : > { %v6576_v44 = vpop.f32.mrb[88].mxu0 }
 0xc76   : > { %v6577_v28 = vadd.f32 %v6576_v44, %v6375_v15  ;;  %v6578_v18 = vpop.f32.mrb[89].mxu0 }
 0xc77   : > { %v6579_v41 = vadd.f32 %v6578_v18, %v6379_v59  ;;  %v6580_v61 = vpop.f32.mrb[90].mxu0 }
 0xc78   : > { %v18565_v7 = vadd.f32 %v16104_v38, %v6577_v28  ;;  %v18567_v58 = vadd.f32 %v6580_v61, %v6375_v15  ;;  %v6582_v22 = vpop.f32.mrb[91].mxu0 }
 0xc79   : > { %v18569_v37 = vadd.f32 %v16105_v49, %v6579_v41  ;;  %v18571_v62 = vadd.f32 %v6582_v22, %v6379_v59  ;;  %v15451_v49 = vld [vmem:[%s19907_s26 + $0x14] ss:$8 sps:$4 sm:$0xff]  }
 0xc7b   : > { %v6607_v47 = vadd.f32 %v18569_v37, %v18565_v7 }
 0xc7d   : > { %6608 = vadd.xlane.f32.xlu1 %v6607_v47  ;;  %v6586_v26 = vpop.f32.mrb[92].mxu0 }
 0xc7e   : > { %v6587_v8 = vadd.f32 %v6586_v26, %v6375_v15  ;;  %v6588_v46 = vpop.f32.mrb[93].mxu0  ;;  %v15449_v26 = vld [vmem:[%s19907_s26 + $0x10] ss:$8 sps:$4 sm:$0xff]  }
 0xc7f   : > { %v6589_v9 = vadd.f32 %v6588_v46, %v6379_v59  ;;  %v6590_v52 = vpop.f32.mrb[94].mxu0 }
 0xc80   : > { %v18575_v57 = vadd.f32 %v16106_v53, %v6587_v8  ;;  %v18577_v19 = vadd.f32 %v6590_v52, %v6375_v15  ;;  %v6592_v55 = vpop.f32.mrb[95].mxu0 }
 0xc81   : > { %v18579_v54 = vadd.f32 %v16107_v30, %v6589_v9  ;;  %v18581_v42 = vadd.f32 %v6592_v55, %v6379_v59  ;;  %v15446_v59 = vld [vmem:[%s19907_s26] ss:$8 sps:$4 sm:$0xff]  }
 0xc83   : > { %v6613_v33 = vadd.f32 %v18579_v54, %v18575_v57 }
 0xc85   : > { %6614 = vadd.xlane.f32.xlu1 %v6613_v33  ;;  %v15454_v33 = vld [vmem:[%s19907_s26 + $0x24] ss:$8 sps:$4 sm:$0xff]  }
 0xc92   : > { %v6982_v5 = vpop.f32.mrb[88].mxu1 }
 0xc93   : > { %v18612_v25 = vadd.f32 %v6982_v5, %v6781_v31  ;;  %v6984_v23 = vpop.f32.mrb[89].mxu1 }
 0xc94   : > { %v6985_v40 = vadd.f32 %v6984_v23, %v6785_v21  ;;  %v6986_v12 = vpop.f32.mrb[90].mxu1 }
 0xc95   : > { %v6987_v32 = vpop.f32.mrb[91].mxu1  ;;  %v6989_v12 = vpack.c.bf16 %v18612_v25, %v18612_v25 }
 0xc96   : > { %v6990_v4 = vpack.c.bf16 %v6985_v40, %v6985_v40 }
 0xcb5   : > { %v7231_v60 = vpop.f32.mrb[96].mxu0 }
 0xcb6   : > { %v7232_v39 = vadd.f32 %v7231_v60, %v7030_v29  ;;  %v7233_v43 = vpop.f32.mrb[97].mxu0  ;;  %v15452_v29 = vld [vmem:[%s19907_s26 + $0x20] ss:$8 sps:$4 sm:$0xff]  }
 0xcb7   : > { %v7234_v50 = vadd.f32 %v7233_v43, %v7034_v6  ;;  %v7235_v0 = vpop.f32.mrb[98].mxu0 }
 0xcb8   : > { %v7238_v11 = vpack.c.bf16 %v7232_v39, %v7232_v39  ;;  %v7236_v27 = vpop.f32.mrb[99].mxu0 }
 0xcb9   : > { %v7239_v20 = vpack.c.bf16 %v7234_v50, %v7234_v50  ;;  %v15457_v27 = vld [vmem:[%s19907_s26 + $0x34] ss:$8 sps:$4 sm:$0xff]  }
 0xcba   : > { %v7300_v13 = vsel %vm7298_vm1, %v7238_v11, 0 }
 0xcbb   : > { %13289 = vmatprep.subr.msk.bf16.mxu1 %vm7298_vm1, %v7239_v20 }
 0xcbc   : > { %7306 = vmatpush1.bf16.msra.mxu1 %v7300_v13  ;;  %v15455_v13 = vld [vmem:[%s19907_s26 + $0x30] ss:$8 sps:$4 sm:$0xff]  }
 0xcbd   : > { %13302 = vmatprep.subr.msk.bf16.mxu1 %vm7298_vm1, %v18486_v48  ;;  %v15445_v48 = vld [vmem:[#allocation8 + $0x18] sm:$0xff]  }
 0xcbf   : > { %13290 = vmatmul.mubr.msk.bf16.vlgmr.msra.gmra.mrb[92].mxu1 %vm7285_vm2, %v15442_v24 }
 0xcc0   : > { %7347 = vmatprep.mubr.bf16.mxu1 %v19898_v35  ;;  %7441 = vmatpush1.bf16.msra.mxu1 %v7435_v56 }
 0xcc7   : > { %13291 = vmatmul.mubr.msk.bf16.gmra.mrb[96].mxu1 %vm7285_vm2, %v15443_v45 }
 0xcc8   : > { %7357 = vmatprep.mubr.bf16.mxu1 %v19898_v35 }
 0xccf   : > { %13292 = vmatmul.mubr.msk.bf16.gmra.mrb[100].mxu1 %vm7285_vm2, %v15444_v51 }
 0xcd0   : > { %7367 = vmatprep.mubr.bf16.mxu1 %v19898_v35 }
 0xcd7   : > { %13293 = vmatmul.mubr.msk.bf16.gmra.mrb[104].mxu1 %vm7285_vm2, %v15445_v48 }
 0xcd8   : > { %7472 = vmatprep.mubr.bf16.mxu1 %v19898_v35 }
 0xcdf   : > { %13303 = vmatmul.mubr.msk.bf16.vlgmr.msra.gmra.mrb[108].mxu1 %vm7285_vm2, %v15442_v24 }
 0xce0   : > { %7482 = vmatprep.mubr.bf16.mxu1 %v19898_v35 }
 0xce7   : > { %13304 = vmatmul.mubr.msk.bf16.gmra.mrb[112].mxu1 %vm7285_vm2, %v15443_v45 }
 0xce8   : > { %7492 = vmatprep.mubr.bf16.mxu1 %v19898_v35 }
 0xcef   : > { %13305 = vmatmul.mubr.msk.bf16.gmra.mrb[116].mxu1 %vm7285_vm2, %v15444_v51 }
 0xcf0   : > { %7502 = vmatprep.mubr.bf16.mxu1 %v19898_v35 }
 0xcf7   : > { %13306 = vmatmul.mubr.msk.bf16.gmra.mrb[120].mxu1 %vm7285_vm2, %v15445_v48 }
 0xcf8   : > { %7561 = vmatprep.mubr.bf16.mxu1 %v6990_v4 }
 0xd92   : > { %v7339_v63 = vpop.f32.mrb[92].mxu1 }
 0xd93   : > { %v7341_v14 = vpop.f32.mrb[93].mxu1 }
 0xd94   : > { %v7343_v16 = vpop.f32.mrb[94].mxu1 }
 0xd95   : > { %v7378_v15 = vpack.c.bf16 %v7343_v16, %v7339_v63  ;;  %v7345_v44 = vpop.f32.mrb[95].mxu1 }
 0xd96   : > { %v7379_v28 = vpack.c.bf16 %v7345_v44, %v7341_v14 }
 0xd97   : > { %v7426_v41 = vmul.bf16 %v15446_v59, %v7378_v15 }
 0xd98   : > { %v7427_v18 = vmul.bf16 %v15448_v17, %v7379_v28 }
 0xd9a   : > { %v7349_v61 = vpop.f32.mrb[96].mxu1  ;;  %7529 = vmatprep.subr.bf16.mxu1 %v7427_v18 }
 0xd9b   : > { %v7351_v38 = vpop.f32.mrb[97].mxu1  ;;  %7530 = vmatpush1.bf16.xpose.msra.mxu1 %v7426_v41 }
 0xd9c   : > { %v7353_v22 = vpop.f32.mrb[98].mxu1 }
 0xd9d   : > { %v7380_v47 = vpack.c.bf16 %v7353_v22, %v7349_v61  ;;  %v7355_v8 = vpop.f32.mrb[99].mxu1 }
 0xd9e   : > { %v7381_v46 = vpack.c.bf16 %v7355_v8, %v7351_v38 }
 0xd9f   : > { %v7428_v52 = vmul.bf16 %v15449_v26, %v7380_v47 }
 0xda0   : > { %v7429_v9 = vmul.bf16 %v15451_v49, %v7381_v46 }
 0xda2   : > { %v7359_v53 = vpop.f32.mrb[100].mxu1  ;;  %7531 = vmatprep.subr.bf16.mxu1 %v7429_v9 }
 0xda3   : > { %v7361_v55 = vpop.f32.mrb[101].mxu1  ;;  %7532 = vmatpush1.bf16.xpose.msra.mxu1 %v7428_v52 }
 0xda4   : > { %v7363_v30 = vpop.f32.mrb[102].mxu1 }
 0xda5   : > { %v7382_v1 = vpack.c.bf16 %v7363_v30, %v7359_v53  ;;  %v7365_v6 = vpop.f32.mrb[103].mxu1  ;;  %v7264_v30 = vld [vmem:[#allocation4] sm:$0xff] }
 0xda6   : > { %v7383_v60 = vpack.c.bf16 %v7365_v6, %v7361_v55 }
 0xda7   : > { %v7430_v43 = vmul.bf16 %v15452_v29, %v7382_v1  ;;  %v6609_v1 = vpop.xlane.xlu1 %6608 }
 0xda8   : > { %v7431_v39 = vmul.bf16 %v15454_v33, %v7383_v60 }
 0xdaa   : > { %v7369_v50 = vpop.f32.mrb[104].mxu1  ;;  %7533 = vmatprep.subr.bf16.mxu1 %v7431_v39 }
 0xdab   : > { %v7371_v0 = vpop.f32.mrb[105].mxu1  ;;  %7534 = vmatpush1.bf16.xpose.msra.mxu1 %v7430_v43  ;;  %v16109_v43 = vld [vmem:[#allocation2 + $0x18] sm:$0xff] }
 0xdac   : > { %v7373_v11 = vpop.f32.mrb[106].mxu1 }
 0xdad   : > { %v7384_v20 = vpack.c.bf16 %v7373_v11, %v7369_v50  ;;  %v7375_v24 = vpop.f32.mrb[107].mxu1  ;;  %v18645_v50 = vadd.f32 %v16109_v43, %v18571_v62  ;;  %v15488_v43 = vld [vmem:[%s17621_s28 + $0x644] ss:$8 sps:$4 sm:$0xff]  }
 0xdae   : > { %v7385_v56 = vpack.c.bf16 %v7375_v24, %v7371_v0  ;;  %v6620_v0 = vmul.f32 0.00390625, %v6609_v1  ;;  %v16110_v24 = vld [vmem:[#allocation2 + $0x30] sm:$0xff]  ;;  %v15477_v1 = vld [vmem:[%s17621_s28 + $0x820] ss:$8 sps:$4 sm:$0xff]  }
 0xdaf   : > { %v7432_v51 = vmul.bf16 %v15455_v13, %v7384_v20  ;;  %v6615_v20 = vpop.xlane.xlu1 %6614 }
 0xdb0   : > { %v7433_v45 = vmul.bf16 %v15457_v27, %v7385_v56  ;;  %v18649_v56 = vadd.f32 %v16110_v24, %v18577_v19  ;;  %v18658_v62 = vsub.f32 %v18569_v37, %v6620_v0  ;;  %v15492_v24 = vld [vmem:[%s17621_s28 + $0x650] ss:$8 sps:$4 sm:$0xff]  }
 0xdb2   : > { %7535 = vmatprep.subr.bf16.mxu1 %v7433_v45  ;;  %v7474_v48 = vpop.f32.mrb[108].mxu1  ;;  %v16111_v45 = vld [vmem:[#allocation2 + $0x38] sm:$0xff]  ;;  %v6633_v37 = vmul.f32 %v18658_v62, %v18658_v62 }
 0xdb3   : > { %7536 = vmatpush1.bf16.xpose.msra.mxu1 %v7432_v51  ;;  %v7476_v3 = vpop.f32.mrb[109].mxu1  ;;  %v18652_v51 = vadd.f32 %v16111_v45, %v18581_v42  ;;  %v15495_v45 = vld [vmem:[%s17621_s28 + $0x850] ss:$8 sps:$4 sm:$0xff]  }
 0xdb4   : > { %v7478_v31 = vpop.f32.mrb[110].mxu1 }
 0xdb5   : > { %v7513_v21 = vpack.c.bf16 %v7478_v31, %v7474_v48  ;;  %v7480_v5 = vpop.f32.mrb[111].mxu1  ;;  %v6622_v48 = vmul.f32 0.00390625, %v6615_v20  ;;  %v6616_v31 = vadd.f32 %v18652_v51, %v18649_v56  ;;  %v15489_v20 = vld [vmem:[%s17621_s28 + $0x840] ss:$8 sps:$4 sm:$0xff]  }
 0xdb6   : > { %v7514_v23 = vpack.c.bf16 %v7480_v5, %v7476_v3 }
 0xdb7   : > { %v7521_v40 = vmul.bf16 %v15446_v59, %v7513_v21  ;;  %v18665_v19 = vsub.f32 %v18575_v57, %v6622_v48  ;;  %v18668_v42 = vsub.f32 %v18579_v54, %v6622_v48  ;;  %v15459_v54 = vld [vmem:[#allocation9 + $0x8] sm:$0xff]  }
 0xdb8   : > { %v7522_v32 = vmul.bf16 %v15448_v17, %v7514_v23 }
 0xdb9   : > { %v6636_v5 = vmul.f32 %v18665_v19, %v18665_v19  ;;  %v6637_v23 = vmul.f32 %v18668_v42, %v18668_v42 }
 0xdba   : > { %7562 = vmatmul.mubr.bf16.vlgmr.msra.gmra.mrb[124].mxu1 %v6989_v12  ;;  %v7484_v4 = vpop.f32.mrb[112].mxu1  ;;  %7651 = vmatprep.subr.bf16.mxu1 %v7522_v32  ;;  %v16867_v12 = vmov 0.0   ;;  %v15460_v32 = vld [vmem:[#allocation9 + $0x10] sm:$0xff]  }
 0xdbb   : > { %v7486_v63 = vpop.f32.mrb[113].mxu1  ;;  %7652 = vmatpush1.bf16.msra.mxu1 %v7521_v40  ;;  %7683 = vmatprep.mubr.bf16.mxu1 %v19898_v35  ;;  %v6646_v57 = vadd.f32 %v6637_v23, %v6636_v5  ;;  %v15458_v40 = vld [vmem:[#allocation9] sm:$0xff]  }
 0xdbc   : > { %v7488_v14 = vpop.f32.mrb[114].mxu1  ;;  %14079 = vmatprep.subr.bf16.mxu0 %v16867_v12  ;;  %14087 = vmatprep.mubr.msk.bf16.mxu0 %vm16868_vm4, %v16867_v12 }
 0xdbd   : > { %v7515_v16 = vpack.c.bf16 %v7488_v14, %v7484_v4  ;;  %v7490_v15 = vpop.f32.mrb[115].mxu1  ;;  %14080 = vmatpush3.bf16.msra.mxu0 %v15458_v40  ;;  %v15461_v4 = vld [vmem:[#allocation9 + $0x18] sm:$0xff]  }
 0xdbe   : > { %v7516_v44 = vpack.c.bf16 %v7490_v15, %v7486_v63  ;;  %14081 = vmatprep.subr.bf16.mxu0 %v16867_v12 }
 0xdbf   : > { %v7523_v28 = vmul.bf16 %v15449_v26, %v7515_v16 }
 0xdc0   : > { %v7524_v18 = vmul.bf16 %v15451_v49, %v7516_v44 }
 0xdc1   : > { %14082 = vmatpush3.bf16.msra.mxu0 %v15459_v54 }
 0xdc2   : > { %v7494_v41 = vpop.f32.mrb[116].mxu1  ;;  %7653 = vmatprep.subr.bf16.mxu1 %v7524_v18  ;;  %14083 = vmatprep.subr.bf16.mxu0 %v16867_v12 }
 0xdc3   : > { %v7496_v59 = vpop.f32.mrb[117].mxu1  ;;  %7654 = vmatpush1.bf16.msra.mxu1 %v7523_v28 }
 0xdc4   : > { %v7498_v61 = vpop.f32.mrb[118].mxu1 }
 0xdc5   : > { %v7517_v25 = vpack.c.bf16 %v7498_v61, %v7494_v41  ;;  %v7500_v17 = vpop.f32.mrb[119].mxu1  ;;  %14084 = vmatpush3.bf16.msra.mxu0 %v15460_v32 }
 0xdc6   : > { %v7518_v38 = vpack.c.bf16 %v7500_v17, %v7496_v59  ;;  %14085 = vmatprep.subr.bf16.mxu0 %v16867_v12 }
 0xdc7   : > { %v7525_v22 = vmul.bf16 %v15452_v29, %v7517_v25  ;;  %v16108_v29 = vld [vmem:[#allocation2 + $0x10] sm:$0xff] }
 0xdc8   : > { %v7526_v47 = vmul.bf16 %v15454_v33, %v7518_v38  ;;  %v18642_v33 = vadd.f32 %v16108_v29, %v18567_v58  ;;  %v18655_v58 = vsub.f32 %v18565_v7, %v6620_v0  ;;  %v15483_v29 = vld [vmem:[%s17621_s28 + $0x830] ss:$8 sps:$4 sm:$0xff]   ;;  %v15491_v0 = vld [vmem:[%s17621_s28 + $0x844] ss:$8 sps:$4 sm:$0xff]  }
 0xdc9   : > { %14086 = vmatpush3.bf16.msra.mxu0 %v15461_v4 }
 0xdca   : > { %v7504_v8 = vpop.f32.mrb[120].mxu1  ;;  %7655 = vmatprep.subr.bf16.mxu1 %v7526_v47  ;;  %v6610_v3 = vadd.f32 %v18645_v50, %v18642_v33  ;;  %v6632_v7 = vmul.f32 %v18655_v58, %v18655_v58  ;;  %v15464_v47 = vld [vmem:[%s17621_s28 + $0x604] ss:$8 sps:$4 sm:$0xff]  }
 0xdcb   : > { %v7506_v46 = vpop.f32.mrb[121].mxu1  ;;  %7656 = vmatpush1.bf16.msra.mxu1 %v7525_v22  ;;  %v15462_v22 = vld [vmem:[%s17621_s28 + $0x600] ss:$8 sps:$4 sm:$0xff]   ;;  %7955 = vmatprep.subr.bf16.mxu0 %v15464_v47  ;;  %v15521_v47 = vld [vmem:[%s17621_s28 + $0x894] ss:$8 sps:$4 sm:$0xff]  }
 0xdcc   : > { %v7508_v9 = vpop.f32.mrb[122].mxu1  ;;  %v6640_v21 = vadd.f32 %v6633_v37, %v6632_v7 }
 0xdcd   : > { %v7519_v52 = vpack.c.bf16 %v7508_v9, %v7504_v8  ;;  %v7510_v53 = vpop.f32.mrb[123].mxu1  ;;  %v15465_v8 = vld [vmem:[%s17621_s28 + $0x800] ss:$8 sps:$4 sm:$0xff]   ;;  %v15470_v9 = vld [vmem:[%s17621_s28 + $0x614] ss:$8 sps:$4 sm:$0xff]  }
 0xdce   : > { %v7520_v55 = vpack.c.bf16 %v7510_v53, %v7506_v46  ;;  %v15467_v46 = vld [vmem:[%s17621_s28 + $0x804] ss:$8 sps:$4 sm:$0xff]   ;;  %v15468_v53 = vld [vmem:[%s17621_s28 + $0x610] ss:$8 sps:$4 sm:$0xff]  }
 0xdcf   : > { %v7527_v26 = vmul.bf16 %v15455_v13, %v7519_v52  ;;  %v15473_v52 = vld [vmem:[%s17621_s28 + $0x814] ss:$8 sps:$4 sm:$0xff]  }
 0xdd0   : > { %v7528_v49 = vmul.bf16 %v15457_v27, %v7520_v55  ;;  %v15471_v55 = vld [vmem:[%s17621_s28 + $0x810] ss:$8 sps:$4 sm:$0xff]  }
 0xdd2   : > { %7657 = vmatprep.subr.bf16.mxu1 %v7528_v49  ;;  %v15479_v49 = vld [vmem:[%s17621_s28 + $0x824] ss:$8 sps:$4 sm:$0xff]  }
 0xdd3   : > { %7658 = vmatpush1.bf16.msra.mxu1 %v7527_v26  ;;  %v15476_v26 = vld [vmem:[%s17621_s28 + $0x624] ss:$8 sps:$4 sm:$0xff]  }
 0xdd4   : > { %8205 = vmatprep.subr.bf16.mxu1 %v15467_v46  ;;  %v15519_v46 = vld [vmem:[%s17621_s28 + $0x890] ss:$8 sps:$4 sm:$0xff]  }
 0xe8d   : > { %v7563_v6 = vpop.f32.mrb[124].mxu1 }
 0xe8e   : > { %v7564_v60 = vadd.f32 %v7563_v6, %v7264_v30  ;;  %v7565_v39 = vpop.f32.mrb[125].mxu1  ;;  %v15474_v30 = vld [vmem:[%s17621_s28 + $0x620] ss:$8 sps:$4 sm:$0xff]   ;;  %v15482_v6 = vld [vmem:[%s17621_s28 + $0x634] ss:$8 sps:$4 sm:$0xff]  }
 0xe8f   : > { %v7566_v11 = vpop.f32.mrb[126].mxu1  ;;  %v15480_v39 = vld [vmem:[%s17621_s28 + $0x630] ss:$8 sps:$4 sm:$0xff]  }
 0xe90   : > { %v7567_v27 = vpop.f32.mrb[127].mxu1  ;;  %v7570_v13 = vsel %vm7569_vm3, %v7564_v60, -inf  ;;  %v15486_v11 = vld [vmem:[%s17621_s28 + $0x640] ss:$8 sps:$4 sm:$0xff]  }
 0xe91   : > { %7571 = vmax.xlane.f32.xlu0 %v7570_v13  ;;  %v15494_v27 = vld [vmem:[%s17621_s28 + $0x654] ss:$8 sps:$4 sm:$0xff]  }
 0xe92   : > { %v15497_v13 = vld [vmem:[%s17621_s28 + $0x854] ss:$8 sps:$4 sm:$0xff]  }
 0xe95   : > { %6611 = vadd.xlane.f32.xlu0 %v6610_v3 }
 0xe99   : > { %6617 = vadd.xlane.f32.xlu0 %v6616_v31 }
 0xe9d   : > { %6641 = vadd.xlane.f32.xlu0 %v6640_v21 }
 0xea1   : > { %6647 = vadd.xlane.f32.xlu0 %v6646_v57 }
 0xf1e   : > { %v7572_v63 = vpop.xlane.xlu0 %7571 }
 0xf1f   : > { %v7573_v14 = vsub.f32 %v7564_v60, %v7572_v63  ;;  %v15485_v60 = vld [vmem:[%s17621_s28 + $0x834] ss:$8 sps:$4 sm:$0xff]  }
 0xf21   : > { %v7574_v16 = vmul.f32 1.442695, %v7573_v14  ;;  %v15498_v14 = vld [vmem:[%s17621_s28 + $0x660] ss:$8 sps:$4 sm:$0xff]  }
 0xf22   : > { %v6612_v48 = vpop.xlane.xlu0 %6611 }
 0xf23   : > { %15784 = vpow2.f32 %v7574_v16  ;;  %v6621_v3 = vmul.f32 0.00390625, %v6612_v48  ;;  %v15500_v16 = vld [vmem:[%s17621_s28 + $0x664] ss:$8 sps:$4 sm:$0xff]   ;;  %v15554_v48 = vld [vmem:[%s17621_s28 + $0x6f4] ss:$8 sps:$4 sm:$0xff]  }
 0xf25   : > { %v18705_v7 = vsub.f32 %v18642_v33, %v6621_v3  ;;  %v18708_v37 = vsub.f32 %v18645_v50, %v6621_v3  ;;  %v15557_v3 = vld [vmem:[%s17621_s28 + $0x8f4] ss:$8 sps:$4 sm:$0xff]  }
 0xf26   : > { %v6618_v31 = vpop.xlane.xlu0 %6617 }
 0xf27   : > { %v6623_v21 = vmul.f32 0.00390625, %v6618_v31  ;;  %v6634_v33 = vmul.f32 %v18705_v7, %v18705_v7  ;;  %v15552_v31 = vld [vmem:[%s17621_s28 + $0x6f0] ss:$8 sps:$4 sm:$0xff]  }
 0xf29   : > { %v18719_v50 = vsub.f32 %v18649_v56, %v6623_v21  ;;  %v18722_v32 = vsub.f32 %v18652_v51, %v6623_v21  ;;  %v15555_v21 = vld [vmem:[%s17621_s28 + $0x8f0] ss:$8 sps:$4 sm:$0xff]  }
 0xf2b   : > { %v6638_v63 = vmul.f32 %v18719_v50, %v18719_v50  ;;  %v6639_v56 = vmul.f32 %v18722_v32, %v18722_v32 }
 0xf2d   : > { %v15785_v15 = vpop.eup %15784  ;;  %v6649_v51 = vadd.f32 %v6639_v56, %v6638_v63 }
 0xf2e   : > { %v7576_v44 = vpack.c.bf16 %v15785_v15, %v15785_v15 }
 0xf30   : > { %14088 = vmatmul.mubr.msk.bf16.vlgmr.msra.gmra.mrb[100].mxu0 %vm7569_vm3, %v7576_v44  ;;  %v15503_v44 = vld [vmem:[%s17621_s28 + $0x864] ss:$8 sps:$4 sm:$0xff]  }
 0xf31   : > { %7956 = vmatpush1.bf16.msra.mxu0 %v15462_v22  ;;  %v15518_v22 = vld [vmem:[%s17621_s28 + $0x694] ss:$8 sps:$4 sm:$0xff]  }
 0xf32   : > { %7957 = vmatprep.subr.bf16.mxu0 %v15470_v9  ;;  %v15524_v9 = vld [vmem:[%s17621_s28 + $0x6a4] ss:$8 sps:$4 sm:$0xff]  }
 0xf35   : > { %7958 = vmatpush1.bf16.msra.mxu0 %v15468_v53  ;;  %v15522_v53 = vld [vmem:[%s17621_s28 + $0x6a0] ss:$8 sps:$4 sm:$0xff]  }
 0xf36   : > { %7959 = vmatprep.subr.bf16.mxu0 %v15476_v26  ;;  %v15530_v26 = vld [vmem:[%s17621_s28 + $0x6b4] ss:$8 sps:$4 sm:$0xff]  }
 0xf39   : > { %7960 = vmatpush1.bf16.msra.mxu0 %v15474_v30  ;;  %v15528_v30 = vld [vmem:[%s17621_s28 + $0x6b0] ss:$8 sps:$4 sm:$0xff]  }
 0xf3a   : > { %7961 = vmatprep.subr.bf16.mxu0 %v15482_v6  ;;  %v15534_v6 = vld [vmem:[%s17621_s28 + $0x6c0] ss:$8 sps:$4 sm:$0xff]  }
 0xf3d   : > { %7962 = vmatpush1.bf16.msra.mxu0 %v15480_v39  ;;  %v15537_v39 = vld [vmem:[%s17621_s28 + $0x8c0] ss:$8 sps:$4 sm:$0xff]  }
 0xf3e   : > { %7963 = vmatprep.subr.bf16.mxu0 %v15488_v43  ;;  %v15542_v43 = vld [vmem:[%s17621_s28 + $0x6d4] ss:$8 sps:$4 sm:$0xff]  }
 0xf41   : > { %7964 = vmatpush1.bf16.msra.mxu0 %v15486_v11  ;;  %v15540_v11 = vld [vmem:[%s17621_s28 + $0x6d0] ss:$8 sps:$4 sm:$0xff]  }
 0xf42   : > { %7965 = vmatprep.subr.bf16.mxu0 %v15494_v27  ;;  %v15548_v27 = vld [vmem:[%s17621_s28 + $0x6e4] ss:$8 sps:$4 sm:$0xff]  }
 0xf45   : > { %7966 = vmatpush1.bf16.msra.mxu0 %v15492_v24  ;;  %v15546_v24 = vld [vmem:[%s17621_s28 + $0x6e0] ss:$8 sps:$4 sm:$0xff]  }
 0xf46   : > { %7967 = vmatprep.subr.bf16.mxu0 %v15500_v16 }
 0xf49   : > { %7968 = vmatpush1.bf16.msra.mxu0 %v15498_v14 }
0x1003   : > { %v7638_v28 = vpop.f32.mrb[100].mxu0 }
0x1004   : > { %v7644_v18 = vmax.f32 %v7638_v28, 1e-30  ;;  %v14089_v41 = vpop.f32.mrb[101].mxu0  ;;  %v15506_v28 = vld [vmem:[%s17621_s28 + $0x674] ss:$8 sps:$4 sm:$0xff]  }
0x1005   : > { %v7641_v59 = vpop.f32.mrb[102].mxu0  ;;  %v15504_v41 = vld [vmem:[%s17621_s28 + $0x670] ss:$8 sps:$4 sm:$0xff]   ;;  %7969 = vmatprep.subr.bf16.mxu0 %v15506_v28 }
0x1006   : > { %15786 = vrcp.f32 %v7644_v18  ;;  %v14090_v61 = vpop.f32.mrb[103].mxu0  ;;  %v15509_v18 = vld [vmem:[%s17621_s28 + $0x874] ss:$8 sps:$4 sm:$0xff]   ;;  %v15507_v59 = vld [vmem:[%s17621_s28 + $0x870] ss:$8 sps:$4 sm:$0xff]   ;;  %7970 = vmatpush1.bf16.msra.mxu0 %v15504_v41 }
0x1007   : > { %v15512_v61 = vld [vmem:[%s17621_s28 + $0x684] ss:$8 sps:$4 sm:$0xff]  }
0x1008   : > { %7971 = vmatprep.subr.bf16.mxu0 %v15512_v61 }
0x1010   : > { %v15787_v25 = vpop.eup %15786 }
0x1011   : > { %v7646_v17 = vmul.f32 %v15787_v25, %v15785_v15  ;;  %v15501_v15 = vld [vmem:[%s17621_s28 + $0x860] ss:$8 sps:$4 sm:$0xff]   ;;  %v15515_v25 = vld [vmem:[%s17621_s28 + $0x884] ss:$8 sps:$4 sm:$0xff]  }
0x1013   : > { %v7647_v38 = vpack.c.bf16 %v7646_v17, %v7646_v17  ;;  %v15510_v17 = vld [vmem:[%s17621_s28 + $0x680] ss:$8 sps:$4 sm:$0xff]  }
0x1014   : > { %7972 = vmatpush1.bf16.msra.mxu0 %v15510_v17 }
0x1015   : > { %13312 = vmatmul.mubr.msk.bf16.vlgmr.msra.gmra.mrb[128].mxu1 %vm7569_vm3, %v7647_v38  ;;  %v15513_v38 = vld [vmem:[%s17621_s28 + $0x880] ss:$8 sps:$4 sm:$0xff]   ;;  %7973 = vmatprep.subr.bf16.mxu0 %v15518_v22 }
0x1016   : > { %8206 = vmatpush1.bf16.msra.mxu1 %v15465_v8  ;;  %v15516_v8 = vld [vmem:[%s17621_s28 + $0x690] ss:$8 sps:$4 sm:$0xff]  }
0x1017   : > { %8207 = vmatprep.subr.bf16.mxu1 %v15473_v52  ;;  %v15527_v52 = vld [vmem:[%s17621_s28 + $0x8a4] ss:$8 sps:$4 sm:$0xff]  }
0x1018   : > { %7974 = vmatpush1.bf16.msra.mxu0 %v15516_v8 }
0x1019   : > { %7975 = vmatprep.subr.bf16.mxu0 %v15524_v9 }
0x101a   : > { %8208 = vmatpush1.bf16.msra.mxu1 %v15471_v55  ;;  %v15525_v55 = vld [vmem:[%s17621_s28 + $0x8a0] ss:$8 sps:$4 sm:$0xff]  }
0x101b   : > { %8209 = vmatprep.subr.bf16.mxu1 %v15479_v49  ;;  %v15533_v49 = vld [vmem:[%s17621_s28 + $0x8b4] ss:$8 sps:$4 sm:$0xff]  }
0x101c   : > { %7976 = vmatpush1.bf16.msra.mxu0 %v15522_v53 }
0x101d   : > { %7977 = vmatprep.subr.bf16.mxu0 %v15530_v26 }
0x101e   : > { %8210 = vmatpush1.bf16.msra.mxu1 %v15477_v1  ;;  %v15531_v1 = vld [vmem:[%s17621_s28 + $0x8b0] ss:$8 sps:$4 sm:$0xff]  }
0x101f   : > { %8211 = vmatprep.subr.bf16.mxu1 %v15485_v60  ;;  %v15536_v60 = vld [vmem:[%s17621_s28 + $0x6c4] ss:$8 sps:$4 sm:$0xff]  }
0x1020   : > { %7978 = vmatpush1.bf16.msra.mxu0 %v15528_v30 }
0x1021   : > { %7979 = vmatprep.subr.bf16.mxu0 %v15536_v60 }
0x1022   : > { %8212 = vmatpush1.bf16.msra.mxu1 %v15483_v29  ;;  %v15539_v29 = vld [vmem:[%s17621_s28 + $0x8c4] ss:$8 sps:$4 sm:$0xff]  }
0x1023   : > { %8213 = vmatprep.subr.bf16.mxu1 %v15491_v0  ;;  %v15545_v0 = vld [vmem:[%s17621_s28 + $0x8d4] ss:$8 sps:$4 sm:$0xff]  }
0x1024   : > { %7980 = vmatpush1.bf16.msra.mxu0 %v15534_v6 }
0x1025   : > { %7981 = vmatprep.subr.bf16.mxu0 %v15542_v43 }
0x1026   : > { %8214 = vmatpush1.bf16.msra.mxu1 %v15489_v20  ;;  %v15543_v20 = vld [vmem:[%s17621_s28 + $0x8d0] ss:$8 sps:$4 sm:$0xff]  }
0x1027   : > { %8215 = vmatprep.subr.bf16.mxu1 %v15497_v13  ;;  %v15551_v13 = vld [vmem:[%s17621_s28 + $0x8e4] ss:$8 sps:$4 sm:$0xff]  }
0x1028   : > { %7982 = vmatpush1.bf16.msra.mxu0 %v15540_v11  ;;  %v13154_v11 = vld [vmem:[%s17635_s19 + $0x13] ss:$8 sm:$0x3] }
0x1029   : > { %7983 = vmatprep.subr.bf16.mxu0 %v15548_v27 }
0x102a   : > { %8216 = vmatpush1.bf16.msra.mxu1 %v15495_v45  ;;  %v15549_v45 = vld [vmem:[%s17621_s28 + $0x8e0] ss:$8 sps:$4 sm:$0xff]  }
0x102b   : > { %8217 = vmatprep.subr.bf16.mxu1 %v15503_v44 }
0x102c   : > { %7984 = vmatpush1.bf16.msra.mxu0 %v15546_v24 }
0x102d   : > { %7985 = vmatprep.subr.bf16.mxu0 %v15554_v48  ;;  %v6723_v48 = vrot.slane %v13154_v11, %v19906_v2 }
0x102e   : > { %8218 = vmatpush1.bf16.msra.mxu1 %v15501_v15 }
0x102f   : > { %8219 = vmatprep.subr.bf16.mxu1 %v15509_v18 }
0x1030   : > { %7986 = vmatpush1.bf16.msra.mxu0 %v15552_v31 }
0x1032   : > { %8220 = vmatpush1.bf16.msra.mxu1 %v15507_v59 }
0x1033   : > { %8221 = vmatprep.subr.bf16.mxu1 %v15515_v25 }
0x1036   : > { %8222 = vmatpush1.bf16.msra.mxu1 %v15513_v38 }
0x1037   : > { %8223 = vmatprep.subr.bf16.mxu1 %v15521_v47 }
0x103a   : > { %8224 = vmatpush1.bf16.msra.mxu1 %v15519_v46 }
0x103b   : > { %8225 = vmatprep.subr.bf16.mxu1 %v15527_v52 }
0x103e   : > { %8226 = vmatpush1.bf16.msra.mxu1 %v15525_v55 }
0x103f   : > { %8227 = vmatprep.subr.bf16.mxu1 %v15533_v49 }
0x1042   : > { %8228 = vmatpush1.bf16.msra.mxu1 %v15531_v1 }
0x1043   : > { %8229 = vmatprep.subr.bf16.mxu1 %v15539_v29 }
0x1046   : > { %8230 = vmatpush1.bf16.msra.mxu1 %v15537_v39 }
0x1047   : > { %8231 = vmatprep.subr.bf16.mxu1 %v15545_v0  ;;  %v13153_v0 = vld [vmem:[%s17635_s19 + $0x12] ss:$8 sm:$0x3] }
0x1048   : > { %v6704_v27 = vrot.slane %v13153_v0, %v19906_v2 }
0x104a   : > { %8232 = vmatpush1.bf16.msra.mxu1 %v15543_v20 }
0x104b   : > { %8233 = vmatprep.subr.bf16.mxu1 %v15551_v13  ;;  %v6708_v13 = vrot.slane %v13153_v0, %v17830_v34  ;;  %v15596_v0 = vld [vmem:[%s17621_s28 + $0x764] ss:$8 sps:$4 sm:$0xff]  }
0x104e   : > { %8234 = vmatpush1.bf16.msra.mxu1 %v15549_v45 }
0x104f   : > { %8235 = vmatprep.subr.bf16.mxu1 %v15557_v3 }
0x1052   : > { %8236 = vmatpush1.bf16.msra.mxu1 %v15555_v21  ;;  %v6727_v21 = vrot.slane %v13154_v11, %v17830_v34  ;;  %v15599_v11 = vld [vmem:[%s17621_s28 + $0x964] ss:$8 sps:$4 sm:$0xff]  }
0x10e8   : > { %v7685_v5 = vpop.f32.mrb[128].mxu1 }
0x10e9   : > { %v18711_v23 = vadd.f32 %v7685_v5, %v18523_v10  ;;  %v7687_v57 = vpop.f32.mrb[129].mxu1  ;;  %v15560_v5 = vld [vmem:[%s17621_s28 + $0x704] ss:$8 sps:$4 sm:$0xff]  }
0x10ea   : > { %v18714_v40 = vadd.f32 %v7687_v57, %v18482_v36  ;;  %v7689_v12 = vpop.f32.mrb[130].mxu1  ;;  %v6635_v36 = vmul.f32 %v18708_v37, %v18708_v37  ;;  %v15563_v57 = vld [vmem:[%s17621_s28 + $0x904] ss:$8 sps:$4 sm:$0xff]   ;;  %8455 = vmatprep.subr.bf16.mxu0 %v15560_v5 }
0x10eb   : > { %v7690_v54 = vpop.f32.mrb[131].mxu1  ;;  %8704 = vmatprep.subr.bf16.mxu1 %v15563_v57  ;;  %v6642_v12 = vpop.xlane.xlu0 %6641 }
0x10ec   : > { %v7698_v10 = vadd.f32 %v18714_v40, %v18711_v23  ;;  %v6643_v4 = vadd.f32 %v6635_v36, %v6634_v33  ;;  %v6652_v54 = vmul.f32 0.003921569, %v6642_v12 }
0x10ee   : > { %7699 = vadd.xlane.f32.xlu1 %v7698_v10  ;;  %15788 = vrsqrt.f32 %v6652_v54  ;;  %vm6658_vm5 = vcmp.eq.f32.partialorder %v6652_v54, inf  ;;  %v6661_v61 = vand.u32 2147483648, %v6652_v54  ;;  %vm6660_vm6 = vcmp.eq.f32.partialorder %v6652_v54, 0.0 }
0x10ef   : > { %v6648_v33 = vpop.xlane.xlu0 %6647 }
0x10f0   : > { %v6654_v10 = vmul.f32 0.003921569, %v6648_v33 }
0x10f2   : > { %6644 = vadd.xlane.f32.xlu1 %v6643_v4  ;;  %15790 = vrsqrt.f32 %v6654_v10  ;;  %vm6672_vm7 = vcmp.eq.f32.partialorder %v6654_v10, inf  ;;  %v6675_v22 = vand.u32 2147483648, %v6654_v10  ;;  %vm6674_vm8 = vcmp.eq.f32.partialorder %v6654_v10, 0.0 }
0x10f6   : > { %6650 = vadd.xlane.f32.xlu1 %v6649_v51 }
0x10f8   : > { %v15789_v36 = vpop.eup %15788 }
0x10f9   : > { %v6657_v56 = vmul.f32 %v15789_v36, %v6652_v54 }
0x10fb   : > { %v6659_v41 = vsel %vm6658_vm5, %v6652_v54, %v6657_v56 }
0x10fc   : > { %v15791_v16 = vpop.eup %15790 }
0x10fd   : > { %v6671_v59 = vmul.f32 %v15791_v16, %v6654_v10 }
0x10ff   : > { %v6673_v38 = vsel %vm6672_vm7, %v6654_v10, %v6671_v59  ;;  %v15566_v59 = vld [vmem:[%s17621_s28 + $0x714] ss:$8 sps:$4 sm:$0xff]  }
0x1100   : > { %v6676_v8 = vsel %vm6674_vm8, %v6675_v22, %v6673_v38  ;;  %v15572_v38 = vld [vmem:[%s17621_s28 + $0x724] ss:$8 sps:$4 sm:$0xff]  }
0x1101   : > { %v6686_v9 = vadd.f32 1e-06, %v6676_v8  ;;  %v15575_v22 = vld [vmem:[%s17621_s28 + $0x924] ss:$8 sps:$4 sm:$0xff]   ;;  %v15570_v8 = vld [vmem:[%s17621_s28 + $0x720] ss:$8 sps:$4 sm:$0xff]  }
0x117b   : > { %v7700_v4 = vpop.xlane.xlu1 %7699 }
0x117c   : > { %v7701_v63 = vmul.f32 0.00390625, %v7700_v4 }
0x117e   : > { %v18775_v51 = vsub.f32 %v18711_v23, %v7701_v63  ;;  %v18778_v14 = vsub.f32 %v18714_v40, %v7701_v63  ;;  %v6662_v40 = vsel %vm6660_vm6, %v6661_v61, %v6659_v41 }
0x117f   : > { %v6645_v15 = vpop.xlane.xlu1 %6644  ;;  %v6684_v47 = vadd.f32 1e-06, %v6662_v40 }
0x1180   : > { %v6653_v44 = vmul.f32 0.003921569, %v6645_v15  ;;  %v7704_v28 = vmul.f32 %v18775_v51, %v18775_v51  ;;  %v7705_v18 = vmul.f32 %v18778_v14, %v18778_v14 }
0x1182   : > { %15792 = vrsqrt.f32 %v6653_v44  ;;  %v7706_v23 = vadd.f32 %v7705_v18, %v7704_v28  ;;  %vm6665_vm9 = vcmp.eq.f32.partialorder %v6653_v44, inf  ;;  %v6668_v53 = vand.u32 2147483648, %v6653_v44  ;;  %v15558_v28 = vld [vmem:[%s17621_s28 + $0x700] ss:$8 sps:$4 sm:$0xff]  }
0x1183   : > { %v6651_v25 = vpop.xlane.xlu1 %6650  ;;  %vm6667_vm10 = vcmp.eq.f32.partialorder %v6653_v44, 0.0  ;;  %v15561_v18 = vld [vmem:[%s17621_s28 + $0x900] ss:$8 sps:$4 sm:$0xff]  }
0x1184   : > { %v6655_v17 = vmul.f32 0.003921569, %v6651_v25  ;;  %7707 = vadd.xlane.f32.xlu0 %v7706_v23  ;;  %v15564_v23 = vld [vmem:[%s17621_s28 + $0x710] ss:$8 sps:$4 sm:$0xff]  }
0x1186   : > { %15794 = vrsqrt.f32 %v6655_v17  ;;  %vm6679_vm11 = vcmp.eq.f32.partialorder %v6655_v17, inf  ;;  %v6682_v6 = vand.u32 2147483648, %v6655_v17  ;;  %vm6681_vm12 = vcmp.eq.f32.partialorder %v6655_v17, 0.0 }
0x1187   : > { %15796 = vrcp.f32 %v6684_v47 }
0x1188   : > { %15798 = vrcp.f32 %v6686_v9 }
0x118c   : > { %v15793_v46 = vpop.eup %15792 }
0x118d   : > { %v6664_v52 = vmul.f32 %v15793_v46, %v6653_v44  ;;  %v15573_v46 = vld [vmem:[%s17621_s28 + $0x920] ss:$8 sps:$4 sm:$0xff]  }
0x118f   : > { %v6666_v55 = vsel %vm6665_vm9, %v6653_v44, %v6664_v52  ;;  %v15578_v52 = vld [vmem:[%s17621_s28 + $0x734] ss:$8 sps:$4 sm:$0xff]  }
0x1190   : > { %v15795_v26 = vpop.eup %15794  ;;  %v6669_v49 = vsel %vm6667_vm10, %v6668_v53, %v6666_v55  ;;  %v15581_v53 = vld [vmem:[%s17621_s28 + $0x934] ss:$8 sps:$4 sm:$0xff]   ;;  %v15576_v55 = vld [vmem:[%s17621_s28 + $0x730] ss:$8 sps:$4 sm:$0xff]  }
0x1191   : > { %v6685_v30 = vadd.f32 1e-06, %v6669_v49  ;;  %v6678_v1 = vmul.f32 %v15795_v26, %v6655_v17  ;;  %v15797_v43 = vpop.eup %15796  ;;  %v15579_v26 = vld [vmem:[%s17621_s28 + $0x930] ss:$8 sps:$4 sm:$0xff]   ;;  %v15584_v49 = vld [vmem:[%s17621_s28 + $0x744] ss:$8 sps:$4 sm:$0xff]  }
0x1192   : > { %v6693_v20 = vmul.f32 %v15797_v43, %v18658_v62  ;;  %v6692_v24 = vmul.f32 %v15797_v43, %v18655_v58  ;;  %v15799_v45 = vpop.eup %15798  ;;  %v15591_v43 = vld [vmem:[%s17621_s28 + $0x950] ss:$8 sps:$4 sm:$0xff]  }
0x1193   : > { %v6680_v60 = vsel %vm6679_vm11, %v6655_v17, %v6678_v1  ;;  %15800 = vrcp.f32 %v6685_v30  ;;  %v6697_v57 = vmul.f32 %v15799_v45, %v18668_v42  ;;  %v15567_v17 = vld [vmem:[%s17621_s28 + $0x910] ss:$8 sps:$4 sm:$0xff]   ;;  %v15587_v30 = vld [vmem:[%s17621_s28 + $0x944] ss:$8 sps:$4 sm:$0xff]   ;;  %v15582_v1 = vld [vmem:[%s17621_s28 + $0x740] ss:$8 sps:$4 sm:$0xff]  }
0x1194   : > { %v6683_v39 = vsel %vm6681_vm12, %v6682_v6, %v6680_v60  ;;  %v6712_v31 = vmul.f32 %v6708_v13, %v6693_v20  ;;  %v6711_v5 = vmul.f32 %v6704_v27, %v6692_v24  ;;  %v15585_v6 = vld [vmem:[%s17621_s28 + $0x940] ss:$8 sps:$4 sm:$0xff]   ;;  %v15590_v60 = vld [vmem:[%s17621_s28 + $0x754] ss:$8 sps:$4 sm:$0xff]  }
0x1195   : > { %v6687_v29 = vadd.f32 1e-06, %v6683_v39  ;;  %v6716_v4 = vmul.f32 %v6708_v13, %v6697_v57  ;;  %v15593_v39 = vld [vmem:[%s17621_s28 + $0x954] ss:$8 sps:$4 sm:$0xff]   ;;  %v15594_v20 = vld [vmem:[%s17621_s28 + $0x760] ss:$8 sps:$4 sm:$0xff]  }
0x1196   : > { %v18795_v10 = vadd.f32 %v6727_v21, %v6712_v31  ;;  %v18797_v36 = vadd.f32 %v6723_v48, %v6711_v5  ;;  %v15605_v24 = vld [vmem:[%s17621_s28 + $0x974] ss:$8 sps:$4 sm:$0xff]   ;;  %v15611_v31 = vld [vmem:[%s17621_s28 + $0x984] ss:$8 sps:$4 sm:$0xff]   ;;  %v15609_v5 = vld [vmem:[%s17621_s28 + $0x980] ss:$8 sps:$4 sm:$0xff]  }
0x1197   : > { %15802 = vrcp.f32 %v6687_v29  ;;  %v15588_v29 = vld [vmem:[%s17621_s28 + $0x750] ss:$8 sps:$4 sm:$0xff]   ;;  %v15614_v57 = vld [vmem:[%s17621_s28 + $0x794] ss:$8 sps:$4 sm:$0xff]  }
0x1198   : > { %19908 = vst [vmem:[#allocation55_spill] sm:$0xff] %v18795_v10  ;;  %19909 = vst [vmem:[#allocation54_spill] sm:$0xff] %v18797_v36 }
0x119d   : > { %v15801_v3 = vpop.eup %15800 }
0x119e   : > { %v6695_v12 = vmul.f32 %v15801_v3, %v18708_v37  ;;  %v6694_v62 = vmul.f32 %v15801_v3, %v18705_v7  ;;  %v6696_v7 = vmul.f32 %v15799_v45, %v18665_v19  ;;  %v18820_v19 = vadd.f32 %v6727_v21, %v6716_v4  ;;  %v15600_v45 = vld [vmem:[%s17621_s28 + $0x770] ss:$8 sps:$4 sm:$0xff]   ;;  %v15608_v3 = vld [vmem:[%s17621_s28 + $0x784] ss:$8 sps:$4 sm:$0xff]   ;;  %v15618_v4 = vld [vmem:[%s17621_s28 + $0x7a0] ss:$8 sps:$4 sm:$0xff]  }
0x11a0   : > { %v6714_v54 = vmul.f32 %v6708_v13, %v6695_v12  ;;  %v6713_v33 = vmul.f32 %v6704_v27, %v6694_v62  ;;  %19912 = vst [vmem:[#allocation59_spill] sm:$0xff] %v18820_v19  ;;  %v6715_v61 = vmul.f32 %v6704_v27, %v6696_v7  ;;  %v15617_v12 = vld [vmem:[%s17621_s28 + $0x994] ss:$8 sps:$4 sm:$0xff]   ;;  %v15612_v62 = vld [vmem:[%s17621_s28 + $0x790] ss:$8 sps:$4 sm:$0xff]  }
0x11a1   : > { %v15803_v58 = vpop.eup %15802  ;;  %v15629_v7 = vld [vmem:[%s17621_s28 + $0x9b4] ss:$8 sps:$4 sm:$0xff]  }
0x11a2   : > { %v18799_v63 = vadd.f32 %v6727_v21, %v6714_v54  ;;  %v18801_v56 = vadd.f32 %v6723_v48, %v6713_v33  ;;  %v6699_v42 = vmul.f32 %v15803_v58, %v18722_v32  ;;  %v6698_v37 = vmul.f32 %v15803_v58, %v18719_v50  ;;  %v15569_v32 = vld [vmem:[%s17621_s28 + $0x914] ss:$8 sps:$4 sm:$0xff]   ;;  %v15615_v54 = vld [vmem:[%s17621_s28 + $0x990] ss:$8 sps:$4 sm:$0xff]   ;;  %v15620_v33 = vld [vmem:[%s17621_s28 + $0x7a4] ss:$8 sps:$4 sm:$0xff]  }
0x11a3   : > { %v18838_v47 = vadd.f32 %v6723_v48, %v6715_v61  ;;  %v15623_v58 = vld [vmem:[%s17621_s28 + $0x9a4] ss:$8 sps:$4 sm:$0xff]   ;;  %v15638_v61 = vld [vmem:[%s17621_s28 + $0x7d4] ss:$8 sps:$4 sm:$0xff]  }
0x11a4   : > { %19910 = vst [vmem:[#allocation57_spill] sm:$0xff] %v18799_v63  ;;  %19911 = vst [vmem:[#allocation56_spill] sm:$0xff] %v18801_v56  ;;  %v18808_v16 = vpack.c.bf16 %v18799_v63, %v18795_v10  ;;  %v18812_v15 = vpack.c.bf16 %v18801_v56, %v18797_v36  ;;  %v6718_v44 = vmul.f32 %v6708_v13, %v6699_v42  ;;  %v15602_v13 = vld [vmem:[%s17621_s28 + $0x774] ss:$8 sps:$4 sm:$0xff]   ;;  %v15621_v42 = vld [vmem:[%s17621_s28 + $0x9a0] ss:$8 sps:$4 sm:$0xff]  }
0x11a5   : > { %v6717_v41 = vmul.f32 %v6704_v27, %v6698_v37  ;;  %19915 = vst [vmem:[#allocation61_spill] sm:$0xff] %v18838_v47  ;;  %v15597_v27 = vld [vmem:[%s17621_s28 + $0x960] ss:$8 sps:$4 sm:$0xff]   ;;  %v15626_v37 = vld [vmem:[%s17621_s28 + $0x7b4] ss:$8 sps:$4 sm:$0xff]  }
0x11a6   : > { %7987 = vmatprep.mubr.bf16.mxu0 %v18808_v16  ;;  %8237 = vmatprep.mubr.bf16.mxu1 %v18808_v16  ;;  %v18822_v50 = vadd.f32 %v6727_v21, %v6718_v44  ;;  %v15606_v21 = vld [vmem:[%s17621_s28 + $0x780] ss:$8 sps:$4 sm:$0xff]   ;;  %v15624_v44 = vld [vmem:[%s17621_s28 + $0x7b0] ss:$8 sps:$4 sm:$0xff]  }
0x11a7   : > { %7988 = vmatmul.mubr.bf16.vlgmr.msra.gmra.mrb[104].mxu0 %v18812_v15  ;;  %8238 = vmatmul.mubr.bf16.vlgmr.msra.gmra.mrb[132].mxu1 %v18812_v15  ;;  %v18832_v40 = vadd.f32 %v6723_v48, %v6717_v41  ;;  %v15603_v48 = vld [vmem:[%s17621_s28 + $0x970] ss:$8 sps:$4 sm:$0xff]   ;;  %v15635_v41 = vld [vmem:[%s17621_s28 + $0x9c4] ss:$8 sps:$4 sm:$0xff]  }
0x11a8   : > { %19913 = vst [vmem:[#allocation58_spill] sm:$0xff] %v18822_v50  ;;  %v18828_v25 = vpack.c.bf16 %v18822_v50, %v18820_v19  ;;  %8456 = vmatpush1.bf16.msra.mxu0 %v15558_v28  ;;  %8705 = vmatpush1.bf16.msra.mxu1 %v15561_v18  ;;  %v15627_v28 = vld [vmem:[%s17621_s28 + $0x9b0] ss:$8 sps:$4 sm:$0xff]   ;;  %v15632_v18 = vld [vmem:[%s17621_s28 + $0x7c4] ss:$8 sps:$4 sm:$0xff]  }
0x11a9   : > { %19914 = vst [vmem:[#allocation60_spill] sm:$0xff] %v18832_v40  ;;  %8457 = vmatprep.subr.bf16.mxu0 %v15566_v59  ;;  %8706 = vmatprep.subr.bf16.mxu1 %v15569_v32  ;;  %v18844_v9 = vpack.c.bf16 %v18832_v40, %v18838_v47  ;;  %v15630_v59 = vld [vmem:[%s17621_s28 + $0x7c0] ss:$8 sps:$4 sm:$0xff]  }
0x11aa   : > { %7997 = vmatprep.mubr.bf16.mxu0 %v18828_v25  ;;  %8247 = vmatprep.mubr.bf16.mxu1 %v18828_v25  ;;  %v15633_v32 = vld [vmem:[%s17621_s28 + $0x9c0] ss:$8 sps:$4 sm:$0xff]  }
0x11ac   : > { %8458 = vmatpush1.bf16.msra.mxu0 %v15564_v23  ;;  %8707 = vmatpush1.bf16.msra.mxu1 %v15567_v17  ;;  %v15641_v23 = vld [vmem:[%s17621_s28 + $0x9d4] ss:$8 sps:$4 sm:$0xff]   ;;  %v15636_v17 = vld [vmem:[%s17621_s28 + $0x7d0] ss:$8 sps:$4 sm:$0xff]  }
0x11ad   : > { %8459 = vmatprep.subr.bf16.mxu0 %v15572_v38  ;;  %8708 = vmatprep.subr.bf16.mxu1 %v15575_v22  ;;  %v15639_v38 = vld [vmem:[%s17621_s28 + $0x9d0] ss:$8 sps:$4 sm:$0xff]   ;;  %v15644_v22 = vld [vmem:[%s17621_s28 + $0x7e4] ss:$8 sps:$4 sm:$0xff]  }
0x11af   : > { %7998 = vmatmul.mubr.bf16.gmra.mrb[108].mxu0 %v18844_v9  ;;  %8248 = vmatmul.mubr.bf16.gmra.mrb[136].mxu1 %v18844_v9 }
0x11b0   : > { %8460 = vmatpush1.bf16.msra.mxu0 %v15570_v8  ;;  %8709 = vmatpush1.bf16.msra.mxu1 %v15573_v46  ;;  %v15647_v8 = vld [vmem:[%s17621_s28 + $0x9e4] ss:$8 sps:$4 sm:$0xff]   ;;  %v15642_v46 = vld [vmem:[%s17621_s28 + $0x7e0] ss:$8 sps:$4 sm:$0xff]  }
0x11b1   : > { %8461 = vmatprep.subr.bf16.mxu0 %v15578_v52  ;;  %8710 = vmatprep.subr.bf16.mxu1 %v15581_v53  ;;  %v15645_v52 = vld [vmem:[%s17621_s28 + $0x9e0] ss:$8 sps:$4 sm:$0xff]   ;;  %v15650_v53 = vld [vmem:[%s17621_s28 + $0x7f4] ss:$8 sps:$4 sm:$0xff]  }
0x11b4   : > { %8462 = vmatpush1.bf16.msra.mxu0 %v15576_v55  ;;  %8711 = vmatpush1.bf16.msra.mxu1 %v15579_v26  ;;  %v15653_v55 = vld [vmem:[%s17621_s28 + $0x9f4] ss:$8 sps:$4 sm:$0xff]   ;;  %v15648_v26 = vld [vmem:[%s17621_s28 + $0x7f0] ss:$8 sps:$4 sm:$0xff]  }
0x11b5   : > { %8463 = vmatprep.subr.bf16.mxu0 %v15584_v49  ;;  %8712 = vmatprep.subr.bf16.mxu1 %v15587_v30  ;;  %v15651_v49 = vld [vmem:[%s17621_s28 + $0x9f0] ss:$8 sps:$4 sm:$0xff]  }
0x11b8   : > { %8464 = vmatpush1.bf16.msra.mxu0 %v15582_v1  ;;  %8713 = vmatpush1.bf16.msra.mxu1 %v15585_v6 }
0x11b9   : > { %8465 = vmatprep.subr.bf16.mxu0 %v15590_v60  ;;  %8714 = vmatprep.subr.bf16.mxu1 %v15593_v39 }
0x11bc   : > { %8466 = vmatpush1.bf16.msra.mxu0 %v15588_v29  ;;  %8715 = vmatpush1.bf16.msra.mxu1 %v15591_v43 }
0x11bd   : > { %8467 = vmatprep.subr.bf16.mxu0 %v15596_v0  ;;  %8716 = vmatprep.subr.bf16.mxu1 %v15599_v11  ;;  %v13313_v11 = vld [vmem:[%s17635_s19 + $0x20] ss:$8 sm:$0x3] }
0x11c0   : > { %8468 = vmatpush1.bf16.msra.mxu0 %v15594_v20  ;;  %8717 = vmatpush1.bf16.msra.mxu1 %v15597_v27  ;;  %v13314_v20 = vld [vmem:[%s17635_s19 + $0x21] ss:$8 sm:$0x3]  ;;  %v7725_v27 = vrot.slane %v13313_v11, %v19906_v2 }
0x11c1   : > { %8469 = vmatprep.subr.bf16.mxu0 %v15602_v13  ;;  %8718 = vmatprep.subr.bf16.mxu1 %v15605_v24  ;;  %v7729_v13 = vrot.slane %v13313_v11, %v17830_v34 }
0x11c4   : > { %8470 = vmatpush1.bf16.msra.mxu0 %v15600_v45  ;;  %8719 = vmatpush1.bf16.msra.mxu1 %v15603_v48 }
0x11c5   : > { %8471 = vmatprep.subr.bf16.mxu0 %v15608_v3  ;;  %8720 = vmatprep.subr.bf16.mxu1 %v15611_v31  ;;  %v7738_v3 = vrot.slane %v13314_v20, %v19906_v2  ;;  %v7742_v31 = vrot.slane %v13314_v20, %v17830_v34  ;;  %v13540_v20 = vld [vmem:[%s17635_s19 + $0x7] ss:$8 sm:$0x3] }
0x11c8   : > { %8472 = vmatpush1.bf16.msra.mxu0 %v15606_v21  ;;  %8721 = vmatpush1.bf16.msra.mxu1 %v15609_v5 }
0x11c9   : > { %8473 = vmatprep.subr.bf16.mxu0 %v15614_v57  ;;  %8722 = vmatprep.subr.bf16.mxu1 %v15617_v12 }
0x11cc   : > { %8474 = vmatpush1.bf16.msra.mxu0 %v15612_v62  ;;  %8723 = vmatpush1.bf16.msra.mxu1 %v15615_v54 }
0x11cd   : > { %8475 = vmatprep.subr.bf16.mxu0 %v15620_v33  ;;  %8724 = vmatprep.subr.bf16.mxu1 %v15623_v58 }
0x11d0   : > { %8476 = vmatpush1.bf16.msra.mxu0 %v15618_v4  ;;  %8725 = vmatpush1.bf16.msra.mxu1 %v15621_v42 }
0x11d1   : > { %8477 = vmatprep.subr.bf16.mxu0 %v15626_v37  ;;  %8726 = vmatprep.subr.bf16.mxu1 %v15629_v7 }
0x11d4   : > { %8478 = vmatpush1.bf16.msra.mxu0 %v15624_v44  ;;  %8727 = vmatpush1.bf16.msra.mxu1 %v15627_v28 }
0x11d5   : > { %8479 = vmatprep.subr.bf16.mxu0 %v15632_v18  ;;  %8728 = vmatprep.subr.bf16.mxu1 %v15635_v41 }
0x11d8   : > { %8480 = vmatpush1.bf16.msra.mxu0 %v15630_v59  ;;  %8729 = vmatpush1.bf16.msra.mxu1 %v15633_v32 }
0x11d9   : > { %8481 = vmatprep.subr.bf16.mxu0 %v15638_v61  ;;  %8730 = vmatprep.subr.bf16.mxu1 %v15641_v23 }
0x11dc   : > { %8482 = vmatpush1.bf16.msra.mxu0 %v15636_v17  ;;  %8731 = vmatpush1.bf16.msra.mxu1 %v15639_v38 }
0x11dd   : > { %8483 = vmatprep.subr.bf16.mxu0 %v15644_v22  ;;  %8732 = vmatprep.subr.bf16.mxu1 %v15647_v8 }
0x11e0   : > { %8484 = vmatpush1.bf16.msra.mxu0 %v15642_v46  ;;  %8733 = vmatpush1.bf16.msra.mxu1 %v15645_v52 }
0x11e1   : > { %8485 = vmatprep.subr.bf16.mxu0 %v15650_v53  ;;  %8734 = vmatprep.subr.bf16.mxu1 %v15653_v55 }
0x11e4   : > { %8486 = vmatpush1.bf16.msra.mxu0 %v15648_v26  ;;  %8735 = vmatpush1.bf16.msra.mxu1 %v15651_v49 }
0x1211   : > { %v7708_v30 = vpop.xlane.xlu0 %7707 }
0x1212   : > { %v7709_v1 = vmul.f32 0.003921569, %v7708_v30 }
0x1214   : > { %15804 = vrsqrt.f32 %v7709_v1  ;;  %vm7712_vm13 = vcmp.eq.f32.partialorder %v7709_v1, inf  ;;  %v7715_v39 = vand.u32 2147483648, %v7709_v1  ;;  %vm7714_vm14 = vcmp.eq.f32.partialorder %v7709_v1, 0.0 }
0x121e   : > { %v15805_v6 = vpop.eup %15804 }
0x121f   : > { %v7711_v60 = vmul.f32 %v15805_v6, %v7709_v1 }
0x1221   : > { %v7713_v29 = vsel %vm7712_vm13, %v7709_v1, %v7711_v60 }
0x1222   : > { %v7716_v43 = vsel %vm7714_vm14, %v7715_v39, %v7713_v29 }
0x1223   : > { %v7717_v0 = vadd.f32 1e-06, %v7716_v43 }
0x1225   : > { %15806 = vrcp.f32 %v7717_v0 }
0x122f   : > { %v15807_v24 = vpop.eup %15806 }
0x1230   : > { %v7719_v45 = vmul.f32 %v15807_v24, %v18775_v51  ;;  %v7720_v48 = vmul.f32 %v15807_v24, %v18778_v14  ;;  %v13347_v14 = vld [vmem:[%s17635_s19 + $0x6] ss:$8 sm:$0x3] }
0x1231   : > { %v7788_v54 = vrot.slane %v13347_v14, %v19906_v2  ;;  %v7792_v4 = vrot.slane %v13347_v14, %v17830_v34 }
0x1232   : > { %v7732_v21 = vmul.f32 %v7725_v27, %v7719_v45  ;;  %v7733_v5 = vmul.f32 %v7729_v13, %v7720_v48  ;;  %v8537_v27 = vrot.slane %v13540_v20, %v19906_v2  ;;  %v8541_v13 = vrot.slane %v13540_v20, %v17830_v34 }
0x1234   : > { %v18908_v57 = vadd.f32 %v7738_v3, %v7732_v21  ;;  %v18910_v12 = vadd.f32 %v7742_v31, %v7733_v5 }
0x1236   : > { %19916 = vst [vmem:[#allocation62_spill] sm:$0xff] %v18908_v57  ;;  %19917 = vst [vmem:[#allocation63_spill] sm:$0xff] %v18910_v12  ;;  %v18914_v62 = vpack.c.bf16 %v18910_v12, %v18910_v12  ;;  %v18918_v51 = vpack.c.bf16 %v18908_v57, %v18908_v57 }
0x1238   : > { %8487 = vmatprep.mubr.bf16.mxu0 %v18914_v62  ;;  %8736 = vmatprep.mubr.bf16.mxu1 %v18914_v62 }
0x1239   : > { %8488 = vmatmul.mubr.bf16.vlgmr.msra.gmra.mrb[112].mxu0 %v18918_v51  ;;  %8737 = vmatmul.mubr.bf16.vlgmr.msra.gmra.mrb[140].mxu1 %v18918_v51 }
0x123a   : > { %8881 = vmatprep.mubr.bf16.mxu0 %v19898_v35  ;;  %9369 = vmatprep.mubr.bf16.mxu1 %v19898_v35 }
0x127a   : > { %v7989_v33 = vpop.f32.mrb[104].mxu0  ;;  %v18928_v58 = vpop.f32.mrb[132].mxu1 }
0x127b   : > { %v7991_v42 = vpop.f32.mrb[105].mxu0  ;;  %v8241_v37 = vpop.f32.mrb[133].mxu1  ;;  %v7990_v28 = vadd.f32 %v7989_v33, %v7788_v54 }
0x127c   : > { %v7993_v7 = vpop.f32.mrb[106].mxu0  ;;  %v8243_v44 = vpop.f32.mrb[134].mxu1  ;;  %v7992_v61 = vadd.f32 %v7991_v42, %v7792_v4 }
0x127d   : > { %v7994_v18 = vadd.f32 %v7993_v7, %v7788_v54  ;;  %v8258_v41 = vpack.c.bf16 %v8243_v44, %v18928_v58  ;;  %v7995_v59 = vpop.f32.mrb[107].mxu0  ;;  %v8245_v32 = vpop.f32.mrb[135].mxu1  ;;  %v18937_v44 = vld [vmem:[#allocation12] sm:$0xff]  }
0x127e   : > { %v7996_v23 = vadd.f32 %v7995_v59, %v7792_v4  ;;  %v8259_v17 = vpack.c.bf16 %v8245_v32, %v8241_v37  ;;  %v18982_v59 = vld [vmem:[#allocation12 + $0x28] sm:$0xff]   ;;  %v18990_v32 = vld [vmem:[#allocation12 + $0x30] sm:$0xff]  }
0x127f   : > { %v8008_v38 = vpack.c.bf16 %v7994_v18, %v7990_v28  ;;  %v18947_v18 = vld [vmem:[#allocation12 + $0x8] sm:$0xff]  }
0x1280   : > { %v8009_v22 = vpack.c.bf16 %v7996_v23, %v7992_v61  ;;  %v18998_v61 = vld [vmem:[#allocation12 + $0x38] sm:$0xff]   ;;  %v15662_v23 = vld [vmem:[#allocation11] sm:$0xff]  }
0x1282   : > { %v7999_v8 = vpop.f32.mrb[108].mxu0  ;;  %v8249_v46 = vpop.f32.mrb[136].mxu1 }
0x1283   : > { %v8001_v52 = vpop.f32.mrb[109].mxu0  ;;  %v8251_v53 = vpop.f32.mrb[137].mxu1  ;;  %v8000_v49 = vadd.f32 %v7999_v8, %v7788_v54  ;;  %v15669_v8 = vld [vmem:[#allocation11 + $0x38] sm:$0xff]  }
0x1284   : > { %v8003_v55 = vpop.f32.mrb[110].mxu0  ;;  %v8253_v26 = vpop.f32.mrb[138].mxu1  ;;  %v8002_v39 = vadd.f32 %v8001_v52, %v7792_v4 }
0x1285   : > { %v8004_v30 = vadd.f32 %v8003_v55, %v7788_v54  ;;  %v8260_v1 = vpack.c.bf16 %v8253_v26, %v8249_v46  ;;  %v8005_v6 = vpop.f32.mrb[111].mxu0  ;;  %v8255_v60 = vpop.f32.mrb[139].mxu1 }
0x1286   : > { %v8006_v29 = vadd.f32 %v8005_v6, %v7792_v4  ;;  %v8261_v43 = vpack.c.bf16 %v8255_v60, %v8251_v53 }
0x1287   : > { %v8010_v0 = vpack.c.bf16 %v8004_v30, %v8000_v49 }
0x1288   : > { %v8011_v11 = vpack.c.bf16 %v8006_v29, %v8002_v39 }
0x130c   : > { %v8489_v24 = vpop.f32.mrb[112].mxu0  ;;  %v8738_v45 = vpop.f32.mrb[140].mxu1 }
0x130d   : > { %v8496_v48 = vpack.c.bf16 %v8489_v24, %v8489_v24  ;;  %v8739_v3 = vadd.f32 %v8738_v45, %v8537_v27  ;;  %v8491_v31 = vpop.f32.mrb[113].mxu0  ;;  %v8740_v21 = vpop.f32.mrb[141].mxu1 }
0x130e   : > { %v8497_v5 = vpack.c.bf16 %v8491_v31, %v8491_v31  ;;  %v8741_v14 = vadd.f32 %v8740_v21, %v8541_v13  ;;  %v8493_v54 = vpop.f32.mrb[114].mxu0  ;;  %v8742_v33 = vpop.f32.mrb[142].mxu1 }
0x130f   : > { %v8844_v58 = vsel %vm7298_vm1, %v8496_v48, 0  ;;  %v8745_v4 = vpack.c.bf16 %v8739_v3, %v8739_v3  ;;  %v8494_v42 = vpop.f32.mrb[115].mxu0  ;;  %v8743_v37 = vpop.f32.mrb[143].mxu1 }
0x1310   : > { %v8746_v7 = vpack.c.bf16 %v8741_v14, %v8741_v14  ;;  %13581 = vmatprep.subr.msk.bf16.mxu0 %vm7298_vm1, %v8497_v5 }
0x1311   : > { %v9332_v28 = vsel %vm7298_vm1, %v8745_v4, 0  ;;  %8850 = vmatpush1.bf16.msra.mxu0 %v8844_v58 }
0x1312   : > { %9026 = vmatprep.subr.bf16.mxu0 %v8009_v22  ;;  %13638 = vmatprep.subr.msk.bf16.mxu1 %vm7298_vm1, %v8746_v7  ;;  %v15668_v22 = vld [vmem:[#allocation11 + $0x30] sm:$0xff]  }
0x1313   : > { %9338 = vmatpush1.bf16.msra.mxu1 %v9332_v28 }
0x1314   : > { %13582 = vmatmul.mubr.msk.bf16.vlgmr.msra.gmra.mrb[116].mxu0 %vm7285_vm2, %v18937_v44  ;;  %9450 = vmatprep.subr.bf16.mxu1 %v8259_v17  ;;  %v9756_v17 = vsel %vm7298_vm1, %v18918_v51, 0  ;;  %v15664_v51 = vld [vmem:[#allocation11 + $0x10] sm:$0xff]  }
0x1315   : > { %9027 = vmatpush1.bf16.msra.mxu0 %v8008_v38  ;;  %8891 = vmatprep.mubr.bf16.mxu0 %v19898_v35  ;;  %v15663_v38 = vld [vmem:[#allocation11 + $0x8] sm:$0xff]  }
0x1316   : > { %9028 = vmatprep.subr.bf16.mxu0 %v8011_v11  ;;  %13639 = vmatmul.mubr.msk.bf16.vlgmr.msra.gmra.mrb[144].mxu1 %vm7285_vm2, %v18937_v44 }
0x1317   : > { %9451 = vmatpush1.bf16.msra.mxu1 %v8258_v41  ;;  %9379 = vmatprep.mubr.bf16.mxu1 %v19898_v35  ;;  %v18958_v41 = vld [vmem:[#allocation12 + $0x10] sm:$0xff]  }
0x1318   : > { %9452 = vmatprep.subr.bf16.mxu1 %v8261_v43 }
0x1319   : > { %9029 = vmatpush1.bf16.msra.mxu0 %v8010_v0 }
0x131a   : > { %13687 = vmatprep.subr.msk.bf16.mxu0 %vm7298_vm1, %v18914_v62  ;;  %v18974_v62 = vld [vmem:[#allocation12 + $0x20] sm:$0xff]  }
0x131b   : > { %9453 = vmatpush1.bf16.msra.mxu1 %v8260_v1 }
0x131c   : > { %13583 = vmatmul.mubr.msk.bf16.gmra.mrb[120].mxu0 %vm7285_vm2, %v18947_v18  ;;  %9874 = vmatprep.subr.bf16.mxu1 %v18808_v16  ;;  %v18966_v16 = vld [vmem:[#allocation12 + $0x18] sm:$0xff]  }
0x131d   : > { %8901 = vmatprep.mubr.bf16.mxu0 %v19898_v35 }
0x131e   : > { %13640 = vmatmul.mubr.msk.bf16.gmra.mrb[148].mxu1 %vm7285_vm2, %v18947_v18 }
0x131f   : > { %9389 = vmatprep.mubr.bf16.mxu1 %v19898_v35 }
0x1324   : > { %13584 = vmatmul.mubr.msk.bf16.gmra.mrb[124].mxu0 %vm7285_vm2, %v18958_v41 }
0x1325   : > { %8911 = vmatprep.mubr.bf16.mxu0 %v19898_v35 }
0x1326   : > { %13641 = vmatmul.mubr.msk.bf16.gmra.mrb[152].mxu1 %vm7285_vm2, %v18958_v41 }
0x1327   : > { %9399 = vmatprep.mubr.bf16.mxu1 %v19898_v35 }
0x132c   : > { %13585 = vmatmul.mubr.msk.bf16.gmra.mrb[128].mxu0 %vm7285_vm2, %v18966_v16 }
0x132d   : > { %8921 = vmatprep.mubr.bf16.mxu0 %v19898_v35 }
0x132e   : > { %13642 = vmatmul.mubr.msk.bf16.gmra.mrb[156].mxu1 %vm7285_vm2, %v18966_v16 }
0x132f   : > { %9409 = vmatprep.mubr.bf16.mxu1 %v19898_v35 }
0x1334   : > { %13586 = vmatmul.mubr.msk.bf16.gmra.mrb[132].mxu0 %vm7285_vm2, %v18974_v62 }
0x1335   : > { %8931 = vmatprep.mubr.bf16.mxu0 %v19898_v35 }
0x1336   : > { %13643 = vmatmul.mubr.msk.bf16.gmra.mrb[160].mxu1 %vm7285_vm2, %v18974_v62 }
0x1337   : > { %9419 = vmatprep.mubr.bf16.mxu1 %v19898_v35 }
0x133c   : > { %13587 = vmatmul.mubr.msk.bf16.gmra.mrb[136].mxu0 %vm7285_vm2, %v18982_v59 }
0x133d   : > { %8941 = vmatprep.mubr.bf16.mxu0 %v19898_v35 }
0x133e   : > { %13644 = vmatmul.mubr.msk.bf16.gmra.mrb[164].mxu1 %vm7285_vm2, %v18982_v59 }
0x133f   : > { %9429 = vmatprep.mubr.bf16.mxu1 %v19898_v35 }
0x1344   : > { %13588 = vmatmul.mubr.msk.bf16.gmra.mrb[140].mxu0 %vm7285_vm2, %v18990_v32 }
0x1345   : > { %8951 = vmatprep.mubr.bf16.mxu0 %v19898_v35 }
0x1346   : > { %13645 = vmatmul.mubr.msk.bf16.gmra.mrb[168].mxu1 %vm7285_vm2, %v18990_v32 }
0x1347   : > { %9439 = vmatprep.mubr.bf16.mxu1 %v19898_v35 }
0x134c   : > { %13589 = vmatmul.mubr.msk.bf16.gmra.mrb[144].mxu0 %vm7285_vm2, %v18998_v61 }
0x134d   : > { %9058 = vmatprep.mubr.bf16.mxu0 %v19898_v35 }
0x134e   : > { %13646 = vmatmul.mubr.msk.bf16.gmra.mrb[172].mxu1 %vm7285_vm2, %v18998_v61 }
0x134f   : > { %9482 = vmatprep.mubr.bf16.mxu1 %v19898_v35 }
0x1354   : > { %13598 = vmatmul.mubr.msk.bf16.vlgmr.msra.gmra.mrb[116].mxu0 %vm5222_vm0, %v15662_v23 }
0x1355   : > { %9762 = vmatpush1.bf16.msra.mxu0 %v9756_v17  ;;  %9068 = vmatprep.mubr.bf16.mxu0 %v19898_v35 }
0x1356   : > { %13647 = vmatmul.mubr.msk.bf16.vlgmr.msra.gmra.mrb[144].mxu1 %vm5222_vm0, %v15662_v23 }
0x1357   : > { %9875 = vmatpush1.bf16.msra.mxu1 %v18812_v15  ;;  %9492 = vmatprep.mubr.bf16.mxu1 %v19898_v35  ;;  %v15665_v15 = vld [vmem:[#allocation11 + $0x18] sm:$0xff]  }
0x1358   : > { %9876 = vmatprep.subr.bf16.mxu1 %v18828_v25  ;;  %v15666_v25 = vld [vmem:[#allocation11 + $0x20] sm:$0xff]  }
0x135b   : > { %9877 = vmatpush1.bf16.msra.mxu1 %v18844_v9  ;;  %v15667_v9 = vld [vmem:[#allocation11 + $0x28] sm:$0xff]  }
0x135c   : > { %13599 = vmatmul.mubr.msk.bf16.gmra.mrb[120].mxu0 %vm5222_vm0, %v15663_v38 }
0x135d   : > { %9078 = vmatprep.mubr.bf16.mxu0 %v19898_v35 }
0x135e   : > { %13648 = vmatmul.mubr.msk.bf16.gmra.mrb[148].mxu1 %vm5222_vm0, %v15663_v38 }
0x135f   : > { %9502 = vmatprep.mubr.bf16.mxu1 %v19898_v35 }
0x1364   : > { %13600 = vmatmul.mubr.msk.bf16.gmra.mrb[124].mxu0 %vm5222_vm0, %v15664_v51 }
0x1365   : > { %9088 = vmatprep.mubr.bf16.mxu0 %v19898_v35 }
0x1366   : > { %13649 = vmatmul.mubr.msk.bf16.gmra.mrb[152].mxu1 %vm5222_vm0, %v15664_v51 }
0x1367   : > { %9512 = vmatprep.mubr.bf16.mxu1 %v19898_v35 }
0x136c   : > { %13601 = vmatmul.mubr.msk.bf16.gmra.mrb[128].mxu0 %vm5222_vm0, %v15665_v15 }
0x136d   : > { %9098 = vmatprep.mubr.bf16.mxu0 %v19898_v35 }
0x136e   : > { %13650 = vmatmul.mubr.msk.bf16.gmra.mrb[156].mxu1 %vm5222_vm0, %v15665_v15 }
0x136f   : > { %9522 = vmatprep.mubr.bf16.mxu1 %v19898_v35 }
0x1374   : > { %13602 = vmatmul.mubr.msk.bf16.gmra.mrb[132].mxu0 %vm5222_vm0, %v15666_v25 }
0x1375   : > { %9108 = vmatprep.mubr.bf16.mxu0 %v19898_v35 }
0x1376   : > { %13651 = vmatmul.mubr.msk.bf16.gmra.mrb[160].mxu1 %vm5222_vm0, %v15666_v25 }
0x1377   : > { %9532 = vmatprep.mubr.bf16.mxu1 %v19898_v35 }
0x137c   : > { %13603 = vmatmul.mubr.msk.bf16.gmra.mrb[136].mxu0 %vm5222_vm0, %v15667_v9 }
0x137d   : > { %9118 = vmatprep.mubr.bf16.mxu0 %v19898_v35 }
0x137e   : > { %13652 = vmatmul.mubr.msk.bf16.gmra.mrb[164].mxu1 %vm5222_vm0, %v15667_v9 }
0x137f   : > { %9542 = vmatprep.mubr.bf16.mxu1 %v19898_v35 }
0x1384   : > { %13604 = vmatmul.mubr.msk.bf16.gmra.mrb[140].mxu0 %vm5222_vm0, %v15668_v22 }
0x1385   : > { %9128 = vmatprep.mubr.bf16.mxu0 %v19898_v35 }
0x1386   : > { %13653 = vmatmul.mubr.msk.bf16.gmra.mrb[168].mxu1 %vm5222_vm0, %v15668_v22 }
0x1387   : > { %9552 = vmatprep.mubr.bf16.mxu1 %v19898_v35 }
0x138c   : > { %13605 = vmatmul.mubr.msk.bf16.gmra.mrb[144].mxu0 %vm5222_vm0, %v15669_v8 }
0x138d   : > { %9793 = vmatprep.mubr.bf16.mxu0 %v19898_v35 }
0x138e   : > { %13654 = vmatmul.mubr.msk.bf16.gmra.mrb[172].mxu1 %vm5222_vm0, %v15669_v8 }
0x138f   : > { %9906 = vmatprep.mubr.bf16.mxu1 %v19898_v35 }
0x1394   : > { %13688 = vmatmul.mubr.msk.bf16.vlgmr.msra.gmra.mrb[148].mxu0 %vm7285_vm2, %v18937_v44 }
0x1395   : > { %9803 = vmatprep.mubr.bf16.mxu0 %v19898_v35 }
0x1396   : > { %13696 = vmatmul.mubr.msk.bf16.vlgmr.msra.gmra.mrb[176].mxu1 %vm5222_vm0, %v15662_v23 }
0x1397   : > { %9916 = vmatprep.mubr.bf16.mxu1 %v19898_v35 }
0x139c   : > { %13689 = vmatmul.mubr.msk.bf16.gmra.mrb[152].mxu0 %vm7285_vm2, %v18947_v18 }
0x139d   : > { %9813 = vmatprep.mubr.bf16.mxu0 %v19898_v35 }
0x139e   : > { %13697 = vmatmul.mubr.msk.bf16.gmra.mrb[180].mxu1 %vm5222_vm0, %v15663_v38 }
0x139f   : > { %9926 = vmatprep.mubr.bf16.mxu1 %v19898_v35 }
0x13a4   : > { %13690 = vmatmul.mubr.msk.bf16.gmra.mrb[156].mxu0 %vm7285_vm2, %v18958_v41 }
0x13a5   : > { %9823 = vmatprep.mubr.bf16.mxu0 %v19898_v35 }
0x13a6   : > { %13698 = vmatmul.mubr.msk.bf16.gmra.mrb[184].mxu1 %vm5222_vm0, %v15664_v51 }
0x13a7   : > { %9936 = vmatprep.mubr.bf16.mxu1 %v19898_v35 }
0x13ac   : > { %13691 = vmatmul.mubr.msk.bf16.gmra.mrb[160].mxu0 %vm7285_vm2, %v18966_v16 }
0x13ad   : > { %9833 = vmatprep.mubr.bf16.mxu0 %v19898_v35 }
0x13ae   : > { %13699 = vmatmul.mubr.msk.bf16.gmra.mrb[188].mxu1 %vm5222_vm0, %v15665_v15 }
0x13af   : > { %9946 = vmatprep.mubr.bf16.mxu1 %v19898_v35 }
0x13b4   : > { %13692 = vmatmul.mubr.msk.bf16.gmra.mrb[164].mxu0 %vm7285_vm2, %v18974_v62 }
0x13b5   : > { %9843 = vmatprep.mubr.bf16.mxu0 %v19898_v35 }
0x13b6   : > { %13700 = vmatmul.mubr.msk.bf16.gmra.mrb[192].mxu1 %vm5222_vm0, %v15666_v25 }
0x13b7   : > { %9956 = vmatprep.mubr.bf16.mxu1 %v19898_v35 }
0x13bc   : > { %13693 = vmatmul.mubr.msk.bf16.gmra.mrb[168].mxu0 %vm7285_vm2, %v18982_v59 }
0x13bd   : > { %9853 = vmatprep.mubr.bf16.mxu0 %v19898_v35 }
0x13be   : > { %13701 = vmatmul.mubr.msk.bf16.gmra.mrb[196].mxu1 %vm5222_vm0, %v15667_v9 }
0x13bf   : > { %9966 = vmatprep.mubr.bf16.mxu1 %v19898_v35 }
0x13c4   : > { %13694 = vmatmul.mubr.msk.bf16.gmra.mrb[172].mxu0 %vm7285_vm2, %v18990_v32 }
0x13c5   : > { %9863 = vmatprep.mubr.bf16.mxu0 %v19898_v35 }
0x13c6   : > { %13702 = vmatmul.mubr.msk.bf16.gmra.mrb[200].mxu1 %vm5222_vm0, %v15668_v22 }
0x13c7   : > { %9976 = vmatprep.mubr.bf16.mxu1 %v19898_v35 }
0x13cc   : > { %13695 = vmatmul.mubr.msk.bf16.gmra.mrb[176].mxu0 %vm7285_vm2, %v18998_v61 }
0x13cd   : > { %10083 = vmatprep.mubr.bf16.mxu0 %v19898_v35 }
0x13ce   : > { %13703 = vmatmul.mubr.msk.bf16.gmra.mrb[204].mxu1 %vm5222_vm0, %v15669_v8 }
0x13cf   : > { %10185 = vmatprep.mubr.bf16.mxu1 %v19898_v35 }
0x1427   : > { %v9060_v46 = vpop.f32.mrb[116].mxu0 }
0x1428   : > { %v13606_v52 = vmul.f32 -1.442695, %v9060_v46  ;;  %v9062_v53 = vpop.f32.mrb[117].mxu0 }
0x1429   : > { %v13607_v55 = vmul.f32 -1.442695, %v9062_v53  ;;  %v9064_v26 = vpop.f32.mrb[118].mxu0  ;;  %v9484_v49 = vpop.f32.mrb[144].mxu1 }
0x142a   : > { %15808 = vpow2.f32 %v13606_v52  ;;  %v13608_v30 = vmul.f32 -1.442695, %v9064_v26  ;;  %v13655_v1 = vmul.f32 -1.442695, %v9484_v49  ;;  %v9066_v6 = vpop.f32.mrb[119].mxu0  ;;  %v9486_v60 = vpop.f32.mrb[145].mxu1 }
0x142b   : > { %15810 = vpow2.f32 %v13607_v55  ;;  %v13609_v39 = vmul.f32 -1.442695, %v9066_v6  ;;  %v13656_v29 = vmul.f32 -1.442695, %v9486_v60  ;;  %v9488_v43 = vpop.f32.mrb[146].mxu1 }
0x142c   : > { %15812 = vpow2.f32 %v13608_v30  ;;  %v13657_v0 = vmul.f32 -1.442695, %v9488_v43  ;;  %v9490_v11 = vpop.f32.mrb[147].mxu1 }
0x142d   : > { %15814 = vpow2.f32 %v13655_v1  ;;  %v13658_v20 = vmul.f32 -1.442695, %v9490_v11 }
0x142e   : > { %15816 = vpow2.f32 %v13609_v39 }
0x142f   : > { %15818 = vpow2.f32 %v13656_v29  ;;  %v9070_v27 = vpop.f32.mrb[120].mxu0 }
0x1430   : > { %15820 = vpow2.f32 %v13657_v0  ;;  %v13610_v13 = vmul.f32 -1.442695, %v9070_v27  ;;  %v9072_v24 = vpop.f32.mrb[121].mxu0 }
0x1431   : > { %15822 = vpow2.f32 %v13658_v20  ;;  %v13611_v45 = vmul.f32 -1.442695, %v9072_v24  ;;  %v9074_v48 = vpop.f32.mrb[122].mxu0  ;;  %v9494_v3 = vpop.f32.mrb[148].mxu1 }
0x1432   : > { %15824 = vpow2.f32 %v13610_v13  ;;  %v13612_v31 = vmul.f32 -1.442695, %v9074_v48  ;;  %v13659_v21 = vmul.f32 -1.442695, %v9494_v3  ;;  %v9076_v5 = vpop.f32.mrb[123].mxu0  ;;  %v9496_v14 = vpop.f32.mrb[149].mxu1 }
0x1433   : > { %15826 = vpow2.f32 %v13611_v45  ;;  %v13613_v54 = vmul.f32 -1.442695, %v9076_v5  ;;  %v9498_v33 = vpop.f32.mrb[150].mxu1  ;;  %v13660_v43 = vmul.f32 -1.442695, %v9496_v14 }
0x1434   : > { %v15809_v58 = vpop.eup %15808  ;;  %15828 = vpow2.f32 %v13612_v31  ;;  %v9500_v4 = vpop.f32.mrb[151].mxu1  ;;  %v13661_v27 = vmul.f32 -1.442695, %v9498_v33 }
0x1435   : > { %v15811_v42 = vpop.eup %15810  ;;  %v9235_v37 = vadd.f32 1.0, %v15809_v58  ;;  %15830 = vpow2.f32 %v13659_v21  ;;  %v13662_v48 = vmul.f32 -1.442695, %v9500_v4 }
0x1436   : > { %v15813_v7 = vpop.eup %15812  ;;  %v9236_v44 = vadd.f32 1.0, %v15811_v42  ;;  %15832 = vpow2.f32 %v13613_v54 }
0x1437   : > { %v15815_v28 = vpop.eup %15814  ;;  %15834 = vrcp.f32 %v9235_v37  ;;  %v9237_v18 = vadd.f32 1.0, %v15813_v7  ;;  %v9080_v41 = vpop.f32.mrb[124].mxu0 }
0x1438   : > { %v15817_v16 = vpop.eup %15816  ;;  %15836 = vrcp.f32 %v9236_v44  ;;  %v9659_v62 = vadd.f32 1.0, %v15815_v28  ;;  %v9082_v59 = vpop.f32.mrb[125].mxu0  ;;  %v13614_v5 = vmul.f32 -1.442695, %v9080_v41 }
0x1439   : > { %v15819_v32 = vpop.eup %15818  ;;  %15838 = vrcp.f32 %v9237_v18  ;;  %v9238_v61 = vadd.f32 1.0, %v15817_v16  ;;  %v9084_v23 = vpop.f32.mrb[126].mxu0  ;;  %v13615_v33 = vmul.f32 -1.442695, %v9082_v59 }
0x143a   : > { %v9504_v17 = vpop.f32.mrb[152].mxu1  ;;  %v15821_v38 = vpop.eup %15820  ;;  %15840 = vrcp.f32 %v9659_v62  ;;  %v9660_v51 = vadd.f32 1.0, %v15819_v32  ;;  %v13616_v4 = vmul.f32 -1.442695, %v9084_v23 }
0x143b   : > { %v9086_v15 = vpop.f32.mrb[127].mxu0  ;;  %v15823_v25 = vpop.eup %15822  ;;  %15842 = vrcp.f32 %v9238_v61  ;;  %v9661_v9 = vadd.f32 1.0, %v15821_v38  ;;  %v13663_v7 = vmul.f32 -1.442695, %v9504_v17 }
0x143c   : > { %v9506_v22 = vpop.f32.mrb[153].mxu1  ;;  %v15825_v8 = vpop.eup %15824  ;;  %15844 = vrcp.f32 %v9660_v51  ;;  %v9662_v46 = vadd.f32 1.0, %v15823_v25  ;;  %v13617_v28 = vmul.f32 -1.442695, %v9086_v15 }
0x143d   : > { %v9508_v52 = vpop.f32.mrb[154].mxu1  ;;  %v15827_v53 = vpop.eup %15826  ;;  %15846 = vrcp.f32 %v9661_v9  ;;  %v9239_v55 = vadd.f32 1.0, %v15825_v8  ;;  %v13664_v16 = vmul.f32 -1.442695, %v9506_v22 }
0x143e   : > { %v9510_v26 = vpop.f32.mrb[155].mxu1  ;;  %v15829_v49 = vpop.eup %15828  ;;  %15848 = vrcp.f32 %v9662_v46  ;;  %v9240_v30 = vadd.f32 1.0, %v15827_v53  ;;  %v13665_v32 = vmul.f32 -1.442695, %v9508_v52 }
0x143f   : > { %v15831_v1 = vpop.eup %15830  ;;  %15850 = vrcp.f32 %v9239_v55  ;;  %v9241_v6 = vadd.f32 1.0, %v15829_v49  ;;  %v9090_v60 = vpop.f32.mrb[128].mxu0  ;;  %v13666_v38 = vmul.f32 -1.442695, %v9510_v26 }
0x1440   : > { %v15833_v39 = vpop.eup %15832  ;;  %15852 = vrcp.f32 %v9240_v30  ;;  %v9663_v29 = vadd.f32 1.0, %v15831_v1  ;;  %v9092_v0 = vpop.f32.mrb[129].mxu0  ;;  %v13618_v9 = vmul.f32 -1.442695, %v9090_v60 }
0x1441   : > { %v19083_v11 = vpop.eup %15834  ;;  %15854 = vrcp.f32 %v9241_v6  ;;  %v9242_v20 = vadd.f32 1.0, %v15833_v39  ;;  %v19085_v13 = vpop.f32.mrb[130].mxu0  ;;  %v13619_v46 = vmul.f32 -1.442695, %v9092_v0 }
0x1442   : > { %v19087_v24 = vpop.f32.mrb[156].mxu1  ;;  %v19089_v45 = vpop.eup %15836  ;;  %15856 = vrcp.f32 %v9663_v29 }
0x1443   : > { %v19091_v3 = vpop.f32.mrb[131].mxu0  ;;  %v19093_v31 = vpop.f32.mrb[157].mxu1  ;;  %15858 = vrcp.f32 %v9242_v20 }
0x1444   : > { %v19095_v21 = vpop.eup %15838  ;;  %v19097_v14 = vpop.f32.mrb[158].mxu1  ;;  %15860 = vpow2.f32 %v13660_v43 }
0x1445   : > { %v19099_v54 = vpop.eup %15840  ;;  %v19101_v58 = vpop.f32.mrb[159].mxu1  ;;  %15862 = vpow2.f32 %v13661_v27 }
0x1446   : > { %v19103_v42 = vpop.eup %15842  ;;  %15864 = vpow2.f32 %v13662_v48 }
0x1447   : > { %v19105_v37 = vpop.eup %15844  ;;  %15866 = vpow2.f32 %v13614_v5  ;;  %v19109_v18 = vpop.f32.mrb[132].mxu0 }
0x1448   : > { %v19107_v44 = vpop.eup %15846  ;;  %15868 = vpow2.f32 %v13615_v33  ;;  %v19113_v62 = vpop.f32.mrb[133].mxu0 }
0x1449   : > { %v19111_v41 = vpop.eup %15848  ;;  %15870 = vpow2.f32 %v13616_v4  ;;  %v19117_v61 = vpop.f32.mrb[134].mxu0 }
0x144a   : > { %v19115_v59 = vpop.eup %15850  ;;  %v19119_v23 = vpop.f32.mrb[160].mxu1  ;;  %15872 = vpow2.f32 %v13663_v7 }
0x144b   : > { %v19121_v17 = vpop.eup %15852  ;;  %v19123_v51 = vpop.f32.mrb[135].mxu0  ;;  %15874 = vpow2.f32 %v13617_v28 }
0x144c   : > { %v19125_v15 = vpop.f32.mrb[161].mxu1  ;;  %v19127_v25 = vpop.eup %15854  ;;  %15876 = vpow2.f32 %v13664_v16  ;;  %v13625_v47 = vmul.f32 -1.442695, %v19123_v51 }
0x144d   : > { %v19129_v22 = vpop.f32.mrb[162].mxu1  ;;  %v19131_v8 = vpop.eup %15856  ;;  %15878 = vpow2.f32 %v13665_v32 }
0x144e   : > { %v19133_v52 = vpop.f32.mrb[163].mxu1  ;;  %v19135_v53 = vpop.eup %15858  ;;  %15880 = vpow2.f32 %v13666_v38 }
0x144f   : > { %v15861_v55 = vpop.eup %15860  ;;  %15882 = vpow2.f32 %v13618_v9  ;;  %v19137_v30 = vpop.f32.mrb[136].mxu0 }
0x1450   : > { %v15863_v26 = vpop.eup %15862  ;;  %v9664_v49 = vadd.f32 1.0, %v15861_v55  ;;  %15884 = vpow2.f32 %v13619_v46  ;;  %v19139_v60 = vpop.f32.mrb[137].mxu0 }
0x1451   : > { %v15865_v1 = vpop.eup %15864  ;;  %v9665_v6 = vadd.f32 1.0, %v15863_v26  ;;  %v19141_v43 = vpop.f32.mrb[138].mxu0 }
0x1452   : > { %v15867_v39 = vpop.eup %15866  ;;  %15886 = vrcp.f32 %v9664_v49  ;;  %v9666_v29 = vadd.f32 1.0, %v15865_v1  ;;  %v19143_v0 = vpop.f32.mrb[164].mxu1 }
0x1453   : > { %v15869_v20 = vpop.eup %15868  ;;  %15888 = vrcp.f32 %v9665_v6  ;;  %v9243_v27 = vadd.f32 1.0, %v15867_v39  ;;  %v19145_v48 = vpop.f32.mrb[139].mxu0 }
0x1454   : > { %v15871_v5 = vpop.eup %15870  ;;  %15890 = vrcp.f32 %v9666_v29  ;;  %v9244_v33 = vadd.f32 1.0, %v15869_v20  ;;  %v19147_v4 = vpop.f32.mrb[165].mxu1 }
0x1455   : > { %v15873_v7 = vpop.eup %15872  ;;  %15892 = vrcp.f32 %v9243_v27  ;;  %v9245_v28 = vadd.f32 1.0, %v15871_v5  ;;  %v19149_v16 = vpop.f32.mrb[166].mxu1 }
0x1456   : > { %v15875_v32 = vpop.eup %15874  ;;  %15894 = vrcp.f32 %v9244_v33  ;;  %v9667_v38 = vadd.f32 1.0, %v15873_v7  ;;  %v19151_v9 = vpop.f32.mrb[167].mxu1 }
0x1457   : > { %v15877_v46 = vpop.eup %15876  ;;  %15896 = vrcp.f32 %v9245_v28  ;;  %v9246_v55 = vadd.f32 1.0, %v15875_v32  ;;  %v19153_v1 = vpop.f32.mrb[140].mxu0  ;;  %v13620_v32 = vmul.f32 -1.442695, %v19085_v13  ;;  %v13668_v13 = vmul.f32 -1.442695, %v19093_v31 }
0x1458   : > { %v15879_v26 = vpop.eup %15878  ;;  %15898 = vrcp.f32 %v9667_v38  ;;  %v9668_v49 = vadd.f32 1.0, %v15877_v46  ;;  %v19155_v29 = vpop.f32.mrb[141].mxu0 }
0x1459   : > { %v15881_v6 = vpop.eup %15880  ;;  %15900 = vrcp.f32 %v9246_v55  ;;  %v9669_v39 = vadd.f32 1.0, %v15879_v26  ;;  %v19157_v5 = vpop.f32.mrb[142].mxu0  ;;  %v13667_v26 = vmul.f32 -1.442695, %v19087_v24  ;;  %v13669_v24 = vmul.f32 -1.442695, %v19097_v14 }
0x145a   : > { %v15883_v20 = vpop.eup %15882  ;;  %15902 = vrcp.f32 %v9668_v49  ;;  %v9670_v27 = vadd.f32 1.0, %v15881_v6  ;;  %v19159_v33 = vpop.f32.mrb[168].mxu1  ;;  %v13621_v6 = vmul.f32 -1.442695, %v19091_v3 }
0x145b   : > { %v15885_v7 = vpop.eup %15884  ;;  %15904 = vrcp.f32 %v9669_v39  ;;  %v9247_v28 = vadd.f32 1.0, %v15883_v20  ;;  %v19162_v38 = vpop.f32.mrb[143].mxu0 }
0x145c   : > { %v19164_v46 = vpop.eup %15886  ;;  %15906 = vrcp.f32 %v9670_v27  ;;  %v9248_v55 = vadd.f32 1.0, %v15885_v7  ;;  %v19167_v34 = vpop.f32.mrb[169].mxu1 }
0x145d   : > { %v19169_v49 = vpop.eup %15888  ;;  %15908 = vrcp.f32 %v9247_v28  ;;  %v19172_v2 = vpop.f32.mrb[170].mxu1  ;;  %v13670_v28 = vmul.f32 -1.442695, %v19101_v58  ;;  %v13624_v58 = vmul.f32 -1.442695, %v19117_v61 }
0x145e   : > { %v19174_v39 = vpop.eup %15890  ;;  %15910 = vrcp.f32 %v9248_v55  ;;  %v19177_v20 = vpop.f32.mrb[171].mxu1  ;;  %v13622_v55 = vmul.f32 -1.442695, %v19109_v18  ;;  %v13672_v61 = vmul.f32 -1.442695, %v19125_v15 }
0x145f   : > { %v19179_v27 = vpop.eup %15892  ;;  %15912 = vpow2.f32 %v13620_v32  ;;  %v19185_v3 = vpop.f32.mrb[144].mxu0  ;;  %v13623_v32 = vmul.f32 -1.442695, %v19113_v62 }
0x1460   : > { %v19182_v7 = vpop.eup %15894  ;;  %15914 = vpow2.f32 %v13667_v26  ;;  %v19190_v31 = vpop.f32.mrb[145].mxu0 }
0x1461   : > { %v19187_v50 = vpop.eup %15896  ;;  %15916 = vpow2.f32 %v13621_v6  ;;  %v19195_v14 = vpop.f32.mrb[146].mxu0 }
0x1462   : > { %v19192_v12 = vpop.eup %15898  ;;  %15918 = vpow2.f32 %v13668_v13  ;;  %19918 = vst [vmem:[#allocation64_spill] sm:$0xff] %v19195_v14  ;;  %v19197_v57 = vpop.f32.mrb[172].mxu1  ;;  %v13671_v13 = vmul.f32 -1.442695, %v19119_v23 }
0x1463   : > { %19919 = vst [vmem:[#allocation65_spill] sm:$0xff] %v19197_v57  ;;  %v19199_v26 = vpop.eup %15900  ;;  %15920 = vpow2.f32 %v13669_v24  ;;  %v19202_v40 = vpop.f32.mrb[147].mxu0 }
0x1464   : > { %19920 = vst [vmem:[#allocation66_spill] sm:$0xff] %v19202_v40  ;;  %v19204_v6 = vpop.f32.mrb[173].mxu1  ;;  %v19206_v18 = vpop.eup %15902  ;;  %15922 = vpow2.f32 %v13670_v28  ;;  %v13673_v28 = vmul.f32 -1.442695, %v19129_v22 }
0x1465   : > { %19921 = vst [vmem:[#allocation67_spill] sm:$0xff] %v19204_v6  ;;  %v19209_v19 = vpop.f32.mrb[174].mxu1  ;;  %v19211_v62 = vpop.eup %15904  ;;  %15924 = vpow2.f32 %v13622_v55 }
0x1466   : > { %19922 = vst [vmem:[#allocation68_spill] sm:$0xff] %v19209_v19  ;;  %v19214_v63 = vpop.f32.mrb[175].mxu1  ;;  %v19216_v24 = vpop.eup %15906  ;;  %15926 = vpow2.f32 %v13623_v32 }
0x1467   : > { %19923 = vst [vmem:[#allocation69_spill] sm:$0xff] %v19214_v63  ;;  %v19219_v56 = vpop.eup %15908  ;;  %15928 = vpow2.f32 %v13624_v58  ;;  %v9795_v10 = vpop.f32.mrb[148].mxu0 }
0x1468   : > { %v19222_v23 = vpop.eup %15910  ;;  %15930 = vpow2.f32 %v13671_v13  ;;  %v9991_v51 = vmul.f32 %v19083_v11, %v9795_v10  ;;  %v9797_v55 = vpop.f32.mrb[149].mxu0 }
0x1469   : > { %v15913_v36 = vpop.eup %15912  ;;  %15932 = vpow2.f32 %v13625_v47  ;;  %v9992_v32 = vmul.f32 %v19089_v45, %v9797_v55  ;;  %v9799_v15 = vpop.f32.mrb[150].mxu0 }
0x146a   : > { %v15915_v35 = vpop.eup %15914  ;;  %v9249_v63 = vadd.f32 1.0, %v15913_v36  ;;  %15934 = vpow2.f32 %v13672_v61  ;;  %v9908_v19 = vpop.f32.mrb[176].mxu1  ;;  %v9993_v22 = vmul.f32 %v19095_v21, %v9799_v15 }
0x146b   : > { %v15917_v6 = vpop.eup %15916  ;;  %v9671_v58 = vadd.f32 1.0, %v15915_v35  ;;  %15936 = vpow2.f32 %v13673_v28  ;;  %v10105_v13 = vmul.f32 %v19099_v54, %v9908_v19  ;;  %v9801_v40 = vpop.f32.mrb[151].mxu0 }
0x146c   : > { %v9910_v57 = vpop.f32.mrb[177].mxu1  ;;  %v15919_v47 = vpop.eup %15918  ;;  %15938 = vrcp.f32 %v9249_v63  ;;  %v9250_v10 = vadd.f32 1.0, %v15917_v6  ;;  %v9994_v11 = vmul.f32 %v19103_v42, %v9801_v40  ;;  %v10023_v14 = vpack.c.bf16 %v9993_v22, %v9991_v51 }
0x146d   : > { %v10106_v36 = vmul.f32 %v19105_v37, %v9910_v57  ;;  %v9912_v61 = vpop.f32.mrb[178].mxu1  ;;  %v15921_v45 = vpop.eup %15920  ;;  %15940 = vrcp.f32 %v9671_v58  ;;  %v9672_v55 = vadd.f32 1.0, %v15919_v47  ;;  %v13674_v22 = vmul.f32 -1.442695, %v19133_v52 }
0x146e   : > { %v10107_v35 = vmul.f32 %v19107_v44, %v9912_v61  ;;  %v9914_v28 = vpop.f32.mrb[179].mxu1  ;;  %v15923_v21 = vpop.eup %15922  ;;  %15942 = vrcp.f32 %v9250_v10  ;;  %v9673_v19 = vadd.f32 1.0, %v15921_v45  ;;  %v10024_v54 = vpack.c.bf16 %v9994_v11, %v9992_v32 }
0x146f   : > { %v10108_v15 = vmul.f32 %v19111_v41, %v9914_v28  ;;  %v15925_v63 = vpop.eup %15924  ;;  %15944 = vrcp.f32 %v9672_v55  ;;  %v9674_v6 = vadd.f32 1.0, %v15923_v21  ;;  %v9805_v58 = vpop.f32.mrb[152].mxu0 }
0x1470   : > { %v10137_v40 = vpack.c.bf16 %v10107_v35, %v10105_v13  ;;  %v15927_v42 = vpop.eup %15926  ;;  %15946 = vrcp.f32 %v9673_v19  ;;  %v9251_v57 = vadd.f32 1.0, %v15925_v63  ;;  %10051 = vmatprep.subr.bf16.mxu0 %v10024_v54  ;;  %v9995_v47 = vmul.f32 %v19115_v59, %v9805_v58  ;;  %v9807_v32 = vpop.f32.mrb[153].mxu0 }
0x1471   : > { %v10138_v37 = vpack.c.bf16 %v10108_v15, %v10106_v36  ;;  %v15929_v51 = vpop.eup %15928  ;;  %15948 = vrcp.f32 %v9674_v6  ;;  %v9252_v44 = vadd.f32 1.0, %v15927_v42  ;;  %10052 = vmatpush1.bf16.msra.mxu0 %v10023_v14  ;;  %v13626_v13 = vmul.f32 -1.442695, %v19137_v30  ;;  %v9809_v61 = vpop.f32.mrb[154].mxu0 }
0x1472   : > { %v15931_v41 = vpop.eup %15930  ;;  %15950 = vrcp.f32 %v9251_v57  ;;  %v9253_v10 = vadd.f32 1.0, %v15929_v51  ;;  %v9996_v11 = vmul.f32 %v19121_v17, %v9807_v32  ;;  %v9918_v36 = vpop.f32.mrb[180].mxu1  ;;  %v9997_v35 = vmul.f32 %v19127_v25, %v9809_v61 }
0x1473   : > { %10153 = vmatprep.subr.bf16.mxu1 %v10138_v37  ;;  %v15933_v45 = vpop.eup %15932  ;;  %15952 = vrcp.f32 %v9252_v44  ;;  %v9675_v55 = vadd.f32 1.0, %v15931_v41  ;;  %v10109_v52 = vmul.f32 %v19131_v8, %v9918_v36  ;;  %v9811_v59 = vpop.f32.mrb[155].mxu0  ;;  %v13628_v51 = vmul.f32 -1.442695, %v19141_v43 }
0x1474   : > { %v9920_v28 = vpop.f32.mrb[181].mxu1  ;;  %10154 = vmatpush1.bf16.msra.mxu1 %v10137_v40  ;;  %v15935_v14 = vpop.eup %15934  ;;  %15954 = vrcp.f32 %v9253_v10  ;;  %v9254_v21 = vadd.f32 1.0, %v15933_v45  ;;  %v9998_v30 = vmul.f32 %v19135_v53, %v9811_v59  ;;  %v10025_v63 = vpack.c.bf16 %v9997_v35, %v9995_v47 }
0x1475   : > { %v10110_v17 = vmul.f32 %v19164_v46, %v9920_v28  ;;  %v9922_v19 = vpop.f32.mrb[182].mxu1  ;;  %v15937_v54 = vpop.eup %15936  ;;  %15956 = vrcp.f32 %v9675_v55  ;;  %v9676_v15 = vadd.f32 1.0, %v15935_v14  ;;  %v13627_v53 = vmul.f32 -1.442695, %v19139_v60 }
0x1476   : > { %v10111_v6 = vmul.f32 %v19169_v49, %v9922_v19  ;;  %v9924_v25 = vpop.f32.mrb[183].mxu1  ;;  %v19241_v42 = vpop.eup %15938  ;;  %15958 = vrcp.f32 %v9254_v21  ;;  %v9677_v8 = vadd.f32 1.0, %v15937_v54  ;;  %v10026_v40 = vpack.c.bf16 %v9998_v30, %v9996_v11 }
0x1477   : > { %v10112_v57 = vmul.f32 %v19174_v39, %v9924_v25  ;;  %v19244_v37 = vpop.eup %15940  ;;  %15960 = vrcp.f32 %v9676_v15  ;;  %v9815_v44 = vpop.f32.mrb[156].mxu0  ;;  %v13675_v32 = vmul.f32 -1.442695, %v19143_v0  ;;  %v13629_v60 = vmul.f32 -1.442695, %v19145_v48 }
0x1478   : > { %v10139_v46 = vpack.c.bf16 %v10111_v6, %v10109_v52  ;;  %v19247_v58 = vpop.eup %15942  ;;  %15962 = vrcp.f32 %v9677_v8  ;;  %10053 = vmatprep.subr.bf16.mxu0 %v10026_v40  ;;  %v9999_v39 = vmul.f32 %v19179_v27, %v9815_v44  ;;  %v9817_v41 = vpop.f32.mrb[157].mxu0  ;;  %v13677_v48 = vmul.f32 -1.442695, %v19149_v16 }
0x1479   : > { %v10140_v49 = vpack.c.bf16 %v10112_v57, %v10110_v17  ;;  %v19250_v47 = vpop.eup %15944  ;;  %15964 = vpow2.f32 %v13674_v22  ;;  %10054 = vmatpush1.bf16.msra.mxu0 %v10025_v63  ;;  %v10000_v11 = vmul.f32 %v19182_v7, %v9817_v41  ;;  %v9819_v43 = vpop.f32.mrb[158].mxu0  ;;  %v13676_v22 = vmul.f32 -1.442695, %v19147_v4 }
0x147a   : > { %v19254_v10 = vpop.eup %15946  ;;  %15966 = vpow2.f32 %v13626_v13  ;;  %v9928_v61 = vpop.f32.mrb[184].mxu1  ;;  %v10001_v0 = vmul.f32 %v19187_v50, %v9819_v43  ;;  %v13678_v50 = vmul.f32 -1.442695, %v19151_v9  ;;  %v13630_v21 = vmul.f32 -1.442695, %v19153_v1 }
0x147b   : > { %10155 = vmatprep.subr.bf16.mxu1 %v10140_v49  ;;  %v19258_v36 = vpop.eup %15948  ;;  %15968 = vpow2.f32 %v13627_v53  ;;  %v10113_v27 = vmul.f32 %v19192_v12, %v9928_v61  ;;  %v9821_v45 = vpop.f32.mrb[159].mxu0  ;;  %v13632_v9 = vmul.f32 -1.442695, %v19157_v5  ;;  %v13679_v1 = vmul.f32 -1.442695, %v19159_v33 }
0x147c   : > { %v9930_v55 = vpop.f32.mrb[185].mxu1  ;;  %10156 = vmatpush1.bf16.msra.mxu1 %v10139_v46  ;;  %v19263_v13 = vpop.eup %15950  ;;  %15970 = vpow2.f32 %v13628_v51  ;;  %v10002_v7 = vmul.f32 %v19199_v26, %v9821_v45  ;;  %v10027_v4 = vpack.c.bf16 %v10001_v0, %v9999_v39 }
0x147d   : > { %v10114_v35 = vmul.f32 %v19206_v18, %v9930_v55  ;;  %v9932_v52 = vpop.f32.mrb[186].mxu1  ;;  %v19268_v59 = vpop.eup %15952  ;;  %15972 = vpow2.f32 %v13675_v32  ;;  %v13631_v18 = vmul.f32 -1.442695, %v19155_v29 }
0x147e   : > { %v10115_v12 = vmul.f32 %v19211_v62, %v9932_v52  ;;  %v9934_v28 = vpop.f32.mrb[187].mxu1  ;;  %v19272_v14 = vpop.eup %15954  ;;  %15974 = vpow2.f32 %v13629_v60  ;;  %v10028_v16 = vpack.c.bf16 %v10002_v7, %v10000_v11 }
0x147f   : > { %v10116_v26 = vmul.f32 %v19216_v24, %v9934_v28  ;;  %v19276_v30 = vpop.eup %15956  ;;  %15976 = vpow2.f32 %v13676_v22  ;;  %v9825_v54 = vpop.f32.mrb[160].mxu0 }
0x1480   : > { %v10141_v17 = vpack.c.bf16 %v10115_v12, %v10113_v27  ;;  %v19279_v19 = vpop.eup %15958  ;;  %15978 = vpow2.f32 %v13677_v48  ;;  %10055 = vmatprep.subr.bf16.mxu0 %v10028_v16  ;;  %v10003_v24 = vmul.f32 %v19219_v56, %v9825_v54  ;;  %v9827_v63 = vpop.f32.mrb[161].mxu0 }
0x1481   : > { %v10142_v62 = vpack.c.bf16 %v10116_v26, %v10114_v35  ;;  %v19282_v15 = vpop.eup %15960  ;;  %15980 = vpow2.f32 %v13678_v50  ;;  %10056 = vmatpush1.bf16.msra.mxu0 %v10027_v4  ;;  %v10004_v29 = vmul.f32 %v19222_v23, %v9827_v63  ;;  %v9829_v25 = vpop.f32.mrb[162].mxu0 }
0x1482   : > { %v19286_v6 = vpop.eup %15962  ;;  %15982 = vpow2.f32 %v13630_v21  ;;  %v9938_v8 = vpop.f32.mrb[188].mxu1  ;;  %v10005_v40 = vmul.f32 %v19241_v42, %v9829_v25 }
0x1483   : > { %10157 = vmatprep.subr.bf16.mxu1 %v10142_v62  ;;  %v15965_v5 = vpop.eup %15964  ;;  %15984 = vpow2.f32 %v13631_v18  ;;  %v10117_v57 = vmul.f32 %v19244_v37, %v9938_v8  ;;  %v9831_v53 = vpop.f32.mrb[163].mxu0 }
0x1484   : > { %v9940_v33 = vpop.f32.mrb[189].mxu1  ;;  %10158 = vmatpush1.bf16.msra.mxu1 %v10141_v17  ;;  %v15967_v56 = vpop.eup %15966  ;;  %v9678_v46 = vadd.f32 1.0, %v15965_v5  ;;  %15986 = vpow2.f32 %v13632_v9  ;;  %v10006_v51 = vmul.f32 %v19247_v58, %v9831_v53  ;;  %v10029_v39 = vpack.c.bf16 %v10005_v40, %v10003_v24 }
0x1485   : > { %v10118_v49 = vmul.f32 %v19250_v47, %v9940_v33  ;;  %v9942_v23 = vpop.f32.mrb[190].mxu1  ;;  %v15969_v44 = vpop.eup %15968  ;;  %v9255_v32 = vadd.f32 1.0, %v15967_v56  ;;  %15988 = vpow2.f32 %v13679_v1  ;;  %v13633_v40 = vmul.f32 -1.442695, %v19162_v38 }
0x1486   : > { %v10119_v41 = vmul.f32 %v19254_v10, %v9942_v23  ;;  %v9944_v42 = vpop.f32.mrb[191].mxu1  ;;  %v15971_v60 = vpop.eup %15970  ;;  %15990 = vrcp.f32 %v9678_v46  ;;  %v9256_v37 = vadd.f32 1.0, %v15969_v44  ;;  %v10030_v11 = vpack.c.bf16 %v10006_v51, %v10004_v29 }
0x1487   : > { %v10120_v43 = vmul.f32 %v19258_v36, %v9944_v42  ;;  %v15973_v61 = vpop.eup %15972  ;;  %15992 = vrcp.f32 %v9255_v32  ;;  %v9257_v22 = vadd.f32 1.0, %v15971_v60  ;;  %v9835_v45 = vpop.f32.mrb[164].mxu0  ;;  %v13680_v53 = vmul.f32 -1.442695, %v19167_v34 }
0x1488   : > { %v10143_v58 = vpack.c.bf16 %v10119_v41, %v10117_v57  ;;  %v15975_v0 = vpop.eup %15974  ;;  %15994 = vrcp.f32 %v9256_v37  ;;  %v9679_v47 = vadd.f32 1.0, %v15973_v61  ;;  %10057 = vmatprep.subr.bf16.mxu0 %v10030_v11  ;;  %v10007_v48 = vmul.f32 %v19263_v13, %v9835_v45  ;;  %v9837_v7 = vpop.f32.mrb[165].mxu0 }
0x1489   : > { %v10144_v27 = vpack.c.bf16 %v10120_v43, %v10118_v49  ;;  %v15977_v55 = vpop.eup %15976  ;;  %15996 = vrcp.f32 %v9257_v22  ;;  %v9258_v10 = vadd.f32 1.0, %v15975_v0  ;;  %10058 = vmatpush1.bf16.msra.mxu0 %v10029_v39  ;;  %v10008_v52 = vmul.f32 %v19268_v59, %v9837_v7  ;;  %v9839_v50 = vpop.f32.mrb[166].mxu0  ;;  %v19926_v7 = vld [vmem:[#allocation66_spill] sm:$0xff] }
0x148a   : > { %v15979_v35 = vpop.eup %15978  ;;  %15998 = vrcp.f32 %v9679_v47  ;;  %v9680_v36 = vadd.f32 1.0, %v15977_v55  ;;  %v9948_v4 = vpop.f32.mrb[192].mxu1  ;;  %v10009_v21 = vmul.f32 %v19272_v14, %v9839_v50  ;;  %v13681_v56 = vmul.f32 -1.442695, %v19172_v2 }
0x148b   : > { %10159 = vmatprep.subr.bf16.mxu1 %v10144_v27  ;;  %v15981_v12 = vpop.eup %15980  ;;  %16000 = vrcp.f32 %v9258_v10  ;;  %v9681_v28 = vadd.f32 1.0, %v15979_v35  ;;  %v19299_v16 = vmul.f32 %v19276_v30, %v9948_v4  ;;  %v9841_v26 = vpop.f32.mrb[167].mxu0  ;;  %v13682_v38 = vmul.f32 -1.442695, %v19177_v20  ;;  %v19924_v20 = vld [vmem:[#allocation64_spill] sm:$0xff] }
0x148c   : > { %v9950_v13 = vpop.f32.mrb[193].mxu1  ;;  %10160 = vmatpush1.bf16.msra.mxu1 %v10143_v58  ;;  %v15983_v18 = vpop.eup %15982  ;;  %16002 = vrcp.f32 %v9680_v36  ;;  %v9682_v17 = vadd.f32 1.0, %v15981_v12  ;;  %v10010_v9 = vmul.f32 %v19279_v19, %v9841_v26  ;;  %v10031_v24 = vpack.c.bf16 %v10009_v21, %v10007_v48 }
0x148d   : > { %v10122_v59 = vmul.f32 %v19282_v15, %v9950_v13  ;;  %v9952_v62 = vpop.f32.mrb[194].mxu1  ;;  %v15985_v54 = vpop.eup %15984  ;;  %16004 = vrcp.f32 %v9681_v28  ;;  %v9259_v1 = vadd.f32 1.0, %v15983_v18  ;;  %v13634_v34 = vmul.f32 -1.442695, %v19185_v3  ;;  %v19925_v3 = vld [vmem:[#allocation65_spill] sm:$0xff] }
0x148e   : > { %v10123_v14 = vmul.f32 %v19286_v6, %v9952_v62  ;;  %v9954_v63 = vpop.f32.mrb[195].mxu1  ;;  %v15987_v30 = vpop.eup %15986  ;;  %16006 = vrcp.f32 %v9682_v17  ;;  %v9260_v29 = vadd.f32 1.0, %v15985_v54  ;;  %v10032_v25 = vpack.c.bf16 %v10010_v9, %v10008_v52  ;;  %v19927_v52 = vld [vmem:[#allocation67_spill] sm:$0xff]  ;;  %v19929_v9 = vld [vmem:[#allocation69_spill] sm:$0xff] }
0x148f   : > { %v15989_v8 = vpop.eup %15988  ;;  %16008 = vrcp.f32 %v9259_v1  ;;  %v9261_v5 = vadd.f32 1.0, %v15987_v30  ;;  %v9845_v33 = vpop.f32.mrb[168].mxu0  ;;  %v13635_v2 = vmul.f32 -1.442695, %v19190_v31  ;;  %v13636_v58 = vmul.f32 -1.442695, %v19924_v20 }
0x1490   : > { %v10145_v19 = vpack.c.bf16 %v10123_v14, %v19299_v16  ;;  %v15991_v15 = vpop.eup %15990  ;;  %16010 = vrcp.f32 %v9260_v29  ;;  %v9683_v57 = vadd.f32 1.0, %v15989_v8  ;;  %10059 = vmatprep.subr.bf16.mxu0 %v10032_v25  ;;  %v9847_v51 = vpop.f32.mrb[169].mxu0  ;;  %v13683_v45 = vmul.f32 -1.442695, %v19925_v3  ;;  %v19928_v16 = vld [vmem:[#allocation68_spill] sm:$0xff] }
0x1491   : > { %v15993_v6 = vpop.eup %15992  ;;  %16012 = vrcp.f32 %v9261_v5  ;;  %v10124_v46 = vmul.f32 %v15991_v15, %v9954_v63  ;;  %10060 = vmatpush1.bf16.msra.mxu0 %v10031_v24  ;;  %v9849_v44 = vpop.f32.mrb[170].mxu0  ;;  %v13637_v31 = vmul.f32 -1.442695, %v19926_v7  ;;  %v13684_v50 = vmul.f32 -1.442695, %v19927_v52 }
0x1492   : > { %v15995_v49 = vpop.eup %15994  ;;  %16014 = vrcp.f32 %v9683_v57  ;;  %v10011_v23 = vmul.f32 %v15993_v6, %v9845_v33  ;;  %v9958_v32 = vpop.f32.mrb[196].mxu1  ;;  %v13685_v26 = vmul.f32 -1.442695, %v19928_v16 }
0x1493   : > { %v15997_v39 = vpop.eup %15996  ;;  %16016 = vpow2.f32 %v13633_v40  ;;  %v10146_v41 = vpack.c.bf16 %v10124_v46, %v10122_v59  ;;  %v10012_v42 = vmul.f32 %v15995_v49, %v9847_v51  ;;  %v9851_v60 = vpop.f32.mrb[171].mxu0  ;;  %v13686_v59 = vmul.f32 -1.442695, %v19929_v9 }
0x1494   : > { %v9960_v37 = vpop.f32.mrb[197].mxu1  ;;  %v15999_v11 = vpop.eup %15998  ;;  %16018 = vpow2.f32 %v13680_v53  ;;  %v10013_v43 = vmul.f32 %v15997_v39, %v9849_v44 }
0x1495   : > { %v9962_v61 = vpop.f32.mrb[198].mxu1  ;;  %v16001_v22 = vpop.eup %16000  ;;  %16020 = vpow2.f32 %v13681_v56  ;;  %v10125_v0 = vmul.f32 %v15999_v11, %v9958_v32  ;;  %10161 = vmatprep.subr.bf16.mxu1 %v10146_v41 }
0x1496   : > { %v9964_v47 = vpop.f32.mrb[199].mxu1  ;;  %v16003_v27 = vpop.eup %16002  ;;  %16022 = vpow2.f32 %v13682_v38  ;;  %v10033_v55 = vpack.c.bf16 %v10013_v43, %v10011_v23  ;;  %v10014_v10 = vmul.f32 %v16001_v22, %v9851_v60  ;;  %10162 = vmatpush1.bf16.msra.mxu1 %v10145_v19 }
0x1497   : > { %v16005_v48 = vpop.eup %16004  ;;  %16024 = vpow2.f32 %v13634_v34  ;;  %v10126_v35 = vmul.f32 %v16003_v27, %v9960_v37  ;;  %v9855_v28 = vpop.f32.mrb[172].mxu0 }
0x1498   : > { %v16007_v36 = vpop.eup %16006  ;;  %16026 = vpow2.f32 %v13635_v2  ;;  %v10034_v4 = vpack.c.bf16 %v10014_v10, %v10012_v42  ;;  %v10127_v12 = vmul.f32 %v16005_v48, %v9962_v61  ;;  %v9857_v18 = vpop.f32.mrb[173].mxu0 }
0x1499   : > { %v16009_v21 = vpop.eup %16008  ;;  %16028 = vpow2.f32 %v13636_v58  ;;  %v10128_v13 = vmul.f32 %v16007_v36, %v9964_v47  ;;  %v9859_v1 = vpop.f32.mrb[174].mxu0 }
0x149a   : > { %v16011_v17 = vpop.eup %16010  ;;  %16030 = vpow2.f32 %v13683_v45  ;;  %v10147_v62 = vpack.c.bf16 %v10127_v12, %v10125_v0  ;;  %v19317_v54 = vmul.f32 %v16009_v21, %v9855_v28  ;;  %10061 = vmatprep.subr.bf16.mxu0 %v10034_v4  ;;  %v9968_v24 = vpop.f32.mrb[200].mxu1 }
0x149b   : > { %v16013_v14 = vpop.eup %16012  ;;  %16032 = vpow2.f32 %v13637_v31  ;;  %v10148_v63 = vpack.c.bf16 %v10128_v13, %v10126_v35  ;;  %v19319_v30 = vmul.f32 %v16011_v17, %v9857_v18  ;;  %10062 = vmatpush1.bf16.msra.mxu0 %v10033_v55  ;;  %v9861_v29 = vpop.f32.mrb[175].mxu0 }
0x149c   : > { %v9970_v25 = vpop.f32.mrb[201].mxu1  ;;  %v16015_v8 = vpop.eup %16014  ;;  %16034 = vpow2.f32 %v13684_v50  ;;  %v19321_v5 = vmul.f32 %v16013_v14, %v9859_v1 }
0x149d   : > { %v9972_v40 = vpop.f32.mrb[202].mxu1  ;;  %v16017_v19 = vpop.eup %16016  ;;  %16036 = vpow2.f32 %v13685_v26  ;;  %v19323_v15 = vmul.f32 %v16015_v8, %v9968_v24  ;;  %10163 = vmatprep.subr.bf16.mxu1 %v10148_v63 }
0x149e   : > { %v9974_v57 = vpop.f32.mrb[203].mxu1  ;;  %v16019_v53 = vpop.eup %16018  ;;  %v9262_v33 = vadd.f32 1.0, %v16017_v19  ;;  %16038 = vpow2.f32 %v13686_v59  ;;  %v10035_v6 = vpack.c.bf16 %v19321_v5, %v19317_v54  ;;  %10164 = vmatpush1.bf16.msra.mxu1 %v10147_v62 }
0x149f   : > { %v16021_v56 = vpop.eup %16020  ;;  %v9684_v46 = vadd.f32 1.0, %v16019_v53  ;;  %v9865_v38 = vpop.f32.mrb[176].mxu0  ;;  %v10104_v53 = vld [vmem:[%s19931_s18] sm:$0xf] }
0x14a0   : > { %v16023_v51 = vpop.eup %16022  ;;  %16040 = vrcp.f32 %v9262_v33  ;;  %v9685_v49 = vadd.f32 1.0, %v16021_v56  ;;  %v9867_v32 = vpop.f32.mrb[177].mxu0  ;;  %v19932_v33 = vmov 0  }
0x14a1   : > { %v16025_v23 = vpop.eup %16024  ;;  %16042 = vrcp.f32 %v9684_v46  ;;  %v9686_v44 = vadd.f32 1.0, %v16023_v51  ;;  %v9869_v41 = vpop.f32.mrb[178].mxu0  ;;  %v19933_v46 = vld [vmem:[#allocation54_spill] sm:$0xff] }
0x14a2   : > { %v16027_v39 = vpop.eup %16026  ;;  %16044 = vrcp.f32 %v9685_v49  ;;  %v9263_v34 = vadd.f32 1.0, %v16025_v23  ;;  %v9978_v42 = vpop.f32.mrb[204].mxu1 }
0x14a3   : > { %v16029_v60 = vpop.eup %16028  ;;  %16046 = vrcp.f32 %v9686_v44  ;;  %v9264_v37 = vadd.f32 1.0, %v16027_v39  ;;  %v9871_v11 = vpop.f32.mrb[179].mxu0 }
0x14a4   : > { %v9980_v2 = vpop.f32.mrb[205].mxu1  ;;  %v16031_v43 = vpop.eup %16030  ;;  %16048 = vrcp.f32 %v9263_v34  ;;  %v9265_v61 = vadd.f32 1.0, %v16029_v60 }
0x14a5   : > { %v9982_v22 = vpop.f32.mrb[206].mxu1  ;;  %v16033_v20 = vpop.eup %16032  ;;  %16050 = vrcp.f32 %v9264_v37  ;;  %v9687_v58 = vadd.f32 1.0, %v16031_v43 }
0x14a6   : > { %v9984_v0 = vpop.f32.mrb[207].mxu1  ;;  %v16035_v47 = vpop.eup %16034  ;;  %16052 = vrcp.f32 %v9265_v61  ;;  %v9266_v27 = vadd.f32 1.0, %v16033_v20  ;;  %v19937_v20 = vld [vmem:[#allocation61_spill] sm:$0xff] }
0x14a7   : > { %v16037_v3 = vpop.eup %16036  ;;  %16054 = vrcp.f32 %v9687_v58  ;;  %v9688_v45 = vadd.f32 1.0, %v16035_v47  ;;  %v19938_v47 = vld [vmem:[#allocation59_spill] sm:$0xff] }
0x14a8   : > { %v16039_v55 = vpop.eup %16038  ;;  %16056 = vrcp.f32 %v9266_v27  ;;  %v9689_v10 = vadd.f32 1.0, %v16037_v3 }
0x14a9   : > { %16058 = vrcp.f32 %v9688_v45  ;;  %v9690_v48 = vadd.f32 1.0, %v16039_v55  ;;  %v19939_v45 = vld [vmem:[#allocation60_spill] sm:$0xff] }
0x14aa   : > { %v16041_v7 = vpop.eup %16040  ;;  %16060 = vrcp.f32 %v9689_v10 }
0x14ab   : > { %v16043_v31 = vpop.eup %16042  ;;  %16062 = vrcp.f32 %v9690_v48  ;;  %v10018_v35 = vmul.f32 %v16041_v7, %v9861_v29  ;;  %v19940_v48 = vld [vmem:[#allocation62_spill] sm:$0xff] }
0x14ac   : > { %v16045_v36 = vpop.eup %16044  ;;  %v10130_v52 = vmul.f32 %v16043_v31, %v9970_v25  ;;  %v19941_v31 = vld [vmem:[#allocation63_spill] sm:$0xff] }
0x14ad   : > { %v16047_v50 = vpop.eup %16046  ;;  %v10036_v4 = vpack.c.bf16 %v10018_v35, %v19319_v30  ;;  %v10131_v12 = vmul.f32 %v16045_v36, %v9972_v40  ;;  %v19942_v36 = vld [vmem:[#allocation58_spill] sm:$0xff] }
0x14ae   : > { %v16049_v28 = vpop.eup %16048  ;;  %v10132_v21 = vmul.f32 %v16047_v50, %v9974_v57 }
0x14af   : > { %v16051_v16 = vpop.eup %16050  ;;  %v10149_v26 = vpack.c.bf16 %v10131_v12, %v19323_v15  ;;  %v10019_v13 = vmul.f32 %v16049_v28, %v9865_v38  ;;  %10063 = vmatprep.subr.bf16.mxu0 %v10036_v4  ;;  %v15670_v15 = vld [vmem:[%s19930_s21] sm:$0xff]  }
0x14b0   : > { %v16053_v18 = vpop.eup %16052  ;;  %v10150_v17 = vpack.c.bf16 %v10132_v21, %v10130_v52  ;;  %v10020_v9 = vmul.f32 %v16051_v16, %v9867_v32  ;;  %10064 = vmatpush1.bf16.msra.mxu0 %v10035_v6  ;;  %v15671_v6 = vld [vmem:[%s19930_s21 + $0x8] sm:$0xff]   ;;  %v19934_v38 = vld [vmem:[#allocation55_spill] sm:$0xff] }
0x14b1   : > { %v16055_v59 = vpop.eup %16054  ;;  %v10021_v62 = vmul.f32 %v16053_v18, %v9869_v41  ;;  %v19935_v32 = vld [vmem:[#allocation56_spill] sm:$0xff] }
0x14b2   : > { %v16057_v54 = vpop.eup %16056  ;;  %v10133_v1 = vmul.f32 %v16055_v59, %v9978_v42  ;;  %10165 = vmatprep.subr.bf16.mxu1 %v10150_v17  ;;  %v19936_v42 = vld [vmem:[#allocation57_spill] sm:$0xff] }
0x14b3   : > { %v16059_v24 = vpop.eup %16058  ;;  %v10037_v14 = vpack.c.bf16 %v10021_v62, %v10019_v13  ;;  %v10022_v63 = vmul.f32 %v16057_v54, %v9871_v11  ;;  %10166 = vmatpush1.bf16.msra.mxu1 %v10149_v26 }
0x14b4   : > { %v16061_v30 = vpop.eup %16060  ;;  %v10134_v29 = vmul.f32 %v16059_v24, %v9980_v2 }
0x14b5   : > { %v16063_v25 = vpop.eup %16062  ;;  %v10038_v8 = vpack.c.bf16 %v10022_v63, %v10020_v9  ;;  %v10135_v5 = vmul.f32 %v16061_v30, %v9982_v22 }
0x14b6   : > { %v10136_v40 = vmul.f32 %v16063_v25, %v9984_v0 }
0x14b7   : > { %v10151_v19 = vpack.c.bf16 %v10135_v5, %v10133_v1  ;;  %10065 = vmatprep.subr.bf16.mxu0 %v10038_v8 }
0x14b8   : > { %v10152_v57 = vpack.c.bf16 %v10136_v40, %v10134_v29  ;;  %10066 = vmatpush1.bf16.msra.mxu0 %v10037_v14 }
0x14ba   : > { %10167 = vmatprep.subr.bf16.mxu1 %v10152_v57 }
0x14bb   : > { %10168 = vmatpush1.bf16.msra.mxu1 %v10151_v19  ;;  %10084 = vmatmul.mubr.bf16.vlgmr.msra.gmra.mrb[180].mxu0 %v15670_v15 }
0x14bc   : > { %10093 = vmatprep.mubr.bf16.mxu0 %v19932_v33 }
0x14be   : > { %10186 = vmatmul.mubr.bf16.vlgmr.msra.gmra.mrb[208].mxu1 %v10104_v53 }
0x14bf   : > { %10726 = vmatprep.mubr.bf16.mxu1 %v19932_v33 }
0x14c3   : > { %10094 = vmatmul.mubr.bf16.gmra.mrb[184].mxu0 %v15671_v6 }
0x158e   : > { %v10085_v56 = vpop.f32.mrb[180].mxu0 }
0x158f   : > { %v10194_v51 = vadd.f32 %v10085_v56, %v19933_v46  ;;  %v10087_v49 = vpop.f32.mrb[181].mxu0 }
0x1590   : > { %v10195_v23 = vadd.f32 %v10087_v49, %v19934_v38  ;;  %v10089_v44 = vpop.f32.mrb[182].mxu0 }
0x1591   : > { %v10196_v39 = vadd.f32 %v10089_v44, %v19935_v32  ;;  %v10187_v34 = vpop.f32.mrb[208].mxu1  ;;  %v10091_v41 = vpop.f32.mrb[183].mxu0 }
0x1592   : > { %v10197_v60 = vadd.f32 %v10091_v41, %v19936_v42  ;;  %v10189_v37 = vpop.f32.mrb[209].mxu1  ;;  %v10206_v11 = vadd.f32 %v10195_v23, %v10194_v51  ;;  %v10336_v7 = vadd.f32 %v10187_v34, %v19940_v48  ;;  %v15672_v34 = vld [vmem:[%s17627_s8 + $0x40] sm:$0xff]   ;;  %v15674_v42 = vld [vmem:[%s17627_s8 + $0x48] sm:$0xff]   ;;  %v15709_v48 = vld [vmem:[%s17629_s15 + $0x14] ss:$8 sps:$4 sm:$0xff]  }
0x1593   : > { %v10191_v2 = vpop.f32.mrb[210].mxu1  ;;  %v10337_v35 = vadd.f32 %v10189_v37, %v19941_v31  ;;  %v15673_v41 = vld [vmem:[%s17627_s8] sm:$0xff]   ;;  %13917 = vmatprep.subr.bf16.mxu0 %v15672_v34  ;;  %v15676_v37 = vld [vmem:[%s17627_s8 + $0x50] sm:$0xff]  }
0x1594   : > { %10207 = vadd.xlane.f32.xlu1 %v10206_v11  ;;  %v10209_v43 = vadd.f32 %v10197_v60, %v10196_v39  ;;  %v10192_v61 = vpop.f32.mrb[211].mxu1  ;;  %13918 = vmatpush3.bf16.msra.mxu0 %v15673_v41  ;;  %v15677_v11 = vld [vmem:[%s17627_s8 + $0x10] sm:$0xff]   ;;  %v15678_v2 = vld [vmem:[%s17627_s8 + $0x58] sm:$0xff]   ;;  %v15712_v31 = vld [vmem:[%s17629_s15 + $0x24] ss:$8 sps:$4 sm:$0xff]  }
0x1595   : > { %v10342_v12 = vadd.f32 %v10337_v35, %v10336_v7  ;;  %13919 = vmatprep.subr.bf16.mxu0 %v15674_v42  ;;  %v15680_v61 = vld [vmem:[%s17627_s8 + $0x60] sm:$0xff]  }
0x1596   : > { %10210 = vadd.xlane.f32.xlu0 %v10209_v43  ;;  %v10095_v22 = vpop.f32.mrb[184].mxu0  ;;  %v15679_v43 = vld [vmem:[%s17627_s8 + $0x18] sm:$0xff]  }
0x1597   : > { %v10198_v58 = vadd.f32 %v10095_v22, %v19937_v20  ;;  %v10097_v0 = vpop.f32.mrb[185].mxu0  ;;  %v15681_v22 = vld [vmem:[%s17627_s8 + $0x20] sm:$0xff]   ;;  %v15682_v20 = vld [vmem:[%s17627_s8 + $0x68] sm:$0xff]  }
0x1598   : > { %v10199_v27 = vadd.f32 %v10097_v0, %v19938_v47  ;;  %v10099_v3 = vpop.f32.mrb[186].mxu0  ;;  %v15684_v0 = vld [vmem:[%s17627_s8 + $0x70] sm:$0xff]  }
0x1599   : > { %v10200_v55 = vadd.f32 %v10099_v3, %v19939_v45  ;;  %v10101_v10 = vpop.f32.mrb[187].mxu0  ;;  %v15685_v47 = vld [vmem:[%s17627_s8 + $0x30] sm:$0xff]   ;;  %v15687_v3 = vld [vmem:[%s17627_s8 + $0x38] sm:$0xff]   ;;  %v15688_v45 = vld [vmem:[%s17627_s8 + $0xc0] sm:$0xff]  }
0x159a   : > { %v10201_v52 = vadd.f32 %v10101_v10, %v19942_v36  ;;  %v10212_v50 = vadd.f32 %v10199_v27, %v10198_v58  ;;  %v15706_v10 = vld [vmem:[%s17629_s15 + $0x4] ss:$8 sps:$4 sm:$0xff]   ;;  %v15715_v36 = vld [vmem:[%s17629_s15 + $0x34] ss:$8 sps:$4 sm:$0xff]  }
0x159b   : > { %10694 = vmatprep.subr.bf16.mxu1 %v15706_v10  ;;  %v19943_v10 = vld [vmem:[#allocation52_spill] sm:$0xff] }
0x159c   : > { %10213 = vadd.xlane.f32.xlu1 %v10212_v50  ;;  %v10215_v4 = vadd.f32 %v10201_v52, %v10200_v55  ;;  %v15718_v50 = vld [vmem:[%s17629_s15 + $0x44] ss:$8 sps:$4 sm:$0xff]  }
0x159e   : > { %10216 = vadd.xlane.f32.xlu0 %v10215_v4  ;;  %v15716_v4 = vld [vmem:[%s17629_s15 + $0x40] ss:$8 sps:$4 sm:$0xff]  }
0x15a0   : > { %10343 = vadd.xlane.f32.xlu1 %v10342_v12  ;;  %v15721_v12 = vld [vmem:[%s17629_s15 + $0x54] ss:$8 sps:$4 sm:$0xff]  }
0x1621   : > { %v10208_v28 = vpop.xlane.xlu1 %10207 }
0x1622   : > { %v10218_v21 = vmul.f32 0.00390625, %v10208_v28  ;;  %v15719_v28 = vld [vmem:[%s17629_s15 + $0x50] ss:$8 sps:$4 sm:$0xff]  }
0x1623   : > { %v10211_v16 = vpop.xlane.xlu0 %10210 }
0x1624   : > { %v19350_v26 = vsub.f32 %v10194_v51, %v10218_v21  ;;  %v19352_v13 = vsub.f32 %v10195_v23, %v10218_v21  ;;  %v10219_v18 = vmul.f32 0.00390625, %v10211_v16 }
0x1626   : > { %v19354_v17 = vsub.f32 %v10196_v39, %v10219_v18  ;;  %v19356_v9 = vsub.f32 %v10197_v60, %v10219_v18  ;;  %v10230_v59 = vmul.f32 %v19350_v26, %v19350_v26  ;;  %v10231_v62 = vmul.f32 %v19352_v13, %v19352_v13  ;;  %v15675_v60 = vld [vmem:[%s17627_s8 + $0x8] sm:$0xff]  }
0x1627   : > { %13920 = vmatpush3.bf16.msra.mxu0 %v15675_v60 }
0x1628   : > { %v10238_v54 = vadd.f32 %v10231_v62, %v10230_v59  ;;  %v10232_v1 = vmul.f32 %v19354_v17, %v19354_v17  ;;  %v10233_v24 = vmul.f32 %v19356_v9, %v19356_v9  ;;  %13921 = vmatprep.subr.bf16.mxu0 %v15676_v37 }
0x1629   : > { %v10214_v14 = vpop.xlane.xlu1 %10213 }
0x162a   : > { %v10220_v63 = vmul.f32 0.00390625, %v10214_v14  ;;  %10239 = vadd.xlane.f32.xlu0 %v10238_v54  ;;  %v10241_v30 = vadd.f32 %v10233_v24, %v10232_v1 }
0x162b   : > { %v10217_v29 = vpop.xlane.xlu0 %10216  ;;  %13922 = vmatpush3.bf16.msra.mxu0 %v15677_v11 }
0x162c   : > { %v19366_v25 = vsub.f32 %v10198_v58, %v10220_v63  ;;  %v19368_v8 = vsub.f32 %v10199_v27, %v10220_v63  ;;  %v10221_v5 = vmul.f32 0.00390625, %v10217_v29  ;;  %10242 = vadd.xlane.f32.xlu1 %v10241_v30  ;;  %13923 = vmatprep.subr.bf16.mxu0 %v15678_v2  ;;  %v15683_v58 = vld [vmem:[%s17627_s8 + $0x28] sm:$0xff]   ;;  %v15686_v27 = vld [vmem:[%s17627_s8 + $0x78] sm:$0xff]  }
0x162d   : > { %v10344_v40 = vpop.xlane.xlu1 %10343 }
0x162e   : > { %v19370_v19 = vsub.f32 %v10200_v55, %v10221_v5  ;;  %v19372_v15 = vsub.f32 %v10201_v52, %v10221_v5  ;;  %v10345_v57 = vmul.f32 0.00390625, %v10344_v40  ;;  %v10234_v53 = vmul.f32 %v19366_v25, %v19366_v25  ;;  %v15704_v55 = vld [vmem:[%s17629_s15] ss:$8 sps:$4 sm:$0xff]   ;;  %v15713_v52 = vld [vmem:[%s17629_s15 + $0x30] ss:$8 sps:$4 sm:$0xff]  }
0x162f   : > { %v10235_v6 = vmul.f32 %v19368_v8, %v19368_v8  ;;  %13924 = vmatpush3.bf16.msra.mxu0 %v15679_v43  ;;  %10695 = vmatpush1.bf16.msra.mxu1 %v15704_v55  ;;  %v13707_v55 = vld [vmem:[%s17635_s19 + $0x15] ss:$8 sm:$0x3] }
0x1630   : > { %v19378_v56 = vsub.f32 %v10336_v7, %v10345_v57  ;;  %v19380_v46 = vsub.f32 %v10337_v35, %v10345_v57  ;;  %v10236_v51 = vmul.f32 %v19370_v19, %v19370_v19  ;;  %v10237_v49 = vmul.f32 %v19372_v15, %v19372_v15  ;;  %13925 = vmatprep.subr.bf16.mxu0 %v15680_v61  ;;  %v15707_v7 = vld [vmem:[%s17629_s15 + $0x10] ss:$8 sps:$4 sm:$0xff]   ;;  %v15710_v35 = vld [vmem:[%s17629_s15 + $0x20] ss:$8 sps:$4 sm:$0xff]  }
0x1631   : > { %v10244_v38 = vadd.f32 %v10235_v6, %v10234_v53  ;;  %10696 = vmatprep.subr.bf16.mxu1 %v15709_v48 }
0x1632   : > { %v10247_v23 = vadd.f32 %v10237_v49, %v10236_v51  ;;  %v10348_v44 = vmul.f32 %v19378_v56, %v19378_v56  ;;  %v10349_v32 = vmul.f32 %v19380_v46, %v19380_v46 }
0x1633   : > { %10245 = vadd.xlane.f32.xlu0 %v10244_v38  ;;  %13926 = vmatpush3.bf16.msra.mxu0 %v15681_v22 }
0x1634   : > { %10248 = vadd.xlane.f32.xlu1 %v10247_v23  ;;  %v10350_v39 = vadd.f32 %v10349_v32, %v10348_v44  ;;  %13927 = vmatprep.subr.bf16.mxu0 %v15682_v20 }
0x1635   : > { %10697 = vmatpush1.bf16.msra.mxu1 %v15707_v7  ;;  %v19944_v7 = vld [vmem:[#allocation53_spill] sm:$0xff] }
0x1636   : > { %10698 = vmatprep.subr.bf16.mxu1 %v15712_v31 }
0x1637   : > { %10351 = vadd.xlane.f32.xlu0 %v10350_v39  ;;  %13928 = vmatpush3.bf16.msra.mxu0 %v15683_v58  ;;  %v13706_v58 = vld [vmem:[%s17635_s19 + $0x14] ss:$8 sm:$0x3] }
0x1638   : > { %13929 = vmatprep.subr.bf16.mxu0 %v15684_v0  ;;  %v10302_v48 = vrot.slane %v13706_v58, %v19943_v10  ;;  %v10306_v31 = vrot.slane %v13706_v58, %v19944_v7  ;;  %v15697_v58 = vld [vmem:[%s17627_s8 + $0xa0] sm:$0xff]  }
0x1639   : > { %10699 = vmatpush1.bf16.msra.mxu1 %v15710_v35 }
0x163a   : > { %10700 = vmatprep.subr.bf16.mxu1 %v15715_v36 }
0x163b   : > { %13930 = vmatpush3.bf16.msra.mxu0 %v15685_v47 }
0x163c   : > { %13931 = vmatprep.subr.bf16.mxu0 %v15686_v27 }
0x163d   : > { %10701 = vmatpush1.bf16.msra.mxu1 %v15713_v52 }
0x163e   : > { %10702 = vmatprep.subr.bf16.mxu1 %v15718_v50 }
0x163f   : > { %13932 = vmatpush3.bf16.msra.mxu0 %v15687_v3 }
0x1640   : > { %13945 = vmatprep.subr.bf16.mxu0 %v15688_v45 }
0x1641   : > { %10703 = vmatpush1.bf16.msra.mxu1 %v15716_v4  ;;  %v10321_v4 = vrot.slane %v13707_v55, %v19943_v10 }
0x1642   : > { %10704 = vmatprep.subr.bf16.mxu1 %v15721_v12  ;;  %v10325_v12 = vrot.slane %v13707_v55, %v19944_v7  ;;  %v15701_v55 = vld [vmem:[%s17627_s8 + $0xb0] sm:$0xff]  }
0x1645   : > { %10705 = vmatpush1.bf16.msra.mxu1 %v15719_v28 }
0x16b7   : > { %v10240_v21 = vpop.xlane.xlu0 %10239 }
0x16b8   : > { %v10250_v16 = vmul.f32 0.003921569, %v10240_v21 }
0x16b9   : > { %v10243_v18 = vpop.xlane.xlu1 %10242 }
0x16ba   : > { %16064 = vrsqrt.f32 %v10250_v16  ;;  %v10251_v59 = vmul.f32 0.003921569, %v10243_v18  ;;  %vm10256_vm15 = vcmp.eq.f32.partialorder %v10250_v16, inf  ;;  %v10259_v5 = vand.u32 2147483648, %v10250_v16 }
0x16bb   : > { %vm10258_vm0 = vcmp.eq.f32.partialorder %v10250_v16, 0.0 }
0x16bc   : > { %16066 = vrsqrt.f32 %v10251_v59  ;;  %vm10263_vm1 = vcmp.eq.f32.partialorder %v10251_v59, inf  ;;  %v10266_v49 = vand.u32 2147483648, %v10251_v59  ;;  %vm10265_vm2 = vcmp.eq.f32.partialorder %v10251_v59, 0.0 }
0x16c0   : > { %v10246_v62 = vpop.xlane.xlu0 %10245 }
0x16c1   : > { %v10252_v54 = vmul.f32 0.003921569, %v10246_v62  ;;  %v10249_v1 = vpop.xlane.xlu1 %10248 }
0x16c2   : > { %v10253_v24 = vmul.f32 0.003921569, %v10249_v1 }
0x16c3   : > { %16068 = vrsqrt.f32 %v10252_v54  ;;  %vm10270_vm3 = vcmp.eq.f32.partialorder %v10252_v54, inf  ;;  %v10273_v41 = vand.u32 2147483648, %v10252_v54  ;;  %vm10272_vm4 = vcmp.eq.f32.partialorder %v10252_v54, 0.0 }
0x16c4   : > { %v16065_v14 = vpop.eup %16064  ;;  %16070 = vrsqrt.f32 %v10253_v24  ;;  %v10352_v63 = vpop.xlane.xlu0 %10351  ;;  %vm10277_vm5 = vcmp.eq.f32.partialorder %v10253_v24, inf  ;;  %v10280_v37 = vand.u32 2147483648, %v10253_v24  ;;  %vm10279_vm6 = vcmp.eq.f32.partialorder %v10253_v24, 0.0 }
0x16c5   : > { %v10255_v30 = vmul.f32 %v16065_v14, %v10250_v16  ;;  %v10353_v29 = vmul.f32 0.003921569, %v10352_v63  ;;  %v13708_v14 = vld [vmem:[%s17635_s19 + $0x22] ss:$8 sm:$0x3] }
0x16c6   : > { %v16067_v40 = vpop.eup %16066 }
0x16c7   : > { %v10257_v57 = vsel %vm10256_vm15, %v10250_v16, %v10255_v30  ;;  %16072 = vrsqrt.f32 %v10353_v29  ;;  %v10262_v6 = vmul.f32 %v16067_v40, %v10251_v59  ;;  %vm10356_vm7 = vcmp.eq.f32.partialorder %v10353_v29, inf  ;;  %v15689_v30 = vld [vmem:[%s17627_s8 + $0x80] sm:$0xff]   ;;  %v15690_v40 = vld [vmem:[%s17627_s8 + $0xc8] sm:$0xff]  }
0x16c8   : > { %v10260_v53 = vsel %vm10258_vm0, %v10259_v5, %v10257_v57  ;;  %v10359_v47 = vand.u32 2147483648, %v10353_v29  ;;  %vm10358_vm8 = vcmp.eq.f32.partialorder %v10353_v29, 0.0 }
0x16c9   : > { %v10282_v51 = vadd.f32 1e-06, %v10260_v53  ;;  %v10264_v38 = vsel %vm10263_vm1, %v10251_v59, %v10262_v6  ;;  %v13709_v6 = vld [vmem:[%s17635_s19 + $0x23] ss:$8 sm:$0x3] }
0x16ca   : > { %v10267_v23 = vsel %vm10265_vm2, %v10266_v49, %v10264_v38  ;;  %v10373_v38 = vrot.slane %v13708_v14, %v19944_v7 }
0x16cb   : > { %16074 = vrcp.f32 %v10282_v51  ;;  %v10283_v44 = vadd.f32 1e-06, %v10267_v23 }
0x16cd   : > { %v16069_v32 = vpop.eup %16068  ;;  %16076 = vrcp.f32 %v10283_v44 }
0x16ce   : > { %v16071_v39 = vpop.eup %16070  ;;  %v10269_v34 = vmul.f32 %v16069_v32, %v10252_v54 }
0x16cf   : > { %v10276_v42 = vmul.f32 %v16071_v39, %v10253_v24 }
0x16d0   : > { %v10271_v60 = vsel %vm10270_vm3, %v10252_v54, %v10269_v34  ;;  %v15692_v34 = vld [vmem:[%s17627_s8 + $0xd0] sm:$0xff]  }
0x16d1   : > { %v16073_v11 = vpop.eup %16072  ;;  %v10274_v2 = vsel %vm10272_vm4, %v10273_v41, %v10271_v60  ;;  %v10278_v43 = vsel %vm10277_vm5, %v10253_v24, %v10276_v42 }
0x16d2   : > { %v10284_v61 = vadd.f32 1e-06, %v10274_v2  ;;  %v10281_v22 = vsel %vm10279_vm6, %v10280_v37, %v10278_v43  ;;  %v10355_v20 = vmul.f32 %v16073_v11, %v10353_v29  ;;  %v15693_v11 = vld [vmem:[%s17627_s8 + $0x90] sm:$0xff]   ;;  %v15694_v43 = vld [vmem:[%s17627_s8 + $0xd8] sm:$0xff]  }
0x16d3   : > { %v10285_v0 = vadd.f32 1e-06, %v10281_v22  ;;  %v15695_v22 = vld [vmem:[%s17627_s8 + $0x98] sm:$0xff]  }
0x16d4   : > { %v10357_v27 = vsel %vm10356_vm7, %v10353_v29, %v10355_v20  ;;  %16078 = vrcp.f32 %v10284_v61  ;;  %v15696_v20 = vld [vmem:[%s17627_s8 + $0xe0] sm:$0xff]  }
0x16d5   : > { %v16075_v3 = vpop.eup %16074  ;;  %v10360_v45 = vsel %vm10358_vm8, %v10359_v47, %v10357_v27  ;;  %16080 = vrcp.f32 %v10285_v0  ;;  %v15698_v0 = vld [vmem:[%s17627_s8 + $0xe8] sm:$0xff]  }
0x16d6   : > { %v10361_v35 = vadd.f32 1e-06, %v10360_v45  ;;  %v10291_v36 = vmul.f32 %v16075_v3, %v19352_v13  ;;  %v10290_v52 = vmul.f32 %v16075_v3, %v19350_v26  ;;  %v15699_v47 = vld [vmem:[%s17627_s8 + $0xa8] sm:$0xff]   ;;  %v10369_v3 = vrot.slane %v13708_v14, %v19943_v10  ;;  %v15700_v45 = vld [vmem:[%s17627_s8 + $0xf0] sm:$0xff]  }
0x16d7   : > { %v16077_v50 = vpop.eup %16076 }
0x16d8   : > { %16082 = vrcp.f32 %v10361_v35  ;;  %v10293_v28 = vmul.f32 %v16077_v50, %v19356_v9  ;;  %v10310_v21 = vmul.f32 %v10306_v31, %v10291_v36  ;;  %v10292_v16 = vmul.f32 %v16077_v50, %v19354_v17  ;;  %v15702_v35 = vld [vmem:[%s17627_s8 + $0xf8] sm:$0xff]   ;;  %v15722_v50 = vld [vmem:[%s17629_s15 + $0x60] ss:$8 sps:$4 sm:$0xff]  }
0x16d9   : > { %v10309_v18 = vmul.f32 %v10302_v48, %v10290_v52  ;;  %v15703_v36 = vld [vmem:[%s17627_s8 + $0xb8] sm:$0xff]  }
0x16da   : > { %v10312_v59 = vmul.f32 %v10306_v31, %v10293_v28  ;;  %v10311_v62 = vmul.f32 %v10302_v48, %v10292_v16  ;;  %v19429_v13 = vadd.f32 %v10325_v12, %v10310_v21  ;;  %v15725_v28 = vld [vmem:[%s17629_s15 + $0x70] ss:$8 sps:$4 sm:$0xff]   ;;  %v15730_v21 = vld [vmem:[%s17629_s15 + $0x84] ss:$8 sps:$4 sm:$0xff]  }
0x16db   : > { %v19433_v54 = vadd.f32 %v10321_v4, %v10309_v18  ;;  %v13710_v18 = vld [vmem:[%s17637_s30] ss:$0 sm:$0xff] }
0x16dc   : > { %v19431_v26 = vadd.f32 %v10325_v12, %v10312_v59  ;;  %v19435_v1 = vadd.f32 %v10321_v4, %v10311_v62 }
0x16de   : > { %v16079_v24 = vpop.eup %16078  ;;  %v10392_v9 = vpack.c.bf16 %v19431_v26, %v19429_v13  ;;  %v10391_v17 = vpack.c.bf16 %v19435_v1, %v19433_v54 }
0x16df   : > { %v16081_v63 = vpop.eup %16080  ;;  %v10295_v29 = vmul.f32 %v16079_v24, %v19368_v8  ;;  %v10294_v5 = vmul.f32 %v16079_v24, %v19366_v25  ;;  %v15691_v8 = vld [vmem:[%s17627_s8 + $0x88] sm:$0xff]  }
0x16e0   : > { %v10297_v57 = vmul.f32 %v16081_v63, %v19372_v15  ;;  %v10296_v53 = vmul.f32 %v16081_v63, %v19370_v19  ;;  %10562 = vmatprep.mubr.bf16.mxu0 %v10392_v9  ;;  %v10386_v15 = vrot.slane %v13709_v6, %v19944_v7 }
0x16e1   : > { %v10314_v51 = vmul.f32 %v10306_v31, %v10295_v29  ;;  %v10313_v49 = vmul.f32 %v10302_v48, %v10294_v5  ;;  %10563 = vmatmul.mubr.bf16.vlgmr.msra.gmra.mrb[188].mxu0 %v10391_v17 }
0x16e2   : > { %v16083_v23 = vpop.eup %16082  ;;  %v10316_v44 = vmul.f32 %v10306_v31, %v10297_v57  ;;  %v10315_v32 = vmul.f32 %v10302_v48, %v10296_v53  ;;  %13946 = vmatpush3.bf16.msra.mxu0 %v15689_v30  ;;  %v10382_v31 = vrot.slane %v13709_v6, %v19943_v10  ;;  %v15728_v57 = vld [vmem:[%s17629_s15 + $0x80] ss:$8 sps:$4 sm:$0xff]  }
0x16e3   : > { %v10364_v25 = vmul.f32 %v16083_v23, %v19380_v46  ;;  %13947 = vmatprep.subr.bf16.mxu0 %v15690_v40  ;;  %v19453_v19 = vadd.f32 %v10325_v12, %v10314_v51  ;;  %v19458_v41 = vadd.f32 %v10321_v4, %v10313_v49  ;;  %v10363_v27 = vmul.f32 %v16083_v23, %v19378_v56  ;;  %v15733_v49 = vld [vmem:[%s17629_s15 + $0x94] ss:$8 sps:$4 sm:$0xff]  }
0x16e4   : > { %v19455_v39 = vadd.f32 %v10325_v12, %v10316_v44  ;;  %v19460_v42 = vadd.f32 %v10321_v4, %v10315_v32  ;;  %v15724_v4 = vld [vmem:[%s17629_s15 + $0x64] ss:$8 sps:$4 sm:$0xff]   ;;  %v15727_v12 = vld [vmem:[%s17629_s15 + $0x74] ss:$8 sps:$4 sm:$0xff]   ;;  %v15731_v32 = vld [vmem:[%s17629_s15 + $0x90] ss:$8 sps:$4 sm:$0xff]  }
0x16e5   : > { %v10377_v60 = vmul.f32 %v10373_v38, %v10364_v25  ;;  %v10376_v48 = vmul.f32 %v10369_v3, %v10363_v27  ;;  %10706 = vmatprep.subr.bf16.mxu1 %v15724_v4  ;;  %v15736_v25 = vld [vmem:[%s17629_s15 + $0xa4] ss:$8 sps:$4 sm:$0xff]   ;;  %v15746_v3 = vld [vmem:[%s17629_s15 + $0xe0] ss:$8 sps:$4 sm:$0xff]  }
0x16e6   : > { %v10394_v37 = vpack.c.bf16 %v19455_v39, %v19453_v19  ;;  %v10393_v46 = vpack.c.bf16 %v19460_v42, %v19458_v41  ;;  %13948 = vmatpush3.bf16.msra.mxu0 %v15691_v8  ;;  %10707 = vmatpush1.bf16.msra.mxu1 %v15722_v50  ;;  %v13727_v50 = vld [vmem:[%s17635_s19 + $0x10] ss:$8 sm:$0x3] }
0x16e7   : > { %v19467_v2 = vadd.f32 %v10386_v15, %v10377_v60  ;;  %13949 = vmatprep.subr.bf16.mxu0 %v15692_v34  ;;  %v19484_v52 = vadd.f32 %v10382_v31, %v10376_v48  ;;  %10708 = vmatprep.subr.bf16.mxu1 %v15727_v12  ;;  %v15734_v60 = vld [vmem:[%s17629_s15 + $0xa0] ss:$8 sps:$4 sm:$0xff]   ;;  %v10607_v4 = vrot.slane %v13727_v50, %v19943_v10 }
0x16e8   : > { %10570 = vmatprep.mubr.bf16.mxu0 %v10394_v37  ;;  %v10611_v12 = vrot.slane %v13727_v50, %v19944_v7 }
0x16e9   : > { %v10396_v61 = vpack.c.bf16 %v19467_v2, %v19467_v2  ;;  %10571 = vmatmul.mubr.bf16.gmra.mrb[192].mxu0 %v10393_v46  ;;  %v10395_v56 = vpack.c.bf16 %v19484_v52, %v19484_v52  ;;  %v15739_v46 = vld [vmem:[%s17629_s15 + $0xb4] ss:$8 sps:$4 sm:$0xff]  }
0x16ea   : > { %13950 = vmatpush3.bf16.msra.mxu0 %v15693_v11  ;;  %10709 = vmatpush1.bf16.msra.mxu1 %v15725_v28  ;;  %v15737_v11 = vld [vmem:[%s17629_s15 + $0xb0] ss:$8 sps:$4 sm:$0xff]  }
0x16eb   : > { %11063 = vmatprep.mubr.bf16.mxu0 %v10396_v61  ;;  %13951 = vmatprep.subr.bf16.mxu0 %v15694_v43  ;;  %v15742_v43 = vld [vmem:[%s17629_s15 + $0xc4] ss:$8 sps:$4 sm:$0xff]   ;;  %v15740_v61 = vld [vmem:[%s17629_s15 + $0xc0] ss:$8 sps:$4 sm:$0xff]  }
0x16ec   : > { %11183 = vmatprep.subr.bf16.mxu1 %v15730_v21 }
0x16ee   : > { %13952 = vmatpush3.bf16.msra.mxu0 %v15695_v22  ;;  %v15745_v22 = vld [vmem:[%s17629_s15 + $0xd4] ss:$8 sps:$4 sm:$0xff]  }
0x16ef   : > { %13953 = vmatprep.subr.bf16.mxu0 %v15696_v20  ;;  %v15743_v20 = vld [vmem:[%s17629_s15 + $0xd0] ss:$8 sps:$4 sm:$0xff]  }
0x16f2   : > { %13954 = vmatpush3.bf16.msra.mxu0 %v15697_v58  ;;  %v15748_v58 = vld [vmem:[%s17629_s15 + $0xe4] ss:$8 sps:$4 sm:$0xff]  }
0x16f3   : > { %13955 = vmatprep.subr.bf16.mxu0 %v15698_v0 }
0x16f6   : > { %13956 = vmatpush3.bf16.msra.mxu0 %v15699_v47  ;;  %v13778_v47 = vld [vmem:[%s17637_s30 + $0x1] ss:$0 sm:$0xff] }
0x16f7   : > { %13957 = vmatprep.subr.bf16.mxu0 %v15700_v45 }
0x16fa   : > { %13958 = vmatpush3.bf16.msra.mxu0 %v15701_v55  ;;  %v15751_v55 = vld [vmem:[%s17629_s15 + $0xf4] ss:$8 sps:$4 sm:$0xff]  }
0x16fb   : > { %13959 = vmatprep.subr.bf16.mxu0 %v15702_v35  ;;  %v15749_v35 = vld [vmem:[%s17629_s15 + $0xf0] ss:$8 sps:$4 sm:$0xff]   ;;  %s19945_s15 = sld [smem:[#allocation70_spill]] (!%p13830_p9) }
0x16fe   : > { %13960 = vmatpush3.bf16.msra.mxu0 %v15703_v36 }
0x1701   : > { %11064 = vmatmul.mubr.bf16.vlgmr.msra.gmra.mrb[196].mxu0 %v10395_v56 }
0x17b4   : > { %v13933_v16 = vpop.f32.mrb[188].mxu0 }
0x17b5   : > { %v13934_v59 = vpop.f32.mrb[189].mxu0 }
0x17b6   : > { %v13935_v62 = vadd.f32 %v13934_v59, %v13933_v16  ;;  %v13936_v24 = vpop.f32.mrb[190].mxu0 }
0x17b7   : > { %v13937_v14 = vpop.f32.mrb[191].mxu0 }
0x17b8   : > { %v10565_v63 = vadd.f32 %v13935_v62, %v13710_v18  ;;  %v13938_v9 = vadd.f32 %v13937_v14, %v13936_v24 }
0x17ba   : > { %v10568_v17 = vadd.f32 %v13938_v9, %v13710_v18  ;;  %v10579_v30 = vmax.f32 %v10565_v63, 0.0 }
0x17bc   : > { %v10580_v29 = vmax.f32 %v10568_v17, 0.0  ;;  %v13939_v5 = vpop.f32.mrb[192].mxu0 }
0x17bd   : > { %v13940_v40 = vpop.f32.mrb[193].mxu0 }
0x17be   : > { %v10583_v53 = vpack.c.bf16 %v10580_v29, %v10579_v30  ;;  %v13941_v6 = vadd.f32 %v13940_v40, %v13939_v5  ;;  %v13942_v51 = vpop.f32.mrb[194].mxu0 }
0x17bf   : > { %v13943_v38 = vpop.f32.mrb[195].mxu0 }
0x17c0   : > { %v10573_v23 = vadd.f32 %v13941_v6, %v13710_v18  ;;  %v13944_v44 = vadd.f32 %v13943_v38, %v13942_v51  ;;  %10727 = vmatmul.mubr.bf16.vlgmr.msra.gmra.mrb[212].mxu1 %v10583_v53 }
0x17c1   : > { %11184 = vmatpush1.bf16.msra.mxu1 %v15728_v57  ;;  %10736 = vmatprep.mubr.bf16.mxu1 %v19932_v33 }
0x17c2   : > { %v10576_v8 = vadd.f32 %v13944_v44, %v13710_v18  ;;  %11185 = vmatprep.subr.bf16.mxu1 %v15733_v49  ;;  %v10581_v15 = vmax.f32 %v10573_v23, 0.0 }
0x17c4   : > { %v10582_v34 = vmax.f32 %v10576_v8, 0.0  ;;  %v13811_v8 = vld [vmem:[%s17635_s19 + $0x11] ss:$8 sm:$0x3] }
0x17c5   : > { %11186 = vmatpush1.bf16.msra.mxu1 %v15731_v32 }
0x17c6   : > { %11187 = vmatprep.subr.bf16.mxu1 %v15736_v25  ;;  %v10584_v37 = vpack.c.bf16 %v10582_v34, %v10581_v15  ;;  %v11096_v25 = vrot.slane %v13811_v8, %v19943_v10  ;;  %v11100_v15 = vrot.slane %v13811_v8, %v19944_v7 }
0x17c8   : > { %10737 = vmatmul.mubr.bf16.gmra.mrb[216].mxu1 %v10584_v37 }
0x17c9   : > { %11188 = vmatpush1.bf16.msra.mxu1 %v15734_v60  ;;  %11215 = vmatprep.mubr.bf16.mxu1 %v19932_v33 }
0x17ca   : > { %11189 = vmatprep.subr.bf16.mxu1 %v15739_v46 }
0x17cd   : > { %11190 = vmatpush1.bf16.msra.mxu1 %v15737_v11 }
0x17ce   : > { %11191 = vmatprep.subr.bf16.mxu1 %v15742_v43 }
0x17d1   : > { %11192 = vmatpush1.bf16.msra.mxu1 %v15740_v61 }
0x17d2   : > { %11193 = vmatprep.subr.bf16.mxu1 %v15745_v22 }
0x17d4   : > { %v13961_v0 = vpop.f32.mrb[196].mxu0 }
0x17d5   : > { %v13962_v27 = vpop.f32.mrb[197].mxu0  ;;  %11194 = vmatpush1.bf16.msra.mxu1 %v15743_v20 }
0x17d6   : > { %v13963_v45 = vadd.f32 %v13962_v27, %v13961_v0  ;;  %v13964_v33 = vpop.f32.mrb[198].mxu0  ;;  %11195 = vmatprep.subr.bf16.mxu1 %v15748_v58 }
0x17d7   : > { %v13965_v48 = vpop.f32.mrb[199].mxu0 }
0x17d8   : > { %v11066_v31 = vadd.f32 %v13963_v45, %v13778_v47 }
0x17d9   : > { %11196 = vmatpush1.bf16.msra.mxu1 %v15746_v3 }
0x17da   : > { %v11071_v36 = vmax.f32 %v11066_v31, 0.0  ;;  %11197 = vmatprep.subr.bf16.mxu1 %v15751_v55 }
0x17dc   : > { %v11072_v56 = vpack.c.bf16 %v11071_v36, %v11071_v36 }
0x17dd   : > { %11198 = vmatpush1.bf16.msra.mxu1 %v15749_v35 }
0x17e0   : > { %11216 = vmatmul.mubr.bf16.vlgmr.msra.gmra.mrb[220].mxu1 %v11072_v56 }
0x1893   : > { %v10728_v28 = vpop.f32.mrb[212].mxu1 }
0x1894   : > { %v10729_v21 = vadd.f32 %v10728_v28, %v10607_v4  ;;  %v10730_v16 = vpop.f32.mrb[213].mxu1 }
0x1895   : > { %v10731_v18 = vadd.f32 %v10730_v16, %v10611_v12  ;;  %v10732_v59 = vpop.f32.mrb[214].mxu1 }
0x1896   : > { %v10747_v62 = vadd.f32 %v10729_v21, %v19433_v54  ;;  %v10733_v24 = vadd.f32 %v10732_v59, %v10607_v4  ;;  %v10734_v14 = vpop.f32.mrb[215].mxu1 }
0x1897   : > { %v10748_v63 = vadd.f32 %v10731_v18, %v19429_v13  ;;  %v10735_v9 = vadd.f32 %v10734_v14, %v10611_v12 }
0x1898   : > { %v10749_v17 = vadd.f32 %v10733_v24, %v19435_v1 }
0x1899   : > { %v10750_v30 = vadd.f32 %v10735_v9, %v19431_v26  ;;  %v10759_v29 = vadd.f32 %v10748_v63, %v10747_v62 }
0x189b   : > { %10760 = vadd.xlane.f32.xlu1 %v10759_v29  ;;  %v10738_v5 = vpop.f32.mrb[216].mxu1  ;;  %v10762_v40 = vadd.f32 %v10750_v30, %v10749_v17 }
0x189c   : > { %v10739_v57 = vadd.f32 %v10738_v5, %v10607_v4  ;;  %v10740_v53 = vpop.f32.mrb[217].mxu1 }
0x189d   : > { %v10741_v6 = vadd.f32 %v10740_v53, %v10611_v12  ;;  %10763 = vadd.xlane.f32.xlu0 %v10762_v40  ;;  %v10742_v51 = vpop.f32.mrb[218].mxu1 }
0x189e   : > { %v10751_v54 = vadd.f32 %v10739_v57, %v19458_v41  ;;  %v10743_v49 = vadd.f32 %v10742_v51, %v10607_v4  ;;  %v10744_v38 = vpop.f32.mrb[219].mxu1 }
0x189f   : > { %v10752_v13 = vadd.f32 %v10741_v6, %v19453_v19  ;;  %v10745_v23 = vadd.f32 %v10744_v38, %v10611_v12 }
0x18a0   : > { %v10753_v1 = vadd.f32 %v10743_v49, %v19460_v42 }
0x18a1   : > { %v10754_v26 = vadd.f32 %v10745_v23, %v19455_v39  ;;  %v10765_v44 = vadd.f32 %v10752_v13, %v10751_v54 }
0x18a3   : > { %10766 = vadd.xlane.f32.xlu1 %v10765_v44  ;;  %v10768_v32 = vadd.f32 %v10754_v26, %v10753_v1 }
0x18a5   : > { %10769 = vadd.xlane.f32.xlu0 %v10768_v32 }
0x18b3   : > { %v11217_v34 = vpop.f32.mrb[220].mxu1 }
0x18b4   : > { %v11218_v41 = vadd.f32 %v11217_v34, %v11096_v25  ;;  %v11219_v60 = vpop.f32.mrb[221].mxu1 }
0x18b5   : > { %v11220_v37 = vadd.f32 %v11219_v60, %v11100_v15  ;;  %v11221_v46 = vpop.f32.mrb[222].mxu1 }
0x18b6   : > { %v11224_v19 = vadd.f32 %v11218_v41, %v19484_v52  ;;  %v11222_v11 = vpop.f32.mrb[223].mxu1 }
0x18b7   : > { %v11225_v42 = vadd.f32 %v11220_v37, %v19467_v2 }
0x18b9   : > { %v11230_v39 = vadd.f32 %v11225_v42, %v11224_v19 }
0x18bb   : > { %11231 = vadd.xlane.f32.xlu1 %v11230_v39 }
0x1928   : > { %v10761_v43 = vpop.xlane.xlu1 %10760 }
0x1929   : > { %v10771_v61 = vmul.f32 0.00390625, %v10761_v43 }
0x192a   : > { %v10764_v22 = vpop.xlane.xlu0 %10763 }
0x192b   : > { %v19528_v20 = vsub.f32 %v10747_v62, %v10771_v61  ;;  %v19530_v58 = vsub.f32 %v10748_v63, %v10771_v61  ;;  %v10772_v0 = vmul.f32 0.00390625, %v10764_v22 }
0x192d   : > { %v19532_v47 = vsub.f32 %v10749_v17, %v10772_v0  ;;  %v19534_v27 = vsub.f32 %v10750_v30, %v10772_v0  ;;  %v10783_v52 = vmul.f32 %v19528_v20, %v19528_v20  ;;  %v10784_v2 = vmul.f32 %v19530_v58, %v19530_v58  ;;  %v13745_v0 = vld [vmem:[%s17635_s19 + $0x17] ss:$8 sm:$0x3] }
0x192f   : > { %v10791_v3 = vadd.f32 %v10784_v2, %v10783_v52  ;;  %v10785_v45 = vmul.f32 %v19532_v47, %v19532_v47  ;;  %v10786_v33 = vmul.f32 %v19534_v27, %v19534_v27 }
0x1930   : > { %v10767_v55 = vpop.xlane.xlu1 %10766 }
0x1931   : > { %v10773_v48 = vmul.f32 0.00390625, %v10767_v55  ;;  %10792 = vadd.xlane.f32.xlu0 %v10791_v3  ;;  %v10794_v31 = vadd.f32 %v10786_v33, %v10785_v45 }
0x1932   : > { %v10770_v35 = vpop.xlane.xlu0 %10769 }
0x1933   : > { %v19544_v36 = vsub.f32 %v10751_v54, %v10773_v48  ;;  %v19546_v56 = vsub.f32 %v10752_v13, %v10773_v48  ;;  %v10774_v50 = vmul.f32 0.00390625, %v10770_v35  ;;  %10795 = vadd.xlane.f32.xlu1 %v10794_v31  ;;  %v10874_v48 = vrot.slane %v13745_v0, %v19943_v10 }
0x1934   : > { %v10878_v31 = vrot.slane %v13745_v0, %v19944_v7  ;;  %v16118_v0 = vld [vmem:[#allocation24 + $0x8] sm:$0xff] (!%p13830_p9)  }
0x1935   : > { %v19548_v4 = vsub.f32 %v10753_v1, %v10774_v50  ;;  %v19550_v12 = vsub.f32 %v10754_v26, %v10774_v50  ;;  %v10787_v28 = vmul.f32 %v19544_v36, %v19544_v36  ;;  %v10788_v21 = vmul.f32 %v19546_v56, %v19546_v56 }
0x1937   : > { %v10797_v16 = vadd.f32 %v10788_v21, %v10787_v28  ;;  %v10789_v18 = vmul.f32 %v19548_v4, %v19548_v4  ;;  %v10790_v59 = vmul.f32 %v19550_v12, %v19550_v12 }
0x1939   : > { %10798 = vadd.xlane.f32.xlu0 %v10797_v16  ;;  %v10800_v62 = vadd.f32 %v10790_v59, %v10789_v18 }
0x193b   : > { %10801 = vadd.xlane.f32.xlu1 %v10800_v62 }
0x1948   : > { %v11232_v24 = vpop.xlane.xlu1 %11231 }
0x1949   : > { %v11233_v14 = vmul.f32 0.00390625, %v11232_v24 }
0x194b   : > { %v19560_v63 = vsub.f32 %v11224_v19, %v11233_v14  ;;  %v19562_v9 = vsub.f32 %v11225_v42, %v11233_v14  ;;  %v13744_v42 = vld [vmem:[%s17635_s19 + $0x16] ss:$8 sm:$0x3] }
0x194c   : > { %v10855_v3 = vrot.slane %v13744_v42, %v19943_v10  ;;  %v10859_v45 = vrot.slane %v13744_v42, %v19944_v7 }
0x194d   : > { %v11236_v17 = vmul.f32 %v19560_v63, %v19560_v63  ;;  %v11237_v30 = vmul.f32 %v19562_v9, %v19562_v9 }
0x194f   : > { %v11238_v29 = vadd.f32 %v11237_v30, %v11236_v17 }
0x1951   : > { %11239 = vadd.xlane.f32.xlu0 %v11238_v29 }
0x19be   : > { %v10793_v5 = vpop.xlane.xlu0 %10792 }
0x19bf   : > { %v10803_v40 = vmul.f32 0.003921569, %v10793_v5 }
0x19c0   : > { %v10796_v57 = vpop.xlane.xlu1 %10795 }
0x19c1   : > { %16084 = vrsqrt.f32 %v10803_v40  ;;  %v10804_v53 = vmul.f32 0.003921569, %v10796_v57  ;;  %vm10809_vm9 = vcmp.eq.f32.partialorder %v10803_v40, inf  ;;  %v10812_v23 = vand.u32 2147483648, %v10803_v40 }
0x19c2   : > { %vm10811_vm10 = vcmp.eq.f32.partialorder %v10803_v40, 0.0 }
0x19c3   : > { %16086 = vrsqrt.f32 %v10804_v53  ;;  %vm10816_vm11 = vcmp.eq.f32.partialorder %v10804_v53, inf  ;;  %v10819_v25 = vand.u32 2147483648, %v10804_v53  ;;  %vm10818_vm12 = vcmp.eq.f32.partialorder %v10804_v53, 0.0 }
0x19c6   : > { %v10799_v6 = vpop.xlane.xlu0 %10798 }
0x19c7   : > { %v10805_v51 = vmul.f32 0.003921569, %v10799_v6 }
0x19c8   : > { %v10802_v54 = vpop.xlane.xlu1 %10801 }
0x19c9   : > { %16088 = vrsqrt.f32 %v10805_v51  ;;  %v10806_v49 = vmul.f32 0.003921569, %v10802_v54  ;;  %vm10823_vm13 = vcmp.eq.f32.partialorder %v10805_v51, inf  ;;  %v10826_v46 = vand.u32 2147483648, %v10805_v51 }
0x19ca   : > { %vm10825_vm14 = vcmp.eq.f32.partialorder %v10805_v51, 0.0 }
0x19cb   : > { %v16085_v38 = vpop.eup %16084  ;;  %16090 = vrsqrt.f32 %v10806_v49  ;;  %vm10830_vm15 = vcmp.eq.f32.partialorder %v10806_v49, inf  ;;  %v10833_v22 = vand.u32 2147483648, %v10806_v49  ;;  %vm10832_vm0 = vcmp.eq.f32.partialorder %v10806_v49, 0.0 }
0x19cc   : > { %v10808_v13 = vmul.f32 %v16085_v38, %v10803_v40 }
0x19cd   : > { %v16087_v1 = vpop.eup %16086 }
0x19ce   : > { %v10810_v26 = vsel %vm10809_vm9, %v10803_v40, %v10808_v13  ;;  %v10815_v32 = vmul.f32 %v16087_v1, %v10804_v53 }
0x19cf   : > { %v10813_v44 = vsel %vm10811_vm10, %v10812_v23, %v10810_v26 }
0x19d0   : > { %v10835_v8 = vadd.f32 1e-06, %v10813_v44  ;;  %v10817_v15 = vsel %vm10816_vm11, %v10804_v53, %v10815_v32  ;;  %v13828_v32 = vld [vmem:[%s17635_s19 + $0x24] ss:$8 sm:$0x3] }
0x19d1   : > { %v10820_v34 = vsel %vm10818_vm12, %v10819_v25, %v10817_v15  ;;  %v11257_v25 = vrot.slane %v13828_v32, %v19943_v10  ;;  %v11261_v15 = vrot.slane %v13828_v32, %v19944_v7  ;;  %v16158_v32 = vld [vmem:[#allocation23 + $0x110] sm:$0xff] (!%p13830_p9)  }
0x19d2   : > { %16092 = vrcp.f32 %v10835_v8  ;;  %v10836_v60 = vadd.f32 1e-06, %v10820_v34  ;;  %v13829_v8 = vld [vmem:[%s17635_s19 + $0x25] ss:$8 sm:$0x3] }
0x19d3   : > { %v16089_v41 = vpop.eup %16088 }
0x19d4   : > { %v10822_v37 = vmul.f32 %v16089_v41, %v10805_v51  ;;  %16094 = vrcp.f32 %v10836_v60  ;;  %v11270_v41 = vrot.slane %v13829_v8, %v19943_v10  ;;  %v11274_v60 = vrot.slane %v13829_v8, %v19944_v7  ;;  %v16114_v10 = vld [vmem:[#allocation24] sm:$0xff] (!%p13830_p9)   ;;  %v16159_v8 = vld [vmem:[#allocation23 + $0xd8] sm:$0xff] (!%p13830_p9)  }
0x19d5   : > { %v16091_v19 = vpop.eup %16090  ;;  %v16115_v7 = vld [vmem:[#allocation23] sm:$0xff] (!%p13830_p9)  }
0x19d6   : > { %v10824_v11 = vsel %vm10823_vm13, %v10805_v51, %v10822_v37  ;;  %v10829_v43 = vmul.f32 %v16091_v19, %v10806_v49 }
0x19d7   : > { %v10827_v39 = vsel %vm10825_vm14, %v10826_v46, %v10824_v11 }
0x19d8   : > { %v10837_v61 = vadd.f32 1e-06, %v10827_v39  ;;  %v10831_v52 = vsel %vm10830_vm15, %v10806_v49, %v10829_v43  ;;  %v16112_v43 = vld [vmem:[#allocation24 + $0x40] sm:$0xff] (!%p13830_p9)  }
0x19d9   : > { %v10834_v2 = vsel %vm10832_vm0, %v10833_v22, %v10831_v52  ;;  %v16113_v22 = vld [vmem:[#allocation23 + $0x40] sm:$0xff] (!%p13830_p9)   ;;  %13967 = vmatprep.subr.bf16.mxu0 (!%p13830_p9), %v16112_v43  ;;  %v16119_v52 = vld [vmem:[#allocation23 + $0x8] sm:$0xff] (!%p13830_p9)   ;;  %v16174_v43 = vld [vmem:[#allocation23 + $0xf0] sm:$0xff] (!%p13830_p9)  }
0x19da   : > { %16096 = vrcp.f32 %v10837_v61  ;;  %v10838_v33 = vadd.f32 1e-06, %v10834_v2  ;;  %13995 = vmatprep.subr.bf16.mxu1 (!%p13830_p9), %v16113_v22  ;;  %13968 = vmatpush3.bf16.msra.mxu0 (!%p13830_p9), %v16114_v10  ;;  %v16120_v2 = vld [vmem:[#allocation24 + $0x50] sm:$0xff] (!%p13830_p9)  }
0x19db   : > { %13996 = vmatpush3.bf16.msra.mxu1 (!%p13830_p9), %v16115_v7  ;;  %v16176_v22 = vld [vmem:[#allocation23 + $0xb0] sm:$0xff] (!%p13830_p9)   ;;  %v16178_v7 = vld [vmem:[#allocation23 + $0xf8] sm:$0xff] (!%p13830_p9)  }
0x19dc   : > { %v16093_v55 = vpop.eup %16092  ;;  %16098 = vrcp.f32 %v10838_v33  ;;  %v16123_v33 = vld [vmem:[#allocation23 + $0x10] sm:$0xff] (!%p13830_p9)  }
0x19dd   : > { %v10843_v35 = vmul.f32 %v16093_v55, %v19528_v20  ;;  %v10844_v50 = vmul.f32 %v16093_v55, %v19530_v58  ;;  %v16124_v55 = vld [vmem:[#allocation24 + $0x58] sm:$0xff] (!%p13830_p9)   ;;  %v16177_v10 = vld [vmem:[#allocation23 + $0x130] sm:$0xff] (!%p13830_p9)  }
0x19de   : > { %v11240_v28 = vpop.xlane.xlu0 %11239  ;;  %v16095_v21 = vpop.eup %16094 }
0x19df   : > { %v10862_v16 = vmul.f32 %v10855_v3, %v10843_v35  ;;  %v10863_v18 = vmul.f32 %v10859_v45, %v10844_v50  ;;  %v11241_v59 = vmul.f32 0.003921569, %v11240_v28  ;;  %v10845_v62 = vmul.f32 %v16095_v21, %v19532_v47  ;;  %v16127_v35 = vld [vmem:[#allocation23 + $0x18] sm:$0xff] (!%p13830_p9)   ;;  %v16128_v50 = vld [vmem:[#allocation24 + $0x60] sm:$0xff] (!%p13830_p9)  }
0x19e0   : > { %v10846_v24 = vmul.f32 %v16095_v21, %v19534_v27  ;;  %v16129_v28 = vld [vmem:[#allocation23 + $0x60] sm:$0xff] (!%p13830_p9)  }
0x19e1   : > { %v19578_v14 = vadd.f32 %v10874_v48, %v10862_v16  ;;  %v10882_v17 = vadd.f32 %v10878_v31, %v10863_v18  ;;  %16100 = vrsqrt.f32 %v11241_v59  ;;  %v10864_v30 = vmul.f32 %v10855_v3, %v10845_v62  ;;  %v16130_v21 = vld [vmem:[#allocation24 + $0x20] sm:$0xff] (!%p13830_p9)   ;;  %v16132_v18 = vld [vmem:[#allocation24 + $0x68] sm:$0xff] (!%p13830_p9)  }
0x19e2   : > { %v10865_v29 = vmul.f32 %v10859_v45, %v10846_v24  ;;  %vm11244_vm1 = vcmp.eq.f32.partialorder %v11241_v59, inf  ;;  %vm11246_vm2 = vcmp.eq.f32.partialorder %v11241_v59, 0.0  ;;  %v16131_v16 = vld [vmem:[#allocation23 + $0x20] sm:$0xff] (!%p13830_p9)   ;;  %v16134_v62 = vld [vmem:[#allocation24 + $0x28] sm:$0xff] (!%p13830_p9)  }
0x19e3   : > { %10889 = vst [vmem:[#allocation2] sm:$0xff] %v19578_v14  ;;  %10890 = vst [vmem:[#allocation2 + $0x8] sm:$0xff] %v10882_v17  ;;  %v19581_v58 = vadd.f32 %v10874_v48, %v10864_v30  ;;  %v16135_v24 = vld [vmem:[#allocation23 + $0x28] sm:$0xff] (!%p13830_p9)   ;;  %v16137_v30 = vld [vmem:[#allocation23 + $0x70] sm:$0xff] (!%p13830_p9)  }
0x19e4   : > { %v16097_v20 = vpop.eup %16096  ;;  %v10884_v5 = vadd.f32 %v10878_v31, %v10865_v29  ;;  %v16138_v29 = vld [vmem:[#allocation24 + $0x30] sm:$0xff] (!%p13830_p9)  }
0x19e5   : > { %v10847_v40 = vmul.f32 %v16097_v20, %v19544_v36  ;;  %v10848_v57 = vmul.f32 %v16097_v20, %v19546_v56  ;;  %10891 = vst [vmem:[#allocation2 + $0x10] sm:$0xff] %v19581_v58  ;;  %v16139_v20 = vld [vmem:[#allocation23 + $0x30] sm:$0xff] (!%p13830_p9)  }
0x19e6   : > { %10892 = vst [vmem:[#allocation2 + $0x18] sm:$0xff] %v10884_v5  ;;  %v16099_v47 = vpop.eup %16098  ;;  %v11394_v61 = vpack.c.bf16 (!%p13830_p9), %v10884_v5, %v10882_v17  ;;  %v16136_v17 = vld [vmem:[#allocation24 + $0x70] sm:$0xff] (!%p13830_p9)   ;;  %v16140_v5 = vld [vmem:[#allocation24 + $0x78] sm:$0xff] (!%p13830_p9)  }
0x19e7   : > { %v10866_v27 = vmul.f32 %v10855_v3, %v10847_v40  ;;  %v10867_v53 = vmul.f32 %v10859_v45, %v10848_v57  ;;  %v10849_v6 = vmul.f32 %v16099_v47, %v19548_v4  ;;  %v10850_v51 = vmul.f32 %v16099_v47, %v19550_v12  ;;  %v16141_v40 = vld [vmem:[#allocation23 + $0x78] sm:$0xff] (!%p13830_p9)  }
0x19e8   : > { %v11247_v12 = vand.u32 2147483648, %v11241_v59  ;;  %11557 = vmatprep.mubr.bf16.mxu0 (!%p13830_p9), %v11394_v61  ;;  %v16142_v57 = vld [vmem:[#allocation24 + $0x38] sm:$0xff] (!%p13830_p9)   ;;  %v16175_v61 = vld [vmem:[#allocation23 + $0x170] sm:$0xff] (!%p13830_p9)  }
0x19e9   : > { %v19588_v54 = vadd.f32 %v10874_v48, %v10866_v27  ;;  %v19590_v49 = vadd.f32 %v10878_v31, %v10867_v53  ;;  %v10868_v38 = vmul.f32 %v10855_v3, %v10849_v6  ;;  %v10869_v13 = vmul.f32 %v10859_v45, %v10850_v51  ;;  %v16121_v3 = vld [vmem:[#allocation23 + $0x50] sm:$0xff] (!%p13830_p9)   ;;  %v16143_v47 = vld [vmem:[#allocation23 + $0x38] sm:$0xff] (!%p13830_p9)  }
0x19ea   : > { %v16122_v45 = vld [vmem:[#allocation24 + $0x10] sm:$0xff] (!%p13830_p9)   ;;  %v11393_v27 = vpack.c.bf16 (!%p13830_p9), %v19581_v58, %v19578_v14  ;;  %v16144_v53 = vld [vmem:[%s19945_s15] ss:$24 sps:$4 sm:$0xff] (!%p13830_p9)   ;;  %v16146_v6 = vld [vmem:[%s19945_s15 + $0x4] ss:$24 sps:$4 sm:$0xff] (!%p13830_p9)  }
0x19eb   : > { %v16101_v36 = vpop.eup %16100  ;;  %10893 = vst [vmem:[#allocation2 + $0x20] sm:$0xff] %v19588_v54  ;;  %10894 = vst [vmem:[#allocation2 + $0x28] sm:$0xff] %v19590_v49  ;;  %v19594_v56 = vadd.f32 %v10874_v48, %v10868_v38  ;;  %v19596_v23 = vadd.f32 %v10878_v31, %v10869_v13  ;;  %v16125_v48 = vld [vmem:[#allocation23 + $0x58] sm:$0xff] (!%p13830_p9)   ;;  %v16147_v38 = vld [vmem:[#allocation23 + $0xc0] sm:$0xff] (!%p13830_p9)   ;;  %11954 = vmatprep.mubr.bf16.mxu1 (!%p13830_p9), %v16146_v6 }
0x19ec   : > { %v11243_v4 = vmul.f32 %v16101_v36, %v11241_v59  ;;  %v16126_v31 = vld [vmem:[#allocation24 + $0x18] sm:$0xff] (!%p13830_p9)   ;;  %v16148_v13 = vld [vmem:[#allocation23 + $0x140] sm:$0xff] (!%p13830_p9)   ;;  %v16151_v36 = vld [vmem:[#allocation23 + $0xc8] sm:$0xff] (!%p13830_p9)  }
0x19ed   : > { %10895 = vst [vmem:[#allocation2 + $0x30] sm:$0xff] %v19594_v56  ;;  %10896 = vst [vmem:[#allocation2 + $0x38] sm:$0xff] %v19596_v23  ;;  %v11396_v51 = vpack.c.bf16 (!%p13830_p9), %v19596_v23, %v19590_v49  ;;  %v16149_v14 = vld [vmem:[#allocation23 + $0x80] sm:$0xff] (!%p13830_p9)   ;;  %v16154_v49 = vld [vmem:[#allocation23 + $0x108] sm:$0xff] (!%p13830_p9)  }
0x19ee   : > { %v11245_v1 = vsel %vm11244_vm1, %v11241_v59, %v11243_v4  ;;  %v16133_v59 = vld [vmem:[#allocation23 + $0x68] sm:$0xff] (!%p13830_p9)   ;;  %v16150_v58 = vld [vmem:[#allocation23 + $0x100] sm:$0xff] (!%p13830_p9)   ;;  %v16155_v23 = vld [vmem:[#allocation23 + $0xd0] sm:$0xff] (!%p13830_p9)  }
0x19ef   : > { %v11248_v26 = vsel %vm11246_vm2, %v11247_v12, %v11245_v1  ;;  %v16152_v4 = vld [vmem:[#allocation23 + $0x148] sm:$0xff] (!%p13830_p9)   ;;  %v11395_v12 = vpack.c.bf16 (!%p13830_p9), %v19594_v56, %v19588_v54  ;;  %v16162_v54 = vld [vmem:[#allocation23 + $0x118] sm:$0xff] (!%p13830_p9)   ;;  %v16163_v56 = vld [vmem:[#allocation23 + $0xe0] sm:$0xff] (!%p13830_p9)  }
0x19f0   : > { %v11249_v44 = vadd.f32 1e-06, %v11248_v26  ;;  %v16153_v1 = vld [vmem:[#allocation23 + $0x88] sm:$0xff] (!%p13830_p9)   ;;  %v16156_v26 = vld [vmem:[#allocation23 + $0x150] sm:$0xff] (!%p13830_p9)  }
0x19f2   : > { %16102 = vrcp.f32 %v11249_v44  ;;  %v16157_v44 = vld [vmem:[#allocation23 + $0x90] sm:$0xff] (!%p13830_p9)  }
0x19fc   : > { %v16103_v34 = vpop.eup %16102 }
0x19fd   : > { %v11251_v37 = vmul.f32 %v16103_v34, %v19560_v63  ;;  %v11252_v46 = vmul.f32 %v16103_v34, %v19562_v9  ;;  %11284 = sbr.rel (%p13830_p9) target bundleno = 6947 (0x1b23), region = 220  ;;  %v16116_v63 = vld [vmem:[#allocation24 + $0x48] sm:$0xff] (!%p13830_p9)   ;;  %v16164_v34 = vld [vmem:[#allocation23 + $0x160] sm:$0xff] (!%p13830_p9)  }
0x19fe   : > { %v16117_v9 = vld [vmem:[#allocation23 + $0x48] sm:$0xff] (!%p13830_p9)   ;;  %13969 = vmatprep.subr.bf16.mxu0 (!%p13830_p9), %v16116_v63  ;;  %v16179_v63 = vld [vmem:[#allocation23 + $0x178] sm:$0xff] (!%p13830_p9)  }
0x19ff   : > { %v11264_v19 = vmul.f32 %v11257_v25, %v11251_v37  ;;  %v11265_v11 = vmul.f32 %v11261_v15, %v11252_v46  ;;  %13997 = vmatprep.subr.bf16.mxu1 (!%p13830_p9), %v16117_v9  ;;  %13970 = vmatpush3.bf16.msra.mxu0 (!%p13830_p9), %v16118_v0  ;;  %v16160_v25 = vld [vmem:[#allocation23 + $0x158] sm:$0xff] (!%p13830_p9)   ;;  %v16169_v46 = vld [vmem:[#allocation23 + $0xe8] sm:$0xff] (!%p13830_p9)  }
0x1a00   : > { %13998 = vmatpush3.bf16.msra.mxu1 (!%p13830_p9), %v16119_v52  ;;  %13971 = vmatprep.subr.bf16.mxu0 (!%p13830_p9), %v16120_v2  ;;  %v16161_v15 = vld [vmem:[#allocation23 + $0x98] sm:$0xff] (!%p13830_p9)   ;;  %v16182_v52 = vld [vmem:[%s19945_s15 + $0x8] ss:$24 sps:$4 sm:$0xff] (!%p13830_p9)   ;;  %v16184_v2 = vld [vmem:[%s19945_s15 + $0xc] ss:$24 sps:$4 sm:$0xff] (!%p13830_p9)  }
0x1a01   : > { %v11277_v42 = vadd.f32 %v11270_v41, %v11264_v19  ;;  %v11278_v39 = vadd.f32 %v11274_v60, %v11265_v11  ;;  %13999 = vmatprep.subr.bf16.mxu1 (!%p13830_p9), %v16121_v3  ;;  %v16165_v41 = vld [vmem:[#allocation23 + $0xa0] sm:$0xff] (!%p13830_p9)   ;;  %v16167_v37 = vld [vmem:[%s19945_s15 + $0x34] ss:$24 sps:$4 sm:$0xff] (!%p13830_p9)   ;;  %v16171_v11 = vld [vmem:[%s19945_s15 + $0x30] ss:$24 sps:$4 sm:$0xff] (!%p13830_p9)  }
0x1a02   : > { %v16166_v60 = vld [vmem:[#allocation23 + $0x120] sm:$0xff] (!%p13830_p9)   ;;  %v16170_v19 = vld [vmem:[#allocation23 + $0x168] sm:$0xff] (!%p13830_p9)   ;;  %v16180_v9 = vld [vmem:[#allocation23 + $0xb8] sm:$0xff] (!%p13830_p9)  }
0x1a03   : > { %11279 = vst [vmem:[#allocation3] sm:$0xff] %v11277_v42  ;;  %11280 = vst [vmem:[#allocation3 + $0x8] sm:$0xff] %v11278_v39  ;;  %13972 = vmatpush3.bf16.msra.mxu0 (!%p13830_p9), %v16122_v45  ;;  %v16172_v42 = vld [vmem:[#allocation23 + $0xa8] sm:$0xff] (!%p13830_p9)   ;;  %v16181_v0 = vld [vmem:[#allocation23 + $0x138] sm:$0xff] (!%p13830_p9)  }
0x1a04   : > { %14000 = vmatpush3.bf16.msra.mxu1 %v16123_v33  ;;  %13973 = vmatprep.subr.bf16.mxu0 %v16124_v55  ;;  %v16173_v39 = vld [vmem:[#allocation23 + $0x128] sm:$0xff]   ;;  %v16188_v33 = vld [vmem:[%s19945_s15 + $0x3c] ss:$24 sps:$4 sm:$0xff]  }
0x1a05   : > { %14001 = vmatprep.subr.bf16.mxu1 %v16125_v48  ;;  %v16185_v3 = vld [vmem:[%s19945_s15 + $0x10] ss:$24 sps:$4 sm:$0xff]   ;;  %v16187_v45 = vld [vmem:[%s19945_s15 + $0x14] ss:$24 sps:$4 sm:$0xff]   ;;  %v16190_v55 = vld [vmem:[%s19945_s15 + $0x44] ss:$24 sps:$4 sm:$0xff]  }
0x1a06   : > { %v16192_v48 = vld [vmem:[%s19945_s15 + $0x38] ss:$24 sps:$4 sm:$0xff]  }
0x1a07   : > { %13974 = vmatpush3.bf16.msra.mxu0 %v16126_v31  ;;  %v16193_v31 = vld [vmem:[%s19945_s15 + $0x40] ss:$24 sps:$4 sm:$0xff]  }
0x1a08   : > { %14002 = vmatpush3.bf16.msra.mxu1 %v16127_v35  ;;  %13975 = vmatprep.subr.bf16.mxu0 %v16128_v50 }
0x1a09   : > { %14003 = vmatprep.subr.bf16.mxu1 %v16129_v28 }
0x1a0b   : > { %13976 = vmatpush3.bf16.msra.mxu0 %v16130_v21 }
0x1a0c   : > { %14004 = vmatpush3.bf16.msra.mxu1 %v16131_v16  ;;  %13977 = vmatprep.subr.bf16.mxu0 %v16132_v18 }
0x1a0d   : > { %14005 = vmatprep.subr.bf16.mxu1 %v16133_v59 }
0x1a0f   : > { %13978 = vmatpush3.bf16.msra.mxu0 %v16134_v62 }
0x1a10   : > { %14006 = vmatpush3.bf16.msra.mxu1 %v16135_v24  ;;  %13979 = vmatprep.subr.bf16.mxu0 %v16136_v17 }
0x1a11   : > { %14007 = vmatprep.subr.bf16.mxu1 %v16137_v30 }
0x1a13   : > { %13980 = vmatpush3.bf16.msra.mxu0 %v16138_v29 }
0x1a14   : > { %14008 = vmatpush3.bf16.msra.mxu1 %v16139_v20  ;;  %13981 = vmatprep.subr.bf16.mxu0 %v16140_v5 }
0x1a15   : > { %14009 = vmatprep.subr.bf16.mxu1 %v16141_v40 }
0x1a17   : > { %13982 = vmatpush3.bf16.msra.mxu0 %v16142_v57 }
0x1a18   : > { %14010 = vmatpush3.bf16.msra.mxu1 %v16143_v47  ;;  %14023 = vmatprep.subr.bf16.mxu0 %v16147_v38 }
0x1a19   : > { %14051 = vmatprep.subr.bf16.mxu1 %v16148_v13 }
0x1a1a   : > { %11558 = vmatmul.mubr.bf16.vlgmr.msra.gmra.mrb[0].mxu0 %v11393_v27 }
0x1a1b   : > { %11955 = vmatmul.mubr.bf16.vlgmr.msra.gmra.mrb[0].mxu1 %v16144_v53  ;;  %11565 = vmatprep.mubr.bf16.mxu0 %v11396_v51 }
0x1a1c   : > { %14024 = vmatpush3.bf16.msra.mxu0 %v16149_v14  ;;  %14052 = vmatpush3.bf16.msra.mxu1 %v16150_v58 }
0x1a1d   : > { %14025 = vmatprep.subr.bf16.mxu0 %v16151_v36  ;;  %14053 = vmatprep.subr.bf16.mxu1 %v16152_v4 }
0x1a1e   : > { %11962 = vmatprep.mubr.bf16.mxu1 %v16167_v37 }
0x1a20   : > { %14026 = vmatpush3.bf16.msra.mxu0 %v16153_v1  ;;  %14054 = vmatpush3.bf16.msra.mxu1 %v16154_v49 }
0x1a21   : > { %14027 = vmatprep.subr.bf16.mxu0 %v16155_v23  ;;  %14055 = vmatprep.subr.bf16.mxu1 %v16156_v26 }
0x1a22   : > { %11566 = vmatmul.mubr.bf16.gmra.mrb[4].mxu0 %v11395_v12 }
0x1a23   : > { %11963 = vmatmul.mubr.bf16.gmra.mrb[4].mxu1 %v16171_v11  ;;  %12003 = vmatprep.mubr.bf16.mxu0 %v16184_v2 }
0x1a24   : > { %14028 = vmatpush3.bf16.msra.mxu0 %v16157_v44  ;;  %14056 = vmatpush3.bf16.msra.mxu1 %v16158_v32 }
0x1a25   : > { %14029 = vmatprep.subr.bf16.mxu0 %v16159_v8  ;;  %14057 = vmatprep.subr.bf16.mxu1 %v16160_v25 }
0x1a26   : > { %12052 = vmatprep.mubr.bf16.mxu1 %v16187_v45 }
0x1a28   : > { %14030 = vmatpush3.bf16.msra.mxu0 %v16161_v15  ;;  %14058 = vmatpush3.bf16.msra.mxu1 %v16162_v54 }
0x1a29   : > { %14031 = vmatprep.subr.bf16.mxu0 %v16163_v56  ;;  %14059 = vmatprep.subr.bf16.mxu1 %v16164_v34  ;;  %v13907_v34 = vld [vmem:[#allocation26] ss:$0 sm:$0xff] }
0x1a2c   : > { %14032 = vmatpush3.bf16.msra.mxu0 %v16165_v41  ;;  %14060 = vmatpush3.bf16.msra.mxu1 %v16166_v60 }
0x1a2d   : > { %14033 = vmatprep.subr.bf16.mxu0 %v16169_v46  ;;  %14061 = vmatprep.subr.bf16.mxu1 %v16170_v19 }
0x1a30   : > { %14034 = vmatpush3.bf16.msra.mxu0 %v16172_v42  ;;  %14062 = vmatpush3.bf16.msra.mxu1 %v16173_v39 }
0x1a31   : > { %14035 = vmatprep.subr.bf16.mxu0 %v16174_v43  ;;  %14063 = vmatprep.subr.bf16.mxu1 %v16175_v61 }
0x1a34   : > { %14036 = vmatpush3.bf16.msra.mxu0 %v16176_v22  ;;  %14064 = vmatpush3.bf16.msra.mxu1 %v16177_v10 }
0x1a35   : > { %14037 = vmatprep.subr.bf16.mxu0 %v16178_v7  ;;  %14065 = vmatprep.subr.bf16.mxu1 %v16179_v63 }
0x1a38   : > { %14038 = vmatpush3.bf16.msra.mxu0 %v16180_v9  ;;  %14066 = vmatpush3.bf16.msra.mxu1 %v16181_v0 }
0x1a3b   : > { %12004 = vmatmul.mubr.bf16.vlgmr.msra.gmra.mrb[8].mxu0 %v16182_v52  ;;  %12053 = vmatmul.mubr.bf16.vlgmr.msra.gmra.mrb[8].mxu1 %v16185_v3 }
0x1a3c   : > { %12011 = vmatprep.mubr.bf16.mxu0 %v16188_v33  ;;  %12060 = vmatprep.mubr.bf16.mxu1 %v16190_v55 }
0x1a43   : > { %12012 = vmatmul.mubr.bf16.gmra.mrb[12].mxu0 %v16192_v48  ;;  %12061 = vmatmul.mubr.bf16.gmra.mrb[12].mxu1 %v16193_v31 }
0x1aed   : > { %v13983_v35 = vpop.f32.mrb[0].mxu0 }
0x1aee   : > { %v14011_v50 = vpop.f32.mrb[0].mxu1  ;;  %v13984_v28 = vpop.f32.mrb[1].mxu0 }
0x1aef   : > { %v13985_v21 = vadd.f32 %v13984_v28, %v13983_v35  ;;  %v14012_v16 = vpop.f32.mrb[1].mxu1  ;;  %v13986_v18 = vpop.f32.mrb[2].mxu0 }
0x1af0   : > { %v14013_v59 = vadd.f32 %v14012_v16, %v14011_v50  ;;  %v14014_v62 = vpop.f32.mrb[2].mxu1  ;;  %v13987_v24 = vpop.f32.mrb[3].mxu0 }
0x1af1   : > { %v13988_v17 = vadd.f32 %v13987_v24, %v13986_v18  ;;  %v14015_v30 = vpop.f32.mrb[3].mxu1 }
0x1af2   : > { %v11957_v29 = vadd.f32 %v14013_v59, %v13985_v21  ;;  %v14016_v20 = vadd.f32 %v14015_v30, %v14014_v62 }
0x1af4   : > { %v11960_v5 = vadd.f32 %v14016_v20, %v13988_v17 }
0x1af5   : > { %v13989_v40 = vpop.f32.mrb[4].mxu0 }
0x1af6   : > { %v13990_v57 = vpop.f32.mrb[5].mxu0  ;;  %v14017_v51 = vpop.f32.mrb[4].mxu1 }
0x1af7   : > { %v13991_v47 = vadd.f32 %v13990_v57, %v13989_v40  ;;  %v13992_v27 = vpop.f32.mrb[6].mxu0  ;;  %v14018_v38 = vpop.f32.mrb[5].mxu1 }
0x1af8   : > { %v13993_v53 = vpop.f32.mrb[7].mxu0  ;;  %v14019_v13 = vadd.f32 %v14018_v38, %v14017_v51  ;;  %v14020_v14 = vpop.f32.mrb[6].mxu1 }
0x1af9   : > { %v13994_v6 = vadd.f32 %v13993_v53, %v13992_v27  ;;  %v14021_v58 = vpop.f32.mrb[7].mxu1 }
0x1afa   : > { %v11965_v36 = vadd.f32 %v14019_v13, %v13991_v47  ;;  %v14022_v4 = vadd.f32 %v14021_v58, %v14020_v14 }
0x1afc   : > { %v11968_v12 = vadd.f32 %v14022_v4, %v13994_v6 }
0x1b0e   : > { %v14039_v1 = vpop.f32.mrb[8].mxu0  ;;  %v14067_v23 = vpop.f32.mrb[8].mxu1 }
0x1b0f   : > { %v14040_v49 = vpop.f32.mrb[9].mxu0  ;;  %v14068_v32 = vpop.f32.mrb[9].mxu1 }
0x1b10   : > { %v14041_v26 = vadd.f32 %v14040_v49, %v14039_v1  ;;  %v14042_v44 = vpop.f32.mrb[10].mxu0  ;;  %v14069_v15 = vadd.f32 %v14068_v32, %v14067_v23  ;;  %v14070_v54 = vpop.f32.mrb[10].mxu1 }
0x1b11   : > { %v14043_v8 = vpop.f32.mrb[11].mxu0  ;;  %v14071_v41 = vpop.f32.mrb[11].mxu1 }
0x1b12   : > { %v12006_v25 = vadd.f32 %v14041_v26, %v11957_v29  ;;  %v14044_v56 = vadd.f32 %v14043_v8, %v14042_v44  ;;  %v14072_v46 = vadd.f32 %v14071_v41, %v14070_v54 }
0x1b14   : > { %v12055_v60 = vadd.f32 %v14069_v15, %v12006_v25  ;;  %v12009_v37 = vadd.f32 %v14044_v56, %v11960_v5 }
0x1b16   : > { %v12076_v19 = vadd.f32 %v13907_v34, %v12055_v60  ;;  %v12058_v11 = vadd.f32 %v14072_v46, %v12009_v37  ;;  %v14045_v42 = vpop.f32.mrb[12].mxu0  ;;  %v14073_v61 = vpop.f32.mrb[12].mxu1 }
0x1b17   : > { %v14046_v39 = vpop.f32.mrb[13].mxu0  ;;  %v14074_v7 = vpop.f32.mrb[13].mxu1 }
0x1b18   : > { %12080 = vst [vmem:[%s19946_s22] sm:$0xff] %v12076_v19  ;;  %v12077_v43 = vadd.f32 %v13907_v34, %v12058_v11  ;;  %v14047_v22 = vadd.f32 %v14046_v39, %v14045_v42  ;;  %v14048_v10 = vpop.f32.mrb[14].mxu0  ;;  %v14075_v0 = vadd.f32 %v14074_v7, %v14073_v61  ;;  %v14076_v52 = vpop.f32.mrb[14].mxu1 }
0x1b19   : > { %v14049_v63 = vpop.f32.mrb[15].mxu0  ;;  %v14077_v3 = vpop.f32.mrb[15].mxu1 }
0x1b1a   : > { %12081 = vst [vmem:[%s19946_s22 + $0x8] sm:$0xff] %v12077_v43  ;;  %v12014_v9 = vadd.f32 %v14047_v22, %v11965_v36  ;;  %v14050_v2 = vadd.f32 %v14049_v63, %v14048_v10  ;;  %v14078_v55 = vadd.f32 %v14077_v3, %v14076_v52 }
0x1b1c   : > { %v12063_v45 = vadd.f32 %v14075_v0, %v12014_v9  ;;  %v12017_v33 = vadd.f32 %v14050_v2, %v11968_v12 }
0x1b1e   : > { %v12078_v48 = vadd.f32 %v13907_v34, %v12063_v45  ;;  %v12066_v31 = vadd.f32 %v14078_v55, %v12017_v33 }
0x1b20   : > { %12082 = vst [vmem:[%s19946_s22 + $0x10] sm:$0xff] %v12078_v48  ;;  %v12079_v35 = vadd.f32 %v13907_v34, %v12066_v31 }
0x1b22   : > { %12083 = vst [vmem:[%s19946_s22 + $0x18] sm:$0xff] %v12079_v35 }
0x1b23 PF: > { %s19947_s30 = sld [smem:[#allocation49_spill]]  ;;  %s19948_s8 = sld [smem:[#allocation46_spill]] }
0x1b24   : > { %s19949_s5 = sld [smem:[#allocation47_spill]]  ;;  %s19950_s9 = sld [smem:[#allocation50_spill]] }
0x1b29   : > { %p52_p3 = scmp.ge.s32.totalorder %s19947_s30, 8  }
0x1b2b   :  { %54 = sbr.rel (!%p52_p3) target bundleno = 44 (0x2c), region = 317 }
0x1b32   :  { %12095 = vsyncpa [#allocation5], 1 }
0x1b33   :  { %12097 = vsyncpa [#allocation5 + $0x1], 1 }
0x1b34   :  { %12098 = vsyncpa [#allocation7], 1 }
0x1b35   :  { %12099 = vsyncpa [#allocation10], 1 }
0x1b36   :  { %12100 = vsyncpa [#allocation13], 1 }
0x1b37   :  { %12101 = vsyncpa [#allocation16], 1 }
0x1b38   :  { %12102 = vsyncpa [#allocation19], 1 }
0x1b39   :  { %12103 = vsyncpa [#allocation22], 1 }
0x1b3a   :  { %12104 = vsyncpa [#allocation25], 1 }
0x1b3b   :  { %12105 = vsyncpa [#allocation28], 1 }
0x1b3c   :  { %12107 = vsyncpa [#allocation28 + $0x1], 1 }
0x1b3d   :  { %12108 = vsyncpa [#allocation31], 1 }
0x1b3e   :  { %12110 = vsyncpa [#allocation31 + $0x1], 1 }
0x1b3f   :  { %12111 = vsyncpa [#allocation34], 1 }
0x1b40   :  { %12113 = vsyncpa [#allocation34 + $0x1], 1 }

</bundles_post_ra>
